<compile_context>
chip_gen: v7x
topology: tpu7x:2x2x1
jax: 0.10.0
libtpu: 0.0.40
codegen_flags: <defaults>
</compile_context>

<pallas_src>
import jax
import jax.numpy as jnp
from jax.experimental import pallas as pl
from jax.experimental.pallas import tpu as pltpu

EPS = 1e-5


def _make_kernel(H, W, C):
    PW = W + 2                     # padded width
    PH = H + 2                     # padded height
    NPIX = H * PW                  # conv-output rows at padded width
    ROWS = PH * PW + 8             # flat padded scratch rows (+ tap-overrun tail)

    def fill_padded(padw, read_row):
        """Write the reflection-padded image, row-major flattened, into padw."""
        for i in range(H):
            rv = read_row(i)                                      # (W, C)
            base = (i + 1) * PW
            padw[pl.ds(base + 1, W), :] = rv                      # row body
            padw[pl.ds(base, 1), :] = rv[1:2]                     # left reflect
            padw[pl.ds(base + PW - 1, 1), :] = rv[W - 2:W - 1]    # right reflect
        # Top / bottom reflected rows: copies of already width-padded rows.
        padw[pl.ds(0, PW), :] = padw[pl.ds(2 * PW, PW), :]
        padw[pl.ds((PH - 1) * PW, PW), :] = padw[pl.ds((PH - 3) * PW, PW), :]
        # Keep the small tap-overrun tail finite (only ever feeds junk columns).
        padw[pl.ds(PH * PW, ROWS - PH * PW), :] = jnp.zeros(
            (ROWS - PH * PW, C), jnp.float32)

    def conv3x3(padw, w_ref, b_ref):
        """3x3 conv as 3 MXU matmuls with K = 3C, computed at padded width."""
        acc = None
        for kx in range(3):
            # Three ky-shifted tap windows are contiguous row slices of the
            # flat padded image; lane-concat is free for C % 128 == 0.
            op = jnp.concatenate(
                [padw[pl.ds(kx, NPIX), :],
                 padw[pl.ds(kx + PW, NPIX), :],
                 padw[pl.ds(kx + 2 * PW, NPIX), :]], axis=-1)     # (NPIX, 3C)
            part = jnp.dot(op.astype(w_ref.dtype), w_ref[kx],
                           preferred_element_type=jnp.float32)
            acc = part if acc is None else acc + part
        return acc + b_ref[...]

    def masked_moments(acc, valid):
        """Single-pass mean / rsqrt(var + eps) over valid pixels only."""
        inv_cnt = 1.0 / float(H * W)
        s = jnp.sum(jnp.where(valid, acc, 0.0), axis=0, keepdims=True)
        sq = jnp.sum(jnp.where(valid, acc * acc, 0.0), axis=0, keepdims=True)
        mean = s * inv_cnt
        var = jnp.maximum(sq * inv_cnt - mean * mean, 0.0)
        return mean, jax.lax.rsqrt(var + EPS)

    def kernel(w1_ref, b1_ref, w2_ref, b2_ref, mask_ref, x_ref, out_ref,
               padw1, padw2):
        valid = mask_ref[...] > 0.0                               # (NPIX, 1)

        # Stage 1: ReflectPad -> Conv3x3 -> masked IN stats.
        fill_padded(padw1, lambda i: x_ref[pl.ds(i * W, W), :])
        acc1 = conv3x3(padw1, w1_ref, b1_ref)                     # (NPIX, C) f32
        mean1, inv1 = masked_moments(acc1, valid)

        # Stage 2 pad fill with IN1 + ReLU fused in (h1 never materialized).
        def h1_row(i):
            row = acc1[i * PW:i * PW + W]                         # valid cols only
            return jnp.maximum((row - mean1) * inv1, 0.0)

        fill_padded(padw2, h1_row)
        acc2 = conv3x3(padw2, w2_ref, b2_ref)
        mean2, inv2 = masked_moments(acc2, valid)

        # IN2 + residual add fused into lane-dense, aligned output stores.
        for i in range(H):
            h2row = (acc2[i * PW:i * PW + W] - mean2) * inv2
            out_ref[pl.ds(i * W, W), :] = x_ref[pl.ds(i * W, W), :] + h2row

    return kernel, NPIX, ROWS, PW


def residual_block(x_nchw, w1, b1, w2, b2, *, matmul_dtype=jnp.float32):
    """CycleGAN ResidualBlock forward.

    x_nchw: f32[N, C, H, W]; w*: OIHW f32[C, C, 3, 3]; b*: f32[C].
    matmul_dtype: jnp.bfloat16 is recommended on v6e/v7x (f32 accumulation is
    kept); jnp.float32 is exact everywhere (default, used by the test).
    """
    N, C, H, W = x_nchw.shape
    kernel, NPIX, ROWS, PW = _make_kernel(H, W, C)

    # Layout glue (fused by XLA around the custom call):
    #   activations NCHW -> (N, H*W, C)       (channels on the lane axis)
    #   weights OIHW -> (kx, ky*Cin + ci, co) = (3, 3C, C) so each tap matmul
    #   has K = 3C with no in-kernel weight shuffling.
    x = jnp.transpose(x_nchw, (0, 2, 3, 1)).reshape(N, H * W, C)
    w1p = jnp.transpose(w1, (3, 2, 1, 0)).reshape(3, 3 * C, C).astype(matmul_dtype)
    w2p = jnp.transpose(w2, (3, 2, 1, 0)).reshape(3, 3 * C, C).astype(matmul_dtype)
    b1r = b1.reshape(1, C).astype(jnp.float32)
    b2r = b2.reshape(1, C).astype(jnp.float32)
    # Valid-pixel mask for the padded-width layout (junk cols j = W, W+1).
    mask = ((jnp.arange(NPIX) % PW) < W).astype(jnp.float32).reshape(NPIX, 1)

    img_spec = pl.BlockSpec((None, H * W, C), lambda n: (n, 0, 0))
    w_spec = pl.BlockSpec((3, 3 * C, C), lambda n: (0, 0, 0))     # resident weights
    b_spec = pl.BlockSpec((1, C), lambda n: (0, 0))
    m_spec = pl.BlockSpec((NPIX, 1), lambda n: (0, 0))

    # NOTE: at production CycleGAN sizes (C=256, H=W=64) add an H-tile grid
    # axis (with 2 halo rows) so the per-step working set fits v7x's 64 MiB
    # VMEM, and single-buffer the constant weight specs.
    out = pl.pallas_call(
        kernel,
        out_shape=jax.ShapeDtypeStruct((N, H * W, C), jnp.float32),
        grid=(N,),
        in_specs=[w_spec, b_spec, w_spec, b_spec, m_spec, img_spec],
        out_specs=img_spec,
        scratch_shapes=[pltpu.VMEM((ROWS, C), jnp.float32),
                        pltpu.VMEM((ROWS, C), jnp.float32)],
        compiler_params=pltpu.CompilerParams(
            dimension_semantics=("parallel",),
            vmem_limit_bytes=64 * 1024 * 1024),
    )(w1p, b1r, w2p, b2r, mask, x)

    return jnp.transpose(out.reshape(N, H, W, C), (0, 3, 1, 2))


def _reference(x, w1, b1, w2, b2):
    # Pure-JAX reference (NCHW, PyTorch semantics) for correctness checking.
    def conv(inp, w, b):
        p = jnp.pad(inp, ((0, 0), (0, 0), (1, 1), (1, 1)), mode="reflect")
        o = jax.lax.conv_general_dilated(
            p, w, window_strides=(1, 1), padding="VALID",
            dimension_numbers=("NCHW", "OIHW", "NCHW"))
        return o + b[None, :, None, None]

    def inorm(v):
        m = jnp.mean(v, axis=(2, 3), keepdims=True)
        var = jnp.mean((v - m) ** 2, axis=(2, 3), keepdims=True)
        return (v - m) * jax.lax.rsqrt(var + EPS)

    h = jax.nn.relu(inorm(conv(x, w1, b1)))
    return x + inorm(conv(h, w2, b2))


if __name__ == "__main__":
    # Small but lane-dense config: C=128 keeps every vreg / DMA / store lane-
    # dense as the perf review recommends (CycleGAN residual blocks use C=256).
    N, C, H, W = 2, 128, 16, 16

    key = jax.random.PRNGKey(0)
    kx, kw1, kb1, kw2, kb2 = jax.random.split(key, 5)
    x = jax.random.normal(kx, (N, C, H, W), dtype=jnp.float32)
    # Deterministic synthetic parameters (Conv2d(in_features, in_features, 3)).
    scale = 1.0 / jnp.sqrt(C * 3.0 * 3.0)
    w1 = jax.random.uniform(kw1, (C, C, 3, 3), jnp.float32, -scale, scale)
    b1 = jax.random.uniform(kb1, (C,), jnp.float32, -scale, scale)
    w2 = jax.random.uniform(kw2, (C, C, 3, 3), jnp.float32, -scale, scale)
    b2 = jax.random.uniform(kb2, (C,), jnp.float32, -scale, scale)

    out = jax.block_until_ready(jax.jit(residual_block)(x, w1, b1, w2, b2))
    ref = jax.block_until_ready(_reference(x, w1, b1, w2, b2))

    assert out.shape == (N, C, H, W)
    err = float(jnp.max(jnp.abs(out - ref)))
    assert jnp.allclose(out, ref, atol=2e-3, rtol=2e-3), err
    print("KERNEL_OK")
</pallas_src>

<mosaic_0001>
module attributes {stable_mosaic.version = 11 : i64} {
  func.func @kernel(%arg0: i32, %arg1: memref<3x384x128xf32, #tpu.memory_space<vmem>>, %arg2: memref<1x128xf32, #tpu.memory_space<vmem>>, %arg3: memref<3x384x128xf32, #tpu.memory_space<vmem>>, %arg4: memref<1x128xf32, #tpu.memory_space<vmem>>, %arg5: memref<288x1xf32, #tpu.memory_space<vmem>>, %arg6: memref<1x256x128xf32, #tpu.memory_space<vmem>>, %arg7: memref<1x256x128xf32, #tpu.memory_space<vmem>>, %arg8: memref<332x128xf32, #tpu.memory_space<vmem>>, %arg9: memref<332x128xf32, #tpu.memory_space<vmem>>) attributes {dimension_semantics = [#tpu.dimension_semantics<parallel>], iteration_bounds = array<i64: 2>, scalar_prefetch = 0 : i64, scratch_operands = 2 : i64, tpu.core_type = #tpu.core_type<tc>, window_params = [{pipeline_mode = #tpu.pipeline_mode<synchronous>, transform_indices = @transform_0, window_bounds = array<i64: 3, 384, 128>}, {pipeline_mode = #tpu.pipeline_mode<synchronous>, transform_indices = @transform_1, window_bounds = array<i64: 1, 128>}, {pipeline_mode = #tpu.pipeline_mode<synchronous>, transform_indices = @transform_2, window_bounds = array<i64: 3, 384, 128>}, {pipeline_mode = #tpu.pipeline_mode<synchronous>, transform_indices = @transform_3, window_bounds = array<i64: 1, 128>}, {pipeline_mode = #tpu.pipeline_mode<synchronous>, transform_indices = @transform_4, window_bounds = array<i64: 288, 1>}, {transform_indices = @transform_5, window_bounds = array<i64: 1, 256, 128>}, {transform_indices = @transform_6, window_bounds = array<i64: 1, 256, 128>}]} {
    %c0 = arith.constant 0 : index
    %c0_0 = arith.constant 0 : index
    %0 = vector.load %arg5[%c0, %c0_0] : memref<288x1xf32, #tpu.memory_space<vmem>>, vector<288x1xf32>
    %cst = arith.constant 0.000000e+00 : f32
    %1 = vector.broadcast %cst : f32 to vector<288x1xf32>
    %2 = arith.cmpf ogt, %0, %1 : vector<288x1xf32>
    %c0_1 = arith.constant 0 : index
    %c0_2 = arith.constant 0 : index
    %c0_3 = arith.constant 0 : index
    %3 = vector.load %arg6[%c0_1, %c0_2, %c0_3] : memref<1x256x128xf32, #tpu.memory_space<vmem>>, vector<1x16x128xf32>
    %4 = vector.shape_cast %3 : vector<1x16x128xf32> to vector<16x128xf32>
    %c19 = arith.constant 19 : index
    %c0_4 = arith.constant 0 : index
    %5 = vector.load %arg8[%c19, %c0_4] : memref<332x128xf32, #tpu.memory_space<vmem>>, vector<16x128xf32>
    tpu.vector_store %arg8[%c19, %c0_4], %4 {strides = array<i32>} : memref<332x128xf32, #tpu.memory_space<vmem>>, vector<16x128xf32>,
    %6 = vector.extract_strided_slice %4 {offsets = [1, 0], sizes = [1, 128], strides = [1, 1]} : vector<16x128xf32> to vector<1x128xf32>
    %c18 = arith.constant 18 : index
    %c0_5 = arith.constant 0 : index
    %7 = vector.load %arg8[%c18, %c0_5] : memref<332x128xf32, #tpu.memory_space<vmem>>, vector<1x128xf32>
    tpu.vector_store %arg8[%c18, %c0_5], %6 {strides = array<i32>} : memref<332x128xf32, #tpu.memory_space<vmem>>, vector<1x128xf32>,
    %8 = vector.extract_strided_slice %4 {offsets = [14, 0], sizes = [1, 128], strides = [1, 1]} : vector<16x128xf32> to vector<1x128xf32>
    %c35 = arith.constant 35 : index
    %c0_6 = arith.constant 0 : index
    %9 = vector.load %arg8[%c35, %c0_6] : memref<332x128xf32, #tpu.memory_space<vmem>>, vector<1x128xf32>
    tpu.vector_store %arg8[%c35, %c0_6], %8 {strides = array<i32>} : memref<332x128xf32, #tpu.memory_space<vmem>>, vector<1x128xf32>,
    %c0_7 = arith.constant 0 : index
    %c16 = arith.constant 16 : index
    %c0_8 = arith.constant 0 : index
    %10 = vector.load %arg6[%c0_7, %c16, %c0_8] : memref<1x256x128xf32, #tpu.memory_space<vmem>>, vector<1x16x128xf32>
    %11 = vector.shape_cast %10 : vector<1x16x128xf32> to vector<16x128xf32>
    %c37 = arith.constant 37 : index
    %c0_9 = arith.constant 0 : index
    %12 = vector.load %arg8[%c37, %c0_9] : memref<332x128xf32, #tpu.memory_space<vmem>>, vector<16x128xf32>
    tpu.vector_store %arg8[%c37, %c0_9], %11 {strides = array<i32>} : memref<332x128xf32, #tpu.memory_space<vmem>>, vector<16x128xf32>,
    %13 = vector.extract_strided_slice %11 {offsets = [1, 0], sizes = [1, 128], strides = [1, 1]} : vector<16x128xf32> to vector<1x128xf32>
    %c36 = arith.constant 36 : index
    %c0_10 = arith.constant 0 : index
    %14 = vector.load %arg8[%c36, %c0_10] : memref<332x128xf32, #tpu.memory_space<vmem>>, vector<1x128xf32>
    tpu.vector_store %arg8[%c36, %c0_10], %13 {strides = array<i32>} : memref<332x128xf32, #tpu.memory_space<vmem>>, vector<1x128xf32>,
    %15 = vector.extract_strided_slice %11 {offsets = [14, 0], sizes = [1, 128], strides = [1, 1]} : vector<16x128xf32> to vector<1x128xf32>
    %c53 = arith.constant 53 : index
    %c0_11 = arith.constant 0 : index
    %16 = vector.load %arg8[%c53, %c0_11] : memref<332x128xf32, #tpu.memory_space<vmem>>, vector<1x128xf32>
    tpu.vector_store %arg8[%c53, %c0_11], %15 {strides = array<i32>} : memref<332x128xf32, #tpu.memory_space<vmem>>, vector<1x128xf32>,
    %c0_12 = arith.constant 0 : index
    %c32 = arith.constant 32 : index
    %c0_13 = arith.constant 0 : index
    %17 = vector.load %arg6[%c0_12, %c32, %c0_13] : memref<1x256x128xf32, #tpu.memory_space<vmem>>, vector<1x16x128xf32>
    %18 = vector.shape_cast %17 : vector<1x16x128xf32> to vector<16x128xf32>
    %c55 = arith.constant 55 : index
    %c0_14 = arith.constant 0 : index
    %19 = vector.load %arg8[%c55, %c0_14] : memref<332x128xf32, #tpu.memory_space<vmem>>, vector<16x128xf32>
    tpu.vector_store %arg8[%c55, %c0_14], %18 {strides = array<i32>} : memref<332x128xf32, #tpu.memory_space<vmem>>, vector<16x128xf32>,
    %20 = vector.extract_strided_slice %18 {offsets = [1, 0], sizes = [1, 128], strides = [1, 1]} : vector<16x128xf32> to vector<1x128xf32>
    %c54 = arith.constant 54 : index
    %c0_15 = arith.constant 0 : index
    %21 = vector.load %arg8[%c54, %c0_15] : memref<332x128xf32, #tpu.memory_space<vmem>>, vector<1x128xf32>
    tpu.vector_store %arg8[%c54, %c0_15], %20 {strides = array<i32>} : memref<332x128xf32, #tpu.memory_space<vmem>>, vector<1x128xf32>,
    %22 = vector.extract_strided_slice %18 {offsets = [14, 0], sizes = [1, 128], strides = [1, 1]} : vector<16x128xf32> to vector<1x128xf32>
    %c71 = arith.constant 71 : index
    %c0_16 = arith.constant 0 : index
    %23 = vector.load %arg8[%c71, %c0_16] : memref<332x128xf32, #tpu.memory_space<vmem>>, vector<1x128xf32>
    tpu.vector_store %arg8[%c71, %c0_16], %22 {strides = array<i32>} : memref<332x128xf32, #tpu.memory_space<vmem>>, vector<1x128xf32>,
    %c0_17 = arith.constant 0 : index
    %c48 = arith.constant 48 : index
    %c0_18 = arith.constant 0 : index
    %24 = vector.load %arg6[%c0_17, %c48, %c0_18] : memref<1x256x128xf32, #tpu.memory_space<vmem>>, vector<1x16x128xf32>
    %25 = vector.shape_cast %24 : vector<1x16x128xf32> to vector<16x128xf32>
    %c73 = arith.constant 73 : index
    %c0_19 = arith.constant 0 : index
    %26 = vector.load %arg8[%c73, %c0_19] : memref<332x128xf32, #tpu.memory_space<vmem>>, vector<16x128xf32>
    tpu.vector_store %arg8[%c73, %c0_19], %25 {strides = array<i32>} : memref<332x128xf32, #tpu.memory_space<vmem>>, vector<16x128xf32>,
    %27 = vector.extract_strided_slice %25 {offsets = [1, 0], sizes = [1, 128], strides = [1, 1]} : vector<16x128xf32> to vector<1x128xf32>
    %c72 = arith.constant 72 : index
    %c0_20 = arith.constant 0 : index
    %28 = vector.load %arg8[%c72, %c0_20] : memref<332x128xf32, #tpu.memory_space<vmem>>, vector<1x128xf32>
    tpu.vector_store %arg8[%c72, %c0_20], %27 {strides = array<i32>} : memref<332x128xf32, #tpu.memory_space<vmem>>, vector<1x128xf32>,
    %29 = vector.extract_strided_slice %25 {offsets = [14, 0], sizes = [1, 128], strides = [1, 1]} : vector<16x128xf32> to vector<1x128xf32>
    %c89 = arith.constant 89 : index
    %c0_21 = arith.constant 0 : index
    %30 = vector.load %arg8[%c89, %c0_21] : memref<332x128xf32, #tpu.memory_space<vmem>>, vector<1x128xf32>
    tpu.vector_store %arg8[%c89, %c0_21], %29 {strides = array<i32>} : memref<332x128xf32, #tpu.memory_space<vmem>>, vector<1x128xf32>,
    %c0_22 = arith.constant 0 : index
    %c64 = arith.constant 64 : index
    %c0_23 = arith.constant 0 : index
    %31 = vector.load %arg6[%c0_22, %c64, %c0_23] : memref<1x256x128xf32, #tpu.memory_space<vmem>>, vector<1x16x128xf32>
    %32 = vector.shape_cast %31 : vector<1x16x128xf32> to vector<16x128xf32>
    %c91 = arith.constant 91 : index
    %c0_24 = arith.constant 0 : index
    %33 = vector.load %arg8[%c91, %c0_24] : memref<332x128xf32, #tpu.memory_space<vmem>>, vector<16x128xf32>
    tpu.vector_store %arg8[%c91, %c0_24], %32 {strides = array<i32>} : memref<332x128xf32, #tpu.memory_space<vmem>>, vector<16x128xf32>,
    %34 = vector.extract_strided_slice %32 {offsets = [1, 0], sizes = [1, 128], strides = [1, 1]} : vector<16x128xf32> to vector<1x128xf32>
    %c90 = arith.constant 90 : index
    %c0_25 = arith.constant 0 : index
    %35 = vector.load %arg8[%c90, %c0_25] : memref<332x128xf32, #tpu.memory_space<vmem>>, vector<1x128xf32>
    tpu.vector_store %arg8[%c90, %c0_25], %34 {strides = array<i32>} : memref<332x128xf32, #tpu.memory_space<vmem>>, vector<1x128xf32>,
    %36 = vector.extract_strided_slice %32 {offsets = [14, 0], sizes = [1, 128], strides = [1, 1]} : vector<16x128xf32> to vector<1x128xf32>
    %c107 = arith.constant 107 : index
    %c0_26 = arith.constant 0 : index
    %37 = vector.load %arg8[%c107, %c0_26] : memref<332x128xf32, #tpu.memory_space<vmem>>, vector<1x128xf32>
    tpu.vector_store %arg8[%c107, %c0_26], %36 {strides = array<i32>} : memref<332x128xf32, #tpu.memory_space<vmem>>, vector<1x128xf32>,
    %c0_27 = arith.constant 0 : index
    %c80 = arith.constant 80 : index
    %c0_28 = arith.constant 0 : index
    %38 = vector.load %arg6[%c0_27, %c80, %c0_28] : memref<1x256x128xf32, #tpu.memory_space<vmem>>, vector<1x16x128xf32>
    %39 = vector.shape_cast %38 : vector<1x16x128xf32> to vector<16x128xf32>
    %c109 = arith.constant 109 : index
    %c0_29 = arith.constant 0 : index
    %40 = vector.load %arg8[%c109, %c0_29] : memref<332x128xf32, #tpu.memory_space<vmem>>, vector<16x128xf32>
    tpu.vector_store %arg8[%c109, %c0_29], %39 {strides = array<i32>} : memref<332x128xf32, #tpu.memory_space<vmem>>, vector<16x128xf32>,
    %41 = vector.extract_strided_slice %39 {offsets = [1, 0], sizes = [1, 128], strides = [1, 1]} : vector<16x128xf32> to vector<1x128xf32>
    %c108 = arith.constant 108 : index
    %c0_30 = arith.constant 0 : index
    %42 = vector.load %arg8[%c108, %c0_30] : memref<332x128xf32, #tpu.memory_space<vmem>>, vector<1x128xf32>
    tpu.vector_store %arg8[%c108, %c0_30], %41 {strides = array<i32>} : memref<332x128xf32, #tpu.memory_space<vmem>>, vector<1x128xf32>,
    %43 = vector.extract_strided_slice %39 {offsets = [14, 0], sizes = [1, 128], strides = [1, 1]} : vector<16x128xf32> to vector<1x128xf32>
    %c125 = arith.constant 125 : index
    %c0_31 = arith.constant 0 : index
    %44 = vector.load %arg8[%c125, %c0_31] : memref<332x128xf32, #tpu.memory_space<vmem>>, vector<1x128xf32>
    tpu.vector_store %arg8[%c125, %c0_31], %43 {strides = array<i32>} : memref<332x128xf32, #tpu.memory_space<vmem>>, vector<1x128xf32>,
    %c0_32 = arith.constant 0 : index
    %c96 = arith.constant 96 : index
    %c0_33 = arith.constant 0 : index
    %45 = vector.load %arg6[%c0_32, %c96, %c0_33] : memref<1x256x128xf32, #tpu.memory_space<vmem>>, vector<1x16x128xf32>
    %46 = vector.shape_cast %45 : vector<1x16x128xf32> to vector<16x128xf32>
    %c127 = arith.constant 127 : index
    %c0_34 = arith.constant 0 : index
    %47 = vector.load %arg8[%c127, %c0_34] : memref<332x128xf32, #tpu.memory_space<vmem>>, vector<16x128xf32>
    tpu.vector_store %arg8[%c127, %c0_34], %46 {strides = array<i32>} : memref<332x128xf32, #tpu.memory_space<vmem>>, vector<16x128xf32>,
    %48 = vector.extract_strided_slice %46 {offsets = [1, 0], sizes = [1, 128], strides = [1, 1]} : vector<16x128xf32> to vector<1x128xf32>
    %c126 = arith.constant 126 : index
    %c0_35 = arith.constant 0 : index
    %49 = vector.load %arg8[%c126, %c0_35] : memref<332x128xf32, #tpu.memory_space<vmem>>, vector<1x128xf32>
    tpu.vector_store %arg8[%c126, %c0_35], %48 {strides = array<i32>} : memref<332x128xf32, #tpu.memory_space<vmem>>, vector<1x128xf32>,
    %50 = vector.extract_strided_slice %46 {offsets = [14, 0], sizes = [1, 128], strides = [1, 1]} : vector<16x128xf32> to vector<1x128xf32>
    %c143 = arith.constant 143 : index
    %c0_36 = arith.constant 0 : index
    %51 = vector.load %arg8[%c143, %c0_36] : memref<332x128xf32, #tpu.memory_space<vmem>>, vector<1x128xf32>
    tpu.vector_store %arg8[%c143, %c0_36], %50 {strides = array<i32>} : memref<332x128xf32, #tpu.memory_space<vmem>>, vector<1x128xf32>,
    %c0_37 = arith.constant 0 : index
    %c112 = arith.constant 112 : index
    %c0_38 = arith.constant 0 : index
    %52 = vector.load %arg6[%c0_37, %c112, %c0_38] : memref<1x256x128xf32, #tpu.memory_space<vmem>>, vector<1x16x128xf32>
    %53 = vector.shape_cast %52 : vector<1x16x128xf32> to vector<16x128xf32>
    %c145 = arith.constant 145 : index
    %c0_39 = arith.constant 0 : index
    %54 = vector.load %arg8[%c145, %c0_39] : memref<332x128xf32, #tpu.memory_space<vmem>>, vector<16x128xf32>
    tpu.vector_store %arg8[%c145, %c0_39], %53 {strides = array<i32>} : memref<332x128xf32, #tpu.memory_space<vmem>>, vector<16x128xf32>,
    %55 = vector.extract_strided_slice %53 {offsets = [1, 0], sizes = [1, 128], strides = [1, 1]} : vector<16x128xf32> to vector<1x128xf32>
    %c144 = arith.constant 144 : index
    %c0_40 = arith.constant 0 : index
    %56 = vector.load %arg8[%c144, %c0_40] : memref<332x128xf32, #tpu.memory_space<vmem>>, vector<1x128xf32>
    tpu.vector_store %arg8[%c144, %c0_40], %55 {strides = array<i32>} : memref<332x128xf32, #tpu.memory_space<vmem>>, vector<1x128xf32>,
    %57 = vector.extract_strided_slice %53 {offsets = [14, 0], sizes = [1, 128], strides = [1, 1]} : vector<16x128xf32> to vector<1x128xf32>
    %c161 = arith.constant 161 : index
    %c0_41 = arith.constant 0 : index
    %58 = vector.load %arg8[%c161, %c0_41] : memref<332x128xf32, #tpu.memory_space<vmem>>, vector<1x128xf32>
    tpu.vector_store %arg8[%c161, %c0_41], %57 {strides = array<i32>} : memref<332x128xf32, #tpu.memory_space<vmem>>, vector<1x128xf32>,
    %c0_42 = arith.constant 0 : index
    %c128 = arith.constant 128 : index
    %c0_43 = arith.constant 0 : index
    %59 = vector.load %arg6[%c0_42, %c128, %c0_43] : memref<1x256x128xf32, #tpu.memory_space<vmem>>, vector<1x16x128xf32>
    %60 = vector.shape_cast %59 : vector<1x16x128xf32> to vector<16x128xf32>
    %c163 = arith.constant 163 : index
    %c0_44 = arith.constant 0 : index
    %61 = vector.load %arg8[%c163, %c0_44] : memref<332x128xf32, #tpu.memory_space<vmem>>, vector<16x128xf32>
    tpu.vector_store %arg8[%c163, %c0_44], %60 {strides = array<i32>} : memref<332x128xf32, #tpu.memory_space<vmem>>, vector<16x128xf32>,
    %62 = vector.extract_strided_slice %60 {offsets = [1, 0], sizes = [1, 128], strides = [1, 1]} : vector<16x128xf32> to vector<1x128xf32>
    %c162 = arith.constant 162 : index
    %c0_45 = arith.constant 0 : index
    %63 = vector.load %arg8[%c162, %c0_45] : memref<332x128xf32, #tpu.memory_space<vmem>>, vector<1x128xf32>
    tpu.vector_store %arg8[%c162, %c0_45], %62 {strides = array<i32>} : memref<332x128xf32, #tpu.memory_space<vmem>>, vector<1x128xf32>,
    %64 = vector.extract_strided_slice %60 {offsets = [14, 0], sizes = [1, 128], strides = [1, 1]} : vector<16x128xf32> to vector<1x128xf32>
    %c179 = arith.constant 179 : index
    %c0_46 = arith.constant 0 : index
    %65 = vector.load %arg8[%c179, %c0_46] : memref<332x128xf32, #tpu.memory_space<vmem>>, vector<1x128xf32>
    tpu.vector_store %arg8[%c179, %c0_46], %64 {strides = array<i32>} : memref<332x128xf32, #tpu.memory_space<vmem>>, vector<1x128xf32>,
    %c0_47 = arith.constant 0 : index
    %c144_48 = arith.constant 144 : index
    %c0_49 = arith.constant 0 : index
    %66 = vector.load %arg6[%c0_47, %c144_48, %c0_49] : memref<1x256x128xf32, #tpu.memory_space<vmem>>, vector<1x16x128xf32>
    %67 = vector.shape_cast %66 : vector<1x16x128xf32> to vector<16x128xf32>
    %c181 = arith.constant 181 : index
    %c0_50 = arith.constant 0 : index
    %68 = vector.load %arg8[%c181, %c0_50] : memref<332x128xf32, #tpu.memory_space<vmem>>, vector<16x128xf32>
    tpu.vector_store %arg8[%c181, %c0_50], %67 {strides = array<i32>} : memref<332x128xf32, #tpu.memory_space<vmem>>, vector<16x128xf32>,
    %69 = vector.extract_strided_slice %67 {offsets = [1, 0], sizes = [1, 128], strides = [1, 1]} : vector<16x128xf32> to vector<1x128xf32>
    %c180 = arith.constant 180 : index
    %c0_51 = arith.constant 0 : index
    %70 = vector.load %arg8[%c180, %c0_51] : memref<332x128xf32, #tpu.memory_space<vmem>>, vector<1x128xf32>
    tpu.vector_store %arg8[%c180, %c0_51], %69 {strides = array<i32>} : memref<332x128xf32, #tpu.memory_space<vmem>>, vector<1x128xf32>,
    %71 = vector.extract_strided_slice %67 {offsets = [14, 0], sizes = [1, 128], strides = [1, 1]} : vector<16x128xf32> to vector<1x128xf32>
    %c197 = arith.constant 197 : index
    %c0_52 = arith.constant 0 : index
    %72 = vector.load %arg8[%c197, %c0_52] : memref<332x128xf32, #tpu.memory_space<vmem>>, vector<1x128xf32>
    tpu.vector_store %arg8[%c197, %c0_52], %71 {strides = array<i32>} : memref<332x128xf32, #tpu.memory_space<vmem>>, vector<1x128xf32>,
    %c0_53 = arith.constant 0 : index
    %c160 = arith.constant 160 : index
    %c0_54 = arith.constant 0 : index
    %73 = vector.load %arg6[%c0_53, %c160, %c0_54] : memref<1x256x128xf32, #tpu.memory_space<vmem>>, vector<1x16x128xf32>
    %74 = vector.shape_cast %73 : vector<1x16x128xf32> to vector<16x128xf32>
    %c199 = arith.constant 199 : index
    %c0_55 = arith.constant 0 : index
    %75 = vector.load %arg8[%c199, %c0_55] : memref<332x128xf32, #tpu.memory_space<vmem>>, vector<16x128xf32>
    tpu.vector_store %arg8[%c199, %c0_55], %74 {strides = array<i32>} : memref<332x128xf32, #tpu.memory_space<vmem>>, vector<16x128xf32>,
    %76 = vector.extract_strided_slice %74 {offsets = [1, 0], sizes = [1, 128], strides = [1, 1]} : vector<16x128xf32> to vector<1x128xf32>
    %c198 = arith.constant 198 : index
    %c0_56 = arith.constant 0 : index
    %77 = vector.load %arg8[%c198, %c0_56] : memref<332x128xf32, #tpu.memory_space<vmem>>, vector<1x128xf32>
    tpu.vector_store %arg8[%c198, %c0_56], %76 {strides = array<i32>} : memref<332x128xf32, #tpu.memory_space<vmem>>, vector<1x128xf32>,
    %78 = vector.extract_strided_slice %74 {offsets = [14, 0], sizes = [1, 128], strides = [1, 1]} : vector<16x128xf32> to vector<1x128xf32>
    %c215 = arith.constant 215 : index
    %c0_57 = arith.constant 0 : index
    %79 = vector.load %arg8[%c215, %c0_57] : memref<332x128xf32, #tpu.memory_space<vmem>>, vector<1x128xf32>
    tpu.vector_store %arg8[%c215, %c0_57], %78 {strides = array<i32>} : memref<332x128xf32, #tpu.memory_space<vmem>>, vector<1x128xf32>,
    %c0_58 = arith.constant 0 : index
    %c176 = arith.constant 176 : index
    %c0_59 = arith.constant 0 : index
    %80 = vector.load %arg6[%c0_58, %c176, %c0_59] : memref<1x256x128xf32, #tpu.memory_space<vmem>>, vector<1x16x128xf32>
    %81 = vector.shape_cast %80 : vector<1x16x128xf32> to vector<16x128xf32>
    %c217 = arith.constant 217 : index
    %c0_60 = arith.constant 0 : index
    %82 = vector.load %arg8[%c217, %c0_60] : memref<332x128xf32, #tpu.memory_space<vmem>>, vector<16x128xf32>
    tpu.vector_store %arg8[%c217, %c0_60], %81 {strides = array<i32>} : memref<332x128xf32, #tpu.memory_space<vmem>>, vector<16x128xf32>,
    %83 = vector.extract_strided_slice %81 {offsets = [1, 0], sizes = [1, 128], strides = [1, 1]} : vector<16x128xf32> to vector<1x128xf32>
    %c216 = arith.constant 216 : index
    %c0_61 = arith.constant 0 : index
    %84 = vector.load %arg8[%c216, %c0_61] : memref<332x128xf32, #tpu.memory_space<vmem>>, vector<1x128xf32>
    tpu.vector_store %arg8[%c216, %c0_61], %83 {strides = array<i32>} : memref<332x128xf32, #tpu.memory_space<vmem>>, vector<1x128xf32>,
    %85 = vector.extract_strided_slice %81 {offsets = [14, 0], sizes = [1, 128], strides = [1, 1]} : vector<16x128xf32> to vector<1x128xf32>
    %c233 = arith.constant 233 : index
    %c0_62 = arith.constant 0 : index
    %86 = vector.load %arg8[%c233, %c0_62] : memref<332x128xf32, #tpu.memory_space<vmem>>, vector<1x128xf32>
    tpu.vector_store %arg8[%c233, %c0_62], %85 {strides = array<i32>} : memref<332x128xf32, #tpu.memory_space<vmem>>, vector<1x128xf32>,
    %c0_63 = arith.constant 0 : index
    %c192 = arith.constant 192 : index
    %c0_64 = arith.constant 0 : index
    %87 = vector.load %arg6[%c0_63, %c192, %c0_64] : memref<1x256x128xf32, #tpu.memory_space<vmem>>, vector<1x16x128xf32>
    %88 = vector.shape_cast %87 : vector<1x16x128xf32> to vector<16x128xf32>
    %c235 = arith.constant 235 : index
    %c0_65 = arith.constant 0 : index
    %89 = vector.load %arg8[%c235, %c0_65] : memref<332x128xf32, #tpu.memory_space<vmem>>, vector<16x128xf32>
    tpu.vector_store %arg8[%c235, %c0_65], %88 {strides = array<i32>} : memref<332x128xf32, #tpu.memory_space<vmem>>, vector<16x128xf32>,
    %90 = vector.extract_strided_slice %88 {offsets = [1, 0], sizes = [1, 128], strides = [1, 1]} : vector<16x128xf32> to vector<1x128xf32>
    %c234 = arith.constant 234 : index
    %c0_66 = arith.constant 0 : index
    %91 = vector.load %arg8[%c234, %c0_66] : memref<332x128xf32, #tpu.memory_space<vmem>>, vector<1x128xf32>
    tpu.vector_store %arg8[%c234, %c0_66], %90 {strides = array<i32>} : memref<332x128xf32, #tpu.memory_space<vmem>>, vector<1x128xf32>,
    %92 = vector.extract_strided_slice %88 {offsets = [14, 0], sizes = [1, 128], strides = [1, 1]} : vector<16x128xf32> to vector<1x128xf32>
    %c251 = arith.constant 251 : index
    %c0_67 = arith.constant 0 : index
    %93 = vector.load %arg8[%c251, %c0_67] : memref<332x128xf32, #tpu.memory_space<vmem>>, vector<1x128xf32>
    tpu.vector_store %arg8[%c251, %c0_67], %92 {strides = array<i32>} : memref<332x128xf32, #tpu.memory_space<vmem>>, vector<1x128xf32>,
    %c0_68 = arith.constant 0 : index
    %c208 = arith.constant 208 : index
    %c0_69 = arith.constant 0 : index
    %94 = vector.load %arg6[%c0_68, %c208, %c0_69] : memref<1x256x128xf32, #tpu.memory_space<vmem>>, vector<1x16x128xf32>
    %95 = vector.shape_cast %94 : vector<1x16x128xf32> to vector<16x128xf32>
    %c253 = arith.constant 253 : index
    %c0_70 = arith.constant 0 : index
    %96 = vector.load %arg8[%c253, %c0_70] : memref<332x128xf32, #tpu.memory_space<vmem>>, vector<16x128xf32>
    tpu.vector_store %arg8[%c253, %c0_70], %95 {strides = array<i32>} : memref<332x128xf32, #tpu.memory_space<vmem>>, vector<16x128xf32>,
    %97 = vector.extract_strided_slice %95 {offsets = [1, 0], sizes = [1, 128], strides = [1, 1]} : vector<16x128xf32> to vector<1x128xf32>
    %c252 = arith.constant 252 : index
    %c0_71 = arith.constant 0 : index
    %98 = vector.load %arg8[%c252, %c0_71] : memref<332x128xf32, #tpu.memory_space<vmem>>, vector<1x128xf32>
    tpu.vector_store %arg8[%c252, %c0_71], %97 {strides = array<i32>} : memref<332x128xf32, #tpu.memory_space<vmem>>, vector<1x128xf32>,
    %99 = vector.extract_strided_slice %95 {offsets = [14, 0], sizes = [1, 128], strides = [1, 1]} : vector<16x128xf32> to vector<1x128xf32>
    %c269 = arith.constant 269 : index
    %c0_72 = arith.constant 0 : index
    %100 = vector.load %arg8[%c269, %c0_72] : memref<332x128xf32, #tpu.memory_space<vmem>>, vector<1x128xf32>
    tpu.vector_store %arg8[%c269, %c0_72], %99 {strides = array<i32>} : memref<332x128xf32, #tpu.memory_space<vmem>>, vector<1x128xf32>,
    %c0_73 = arith.constant 0 : index
    %c224 = arith.constant 224 : index
    %c0_74 = arith.constant 0 : index
    %101 = vector.load %arg6[%c0_73, %c224, %c0_74] : memref<1x256x128xf32, #tpu.memory_space<vmem>>, vector<1x16x128xf32>
    %102 = vector.shape_cast %101 : vector<1x16x128xf32> to vector<16x128xf32>
    %c271 = arith.constant 271 : index
    %c0_75 = arith.constant 0 : index
    %103 = vector.load %arg8[%c271, %c0_75] : memref<332x128xf32, #tpu.memory_space<vmem>>, vector<16x128xf32>
    tpu.vector_store %arg8[%c271, %c0_75], %102 {strides = array<i32>} : memref<332x128xf32, #tpu.memory_space<vmem>>, vector<16x128xf32>,
    %104 = vector.extract_strided_slice %102 {offsets = [1, 0], sizes = [1, 128], strides = [1, 1]} : vector<16x128xf32> to vector<1x128xf32>
    %c270 = arith.constant 270 : index
    %c0_76 = arith.constant 0 : index
    %105 = vector.load %arg8[%c270, %c0_76] : memref<332x128xf32, #tpu.memory_space<vmem>>, vector<1x128xf32>
    tpu.vector_store %arg8[%c270, %c0_76], %104 {strides = array<i32>} : memref<332x128xf32, #tpu.memory_space<vmem>>, vector<1x128xf32>,
    %106 = vector.extract_strided_slice %102 {offsets = [14, 0], sizes = [1, 128], strides = [1, 1]} : vector<16x128xf32> to vector<1x128xf32>
    %c287 = arith.constant 287 : index
    %c0_77 = arith.constant 0 : index
    %107 = vector.load %arg8[%c287, %c0_77] : memref<332x128xf32, #tpu.memory_space<vmem>>, vector<1x128xf32>
    tpu.vector_store %arg8[%c287, %c0_77], %106 {strides = array<i32>} : memref<332x128xf32, #tpu.memory_space<vmem>>, vector<1x128xf32>,
    %c0_78 = arith.constant 0 : index
    %c240 = arith.constant 240 : index
    %c0_79 = arith.constant 0 : index
    %108 = vector.load %arg6[%c0_78, %c240, %c0_79] : memref<1x256x128xf32, #tpu.memory_space<vmem>>, vector<1x16x128xf32>
    %109 = vector.shape_cast %108 : vector<1x16x128xf32> to vector<16x128xf32>
    %c289 = arith.constant 289 : index
    %c0_80 = arith.constant 0 : index
    %110 = vector.load %arg8[%c289, %c0_80] : memref<332x128xf32, #tpu.memory_space<vmem>>, vector<16x128xf32>
    tpu.vector_store %arg8[%c289, %c0_80], %109 {strides = array<i32>} : memref<332x128xf32, #tpu.memory_space<vmem>>, vector<16x128xf32>,
    %111 = vector.extract_strided_slice %109 {offsets = [1, 0], sizes = [1, 128], strides = [1, 1]} : vector<16x128xf32> to vector<1x128xf32>
    %c288 = arith.constant 288 : index
    %c0_81 = arith.constant 0 : index
    %112 = vector.load %arg8[%c288, %c0_81] : memref<332x128xf32, #tpu.memory_space<vmem>>, vector<1x128xf32>
    tpu.vector_store %arg8[%c288, %c0_81], %111 {strides = array<i32>} : memref<332x128xf32, #tpu.memory_space<vmem>>, vector<1x128xf32>,
    %113 = vector.extract_strided_slice %109 {offsets = [14, 0], sizes = [1, 128], strides = [1, 1]} : vector<16x128xf32> to vector<1x128xf32>
    %c305 = arith.constant 305 : index
    %c0_82 = arith.constant 0 : index
    %114 = vector.load %arg8[%c305, %c0_82] : memref<332x128xf32, #tpu.memory_space<vmem>>, vector<1x128xf32>
    tpu.vector_store %arg8[%c305, %c0_82], %113 {strides = array<i32>} : memref<332x128xf32, #tpu.memory_space<vmem>>, vector<1x128xf32>,
    %c36_83 = arith.constant 36 : index
    %c0_84 = arith.constant 0 : index
    %115 = vector.load %arg8[%c36_83, %c0_84] : memref<332x128xf32, #tpu.memory_space<vmem>>, vector<18x128xf32>
    %c0_85 = arith.constant 0 : index
    %c0_86 = arith.constant 0 : index
    %116 = vector.load %arg8[%c0_85, %c0_86] : memref<332x128xf32, #tpu.memory_space<vmem>>, vector<18x128xf32>
    tpu.vector_store %arg8[%c0_85, %c0_86], %115 {strides = array<i32>} : memref<332x128xf32, #tpu.memory_space<vmem>>, vector<18x128xf32>,
    %c270_87 = arith.constant 270 : index
    %c0_88 = arith.constant 0 : index
    %117 = vector.load %arg8[%c270_87, %c0_88] : memref<332x128xf32, #tpu.memory_space<vmem>>, vector<18x128xf32>
    %c306 = arith.constant 306 : index
    %c0_89 = arith.constant 0 : index
    %118 = vector.load %arg8[%c306, %c0_89] : memref<332x128xf32, #tpu.memory_space<vmem>>, vector<18x128xf32>
    tpu.vector_store %arg8[%c306, %c0_89], %117 {strides = array<i32>} : memref<332x128xf32, #tpu.memory_space<vmem>>, vector<18x128xf32>,
    %cst_90 = arith.constant 0.000000e+00 : f32
    %119 = vector.broadcast %cst_90 : f32 to vector<8x128xf32>
    %c324 = arith.constant 324 : index
    %c0_91 = arith.constant 0 : index
    %120 = vector.load %arg8[%c324, %c0_91] : memref<332x128xf32, #tpu.memory_space<vmem>>, vector<8x128xf32>
    tpu.vector_store %arg8[%c324, %c0_91], %119 {strides = array<i32>} : memref<332x128xf32, #tpu.memory_space<vmem>>, vector<8x128xf32>,
    %c0_92 = arith.constant 0 : index
    %c0_93 = arith.constant 0 : index
    %121 = vector.load %arg8[%c0_92, %c0_93] : memref<332x128xf32, #tpu.memory_space<vmem>>, vector<288x128xf32>
    %c18_94 = arith.constant 18 : index
    %c0_95 = arith.constant 0 : index
    %122 = vector.load %arg8[%c18_94, %c0_95] : memref<332x128xf32, #tpu.memory_space<vmem>>, vector<288x128xf32>
    %c36_96 = arith.constant 36 : index
    %c0_97 = arith.constant 0 : index
    %123 = vector.load %arg8[%c36_96, %c0_97] : memref<332x128xf32, #tpu.memory_space<vmem>>, vector<288x128xf32>
    %124 = tpu.concatenate %121, %122, %123 in 1 : vector<288x128xf32>, vector<288x128xf32>, vector<288x128xf32> -> vector<288x384xf32>
    %c0_98 = arith.constant 0 : index
    %c0_99 = arith.constant 0 : index
    %c0_100 = arith.constant 0 : index
    %125 = vector.load %arg1[%c0_98, %c0_99, %c0_100] : memref<3x384x128xf32, #tpu.memory_space<vmem>>, vector<1x384x128xf32>
    %126 = vector.shape_cast %125 : vector<1x384x128xf32> to vector<384x128xf32>
    %cst_101 = arith.constant dense<0.000000e+00> : vector<288x128xf32>
    %127 = tpu.matmul %124, %126, %cst_101 {dimension_numbers = #tpu.dot_dimension_numbers<[1], [0], [0], [1], [0, 0, 1, 1], [], []>} : vector<288x384xf32>, vector<384x128xf32>, vector<288x128xf32> -> vector<288x128xf32>
    %c1 = arith.constant 1 : index
    %c0_102 = arith.constant 0 : index
    %128 = vector.load %arg8[%c1, %c0_102] : memref<332x128xf32, #tpu.memory_space<vmem>>, vector<288x128xf32>
    %c19_103 = arith.constant 19 : index
    %c0_104 = arith.constant 0 : index
    %129 = vector.load %arg8[%c19_103, %c0_104] : memref<332x128xf32, #tpu.memory_space<vmem>>, vector<288x128xf32>
    %c37_105 = arith.constant 37 : index
    %c0_106 = arith.constant 0 : index
    %130 = vector.load %arg8[%c37_105, %c0_106] : memref<332x128xf32, #tpu.memory_space<vmem>>, vector<288x128xf32>
    %131 = tpu.concatenate %128, %129, %130 in 1 : vector<288x128xf32>, vector<288x128xf32>, vector<288x128xf32> -> vector<288x384xf32>
    %c1_107 = arith.constant 1 : index
    %c0_108 = arith.constant 0 : index
    %c0_109 = arith.constant 0 : index
    %132 = vector.load %arg1[%c1_107, %c0_108, %c0_109] : memref<3x384x128xf32, #tpu.memory_space<vmem>>, vector<1x384x128xf32>
    %133 = vector.shape_cast %132 : vector<1x384x128xf32> to vector<384x128xf32>
    %cst_110 = arith.constant dense<0.000000e+00> : vector<288x128xf32>
    %134 = tpu.matmul %131, %133, %cst_110 {dimension_numbers = #tpu.dot_dimension_numbers<[1], [0], [0], [1], [0, 0, 1, 1], [], []>} : vector<288x384xf32>, vector<384x128xf32>, vector<288x128xf32> -> vector<288x128xf32>
    %135 = arith.addf %127, %134 : vector<288x128xf32>
    %c2 = arith.constant 2 : index
    %c0_111 = arith.constant 0 : index
    %136 = vector.load %arg8[%c2, %c0_111] : memref<332x128xf32, #tpu.memory_space<vmem>>, vector<288x128xf32>
    %c20 = arith.constant 20 : index
    %c0_112 = arith.constant 0 : index
    %137 = vector.load %arg8[%c20, %c0_112] : memref<332x128xf32, #tpu.memory_space<vmem>>, vector<288x128xf32>
    %c38 = arith.constant 38 : index
    %c0_113 = arith.constant 0 : index
    %138 = vector.load %arg8[%c38, %c0_113] : memref<332x128xf32, #tpu.memory_space<vmem>>, vector<288x128xf32>
    %139 = tpu.concatenate %136, %137, %138 in 1 : vector<288x128xf32>, vector<288x128xf32>, vector<288x128xf32> -> vector<288x384xf32>
    %c2_114 = arith.constant 2 : index
    %c0_115 = arith.constant 0 : index
    %c0_116 = arith.constant 0 : index
    %140 = vector.load %arg1[%c2_114, %c0_115, %c0_116] : memref<3x384x128xf32, #tpu.memory_space<vmem>>, vector<1x384x128xf32>
    %141 = vector.shape_cast %140 : vector<1x384x128xf32> to vector<384x128xf32>
    %cst_117 = arith.constant dense<0.000000e+00> : vector<288x128xf32>
    %142 = tpu.matmul %139, %141, %cst_117 {dimension_numbers = #tpu.dot_dimension_numbers<[1], [0], [0], [1], [0, 0, 1, 1], [], []>} : vector<288x384xf32>, vector<384x128xf32>, vector<288x128xf32> -> vector<288x128xf32>
    %143 = arith.addf %135, %142 : vector<288x128xf32>
    %c0_118 = arith.constant 0 : index
    %c0_119 = arith.constant 0 : index
    %144 = vector.load %arg2[%c0_118, %c0_119] : memref<1x128xf32, #tpu.memory_space<vmem>>, vector<1x128xf32>
    %145 = vector.broadcast %144 : vector<1x128xf32> to vector<288x128xf32>
    %146 = arith.addf %143, %145 : vector<288x128xf32>
    %cst_120 = arith.constant 0.000000e+00 : f32
    %147 = vector.shape_cast %2 : vector<288x1xi1> to vector<288x1xi1>
    %148 = vector.broadcast %147 : vector<288x1xi1> to vector<288x128xi1>
    %149 = vector.broadcast %cst_120 : f32 to vector<288x128xf32>
    %150 = arith.select %148, %146, %149 : vector<288x128xi1>, vector<288x128xf32>
    %cst_121 = arith.constant dense<0.000000e+00> : vector<128xf32>
    %151 = vector.multi_reduction <add>, %150, %cst_121 [0] : vector<288x128xf32> to vector<128xf32>
    %152 = vector.shape_cast %151 : vector<128xf32> to vector<1x128xf32>
    %153 = arith.mulf %146, %146 : vector<288x128xf32>
    %cst_122 = arith.constant 0.000000e+00 : f32
    %154 = vector.shape_cast %2 : vector<288x1xi1> to vector<288x1xi1>
    %155 = vector.broadcast %154 : vector<288x1xi1> to vector<288x128xi1>
    %156 = vector.broadcast %cst_122 : f32 to vector<288x128xf32>
    %157 = arith.select %155, %153, %156 : vector<288x128xi1>, vector<288x128xf32>
    %cst_123 = arith.constant dense<0.000000e+00> : vector<128xf32>
    %158 = vector.multi_reduction <add>, %157, %cst_123 [0] : vector<288x128xf32> to vector<128xf32>
    %159 = vector.shape_cast %158 : vector<128xf32> to vector<1x128xf32>
    %cst_124 = arith.constant 3.906250e-03 : f32
    %160 = vector.broadcast %cst_124 : f32 to vector<1x128xf32>
    %161 = arith.mulf %152, %160 : vector<1x128xf32>
    %cst_125 = arith.constant 3.906250e-03 : f32
    %162 = vector.broadcast %cst_125 : f32 to vector<1x128xf32>
    %163 = arith.mulf %159, %162 : vector<1x128xf32>
    %164 = arith.mulf %161, %161 : vector<1x128xf32>
    %165 = arith.subf %163, %164 : vector<1x128xf32>
    %cst_126 = arith.constant 0.000000e+00 : f32
    %166 = vector.broadcast %cst_126 : f32 to vector<1x128xf32>
    %167 = arith.maximumf %165, %166 : vector<1x128xf32>
    %cst_127 = arith.constant 9.99999974E-6 : f32
    %168 = vector.broadcast %cst_127 : f32 to vector<1x128xf32>
    %169 = arith.addf %167, %168 : vector<1x128xf32>
    %170 = math.rsqrt %169 : vector<1x128xf32>
    %171 = vector.extract_strided_slice %146 {offsets = [0, 0], sizes = [16, 128], strides = [1, 1]} : vector<288x128xf32> to vector<16x128xf32>
    %172 = vector.broadcast %161 : vector<1x128xf32> to vector<16x128xf32>
    %173 = arith.subf %171, %172 : vector<16x128xf32>
    %174 = vector.broadcast %170 : vector<1x128xf32> to vector<16x128xf32>
    %175 = arith.mulf %173, %174 : vector<16x128xf32>
    %cst_128 = arith.constant 0.000000e+00 : f32
    %176 = vector.broadcast %cst_128 : f32 to vector<16x128xf32>
    %177 = arith.maximumf %175, %176 : vector<16x128xf32>
    %c19_129 = arith.constant 19 : index
    %c0_130 = arith.constant 0 : index
    %178 = vector.load %arg9[%c19_129, %c0_130] : memref<332x128xf32, #tpu.memory_space<vmem>>, vector<16x128xf32>
    tpu.vector_store %arg9[%c19_129, %c0_130], %177 {strides = array<i32>} : memref<332x128xf32, #tpu.memory_space<vmem>>, vector<16x128xf32>,
    %179 = vector.extract_strided_slice %177 {offsets = [1, 0], sizes = [1, 128], strides = [1, 1]} : vector<16x128xf32> to vector<1x128xf32>
    %c18_131 = arith.constant 18 : index
    %c0_132 = arith.constant 0 : index
    %180 = vector.load %arg9[%c18_131, %c0_132] : memref<332x128xf32, #tpu.memory_space<vmem>>, vector<1x128xf32>
    tpu.vector_store %arg9[%c18_131, %c0_132], %179 {strides = array<i32>} : memref<332x128xf32, #tpu.memory_space<vmem>>, vector<1x128xf32>,
    %181 = vector.extract_strided_slice %177 {offsets = [14, 0], sizes = [1, 128], strides = [1, 1]} : vector<16x128xf32> to vector<1x128xf32>
    %c35_133 = arith.constant 35 : index
    %c0_134 = arith.constant 0 : index
    %182 = vector.load %arg9[%c35_133, %c0_134] : memref<332x128xf32, #tpu.memory_space<vmem>>, vector<1x128xf32>
    tpu.vector_store %arg9[%c35_133, %c0_134], %181 {strides = array<i32>} : memref<332x128xf32, #tpu.memory_space<vmem>>, vector<1x128xf32>,
    %183 = vector.extract_strided_slice %146 {offsets = [18, 0], sizes = [16, 128], strides = [1, 1]} : vector<288x128xf32> to vector<16x128xf32>
    %184 = vector.broadcast %161 : vector<1x128xf32> to vector<16x128xf32>
    %185 = arith.subf %183, %184 : vector<16x128xf32>
    %186 = vector.broadcast %170 : vector<1x128xf32> to vector<16x128xf32>
    %187 = arith.mulf %185, %186 : vector<16x128xf32>
    %cst_135 = arith.constant 0.000000e+00 : f32
    %188 = vector.broadcast %cst_135 : f32 to vector<16x128xf32>
    %189 = arith.maximumf %187, %188 : vector<16x128xf32>
    %c37_136 = arith.constant 37 : index
    %c0_137 = arith.constant 0 : index
    %190 = vector.load %arg9[%c37_136, %c0_137] : memref<332x128xf32, #tpu.memory_space<vmem>>, vector<16x128xf32>
    tpu.vector_store %arg9[%c37_136, %c0_137], %189 {strides = array<i32>} : memref<332x128xf32, #tpu.memory_space<vmem>>, vector<16x128xf32>,
    %191 = vector.extract_strided_slice %189 {offsets = [1, 0], sizes = [1, 128], strides = [1, 1]} : vector<16x128xf32> to vector<1x128xf32>
    %c36_138 = arith.constant 36 : index
    %c0_139 = arith.constant 0 : index
    %192 = vector.load %arg9[%c36_138, %c0_139] : memref<332x128xf32, #tpu.memory_space<vmem>>, vector<1x128xf32>
    tpu.vector_store %arg9[%c36_138, %c0_139], %191 {strides = array<i32>} : memref<332x128xf32, #tpu.memory_space<vmem>>, vector<1x128xf32>,
    %193 = vector.extract_strided_slice %189 {offsets = [14, 0], sizes = [1, 128], strides = [1, 1]} : vector<16x128xf32> to vector<1x128xf32>
    %c53_140 = arith.constant 53 : index
    %c0_141 = arith.constant 0 : index
    %194 = vector.load %arg9[%c53_140, %c0_141] : memref<332x128xf32, #tpu.memory_space<vmem>>, vector<1x128xf32>
    tpu.vector_store %arg9[%c53_140, %c0_141], %193 {strides = array<i32>} : memref<332x128xf32, #tpu.memory_space<vmem>>, vector<1x128xf32>,
    %195 = vector.extract_strided_slice %146 {offsets = [36, 0], sizes = [16, 128], strides = [1, 1]} : vector<288x128xf32> to vector<16x128xf32>
    %196 = vector.broadcast %161 : vector<1x128xf32> to vector<16x128xf32>
    %197 = arith.subf %195, %196 : vector<16x128xf32>
    %198 = vector.broadcast %170 : vector<1x128xf32> to vector<16x128xf32>
    %199 = arith.mulf %197, %198 : vector<16x128xf32>
    %cst_142 = arith.constant 0.000000e+00 : f32
    %200 = vector.broadcast %cst_142 : f32 to vector<16x128xf32>
    %201 = arith.maximumf %199, %200 : vector<16x128xf32>
    %c55_143 = arith.constant 55 : index
    %c0_144 = arith.constant 0 : index
    %202 = vector.load %arg9[%c55_143, %c0_144] : memref<332x128xf32, #tpu.memory_space<vmem>>, vector<16x128xf32>
    tpu.vector_store %arg9[%c55_143, %c0_144], %201 {strides = array<i32>} : memref<332x128xf32, #tpu.memory_space<vmem>>, vector<16x128xf32>,
    %203 = vector.extract_strided_slice %201 {offsets = [1, 0], sizes = [1, 128], strides = [1, 1]} : vector<16x128xf32> to vector<1x128xf32>
    %c54_145 = arith.constant 54 : index
    %c0_146 = arith.constant 0 : index
    %204 = vector.load %arg9[%c54_145, %c0_146] : memref<332x128xf32, #tpu.memory_space<vmem>>, vector<1x128xf32>
    tpu.vector_store %arg9[%c54_145, %c0_146], %203 {strides = array<i32>} : memref<332x128xf32, #tpu.memory_space<vmem>>, vector<1x128xf32>,
    %205 = vector.extract_strided_slice %201 {offsets = [14, 0], sizes = [1, 128], strides = [1, 1]} : vector<16x128xf32> to vector<1x128xf32>
    %c71_147 = arith.constant 71 : index
    %c0_148 = arith.constant 0 : index
    %206 = vector.load %arg9[%c71_147, %c0_148] : memref<332x128xf32, #tpu.memory_space<vmem>>, vector<1x128xf32>
    tpu.vector_store %arg9[%c71_147, %c0_148], %205 {strides = array<i32>} : memref<332x128xf32, #tpu.memory_space<vmem>>, vector<1x128xf32>,
    %207 = vector.extract_strided_slice %146 {offsets = [54, 0], sizes = [16, 128], strides = [1, 1]} : vector<288x128xf32> to vector<16x128xf32>
    %208 = vector.broadcast %161 : vector<1x128xf32> to vector<16x128xf32>
    %209 = arith.subf %207, %208 : vector<16x128xf32>
    %210 = vector.broadcast %170 : vector<1x128xf32> to vector<16x128xf32>
    %211 = arith.mulf %209, %210 : vector<16x128xf32>
    %cst_149 = arith.constant 0.000000e+00 : f32
    %212 = vector.broadcast %cst_149 : f32 to vector<16x128xf32>
    %213 = arith.maximumf %211, %212 : vector<16x128xf32>
    %c73_150 = arith.constant 73 : index
    %c0_151 = arith.constant 0 : index
    %214 = vector.load %arg9[%c73_150, %c0_151] : memref<332x128xf32, #tpu.memory_space<vmem>>, vector<16x128xf32>
    tpu.vector_store %arg9[%c73_150, %c0_151], %213 {strides = array<i32>} : memref<332x128xf32, #tpu.memory_space<vmem>>, vector<16x128xf32>,
    %215 = vector.extract_strided_slice %213 {offsets = [1, 0], sizes = [1, 128], strides = [1, 1]} : vector<16x128xf32> to vector<1x128xf32>
    %c72_152 = arith.constant 72 : index
    %c0_153 = arith.constant 0 : index
    %216 = vector.load %arg9[%c72_152, %c0_153] : memref<332x128xf32, #tpu.memory_space<vmem>>, vector<1x128xf32>
    tpu.vector_store %arg9[%c72_152, %c0_153], %215 {strides = array<i32>} : memref<332x128xf32, #tpu.memory_space<vmem>>, vector<1x128xf32>,
    %217 = vector.extract_strided_slice %213 {offsets = [14, 0], sizes = [1, 128], strides = [1, 1]} : vector<16x128xf32> to vector<1x128xf32>
    %c89_154 = arith.constant 89 : index
    %c0_155 = arith.constant 0 : index
    %218 = vector.load %arg9[%c89_154, %c0_155] : memref<332x128xf32, #tpu.memory_space<vmem>>, vector<1x128xf32>
    tpu.vector_store %arg9[%c89_154, %c0_155], %217 {strides = array<i32>} : memref<332x128xf32, #tpu.memory_space<vmem>>, vector<1x128xf32>,
    %219 = vector.extract_strided_slice %146 {offsets = [72, 0], sizes = [16, 128], strides = [1, 1]} : vector<288x128xf32> to vector<16x128xf32>
    %220 = vector.broadcast %161 : vector<1x128xf32> to vector<16x128xf32>
    %221 = arith.subf %219, %220 : vector<16x128xf32>
    %222 = vector.broadcast %170 : vector<1x128xf32> to vector<16x128xf32>
    %223 = arith.mulf %221, %222 : vector<16x128xf32>
    %cst_156 = arith.constant 0.000000e+00 : f32
    %224 = vector.broadcast %cst_156 : f32 to vector<16x128xf32>
    %225 = arith.maximumf %223, %224 : vector<16x128xf32>
    %c91_157 = arith.constant 91 : index
    %c0_158 = arith.constant 0 : index
    %226 = vector.load %arg9[%c91_157, %c0_158] : memref<332x128xf32, #tpu.memory_space<vmem>>, vector<16x128xf32>
    tpu.vector_store %arg9[%c91_157, %c0_158], %225 {strides = array<i32>} : memref<332x128xf32, #tpu.memory_space<vmem>>, vector<16x128xf32>,
    %227 = vector.extract_strided_slice %225 {offsets = [1, 0], sizes = [1, 128], strides = [1, 1]} : vector<16x128xf32> to vector<1x128xf32>
    %c90_159 = arith.constant 90 : index
    %c0_160 = arith.constant 0 : index
    %228 = vector.load %arg9[%c90_159, %c0_160] : memref<332x128xf32, #tpu.memory_space<vmem>>, vector<1x128xf32>
    tpu.vector_store %arg9[%c90_159, %c0_160], %227 {strides = array<i32>} : memref<332x128xf32, #tpu.memory_space<vmem>>, vector<1x128xf32>,
    %229 = vector.extract_strided_slice %225 {offsets = [14, 0], sizes = [1, 128], strides = [1, 1]} : vector<16x128xf32> to vector<1x128xf32>
    %c107_161 = arith.constant 107 : index
    %c0_162 = arith.constant 0 : index
    %230 = vector.load %arg9[%c107_161, %c0_162] : memref<332x128xf32, #tpu.memory_space<vmem>>, vector<1x128xf32>
    tpu.vector_store %arg9[%c107_161, %c0_162], %229 {strides = array<i32>} : memref<332x128xf32, #tpu.memory_space<vmem>>, vector<1x128xf32>,
    %231 = vector.extract_strided_slice %146 {offsets = [90, 0], sizes = [16, 128], strides = [1, 1]} : vector<288x128xf32> to vector<16x128xf32>
    %232 = vector.broadcast %161 : vector<1x128xf32> to vector<16x128xf32>
    %233 = arith.subf %231, %232 : vector<16x128xf32>
    %234 = vector.broadcast %170 : vector<1x128xf32> to vector<16x128xf32>
    %235 = arith.mulf %233, %234 : vector<16x128xf32>
    %cst_163 = arith.constant 0.000000e+00 : f32
    %236 = vector.broadcast %cst_163 : f32 to vector<16x128xf32>
    %237 = arith.maximumf %235, %236 : vector<16x128xf32>
    %c109_164 = arith.constant 109 : index
    %c0_165 = arith.constant 0 : index
    %238 = vector.load %arg9[%c109_164, %c0_165] : memref<332x128xf32, #tpu.memory_space<vmem>>, vector<16x128xf32>
    tpu.vector_store %arg9[%c109_164, %c0_165], %237 {strides = array<i32>} : memref<332x128xf32, #tpu.memory_space<vmem>>, vector<16x128xf32>,
    %239 = vector.extract_strided_slice %237 {offsets = [1, 0], sizes = [1, 128], strides = [1, 1]} : vector<16x128xf32> to vector<1x128xf32>
    %c108_166 = arith.constant 108 : index
    %c0_167 = arith.constant 0 : index
    %240 = vector.load %arg9[%c108_166, %c0_167] : memref<332x128xf32, #tpu.memory_space<vmem>>, vector<1x128xf32>
    tpu.vector_store %arg9[%c108_166, %c0_167], %239 {strides = array<i32>} : memref<332x128xf32, #tpu.memory_space<vmem>>, vector<1x128xf32>,
    %241 = vector.extract_strided_slice %237 {offsets = [14, 0], sizes = [1, 128], strides = [1, 1]} : vector<16x128xf32> to vector<1x128xf32>
    %c125_168 = arith.constant 125 : index
    %c0_169 = arith.constant 0 : index
    %242 = vector.load %arg9[%c125_168, %c0_169] : memref<332x128xf32, #tpu.memory_space<vmem>>, vector<1x128xf32>
    tpu.vector_store %arg9[%c125_168, %c0_169], %241 {strides = array<i32>} : memref<332x128xf32, #tpu.memory_space<vmem>>, vector<1x128xf32>,
    %243 = vector.extract_strided_slice %146 {offsets = [108, 0], sizes = [16, 128], strides = [1, 1]} : vector<288x128xf32> to vector<16x128xf32>
    %244 = vector.broadcast %161 : vector<1x128xf32> to vector<16x128xf32>
    %245 = arith.subf %243, %244 : vector<16x128xf32>
    %246 = vector.broadcast %170 : vector<1x128xf32> to vector<16x128xf32>
    %247 = arith.mulf %245, %246 : vector<16x128xf32>
    %cst_170 = arith.constant 0.000000e+00 : f32
    %248 = vector.broadcast %cst_170 : f32 to vector<16x128xf32>
    %249 = arith.maximumf %247, %248 : vector<16x128xf32>
    %c127_171 = arith.constant 127 : index
    %c0_172 = arith.constant 0 : index
    %250 = vector.load %arg9[%c127_171, %c0_172] : memref<332x128xf32, #tpu.memory_space<vmem>>, vector<16x128xf32>
    tpu.vector_store %arg9[%c127_171, %c0_172], %249 {strides = array<i32>} : memref<332x128xf32, #tpu.memory_space<vmem>>, vector<16x128xf32>,
    %251 = vector.extract_strided_slice %249 {offsets = [1, 0], sizes = [1, 128], strides = [1, 1]} : vector<16x128xf32> to vector<1x128xf32>
    %c126_173 = arith.constant 126 : index
    %c0_174 = arith.constant 0 : index
    %252 = vector.load %arg9[%c126_173, %c0_174] : memref<332x128xf32, #tpu.memory_space<vmem>>, vector<1x128xf32>
    tpu.vector_store %arg9[%c126_173, %c0_174], %251 {strides = array<i32>} : memref<332x128xf32, #tpu.memory_space<vmem>>, vector<1x128xf32>,
    %253 = vector.extract_strided_slice %249 {offsets = [14, 0], sizes = [1, 128], strides = [1, 1]} : vector<16x128xf32> to vector<1x128xf32>
    %c143_175 = arith.constant 143 : index
    %c0_176 = arith.constant 0 : index
    %254 = vector.load %arg9[%c143_175, %c0_176] : memref<332x128xf32, #tpu.memory_space<vmem>>, vector<1x128xf32>
    tpu.vector_store %arg9[%c143_175, %c0_176], %253 {strides = array<i32>} : memref<332x128xf32, #tpu.memory_space<vmem>>, vector<1x128xf32>,
    %255 = vector.extract_strided_slice %146 {offsets = [126, 0], sizes = [16, 128], strides = [1, 1]} : vector<288x128xf32> to vector<16x128xf32>
    %256 = vector.broadcast %161 : vector<1x128xf32> to vector<16x128xf32>
    %257 = arith.subf %255, %256 : vector<16x128xf32>
    %258 = vector.broadcast %170 : vector<1x128xf32> to vector<16x128xf32>
    %259 = arith.mulf %257, %258 : vector<16x128xf32>
    %cst_177 = arith.constant 0.000000e+00 : f32
    %260 = vector.broadcast %cst_177 : f32 to vector<16x128xf32>
    %261 = arith.maximumf %259, %260 : vector<16x128xf32>
    %c145_178 = arith.constant 145 : index
    %c0_179 = arith.constant 0 : index
    %262 = vector.load %arg9[%c145_178, %c0_179] : memref<332x128xf32, #tpu.memory_space<vmem>>, vector<16x128xf32>
    tpu.vector_store %arg9[%c145_178, %c0_179], %261 {strides = array<i32>} : memref<332x128xf32, #tpu.memory_space<vmem>>, vector<16x128xf32>,
    %263 = vector.extract_strided_slice %261 {offsets = [1, 0], sizes = [1, 128], strides = [1, 1]} : vector<16x128xf32> to vector<1x128xf32>
    %c144_180 = arith.constant 144 : index
    %c0_181 = arith.constant 0 : index
    %264 = vector.load %arg9[%c144_180, %c0_181] : memref<332x128xf32, #tpu.memory_space<vmem>>, vector<1x128xf32>
    tpu.vector_store %arg9[%c144_180, %c0_181], %263 {strides = array<i32>} : memref<332x128xf32, #tpu.memory_space<vmem>>, vector<1x128xf32>,
    %265 = vector.extract_strided_slice %261 {offsets = [14, 0], sizes = [1, 128], strides = [1, 1]} : vector<16x128xf32> to vector<1x128xf32>
    %c161_182 = arith.constant 161 : index
    %c0_183 = arith.constant 0 : index
    %266 = vector.load %arg9[%c161_182, %c0_183] : memref<332x128xf32, #tpu.memory_space<vmem>>, vector<1x128xf32>
    tpu.vector_store %arg9[%c161_182, %c0_183], %265 {strides = array<i32>} : memref<332x128xf32, #tpu.memory_space<vmem>>, vector<1x128xf32>,
    %267 = vector.extract_strided_slice %146 {offsets = [144, 0], sizes = [16, 128], strides = [1, 1]} : vector<288x128xf32> to vector<16x128xf32>
    %268 = vector.broadcast %161 : vector<1x128xf32> to vector<16x128xf32>
    %269 = arith.subf %267, %268 : vector<16x128xf32>
    %270 = vector.broadcast %170 : vector<1x128xf32> to vector<16x128xf32>
    %271 = arith.mulf %269, %270 : vector<16x128xf32>
    %cst_184 = arith.constant 0.000000e+00 : f32
    %272 = vector.broadcast %cst_184 : f32 to vector<16x128xf32>
    %273 = arith.maximumf %271, %272 : vector<16x128xf32>
    %c163_185 = arith.constant 163 : index
    %c0_186 = arith.constant 0 : index
    %274 = vector.load %arg9[%c163_185, %c0_186] : memref<332x128xf32, #tpu.memory_space<vmem>>, vector<16x128xf32>
    tpu.vector_store %arg9[%c163_185, %c0_186], %273 {strides = array<i32>} : memref<332x128xf32, #tpu.memory_space<vmem>>, vector<16x128xf32>,
    %275 = vector.extract_strided_slice %273 {offsets = [1, 0], sizes = [1, 128], strides = [1, 1]} : vector<16x128xf32> to vector<1x128xf32>
    %c162_187 = arith.constant 162 : index
    %c0_188 = arith.constant 0 : index
    %276 = vector.load %arg9[%c162_187, %c0_188] : memref<332x128xf32, #tpu.memory_space<vmem>>, vector<1x128xf32>
    tpu.vector_store %arg9[%c162_187, %c0_188], %275 {strides = array<i32>} : memref<332x128xf32, #tpu.memory_space<vmem>>, vector<1x128xf32>,
    %277 = vector.extract_strided_slice %273 {offsets = [14, 0], sizes = [1, 128], strides = [1, 1]} : vector<16x128xf32> to vector<1x128xf32>
    %c179_189 = arith.constant 179 : index
    %c0_190 = arith.constant 0 : index
    %278 = vector.load %arg9[%c179_189, %c0_190] : memref<332x128xf32, #tpu.memory_space<vmem>>, vector<1x128xf32>
    tpu.vector_store %arg9[%c179_189, %c0_190], %277 {strides = array<i32>} : memref<332x128xf32, #tpu.memory_space<vmem>>, vector<1x128xf32>,
    %279 = vector.extract_strided_slice %146 {offsets = [162, 0], sizes = [16, 128], strides = [1, 1]} : vector<288x128xf32> to vector<16x128xf32>
    %280 = vector.broadcast %161 : vector<1x128xf32> to vector<16x128xf32>
    %281 = arith.subf %279, %280 : vector<16x128xf32>
    %282 = vector.broadcast %170 : vector<1x128xf32> to vector<16x128xf32>
    %283 = arith.mulf %281, %282 : vector<16x128xf32>
    %cst_191 = arith.constant 0.000000e+00 : f32
    %284 = vector.broadcast %cst_191 : f32 to vector<16x128xf32>
    %285 = arith.maximumf %283, %284 : vector<16x128xf32>
    %c181_192 = arith.constant 181 : index
    %c0_193 = arith.constant 0 : index
    %286 = vector.load %arg9[%c181_192, %c0_193] : memref<332x128xf32, #tpu.memory_space<vmem>>, vector<16x128xf32>
    tpu.vector_store %arg9[%c181_192, %c0_193], %285 {strides = array<i32>} : memref<332x128xf32, #tpu.memory_space<vmem>>, vector<16x128xf32>,
    %287 = vector.extract_strided_slice %285 {offsets = [1, 0], sizes = [1, 128], strides = [1, 1]} : vector<16x128xf32> to vector<1x128xf32>
    %c180_194 = arith.constant 180 : index
    %c0_195 = arith.constant 0 : index
    %288 = vector.load %arg9[%c180_194, %c0_195] : memref<332x128xf32, #tpu.memory_space<vmem>>, vector<1x128xf32>
    tpu.vector_store %arg9[%c180_194, %c0_195], %287 {strides = array<i32>} : memref<332x128xf32, #tpu.memory_space<vmem>>, vector<1x128xf32>,
    %289 = vector.extract_strided_slice %285 {offsets = [14, 0], sizes = [1, 128], strides = [1, 1]} : vector<16x128xf32> to vector<1x128xf32>
    %c197_196 = arith.constant 197 : index
    %c0_197 = arith.constant 0 : index
    %290 = vector.load %arg9[%c197_196, %c0_197] : memref<332x128xf32, #tpu.memory_space<vmem>>, vector<1x128xf32>
    tpu.vector_store %arg9[%c197_196, %c0_197], %289 {strides = array<i32>} : memref<332x128xf32, #tpu.memory_space<vmem>>, vector<1x128xf32>,
    %291 = vector.extract_strided_slice %146 {offsets = [180, 0], sizes = [16, 128], strides = [1, 1]} : vector<288x128xf32> to vector<16x128xf32>
    %292 = vector.broadcast %161 : vector<1x128xf32> to vector<16x128xf32>
    %293 = arith.subf %291, %292 : vector<16x128xf32>
    %294 = vector.broadcast %170 : vector<1x128xf32> to vector<16x128xf32>
    %295 = arith.mulf %293, %294 : vector<16x128xf32>
    %cst_198 = arith.constant 0.000000e+00 : f32
    %296 = vector.broadcast %cst_198 : f32 to vector<16x128xf32>
    %297 = arith.maximumf %295, %296 : vector<16x128xf32>
    %c199_199 = arith.constant 199 : index
    %c0_200 = arith.constant 0 : index
    %298 = vector.load %arg9[%c199_199, %c0_200] : memref<332x128xf32, #tpu.memory_space<vmem>>, vector<16x128xf32>
    tpu.vector_store %arg9[%c199_199, %c0_200], %297 {strides = array<i32>} : memref<332x128xf32, #tpu.memory_space<vmem>>, vector<16x128xf32>,
    %299 = vector.extract_strided_slice %297 {offsets = [1, 0], sizes = [1, 128], strides = [1, 1]} : vector<16x128xf32> to vector<1x128xf32>
    %c198_201 = arith.constant 198 : index
    %c0_202 = arith.constant 0 : index
    %300 = vector.load %arg9[%c198_201, %c0_202] : memref<332x128xf32, #tpu.memory_space<vmem>>, vector<1x128xf32>
    tpu.vector_store %arg9[%c198_201, %c0_202], %299 {strides = array<i32>} : memref<332x128xf32, #tpu.memory_space<vmem>>, vector<1x128xf32>,
    %301 = vector.extract_strided_slice %297 {offsets = [14, 0], sizes = [1, 128], strides = [1, 1]} : vector<16x128xf32> to vector<1x128xf32>
    %c215_203 = arith.constant 215 : index
    %c0_204 = arith.constant 0 : index
    %302 = vector.load %arg9[%c215_203, %c0_204] : memref<332x128xf32, #tpu.memory_space<vmem>>, vector<1x128xf32>
    tpu.vector_store %arg9[%c215_203, %c0_204], %301 {strides = array<i32>} : memref<332x128xf32, #tpu.memory_space<vmem>>, vector<1x128xf32>,
    %303 = vector.extract_strided_slice %146 {offsets = [198, 0], sizes = [16, 128], strides = [1, 1]} : vector<288x128xf32> to vector<16x128xf32>
    %304 = vector.broadcast %161 : vector<1x128xf32> to vector<16x128xf32>
    %305 = arith.subf %303, %304 : vector<16x128xf32>
    %306 = vector.broadcast %170 : vector<1x128xf32> to vector<16x128xf32>
    %307 = arith.mulf %305, %306 : vector<16x128xf32>
    %cst_205 = arith.constant 0.000000e+00 : f32
    %308 = vector.broadcast %cst_205 : f32 to vector<16x128xf32>
    %309 = arith.maximumf %307, %308 : vector<16x128xf32>
    %c217_206 = arith.constant 217 : index
    %c0_207 = arith.constant 0 : index
    %310 = vector.load %arg9[%c217_206, %c0_207] : memref<332x128xf32, #tpu.memory_space<vmem>>, vector<16x128xf32>
    tpu.vector_store %arg9[%c217_206, %c0_207], %309 {strides = array<i32>} : memref<332x128xf32, #tpu.memory_space<vmem>>, vector<16x128xf32>,
    %311 = vector.extract_strided_slice %309 {offsets = [1, 0], sizes = [1, 128], strides = [1, 1]} : vector<16x128xf32> to vector<1x128xf32>
    %c216_208 = arith.constant 216 : index
    %c0_209 = arith.constant 0 : index
    %312 = vector.load %arg9[%c216_208, %c0_209] : memref<332x128xf32, #tpu.memory_space<vmem>>, vector<1x128xf32>
    tpu.vector_store %arg9[%c216_208, %c0_209], %311 {strides = array<i32>} : memref<332x128xf32, #tpu.memory_space<vmem>>, vector<1x128xf32>,
    %313 = vector.extract_strided_slice %309 {offsets = [14, 0], sizes = [1, 128], strides = [1, 1]} : vector<16x128xf32> to vector<1x128xf32>
    %c233_210 = arith.constant 233 : index
    %c0_211 = arith.constant 0 : index
    %314 = vector.load %arg9[%c233_210, %c0_211] : memref<332x128xf32, #tpu.memory_space<vmem>>, vector<1x128xf32>
    tpu.vector_store %arg9[%c233_210, %c0_211], %313 {strides = array<i32>} : memref<332x128xf32, #tpu.memory_space<vmem>>, vector<1x128xf32>,
    %315 = vector.extract_strided_slice %146 {offsets = [216, 0], sizes = [16, 128], strides = [1, 1]} : vector<288x128xf32> to vector<16x128xf32>
    %316 = vector.broadcast %161 : vector<1x128xf32> to vector<16x128xf32>
    %317 = arith.subf %315, %316 : vector<16x128xf32>
    %318 = vector.broadcast %170 : vector<1x128xf32> to vector<16x128xf32>
    %319 = arith.mulf %317, %318 : vector<16x128xf32>
    %cst_212 = arith.constant 0.000000e+00 : f32
    %320 = vector.broadcast %cst_212 : f32 to vector<16x128xf32>
    %321 = arith.maximumf %319, %320 : vector<16x128xf32>
    %c235_213 = arith.constant 235 : index
    %c0_214 = arith.constant 0 : index
    %322 = vector.load %arg9[%c235_213, %c0_214] : memref<332x128xf32, #tpu.memory_space<vmem>>, vector<16x128xf32>
    tpu.vector_store %arg9[%c235_213, %c0_214], %321 {strides = array<i32>} : memref<332x128xf32, #tpu.memory_space<vmem>>, vector<16x128xf32>,
    %323 = vector.extract_strided_slice %321 {offsets = [1, 0], sizes = [1, 128], strides = [1, 1]} : vector<16x128xf32> to vector<1x128xf32>
    %c234_215 = arith.constant 234 : index
    %c0_216 = arith.constant 0 : index
    %324 = vector.load %arg9[%c234_215, %c0_216] : memref<332x128xf32, #tpu.memory_space<vmem>>, vector<1x128xf32>
    tpu.vector_store %arg9[%c234_215, %c0_216], %323 {strides = array<i32>} : memref<332x128xf32, #tpu.memory_space<vmem>>, vector<1x128xf32>,
    %325 = vector.extract_strided_slice %321 {offsets = [14, 0], sizes = [1, 128], strides = [1, 1]} : vector<16x128xf32> to vector<1x128xf32>
    %c251_217 = arith.constant 251 : index
    %c0_218 = arith.constant 0 : index
    %326 = vector.load %arg9[%c251_217, %c0_218] : memref<332x128xf32, #tpu.memory_space<vmem>>, vector<1x128xf32>
    tpu.vector_store %arg9[%c251_217, %c0_218], %325 {strides = array<i32>} : memref<332x128xf32, #tpu.memory_space<vmem>>, vector<1x128xf32>,
    %327 = vector.extract_strided_slice %146 {offsets = [234, 0], sizes = [16, 128], strides = [1, 1]} : vector<288x128xf32> to vector<16x128xf32>
    %328 = vector.broadcast %161 : vector<1x128xf32> to vector<16x128xf32>
    %329 = arith.subf %327, %328 : vector<16x128xf32>
    %330 = vector.broadcast %170 : vector<1x128xf32> to vector<16x128xf32>
    %331 = arith.mulf %329, %330 : vector<16x128xf32>
    %cst_219 = arith.constant 0.000000e+00 : f32
    %332 = vector.broadcast %cst_219 : f32 to vector<16x128xf32>
    %333 = arith.maximumf %331, %332 : vector<16x128xf32>
    %c253_220 = arith.constant 253 : index
    %c0_221 = arith.constant 0 : index
    %334 = vector.load %arg9[%c253_220, %c0_221] : memref<332x128xf32, #tpu.memory_space<vmem>>, vector<16x128xf32>
    tpu.vector_store %arg9[%c253_220, %c0_221], %333 {strides = array<i32>} : memref<332x128xf32, #tpu.memory_space<vmem>>, vector<16x128xf32>,
    %335 = vector.extract_strided_slice %333 {offsets = [1, 0], sizes = [1, 128], strides = [1, 1]} : vector<16x128xf32> to vector<1x128xf32>
    %c252_222 = arith.constant 252 : index
    %c0_223 = arith.constant 0 : index
    %336 = vector.load %arg9[%c252_222, %c0_223] : memref<332x128xf32, #tpu.memory_space<vmem>>, vector<1x128xf32>
    tpu.vector_store %arg9[%c252_222, %c0_223], %335 {strides = array<i32>} : memref<332x128xf32, #tpu.memory_space<vmem>>, vector<1x128xf32>,
    %337 = vector.extract_strided_slice %333 {offsets = [14, 0], sizes = [1, 128], strides = [1, 1]} : vector<16x128xf32> to vector<1x128xf32>
    %c269_224 = arith.constant 269 : index
    %c0_225 = arith.constant 0 : index
    %338 = vector.load %arg9[%c269_224, %c0_225] : memref<332x128xf32, #tpu.memory_space<vmem>>, vector<1x128xf32>
    tpu.vector_store %arg9[%c269_224, %c0_225], %337 {strides = array<i32>} : memref<332x128xf32, #tpu.memory_space<vmem>>, vector<1x128xf32>,
    %339 = vector.extract_strided_slice %146 {offsets = [252, 0], sizes = [16, 128], strides = [1, 1]} : vector<288x128xf32> to vector<16x128xf32>
    %340 = vector.broadcast %161 : vector<1x128xf32> to vector<16x128xf32>
    %341 = arith.subf %339, %340 : vector<16x128xf32>
    %342 = vector.broadcast %170 : vector<1x128xf32> to vector<16x128xf32>
    %343 = arith.mulf %341, %342 : vector<16x128xf32>
    %cst_226 = arith.constant 0.000000e+00 : f32
    %344 = vector.broadcast %cst_226 : f32 to vector<16x128xf32>
    %345 = arith.maximumf %343, %344 : vector<16x128xf32>
    %c271_227 = arith.constant 271 : index
    %c0_228 = arith.constant 0 : index
    %346 = vector.load %arg9[%c271_227, %c0_228] : memref<332x128xf32, #tpu.memory_space<vmem>>, vector<16x128xf32>
    tpu.vector_store %arg9[%c271_227, %c0_228], %345 {strides = array<i32>} : memref<332x128xf32, #tpu.memory_space<vmem>>, vector<16x128xf32>,
    %347 = vector.extract_strided_slice %345 {offsets = [1, 0], sizes = [1, 128], strides = [1, 1]} : vector<16x128xf32> to vector<1x128xf32>
    %c270_229 = arith.constant 270 : index
    %c0_230 = arith.constant 0 : index
    %348 = vector.load %arg9[%c270_229, %c0_230] : memref<332x128xf32, #tpu.memory_space<vmem>>, vector<1x128xf32>
    tpu.vector_store %arg9[%c270_229, %c0_230], %347 {strides = array<i32>} : memref<332x128xf32, #tpu.memory_space<vmem>>, vector<1x128xf32>,
    %349 = vector.extract_strided_slice %345 {offsets = [14, 0], sizes = [1, 128], strides = [1, 1]} : vector<16x128xf32> to vector<1x128xf32>
    %c287_231 = arith.constant 287 : index
    %c0_232 = arith.constant 0 : index
    %350 = vector.load %arg9[%c287_231, %c0_232] : memref<332x128xf32, #tpu.memory_space<vmem>>, vector<1x128xf32>
    tpu.vector_store %arg9[%c287_231, %c0_232], %349 {strides = array<i32>} : memref<332x128xf32, #tpu.memory_space<vmem>>, vector<1x128xf32>,
    %351 = vector.extract_strided_slice %146 {offsets = [270, 0], sizes = [16, 128], strides = [1, 1]} : vector<288x128xf32> to vector<16x128xf32>
    %352 = vector.broadcast %161 : vector<1x128xf32> to vector<16x128xf32>
    %353 = arith.subf %351, %352 : vector<16x128xf32>
    %354 = vector.broadcast %170 : vector<1x128xf32> to vector<16x128xf32>
    %355 = arith.mulf %353, %354 : vector<16x128xf32>
    %cst_233 = arith.constant 0.000000e+00 : f32
    %356 = vector.broadcast %cst_233 : f32 to vector<16x128xf32>
    %357 = arith.maximumf %355, %356 : vector<16x128xf32>
    %c289_234 = arith.constant 289 : index
    %c0_235 = arith.constant 0 : index
    %358 = vector.load %arg9[%c289_234, %c0_235] : memref<332x128xf32, #tpu.memory_space<vmem>>, vector<16x128xf32>
    tpu.vector_store %arg9[%c289_234, %c0_235], %357 {strides = array<i32>} : memref<332x128xf32, #tpu.memory_space<vmem>>, vector<16x128xf32>,
    %359 = vector.extract_strided_slice %357 {offsets = [1, 0], sizes = [1, 128], strides = [1, 1]} : vector<16x128xf32> to vector<1x128xf32>
    %c288_236 = arith.constant 288 : index
    %c0_237 = arith.constant 0 : index
    %360 = vector.load %arg9[%c288_236, %c0_237] : memref<332x128xf32, #tpu.memory_space<vmem>>, vector<1x128xf32>
    tpu.vector_store %arg9[%c288_236, %c0_237], %359 {strides = array<i32>} : memref<332x128xf32, #tpu.memory_space<vmem>>, vector<1x128xf32>,
    %361 = vector.extract_strided_slice %357 {offsets = [14, 0], sizes = [1, 128], strides = [1, 1]} : vector<16x128xf32> to vector<1x128xf32>
    %c305_238 = arith.constant 305 : index
    %c0_239 = arith.constant 0 : index
    %362 = vector.load %arg9[%c305_238, %c0_239] : memref<332x128xf32, #tpu.memory_space<vmem>>, vector<1x128xf32>
    tpu.vector_store %arg9[%c305_238, %c0_239], %361 {strides = array<i32>} : memref<332x128xf32, #tpu.memory_space<vmem>>, vector<1x128xf32>,
    %c36_240 = arith.constant 36 : index
    %c0_241 = arith.constant 0 : index
    %363 = vector.load %arg9[%c36_240, %c0_241] : memref<332x128xf32, #tpu.memory_space<vmem>>, vector<18x128xf32>
    %c0_242 = arith.constant 0 : index
    %c0_243 = arith.constant 0 : index
    %364 = vector.load %arg9[%c0_242, %c0_243] : memref<332x128xf32, #tpu.memory_space<vmem>>, vector<18x128xf32>
    tpu.vector_store %arg9[%c0_242, %c0_243], %363 {strides = array<i32>} : memref<332x128xf32, #tpu.memory_space<vmem>>, vector<18x128xf32>,
    %c270_244 = arith.constant 270 : index
    %c0_245 = arith.constant 0 : index
    %365 = vector.load %arg9[%c270_244, %c0_245] : memref<332x128xf32, #tpu.memory_space<vmem>>, vector<18x128xf32>
    %c306_246 = arith.constant 306 : index
    %c0_247 = arith.constant 0 : index
    %366 = vector.load %arg9[%c306_246, %c0_247] : memref<332x128xf32, #tpu.memory_space<vmem>>, vector<18x128xf32>
    tpu.vector_store %arg9[%c306_246, %c0_247], %365 {strides = array<i32>} : memref<332x128xf32, #tpu.memory_space<vmem>>, vector<18x128xf32>,
    %cst_248 = arith.constant 0.000000e+00 : f32
    %367 = vector.broadcast %cst_248 : f32 to vector<8x128xf32>
    %c324_249 = arith.constant 324 : index
    %c0_250 = arith.constant 0 : index
    %368 = vector.load %arg9[%c324_249, %c0_250] : memref<332x128xf32, #tpu.memory_space<vmem>>, vector<8x128xf32>
    tpu.vector_store %arg9[%c324_249, %c0_250], %367 {strides = array<i32>} : memref<332x128xf32, #tpu.memory_space<vmem>>, vector<8x128xf32>,
    %c0_251 = arith.constant 0 : index
    %c0_252 = arith.constant 0 : index
    %369 = vector.load %arg9[%c0_251, %c0_252] : memref<332x128xf32, #tpu.memory_space<vmem>>, vector<288x128xf32>
    %c18_253 = arith.constant 18 : index
    %c0_254 = arith.constant 0 : index
    %370 = vector.load %arg9[%c18_253, %c0_254] : memref<332x128xf32, #tpu.memory_space<vmem>>, vector<288x128xf32>
    %c36_255 = arith.constant 36 : index
    %c0_256 = arith.constant 0 : index
    %371 = vector.load %arg9[%c36_255, %c0_256] : memref<332x128xf32, #tpu.memory_space<vmem>>, vector<288x128xf32>
    %372 = tpu.concatenate %369, %370, %371 in 1 : vector<288x128xf32>, vector<288x128xf32>, vector<288x128xf32> -> vector<288x384xf32>
    %c0_257 = arith.constant 0 : index
    %c0_258 = arith.constant 0 : index
    %c0_259 = arith.constant 0 : index
    %373 = vector.load %arg3[%c0_257, %c0_258, %c0_259] : memref<3x384x128xf32, #tpu.memory_space<vmem>>, vector<1x384x128xf32>
    %374 = vector.shape_cast %373 : vector<1x384x128xf32> to vector<384x128xf32>
    %cst_260 = arith.constant dense<0.000000e+00> : vector<288x128xf32>
    %375 = tpu.matmul %372, %374, %cst_260 {dimension_numbers = #tpu.dot_dimension_numbers<[1], [0], [0], [1], [0, 0, 1, 1], [], []>} : vector<288x384xf32>, vector<384x128xf32>, vector<288x128xf32> -> vector<288x128xf32>
    %c1_261 = arith.constant 1 : index
    %c0_262 = arith.constant 0 : index
    %376 = vector.load %arg9[%c1_261, %c0_262] : memref<332x128xf32, #tpu.memory_space<vmem>>, vector<288x128xf32>
    %c19_263 = arith.constant 19 : index
    %c0_264 = arith.constant 0 : index
    %377 = vector.load %arg9[%c19_263, %c0_264] : memref<332x128xf32, #tpu.memory_space<vmem>>, vector<288x128xf32>
    %c37_265 = arith.constant 37 : index
    %c0_266 = arith.constant 0 : index
    %378 = vector.load %arg9[%c37_265, %c0_266] : memref<332x128xf32, #tpu.memory_space<vmem>>, vector<288x128xf32>
    %379 = tpu.concatenate %376, %377, %378 in 1 : vector<288x128xf32>, vector<288x128xf32>, vector<288x128xf32> -> vector<288x384xf32>
    %c1_267 = arith.constant 1 : index
    %c0_268 = arith.constant 0 : index
    %c0_269 = arith.constant 0 : index
    %380 = vector.load %arg3[%c1_267, %c0_268, %c0_269] : memref<3x384x128xf32, #tpu.memory_space<vmem>>, vector<1x384x128xf32>
    %381 = vector.shape_cast %380 : vector<1x384x128xf32> to vector<384x128xf32>
    %cst_270 = arith.constant dense<0.000000e+00> : vector<288x128xf32>
    %382 = tpu.matmul %379, %381, %cst_270 {dimension_numbers = #tpu.dot_dimension_numbers<[1], [0], [0], [1], [0, 0, 1, 1], [], []>} : vector<288x384xf32>, vector<384x128xf32>, vector<288x128xf32> -> vector<288x128xf32>
    %383 = arith.addf %375, %382 : vector<288x128xf32>
    %c2_271 = arith.constant 2 : index
    %c0_272 = arith.constant 0 : index
    %384 = vector.load %arg9[%c2_271, %c0_272] : memref<332x128xf32, #tpu.memory_space<vmem>>, vector<288x128xf32>
    %c20_273 = arith.constant 20 : index
    %c0_274 = arith.constant 0 : index
    %385 = vector.load %arg9[%c20_273, %c0_274] : memref<332x128xf32, #tpu.memory_space<vmem>>, vector<288x128xf32>
    %c38_275 = arith.constant 38 : index
    %c0_276 = arith.constant 0 : index
    %386 = vector.load %arg9[%c38_275, %c0_276] : memref<332x128xf32, #tpu.memory_space<vmem>>, vector<288x128xf32>
    %387 = tpu.concatenate %384, %385, %386 in 1 : vector<288x128xf32>, vector<288x128xf32>, vector<288x128xf32> -> vector<288x384xf32>
    %c2_277 = arith.constant 2 : index
    %c0_278 = arith.constant 0 : index
    %c0_279 = arith.constant 0 : index
    %388 = vector.load %arg3[%c2_277, %c0_278, %c0_279] : memref<3x384x128xf32, #tpu.memory_space<vmem>>, vector<1x384x128xf32>
    %389 = vector.shape_cast %388 : vector<1x384x128xf32> to vector<384x128xf32>
    %cst_280 = arith.constant dense<0.000000e+00> : vector<288x128xf32>
    %390 = tpu.matmul %387, %389, %cst_280 {dimension_numbers = #tpu.dot_dimension_numbers<[1], [0], [0], [1], [0, 0, 1, 1], [], []>} : vector<288x384xf32>, vector<384x128xf32>, vector<288x128xf32> -> vector<288x128xf32>
    %391 = arith.addf %383, %390 : vector<288x128xf32>
    %c0_281 = arith.constant 0 : index
    %c0_282 = arith.constant 0 : index
    %392 = vector.load %arg4[%c0_281, %c0_282] : memref<1x128xf32, #tpu.memory_space<vmem>>, vector<1x128xf32>
    %393 = vector.broadcast %392 : vector<1x128xf32> to vector<288x128xf32>
    %394 = arith.addf %391, %393 : vector<288x128xf32>
    %cst_283 = arith.constant 0.000000e+00 : f32
    %395 = vector.shape_cast %2 : vector<288x1xi1> to vector<288x1xi1>
    %396 = vector.broadcast %395 : vector<288x1xi1> to vector<288x128xi1>
    %397 = vector.broadcast %cst_283 : f32 to vector<288x128xf32>
    %398 = arith.select %396, %394, %397 : vector<288x128xi1>, vector<288x128xf32>
    %cst_284 = arith.constant dense<0.000000e+00> : vector<128xf32>
    %399 = vector.multi_reduction <add>, %398, %cst_284 [0] : vector<288x128xf32> to vector<128xf32>
    %400 = vector.shape_cast %399 : vector<128xf32> to vector<1x128xf32>
    %401 = arith.mulf %394, %394 : vector<288x128xf32>
    %cst_285 = arith.constant 0.000000e+00 : f32
    %402 = vector.shape_cast %2 : vector<288x1xi1> to vector<288x1xi1>
    %403 = vector.broadcast %402 : vector<288x1xi1> to vector<288x128xi1>
    %404 = vector.broadcast %cst_285 : f32 to vector<288x128xf32>
    %405 = arith.select %403, %401, %404 : vector<288x128xi1>, vector<288x128xf32>
    %cst_286 = arith.constant dense<0.000000e+00> : vector<128xf32>
    %406 = vector.multi_reduction <add>, %405, %cst_286 [0] : vector<288x128xf32> to vector<128xf32>
    %407 = vector.shape_cast %406 : vector<128xf32> to vector<1x128xf32>
    %cst_287 = arith.constant 3.906250e-03 : f32
    %408 = vector.broadcast %cst_287 : f32 to vector<1x128xf32>
    %409 = arith.mulf %400, %408 : vector<1x128xf32>
    %cst_288 = arith.constant 3.906250e-03 : f32
    %410 = vector.broadcast %cst_288 : f32 to vector<1x128xf32>
    %411 = arith.mulf %407, %410 : vector<1x128xf32>
    %412 = arith.mulf %409, %409 : vector<1x128xf32>
    %413 = arith.subf %411, %412 : vector<1x128xf32>
    %cst_289 = arith.constant 0.000000e+00 : f32
    %414 = vector.broadcast %cst_289 : f32 to vector<1x128xf32>
    %415 = arith.maximumf %413, %414 : vector<1x128xf32>
    %cst_290 = arith.constant 9.99999974E-6 : f32
    %416 = vector.broadcast %cst_290 : f32 to vector<1x128xf32>
    %417 = arith.addf %415, %416 : vector<1x128xf32>
    %418 = math.rsqrt %417 : vector<1x128xf32>
    %419 = vector.extract_strided_slice %394 {offsets = [0, 0], sizes = [16, 128], strides = [1, 1]} : vector<288x128xf32> to vector<16x128xf32>
    %420 = vector.broadcast %409 : vector<1x128xf32> to vector<16x128xf32>
    %421 = arith.subf %419, %420 : vector<16x128xf32>
    %422 = vector.broadcast %418 : vector<1x128xf32> to vector<16x128xf32>
    %423 = arith.mulf %421, %422 : vector<16x128xf32>
    %c0_291 = arith.constant 0 : index
    %c0_292 = arith.constant 0 : index
    %c0_293 = arith.constant 0 : index
    %424 = vector.load %arg6[%c0_291, %c0_292, %c0_293] : memref<1x256x128xf32, #tpu.memory_space<vmem>>, vector<1x16x128xf32>
    %425 = vector.shape_cast %424 : vector<1x16x128xf32> to vector<16x128xf32>
    %426 = arith.addf %425, %423 : vector<16x128xf32>
    %c0_294 = arith.constant 0 : index
    %c0_295 = arith.constant 0 : index
    %c0_296 = arith.constant 0 : index
    %427 = vector.load %arg7[%c0_294, %c0_295, %c0_296] : memref<1x256x128xf32, #tpu.memory_space<vmem>>, vector<1x16x128xf32>
    %428 = vector.shape_cast %427 : vector<1x16x128xf32> to vector<16x128xf32>
    %429 = vector.shape_cast %426 : vector<16x128xf32> to vector<1x16x128xf32>
    tpu.vector_store %arg7[%c0_294, %c0_295, %c0_296], %429 {strides = array<i32>} : memref<1x256x128xf32, #tpu.memory_space<vmem>>, vector<1x16x128xf32>,
    %430 = vector.extract_strided_slice %394 {offsets = [18, 0], sizes = [16, 128], strides = [1, 1]} : vector<288x128xf32> to vector<16x128xf32>
    %431 = vector.broadcast %409 : vector<1x128xf32> to vector<16x128xf32>
    %432 = arith.subf %430, %431 : vector<16x128xf32>
    %433 = vector.broadcast %418 : vector<1x128xf32> to vector<16x128xf32>
    %434 = arith.mulf %432, %433 : vector<16x128xf32>
    %c0_297 = arith.constant 0 : index
    %c16_298 = arith.constant 16 : index
    %c0_299 = arith.constant 0 : index
    %435 = vector.load %arg6[%c0_297, %c16_298, %c0_299] : memref<1x256x128xf32, #tpu.memory_space<vmem>>, vector<1x16x128xf32>
    %436 = vector.shape_cast %435 : vector<1x16x128xf32> to vector<16x128xf32>
    %437 = arith.addf %436, %434 : vector<16x128xf32>
    %c0_300 = arith.constant 0 : index
    %c16_301 = arith.constant 16 : index
    %c0_302 = arith.constant 0 : index
    %438 = vector.load %arg7[%c0_300, %c16_301, %c0_302] : memref<1x256x128xf32, #tpu.memory_space<vmem>>, vector<1x16x128xf32>
    %439 = vector.shape_cast %438 : vector<1x16x128xf32> to vector<16x128xf32>
    %440 = vector.shape_cast %437 : vector<16x128xf32> to vector<1x16x128xf32>
    tpu.vector_store %arg7[%c0_300, %c16_301, %c0_302], %440 {strides = array<i32>} : memref<1x256x128xf32, #tpu.memory_space<vmem>>, vector<1x16x128xf32>,
    %441 = vector.extract_strided_slice %394 {offsets = [36, 0], sizes = [16, 128], strides = [1, 1]} : vector<288x128xf32> to vector<16x128xf32>
    %442 = vector.broadcast %409 : vector<1x128xf32> to vector<16x128xf32>
    %443 = arith.subf %441, %442 : vector<16x128xf32>
    %444 = vector.broadcast %418 : vector<1x128xf32> to vector<16x128xf32>
    %445 = arith.mulf %443, %444 : vector<16x128xf32>
    %c0_303 = arith.constant 0 : index
    %c32_304 = arith.constant 32 : index
    %c0_305 = arith.constant 0 : index
    %446 = vector.load %arg6[%c0_303, %c32_304, %c0_305] : memref<1x256x128xf32, #tpu.memory_space<vmem>>, vector<1x16x128xf32>
    %447 = vector.shape_cast %446 : vector<1x16x128xf32> to vector<16x128xf32>
    %448 = arith.addf %447, %445 : vector<16x128xf32>
    %c0_306 = arith.constant 0 : index
    %c32_307 = arith.constant 32 : index
    %c0_308 = arith.constant 0 : index
    %449 = vector.load %arg7[%c0_306, %c32_307, %c0_308] : memref<1x256x128xf32, #tpu.memory_space<vmem>>, vector<1x16x128xf32>
    %450 = vector.shape_cast %449 : vector<1x16x128xf32> to vector<16x128xf32>
    %451 = vector.shape_cast %448 : vector<16x128xf32> to vector<1x16x128xf32>
    tpu.vector_store %arg7[%c0_306, %c32_307, %c0_308], %451 {strides = array<i32>} : memref<1x256x128xf32, #tpu.memory_space<vmem>>, vector<1x16x128xf32>,
    %452 = vector.extract_strided_slice %394 {offsets = [54, 0], sizes = [16, 128], strides = [1, 1]} : vector<288x128xf32> to vector<16x128xf32>
    %453 = vector.broadcast %409 : vector<1x128xf32> to vector<16x128xf32>
    %454 = arith.subf %452, %453 : vector<16x128xf32>
    %455 = vector.broadcast %418 : vector<1x128xf32> to vector<16x128xf32>
    %456 = arith.mulf %454, %455 : vector<16x128xf32>
    %c0_309 = arith.constant 0 : index
    %c48_310 = arith.constant 48 : index
    %c0_311 = arith.constant 0 : index
    %457 = vector.load %arg6[%c0_309, %c48_310, %c0_311] : memref<1x256x128xf32, #tpu.memory_space<vmem>>, vector<1x16x128xf32>
    %458 = vector.shape_cast %457 : vector<1x16x128xf32> to vector<16x128xf32>
    %459 = arith.addf %458, %456 : vector<16x128xf32>
    %c0_312 = arith.constant 0 : index
    %c48_313 = arith.constant 48 : index
    %c0_314 = arith.constant 0 : index
    %460 = vector.load %arg7[%c0_312, %c48_313, %c0_314] : memref<1x256x128xf32, #tpu.memory_space<vmem>>, vector<1x16x128xf32>
    %461 = vector.shape_cast %460 : vector<1x16x128xf32> to vector<16x128xf32>
    %462 = vector.shape_cast %459 : vector<16x128xf32> to vector<1x16x128xf32>
    tpu.vector_store %arg7[%c0_312, %c48_313, %c0_314], %462 {strides = array<i32>} : memref<1x256x128xf32, #tpu.memory_space<vmem>>, vector<1x16x128xf32>,
    %463 = vector.extract_strided_slice %394 {offsets = [72, 0], sizes = [16, 128], strides = [1, 1]} : vector<288x128xf32> to vector<16x128xf32>
    %464 = vector.broadcast %409 : vector<1x128xf32> to vector<16x128xf32>
    %465 = arith.subf %463, %464 : vector<16x128xf32>
    %466 = vector.broadcast %418 : vector<1x128xf32> to vector<16x128xf32>
    %467 = arith.mulf %465, %466 : vector<16x128xf32>
    %c0_315 = arith.constant 0 : index
    %c64_316 = arith.constant 64 : index
    %c0_317 = arith.constant 0 : index
    %468 = vector.load %arg6[%c0_315, %c64_316, %c0_317] : memref<1x256x128xf32, #tpu.memory_space<vmem>>, vector<1x16x128xf32>
    %469 = vector.shape_cast %468 : vector<1x16x128xf32> to vector<16x128xf32>
    %470 = arith.addf %469, %467 : vector<16x128xf32>
    %c0_318 = arith.constant 0 : index
    %c64_319 = arith.constant 64 : index
    %c0_320 = arith.constant 0 : index
    %471 = vector.load %arg7[%c0_318, %c64_319, %c0_320] : memref<1x256x128xf32, #tpu.memory_space<vmem>>, vector<1x16x128xf32>
    %472 = vector.shape_cast %471 : vector<1x16x128xf32> to vector<16x128xf32>
    %473 = vector.shape_cast %470 : vector<16x128xf32> to vector<1x16x128xf32>
    tpu.vector_store %arg7[%c0_318, %c64_319, %c0_320], %473 {strides = array<i32>} : memref<1x256x128xf32, #tpu.memory_space<vmem>>, vector<1x16x128xf32>,
    %474 = vector.extract_strided_slice %394 {offsets = [90, 0], sizes = [16, 128], strides = [1, 1]} : vector<288x128xf32> to vector<16x128xf32>
    %475 = vector.broadcast %409 : vector<1x128xf32> to vector<16x128xf32>
    %476 = arith.subf %474, %475 : vector<16x128xf32>
    %477 = vector.broadcast %418 : vector<1x128xf32> to vector<16x128xf32>
    %478 = arith.mulf %476, %477 : vector<16x128xf32>
    %c0_321 = arith.constant 0 : index
    %c80_322 = arith.constant 80 : index
    %c0_323 = arith.constant 0 : index
    %479 = vector.load %arg6[%c0_321, %c80_322, %c0_323] : memref<1x256x128xf32, #tpu.memory_space<vmem>>, vector<1x16x128xf32>
    %480 = vector.shape_cast %479 : vector<1x16x128xf32> to vector<16x128xf32>
    %481 = arith.addf %480, %478 : vector<16x128xf32>
    %c0_324 = arith.constant 0 : index
    %c80_325 = arith.constant 80 : index
    %c0_326 = arith.constant 0 : index
    %482 = vector.load %arg7[%c0_324, %c80_325, %c0_326] : memref<1x256x128xf32, #tpu.memory_space<vmem>>, vector<1x16x128xf32>
    %483 = vector.shape_cast %482 : vector<1x16x128xf32> to vector<16x128xf32>
    %484 = vector.shape_cast %481 : vector<16x128xf32> to vector<1x16x128xf32>
    tpu.vector_store %arg7[%c0_324, %c80_325, %c0_326], %484 {strides = array<i32>} : memref<1x256x128xf32, #tpu.memory_space<vmem>>, vector<1x16x128xf32>,
    %485 = vector.extract_strided_slice %394 {offsets = [108, 0], sizes = [16, 128], strides = [1, 1]} : vector<288x128xf32> to vector<16x128xf32>
    %486 = vector.broadcast %409 : vector<1x128xf32> to vector<16x128xf32>
    %487 = arith.subf %485, %486 : vector<16x128xf32>
    %488 = vector.broadcast %418 : vector<1x128xf32> to vector<16x128xf32>
    %489 = arith.mulf %487, %488 : vector<16x128xf32>
    %c0_327 = arith.constant 0 : index
    %c96_328 = arith.constant 96 : index
    %c0_329 = arith.constant 0 : index
    %490 = vector.load %arg6[%c0_327, %c96_328, %c0_329] : memref<1x256x128xf32, #tpu.memory_space<vmem>>, vector<1x16x128xf32>
    %491 = vector.shape_cast %490 : vector<1x16x128xf32> to vector<16x128xf32>
    %492 = arith.addf %491, %489 : vector<16x128xf32>
    %c0_330 = arith.constant 0 : index
    %c96_331 = arith.constant 96 : index
    %c0_332 = arith.constant 0 : index
    %493 = vector.load %arg7[%c0_330, %c96_331, %c0_332] : memref<1x256x128xf32, #tpu.memory_space<vmem>>, vector<1x16x128xf32>
    %494 = vector.shape_cast %493 : vector<1x16x128xf32> to vector<16x128xf32>
    %495 = vector.shape_cast %492 : vector<16x128xf32> to vector<1x16x128xf32>
    tpu.vector_store %arg7[%c0_330, %c96_331, %c0_332], %495 {strides = array<i32>} : memref<1x256x128xf32, #tpu.memory_space<vmem>>, vector<1x16x128xf32>,
    %496 = vector.extract_strided_slice %394 {offsets = [126, 0], sizes = [16, 128], strides = [1, 1]} : vector<288x128xf32> to vector<16x128xf32>
    %497 = vector.broadcast %409 : vector<1x128xf32> to vector<16x128xf32>
    %498 = arith.subf %496, %497 : vector<16x128xf32>
    %499 = vector.broadcast %418 : vector<1x128xf32> to vector<16x128xf32>
    %500 = arith.mulf %498, %499 : vector<16x128xf32>
    %c0_333 = arith.constant 0 : index
    %c112_334 = arith.constant 112 : index
    %c0_335 = arith.constant 0 : index
    %501 = vector.load %arg6[%c0_333, %c112_334, %c0_335] : memref<1x256x128xf32, #tpu.memory_space<vmem>>, vector<1x16x128xf32>
    %502 = vector.shape_cast %501 : vector<1x16x128xf32> to vector<16x128xf32>
    %503 = arith.addf %502, %500 : vector<16x128xf32>
    %c0_336 = arith.constant 0 : index
    %c112_337 = arith.constant 112 : index
    %c0_338 = arith.constant 0 : index
    %504 = vector.load %arg7[%c0_336, %c112_337, %c0_338] : memref<1x256x128xf32, #tpu.memory_space<vmem>>, vector<1x16x128xf32>
    %505 = vector.shape_cast %504 : vector<1x16x128xf32> to vector<16x128xf32>
    %506 = vector.shape_cast %503 : vector<16x128xf32> to vector<1x16x128xf32>
    tpu.vector_store %arg7[%c0_336, %c112_337, %c0_338], %506 {strides = array<i32>} : memref<1x256x128xf32, #tpu.memory_space<vmem>>, vector<1x16x128xf32>,
    %507 = vector.extract_strided_slice %394 {offsets = [144, 0], sizes = [16, 128], strides = [1, 1]} : vector<288x128xf32> to vector<16x128xf32>
    %508 = vector.broadcast %409 : vector<1x128xf32> to vector<16x128xf32>
    %509 = arith.subf %507, %508 : vector<16x128xf32>
    %510 = vector.broadcast %418 : vector<1x128xf32> to vector<16x128xf32>
    %511 = arith.mulf %509, %510 : vector<16x128xf32>
    %c0_339 = arith.constant 0 : index
    %c128_340 = arith.constant 128 : index
    %c0_341 = arith.constant 0 : index
    %512 = vector.load %arg6[%c0_339, %c128_340, %c0_341] : memref<1x256x128xf32, #tpu.memory_space<vmem>>, vector<1x16x128xf32>
    %513 = vector.shape_cast %512 : vector<1x16x128xf32> to vector<16x128xf32>
    %514 = arith.addf %513, %511 : vector<16x128xf32>
    %c0_342 = arith.constant 0 : index
    %c128_343 = arith.constant 128 : index
    %c0_344 = arith.constant 0 : index
    %515 = vector.load %arg7[%c0_342, %c128_343, %c0_344] : memref<1x256x128xf32, #tpu.memory_space<vmem>>, vector<1x16x128xf32>
    %516 = vector.shape_cast %515 : vector<1x16x128xf32> to vector<16x128xf32>
    %517 = vector.shape_cast %514 : vector<16x128xf32> to vector<1x16x128xf32>
    tpu.vector_store %arg7[%c0_342, %c128_343, %c0_344], %517 {strides = array<i32>} : memref<1x256x128xf32, #tpu.memory_space<vmem>>, vector<1x16x128xf32>,
    %518 = vector.extract_strided_slice %394 {offsets = [162, 0], sizes = [16, 128], strides = [1, 1]} : vector<288x128xf32> to vector<16x128xf32>
    %519 = vector.broadcast %409 : vector<1x128xf32> to vector<16x128xf32>
    %520 = arith.subf %518, %519 : vector<16x128xf32>
    %521 = vector.broadcast %418 : vector<1x128xf32> to vector<16x128xf32>
    %522 = arith.mulf %520, %521 : vector<16x128xf32>
    %c0_345 = arith.constant 0 : index
    %c144_346 = arith.constant 144 : index
    %c0_347 = arith.constant 0 : index
    %523 = vector.load %arg6[%c0_345, %c144_346, %c0_347] : memref<1x256x128xf32, #tpu.memory_space<vmem>>, vector<1x16x128xf32>
    %524 = vector.shape_cast %523 : vector<1x16x128xf32> to vector<16x128xf32>
    %525 = arith.addf %524, %522 : vector<16x128xf32>
    %c0_348 = arith.constant 0 : index
    %c144_349 = arith.constant 144 : index
    %c0_350 = arith.constant 0 : index
    %526 = vector.load %arg7[%c0_348, %c144_349, %c0_350] : memref<1x256x128xf32, #tpu.memory_space<vmem>>, vector<1x16x128xf32>
    %527 = vector.shape_cast %526 : vector<1x16x128xf32> to vector<16x128xf32>
    %528 = vector.shape_cast %525 : vector<16x128xf32> to vector<1x16x128xf32>
    tpu.vector_store %arg7[%c0_348, %c144_349, %c0_350], %528 {strides = array<i32>} : memref<1x256x128xf32, #tpu.memory_space<vmem>>, vector<1x16x128xf32>,
    %529 = vector.extract_strided_slice %394 {offsets = [180, 0], sizes = [16, 128], strides = [1, 1]} : vector<288x128xf32> to vector<16x128xf32>
    %530 = vector.broadcast %409 : vector<1x128xf32> to vector<16x128xf32>
    %531 = arith.subf %529, %530 : vector<16x128xf32>
    %532 = vector.broadcast %418 : vector<1x128xf32> to vector<16x128xf32>
    %533 = arith.mulf %531, %532 : vector<16x128xf32>
    %c0_351 = arith.constant 0 : index
    %c160_352 = arith.constant 160 : index
    %c0_353 = arith.constant 0 : index
    %534 = vector.load %arg6[%c0_351, %c160_352, %c0_353] : memref<1x256x128xf32, #tpu.memory_space<vmem>>, vector<1x16x128xf32>
    %535 = vector.shape_cast %534 : vector<1x16x128xf32> to vector<16x128xf32>
    %536 = arith.addf %535, %533 : vector<16x128xf32>
    %c0_354 = arith.constant 0 : index
    %c160_355 = arith.constant 160 : index
    %c0_356 = arith.constant 0 : index
    %537 = vector.load %arg7[%c0_354, %c160_355, %c0_356] : memref<1x256x128xf32, #tpu.memory_space<vmem>>, vector<1x16x128xf32>
    %538 = vector.shape_cast %537 : vector<1x16x128xf32> to vector<16x128xf32>
    %539 = vector.shape_cast %536 : vector<16x128xf32> to vector<1x16x128xf32>
    tpu.vector_store %arg7[%c0_354, %c160_355, %c0_356], %539 {strides = array<i32>} : memref<1x256x128xf32, #tpu.memory_space<vmem>>, vector<1x16x128xf32>,
    %540 = vector.extract_strided_slice %394 {offsets = [198, 0], sizes = [16, 128], strides = [1, 1]} : vector<288x128xf32> to vector<16x128xf32>
    %541 = vector.broadcast %409 : vector<1x128xf32> to vector<16x128xf32>
    %542 = arith.subf %540, %541 : vector<16x128xf32>
    %543 = vector.broadcast %418 : vector<1x128xf32> to vector<16x128xf32>
    %544 = arith.mulf %542, %543 : vector<16x128xf32>
    %c0_357 = arith.constant 0 : index
    %c176_358 = arith.constant 176 : index
    %c0_359 = arith.constant 0 : index
    %545 = vector.load %arg6[%c0_357, %c176_358, %c0_359] : memref<1x256x128xf32, #tpu.memory_space<vmem>>, vector<1x16x128xf32>
    %546 = vector.shape_cast %545 : vector<1x16x128xf32> to vector<16x128xf32>
    %547 = arith.addf %546, %544 : vector<16x128xf32>
    %c0_360 = arith.constant 0 : index
    %c176_361 = arith.constant 176 : index
    %c0_362 = arith.constant 0 : index
    %548 = vector.load %arg7[%c0_360, %c176_361, %c0_362] : memref<1x256x128xf32, #tpu.memory_space<vmem>>, vector<1x16x128xf32>
    %549 = vector.shape_cast %548 : vector<1x16x128xf32> to vector<16x128xf32>
    %550 = vector.shape_cast %547 : vector<16x128xf32> to vector<1x16x128xf32>
    tpu.vector_store %arg7[%c0_360, %c176_361, %c0_362], %550 {strides = array<i32>} : memref<1x256x128xf32, #tpu.memory_space<vmem>>, vector<1x16x128xf32>,
    %551 = vector.extract_strided_slice %394 {offsets = [216, 0], sizes = [16, 128], strides = [1, 1]} : vector<288x128xf32> to vector<16x128xf32>
    %552 = vector.broadcast %409 : vector<1x128xf32> to vector<16x128xf32>
    %553 = arith.subf %551, %552 : vector<16x128xf32>
    %554 = vector.broadcast %418 : vector<1x128xf32> to vector<16x128xf32>
    %555 = arith.mulf %553, %554 : vector<16x128xf32>
    %c0_363 = arith.constant 0 : index
    %c192_364 = arith.constant 192 : index
    %c0_365 = arith.constant 0 : index
    %556 = vector.load %arg6[%c0_363, %c192_364, %c0_365] : memref<1x256x128xf32, #tpu.memory_space<vmem>>, vector<1x16x128xf32>
    %557 = vector.shape_cast %556 : vector<1x16x128xf32> to vector<16x128xf32>
    %558 = arith.addf %557, %555 : vector<16x128xf32>
    %c0_366 = arith.constant 0 : index
    %c192_367 = arith.constant 192 : index
    %c0_368 = arith.constant 0 : index
    %559 = vector.load %arg7[%c0_366, %c192_367, %c0_368] : memref<1x256x128xf32, #tpu.memory_space<vmem>>, vector<1x16x128xf32>
    %560 = vector.shape_cast %559 : vector<1x16x128xf32> to vector<16x128xf32>
    %561 = vector.shape_cast %558 : vector<16x128xf32> to vector<1x16x128xf32>
    tpu.vector_store %arg7[%c0_366, %c192_367, %c0_368], %561 {strides = array<i32>} : memref<1x256x128xf32, #tpu.memory_space<vmem>>, vector<1x16x128xf32>,
    %562 = vector.extract_strided_slice %394 {offsets = [234, 0], sizes = [16, 128], strides = [1, 1]} : vector<288x128xf32> to vector<16x128xf32>
    %563 = vector.broadcast %409 : vector<1x128xf32> to vector<16x128xf32>
    %564 = arith.subf %562, %563 : vector<16x128xf32>
    %565 = vector.broadcast %418 : vector<1x128xf32> to vector<16x128xf32>
    %566 = arith.mulf %564, %565 : vector<16x128xf32>
    %c0_369 = arith.constant 0 : index
    %c208_370 = arith.constant 208 : index
    %c0_371 = arith.constant 0 : index
    %567 = vector.load %arg6[%c0_369, %c208_370, %c0_371] : memref<1x256x128xf32, #tpu.memory_space<vmem>>, vector<1x16x128xf32>
    %568 = vector.shape_cast %567 : vector<1x16x128xf32> to vector<16x128xf32>
    %569 = arith.addf %568, %566 : vector<16x128xf32>
    %c0_372 = arith.constant 0 : index
    %c208_373 = arith.constant 208 : index
    %c0_374 = arith.constant 0 : index
    %570 = vector.load %arg7[%c0_372, %c208_373, %c0_374] : memref<1x256x128xf32, #tpu.memory_space<vmem>>, vector<1x16x128xf32>
    %571 = vector.shape_cast %570 : vector<1x16x128xf32> to vector<16x128xf32>
    %572 = vector.shape_cast %569 : vector<16x128xf32> to vector<1x16x128xf32>
    tpu.vector_store %arg7[%c0_372, %c208_373, %c0_374], %572 {strides = array<i32>} : memref<1x256x128xf32, #tpu.memory_space<vmem>>, vector<1x16x128xf32>,
    %573 = vector.extract_strided_slice %394 {offsets = [252, 0], sizes = [16, 128], strides = [1, 1]} : vector<288x128xf32> to vector<16x128xf32>
    %574 = vector.broadcast %409 : vector<1x128xf32> to vector<16x128xf32>
    %575 = arith.subf %573, %574 : vector<16x128xf32>
    %576 = vector.broadcast %418 : vector<1x128xf32> to vector<16x128xf32>
    %577 = arith.mulf %575, %576 : vector<16x128xf32>
    %c0_375 = arith.constant 0 : index
    %c224_376 = arith.constant 224 : index
    %c0_377 = arith.constant 0 : index
    %578 = vector.load %arg6[%c0_375, %c224_376, %c0_377] : memref<1x256x128xf32, #tpu.memory_space<vmem>>, vector<1x16x128xf32>
    %579 = vector.shape_cast %578 : vector<1x16x128xf32> to vector<16x128xf32>
    %580 = arith.addf %579, %577 : vector<16x128xf32>
    %c0_378 = arith.constant 0 : index
    %c224_379 = arith.constant 224 : index
    %c0_380 = arith.constant 0 : index
    %581 = vector.load %arg7[%c0_378, %c224_379, %c0_380] : memref<1x256x128xf32, #tpu.memory_space<vmem>>, vector<1x16x128xf32>
    %582 = vector.shape_cast %581 : vector<1x16x128xf32> to vector<16x128xf32>
    %583 = vector.shape_cast %580 : vector<16x128xf32> to vector<1x16x128xf32>
    tpu.vector_store %arg7[%c0_378, %c224_379, %c0_380], %583 {strides = array<i32>} : memref<1x256x128xf32, #tpu.memory_space<vmem>>, vector<1x16x128xf32>,
    %584 = vector.extract_strided_slice %394 {offsets = [270, 0], sizes = [16, 128], strides = [1, 1]} : vector<288x128xf32> to vector<16x128xf32>
    %585 = vector.broadcast %409 : vector<1x128xf32> to vector<16x128xf32>
    %586 = arith.subf %584, %585 : vector<16x128xf32>
    %587 = vector.broadcast %418 : vector<1x128xf32> to vector<16x128xf32>
    %588 = arith.mulf %586, %587 : vector<16x128xf32>
    %c0_381 = arith.constant 0 : index
    %c240_382 = arith.constant 240 : index
    %c0_383 = arith.constant 0 : index
    %589 = vector.load %arg6[%c0_381, %c240_382, %c0_383] : memref<1x256x128xf32, #tpu.memory_space<vmem>>, vector<1x16x128xf32>
    %590 = vector.shape_cast %589 : vector<1x16x128xf32> to vector<16x128xf32>
    %591 = arith.addf %590, %588 : vector<16x128xf32>
    %c0_384 = arith.constant 0 : index
    %c240_385 = arith.constant 240 : index
    %c0_386 = arith.constant 0 : index
    %592 = vector.load %arg7[%c0_384, %c240_385, %c0_386] : memref<1x256x128xf32, #tpu.memory_space<vmem>>, vector<1x16x128xf32>
    %593 = vector.shape_cast %592 : vector<1x16x128xf32> to vector<16x128xf32>
    %594 = vector.shape_cast %591 : vector<16x128xf32> to vector<1x16x128xf32>
    tpu.vector_store %arg7[%c0_384, %c240_385, %c0_386], %594 {strides = array<i32>} : memref<1x256x128xf32, #tpu.memory_space<vmem>>, vector<1x16x128xf32>,
    return
  }
  func.func @transform_0(%arg0: i32) -> (i32, i32, i32) {
    %c0_i32 = arith.constant 0 : i32
    %c0_i32_0 = arith.constant 0 : i32
    %c0_i32_1 = arith.constant 0 : i32
    %c0_i32_2 = arith.constant 0 : i32
    return %c0_i32, %c0_i32_0, %c0_i32_1 : i32, i32, i32
  }
  func.func @transform_1(%arg0: i32) -> (i32, i32) {
    %c0_i32 = arith.constant 0 : i32
    %c0_i32_0 = arith.constant 0 : i32
    %c0_i32_1 = arith.constant 0 : i32
    return %c0_i32, %c0_i32_0 : i32, i32
  }
  func.func @transform_2(%arg0: i32) -> (i32, i32, i32) {
    %c0_i32 = arith.constant 0 : i32
    %c0_i32_0 = arith.constant 0 : i32
    %c0_i32_1 = arith.constant 0 : i32
    %c0_i32_2 = arith.constant 0 : i32
    return %c0_i32, %c0_i32_0, %c0_i32_1 : i32, i32, i32
  }
  func.func @transform_3(%arg0: i32) -> (i32, i32) {
    %c0_i32 = arith.constant 0 : i32
    %c0_i32_0 = arith.constant 0 : i32
    %c0_i32_1 = arith.constant 0 : i32
    return %c0_i32, %c0_i32_0 : i32, i32
  }
  func.func @transform_4(%arg0: i32) -> (i32, i32) {
    %c0_i32 = arith.constant 0 : i32
    %c0_i32_0 = arith.constant 0 : i32
    %c0_i32_1 = arith.constant 0 : i32
    return %c0_i32, %c0_i32_0 : i32, i32
  }
  func.func @transform_5(%arg0: i32) -> (i32, i32, i32) {
    %c0_i32 = arith.constant 0 : i32
    %c0_i32_0 = arith.constant 0 : i32
    %c0_i32_1 = arith.constant 0 : i32
    return %arg0, %c0_i32, %c0_i32_0 : i32, i32, i32
  }
  func.func @transform_6(%arg0: i32) -> (i32, i32, i32) {
    %c0_i32 = arith.constant 0 : i32
    %c0_i32_0 = arith.constant 0 : i32
    %c0_i32_1 = arith.constant 0 : i32
    return %arg0, %c0_i32, %c0_i32_0 : i32, i32, i32
  }
}

</mosaic_0001>

<bundles_post_ra>
// kernel: residual_block.1
= control target key start
LH: loop header
LB: loop body
LE: loop exit
PB: predicated region body
PF: predicated region fallthrough
CT: control target
= control target key end

     0   :  { %11 = vsyncpa [#allocation5], 0  ;;  %s10884_s0 = inlined_call_operand.hbm [shape: f32[3,384,128], index: 0, kind: input, shape index: {}]   ;;  %s10885_s1 = inlined_call_operand.hbm [shape: f32[1,128], index: 1, kind: input, shape index: {}]   ;;  %s10886_s2 = inlined_call_operand.hbm [shape: f32[3,384,128], index: 2, kind: input, shape index: {}]   ;;  %s10887_s3 = inlined_call_operand.hbm [shape: f32[1,128], index: 3, kind: input, shape index: {}]   ;;  %s10888_s4 = inlined_call_operand.hbm [shape: f32[288,1], index: 4, kind: input, shape index: {}]   ;;  %s10889_s5 = inlined_call_operand.hbm [shape: f32[2,256,128], index: 5, kind: input, shape index: {}]   ;;  %s10890_s6 = inlined_call_operand.hbm [shape: f32[2,256,128], index: 6, kind: output, shape index: {}]  }
   0x1   :  { %12 = vsyncpa [#allocation8], 0 }
   0x2   :  { %13 = vsyncpa [#allocation11], 0 }
   0x3   :  { %14 = vsyncpa [#allocation14], 0 }
   0x4   :  { %16 = vsyncpa [#allocation14 + $0x1], 0 }
   0x5   :  { %17 = vsyncpa [#allocation6], 0 }
   0x6   :  { %19 = vsyncpa [#allocation6 + $0x1], 0  ;;  %s7524_s21 = smov 0   ;;  %s7526_s22 = smov 0  }
   0x7   :  { %s7528_s23 = smov 0   ;;  %s7530_s24 = smov 0  }
   0x8 LB: > { %s7475_s25 = smov [#allocation7]   ;;  %s7545_s27 = sadd.s32 4294967295, %s7473_s24   ;;  %s7473_s24 = sphi %s7530_s24, %s11234_s24   ;;  %s7469_s23 = sphi %s7528_s23, %s11233_s23   ;;  %s7465_s22 = sphi %s7526_s22, %s11232_s22   ;;  %s7461_s21 = sphi %s7524_s21, %s11231_s21  }
   0x9   : > { %s213_s26 = sshll.u32 %s7475_s25, 4  ;;  %p5750_p0 = scmp.ge.s32.totalorder %s7473_s24, 1  ;;  %s7550_s26 = int_to_ptr.vmem [resolvable:$true] %s213_s26 }
   0xa   : > { %p10891_p1 = scmp.eq.s32.totalorder %s7545_s27, 0  ;;  %p187_p2 = scmp.lt.s32.totalorder %s7473_s24, 3 }
   0xb   : > { %s7476_s29 = smov [#allocation10]   ;;  %s7477_s7 = smov [#allocation4]  }
   0xc   : > { %p7552_p3 = pnand %p5750_p0, %p187_p2  ;;  %s237_s30 = sshll.u32 %s7476_s29, 4  ;;  %s7559_s30 = int_to_ptr.vmem [resolvable:$true] %s237_s30 }
   0xd   : > { %s199_s8 = sshll.u32 %s7477_s7, 4  ;;  %s7225_s12 = scalar_lea.hbm %s10885_s1, 16  ;;  %s7567_s8 = int_to_ptr.vmem [resolvable:$true] %s199_s8 }
   0xe   : > { %s11009_s28 = scalar_select %p7552_p3, 1, 0 }
   0xf   : > { %p7109_p5 = pneg %p7552_p3  ;;  %p7226_p7 = scmp.ne.s32.totalorder %s10885_s1, %s7225_s12 }
  0x10   : > { %p7232_p11 = scmp.lt.u32.totalorder %s7225_s12, %s10885_s1 }
  0x11   : > { %p7563_p6 = pnand %p7109_p5, %p10891_p1 }
  0x13   : > { %p7577_p8 = pneg %p7563_p6 }
  0x15   : > { %p7228_p9 = pnand %p7577_p8, %p7226_p7 }
  0x17   : > { %p7229_p10 = pneg %p7228_p9 }
  0x19   : > { %p7234_p12 = pnand %p7232_p11, %p7229_p10 }
  0x1b   : > { %7237 = shalt.err (!%p7234_p12)
}
  0x1c   : > { %s7238_s18 = scalar_lea.vmem %s7550_s26, 16  ;;  %s7245_s19 = scalar_lea.vmem %s7550_s26, 32 }
  0x1d   : > { %p7239_p13 = scmp.ne.s32.totalorder %s7550_s26, %s7238_s18  ;;  %p7246_p5 = scmp.lt.s32.totalorder %s7550_s26, %s7550_s26 }
  0x1e   : > { %p7247_p7 = scmp.lt.s32.totalorder %s7245_s19, %s7238_s18 }
  0x1f   : > { %p7241_p0 = pnand %p7239_p13, %p7577_p8 }
  0x20   : > { %p7248_p9 = por %p7247_p7, %p7246_p5 }
  0x21   : > { %p7242_p2 = pneg %p7241_p0 }
  0x23   : > { %p7249_p4 = pnand %p7248_p9, %p7242_p2 }
  0x25   : > { %7252 = shalt.err (!%p7249_p4)
}
  0x26   : > { %7115 = dma.hbm_to_vmem [thread:$0]  (!%p7563_p6), %s10885_s1, 16, %s7550_s26, [#allocation8]  }
  0x27   : > { %s7253_s10 = scalar_lea.hbm %s10887_s3, 16 }
  0x28   : > { %p7254_p10 = scmp.ne.s32.totalorder %s10887_s3, %s7253_s10  ;;  %p7260_p4 = scmp.lt.u32.totalorder %s7253_s10, %s10887_s3 }
  0x2a   : > { %p7256_p11 = pnand %p7254_p10, %p7577_p8 }
  0x2c   : > { %p7257_p12 = pneg %p7256_p11 }
  0x2e   : > { %p7262_p13 = pnand %p7260_p4, %p7257_p12 }
  0x30   : > { %7265 = shalt.err (!%p7262_p13)
}
  0x31   : > { %s7266_s26 = scalar_lea.vmem %s7559_s30, 16  ;;  %s7273_s16 = scalar_lea.vmem %s7559_s30, 32 }
  0x32   : > { %p7267_p0 = scmp.ne.s32.totalorder %s7559_s30, %s7266_s26  ;;  %p7274_p7 = scmp.lt.s32.totalorder %s7559_s30, %s7559_s30 }
  0x33   : > { %p7275_p9 = scmp.lt.s32.totalorder %s7273_s16, %s7266_s26 }
  0x34   : > { %p7269_p2 = pnand %p7267_p0, %p7577_p8 }
  0x35   : > { %p7276_p10 = por %p7275_p9, %p7274_p7 }
  0x36   : > { %p7270_p5 = pneg %p7269_p2 }
  0x38   : > { %p7277_p11 = pnand %p7276_p10, %p7270_p5 }
  0x3a   : > { %7280 = shalt.err (!%p7277_p11)
}
  0x3b   : > { %7121 = dma.hbm_to_vmem [thread:$0]  (!%p7563_p6), %s10887_s3, 16, %s7559_s30, [#allocation11]  }
  0x3c   : > { %s7281_s25 = scalar_lea.hbm %s10884_s0, 18432 }
  0x3d   : > { %p7282_p12 = scmp.ne.s32.totalorder %s10884_s0, %s7281_s25  ;;  %p7288_p0 = scmp.lt.u32.totalorder %s7281_s25, %s10884_s0 }
  0x3f   : > { %p7284_p4 = pnand %p7282_p12, %p7577_p8 }
  0x41   : > { %p7285_p13 = pneg %p7284_p4 }
  0x43   : > { %p7290_p2 = pnand %p7288_p0, %p7285_p13 }
  0x45   : > { %7293 = shalt.err (!%p7290_p2)
}
  0x46   : > { %s7294_s30 = scalar_lea.vmem %s7567_s8, 18432  ;;  %p7302_p10 = scmp.lt.s32.totalorder %s7567_s8, %s7567_s8 }
  0x47   : > { %p7295_p5 = scmp.ne.s32.totalorder %s7567_s8, %s7294_s30  ;;  %p7303_p11 = scmp.lt.s32.totalorder %s7294_s30, %s7294_s30 }
  0x49   : > { %p7297_p7 = pnand %p7295_p5, %p7577_p8  ;;  %p7304_p12 = por %p7303_p11, %p7302_p10 }
  0x4b   : > { %p7298_p9 = pneg %p7297_p7 }
  0x4d   : > { %p7305_p4 = pnand %p7304_p12, %p7298_p9 }
  0x4f   : > { %7308 = shalt.err (!%p7305_p4)
}
  0x50   : > { %s7478_s12 = smov 128   ;;  %s7479_s13 = smov 8  }
  0x51   : > { %7112 = dma.hbm_to_vmem [thread:$0]  (!%p7563_p6), %s10884_s0, 18432, %s7567_s8, [#allocation5], %s7478_s12, %s7478_s12, %s7479_s13  }
  0x52   : > { %s7480_s16 = smov [#allocation9]   ;;  %s7481_s18 = smov [#allocation12]  }
  0x53   : > { %s223_s17 = sshll.u32 %s7480_s16, 4  ;;  %s247_s19 = sshll.u32 %s7481_s18, 4  ;;  %s224_s17 = int_to_ptr.vmem [resolvable:$true] %s223_s17  ;;  %s248_s19 = int_to_ptr.vmem [resolvable:$true] %s247_s19 }
  0x54   : > { %s7309_s29 = scalar_lea.hbm %s10886_s2, 18432 }
  0x55   : > { %p7310_p13 = scmp.ne.s32.totalorder %s10886_s2, %s7309_s29  ;;  %p7316_p5 = scmp.lt.u32.totalorder %s7309_s29, %s10886_s2 }
  0x57   : > { %p7312_p0 = pnand %p7310_p13, %p7577_p8 }
  0x59   : > { %p7313_p2 = pneg %p7312_p0 }
  0x5b   : > { %p7318_p7 = pnand %p7316_p5, %p7313_p2 }
  0x5d   : > { %7321 = shalt.err (!%p7318_p7)
}
  0x5e   : > { %s7322_s8 = scalar_lea.vmem %s224_s17, 18432  ;;  %p7330_p12 = scmp.lt.s32.totalorder %s224_s17, %s224_s17 }
  0x5f   : > { %p7323_p9 = scmp.ne.s32.totalorder %s224_s17, %s7322_s8  ;;  %p7331_p4 = scmp.lt.s32.totalorder %s7322_s8, %s7322_s8 }
  0x61   : > { %p7325_p10 = pnand %p7323_p9, %p7577_p8  ;;  %p7332_p1 = por %p7331_p4, %p7330_p12 }
  0x63   : > { %p7326_p11 = pneg %p7325_p10 }
  0x65   : > { %p7333_p3 = pnand %p7332_p1, %p7326_p11 }
  0x67   : > { %7336 = shalt.err (!%p7333_p3)
}
  0x68   : > { %7118 = dma.hbm_to_vmem [thread:$0]  (!%p7563_p6), %s10886_s2, 18432, %s224_s17, [#allocation8], %s7478_s12, %s7478_s12, %s7479_s13  }
  0x69   : > { %s7337_s20 = scalar_lea.hbm %s10888_s4, 4608 }
  0x6a   : > { %p7338_p1 = scmp.ne.s32.totalorder %s10888_s4, %s7337_s20  ;;  %p7344_p0 = scmp.lt.u32.totalorder %s7337_s20, %s10888_s4 }
  0x6c   : > { %p7340_p3 = pnand %p7338_p1, %p7577_p8 }
  0x6e   : > { %p7341_p13 = pneg %p7340_p3 }
  0x70   : > { %p7346_p2 = pnand %p7344_p0, %p7341_p13 }
  0x72   : > { %7349 = shalt.err (!%p7346_p2)
}
  0x73   : > { %s7350_s11 = scalar_lea.vmem %s248_s19, 4608  ;;  %p7358_p10 = scmp.lt.s32.totalorder %s248_s19, %s248_s19 }
  0x74   : > { %p7351_p5 = scmp.ne.s32.totalorder %s248_s19, %s7350_s11  ;;  %p7359_p11 = scmp.lt.s32.totalorder %s7350_s11, %s7350_s11 }
  0x76   : > { %p7353_p7 = pnand %p7351_p5, %p7577_p8  ;;  %p7360_p12 = por %p7359_p11, %p7358_p10 }
  0x78   : > { %p7354_p9 = pneg %p7353_p7 }
  0x7a   : > { %p7361_p4 = pnand %p7360_p12, %p7354_p9 }
  0x7c   : > { %7364 = shalt.err (!%p7361_p4)
}
  0x7d   : > { %7124 = dma.hbm_to_vmem [thread:$0]  (!%p7563_p6), %s10888_s4, 4608, %s248_s19, [#allocation11], %s7478_s12, %s7478_s12, %s7479_s13  }
  0x7e   : > { %s5749_s9 = sadd.s32 4294967294, %s7473_s24   ;;  %s7693_s15 = sadd.s32 1, %s7473_s24  }
  0x7f   : > { %s137_s8 = sadd.s32 1, %s7469_s23  ;;  %s134_s14 = ssub.s32 %s7473_s24, %s7693_s15 }
  0x80   : > { %p144_p8 = scmp.ne.s32.totalorder %s7469_s23, %s7465_s22  ;;  %p135_p1 = scmp.eq.s32.totalorder %s134_s14, 0 }
  0x81   : > { %p145_p3 = scmp.eq.s32.totalorder %s7473_s24, 0  ;;  %p150_p13 = scmp.ne.s32.totalorder %s7465_s22, %s7461_s21 }
  0x82   : > { %p174_p0 = scmp.eq.s32.totalorder %s7545_s27, 1  ;;  %p11012_p5 = scmp.eq.s32.totalorder %s7545_s27, 0 }
  0x83   : > { %s7705_s26 = scalar_select %p135_p1, %s7469_s23, %s137_s8  }
  0x84   : > { %p146_p2 = por %p145_p3, %p144_p8  ;;  %p7709_p7 = por %p11012_p5, %p150_p13 }
  0x85   : > { %p7713_p6 = por %p174_p0, %p144_p8  ;;  %p180_p9 = scmp.eq.s32.totalorder %s5749_s9, 1 }
  0x86   : > { %p7138_p10 = scmp.lt.s32.totalorder %s7473_s24, 2  ;;  %s261_s18 = sand.u32 1, %s7469_s23  }
  0x87   : > { %s11014_s19 = scalar_select %p7713_p6, 1, 0 }
  0x88   : > { %p7719_p11 = por %p180_p9, %p150_p13  ;;  %s5757_s25 = sshll.u32 %s261_s18, 8 }
  0x89   : > { %s5775_s29 = sshll.u32 %s7473_s24, 12  ;;  %s265_s17 = scalar_lea.vmem [#allocation13], %s5757_s25 }
  0x8a   : > { %s11015_s20 = scalar_select %p7719_p11, 1, 0 }
  0x8b   : > { %s7727_s11 = scalar_lea.hbm %s10889_s5, %s5775_s29  ;;  %s272_s30 = sshll.u32 %s265_s17, 4  ;;  %s7733_s30 = int_to_ptr.vmem [resolvable:$true] %s272_s30 }
  0x8c   : > { %p7729_p12 = pnand %p7138_p10, %p146_p2  ;;  %s7735_s8 = scalar_lea.sflag [#allocation14], %s261_s18 }
  0x8d   : > { %s7365_s14 = scalar_lea.hbm %s7727_s11, 4096  ;;  %s7370_s7 = scalar_lea.hbm %s10889_s5, 8192 }
  0x8e   : > { %p7366_p4 = scmp.ne.s32.totalorder %s7727_s11, %s7365_s14  ;;  %p7367_p8 = pneg %p7729_p12 }
  0x8f   : > { %p7371_p13 = scmp.lt.u32.totalorder %s7727_s11, %s10889_s5  ;;  %p7372_p0 = scmp.lt.u32.totalorder %s7370_s7, %s7365_s14 }
  0x90   : > { %p7368_p1 = pnand %p7367_p8, %p7366_p4  ;;  %p7374_p5 = scmp.lt.u32.totalorder %s7365_s14, %s7727_s11 }
  0x91   : > { %p7373_p2 = por %p7372_p0, %p7371_p13 }
  0x92   : > { %p7369_p3 = pneg %p7368_p1 }
  0x93   : > { %p7375_p9 = por %p7374_p5, %p7373_p2 }
  0x95   : > { %p7376_p10 = pnand %p7375_p9, %p7369_p3 }
  0x97   : > { %7379 = shalt.err (!%p7376_p10)
}
  0x98   : > { %s7380_s18 = scalar_lea.vmem %s7733_s30, 4096  ;;  %s7482_s25 = smov [#allocation13]  }
  0x99   : > { %p7381_p4 = scmp.ne.s32.totalorder %s7733_s30, %s7380_s18  ;;  %s7385_s29 = sshll.u32 %s7482_s25, 4  ;;  %s7386_s29 = int_to_ptr.vmem [resolvable:$false] %s7385_s29 }
  0x9a   : > { %s7387_s10 = scalar_lea.vmem %s7386_s29, 8192  ;;  %p7388_p6 = scmp.lt.s32.totalorder %s7733_s30, %s7386_s29 }
  0x9b   : > { %p7383_p1 = pnand %p7381_p4, %p7367_p8  ;;  %p7389_p13 = scmp.lt.s32.totalorder %s7387_s10, %s7380_s18 }
  0x9d   : > { %p7384_p11 = pneg %p7383_p1  ;;  %p7390_p0 = por %p7389_p13, %p7388_p6 }
  0x9f   : > { %p7391_p2 = pnand %p7390_p0, %p7384_p11 }
  0xa1   : > { %7394 = shalt.err (!%p7391_p2)
}
  0xa2   : > { %7128 = dma.hbm_to_vmem [thread:$0]  (!%p7729_p12), %s7727_s11, 4096, %s7733_s30, %s7735_s8, %s7478_s12, %s7478_s12, %s7479_s13  }
  0xa3   : > { %p11017_p8 = scmp.ne.s32.totalorder %s11009_s28, 0 }
  0xa5   : > { %284 = sbr.rel (%p11017_p8) target bundleno = 1526 (0x5f6), region = 44 }
  0xac   : > { %p11018_p3 = scmp.eq.s32.totalorder %s7545_s27, 0 }
  0xae   : > { %7440 = dma.done.wait (%p11018_p3), [#allocation5], 18432   ;;  %p11019_p5 = pmov %p11018_p3 }
  0xaf   : > { %p11020_p6 = pmov %p11018_p3 }
  0xb0   : > { %7442 = vsyncadd (%p11019_p5), [#allocation5], 4294948864 }
  0xb1   : > { %7444 = dma.done.wait (%p11020_p6), [#allocation8], 18448   ;;  %p11021_p11 = pmov %p11018_p3 }
  0xb2   : > { %p11022_p9 = pmov %p11018_p3 }
  0xb3   : > { %7446 = vsyncadd (%p11021_p11), [#allocation8], 4294948848 }
  0xb4   : > { %7448 = dma.done.wait (%p11022_p9), [#allocation11], 4624   ;;  %p11023_p12 = pmov %p11018_p3 }
  0xb5   : > { %s7781_s28 = sand.u32 1, %s7465_s22  }
  0xb6   : > { %7450 = vsyncadd (%p11023_p12), [#allocation11], 4294962672  ;;  %s5766_s12 = sshll.u32 %s7781_s28, 8  ;;  %s307_s13 = scalar_lea.sflag [#allocation14], %s7781_s28 }
  0xb7   : > { %s7787_s11 = scalar_lea.vmem [#allocation13], %s5766_s12 }
  0xb8   : > { %7452 = dma.done.wait (%p7709_p7), %s307_s13, 4096  }
  0xb9   : > { %7454 = vsyncadd (%p7709_p7), %s307_s13, 4294963200  ;;  %v10894_v0 = vmov 0.0|0.0   ;;  %v7484_v1 = vmov 0.0   ;;  %v785_v2 = vld [vmem:[#allocation4 + $0x180] sm:$0xff]  ;;  %v786_v3 = vld [vmem:[#allocation4 + $0x188] sm:$0xff]  ;;  %s10658_s16 = scalar_lea.vmem [#allocation15], %s5766_s12 }
  0xba   : > { %6605 = vmatprep.subr.bf16.mxu0 %v10894_v0  ;;  %519 = vst [vmem:[#allocation2 + $0x144] sm:$0xff] %v7484_v1  ;;  %3112 = vst [vmem:[#allocation3 + $0x144] sm:$0xff] %v7484_v1  ;;  %v817_v4 = vld [vmem:[#allocation4 + $0x280] sm:$0xff]  ;;  %v6606_v5 = vpack.c.bf16 %v786_v3, %v785_v2  ;;  %v818_v6 = vld [vmem:[#allocation4 + $0x288] sm:$0xff]  ;;  %s5776_s30 = sshll.u32 %s7545_s27, 12  ;;  %s5626_s9 = sshll.u32 %s10658_s16, 4  ;;  %s10835_s9 = int_to_ptr.vmem [resolvable:$true] %s5626_s9 }
  0xbb   : > { %v787_v7 = vld [vmem:[#allocation4 + $0x190] sm:$0xff]  ;;  %v788_v8 = vld [vmem:[#allocation4 + $0x198] sm:$0xff]  ;;  %v6653_v9 = vpack.c.bf16 %v818_v6, %v817_v4  ;;  %v821_v14 = vld [vmem:[#allocation4 + $0x2a0] sm:$0xff]  ;;  %s10833_s14 = scalar_lea.hbm %s10890_s6, %s5776_s30  ;;  %s5613_s7 = scalar_lea.sflag [#allocation6], %s7781_s28 }
  0xbc   : > { %v819_v10 = vld [vmem:[#allocation4 + $0x290] sm:$0xff]  ;;  %v820_v11 = vld [vmem:[#allocation4 + $0x298] sm:$0xff]  ;;  %6607 = vmatpush1.bf16.msra.mxu0 %v6606_v5  ;;  %v6609_v12 = vpack.c.bf16 %v788_v8, %v787_v7  ;;  %v822_v15 = vld [vmem:[#allocation4 + $0x2a8] sm:$0xff]  ;;  %s7395_s17 = scalar_lea.vmem %s10835_s9, 4096  ;;  %p11228_p10 = scmp.ne.s32.totalorder %s11014_s19, 0 }
  0xbd   : > { %v6657_v13 = vpack.c.bf16 %v820_v11, %v819_v10  ;;  %6654 = vmatprep.subr.bf16.mxu1 %v6653_v9  ;;  %6608 = vmatprep.subr.bf16.mxu0 %v10894_v0  ;;  %v789_v16 = vld [vmem:[#allocation4 + $0x1a0] sm:$0xff]  ;;  %v790_v17 = vld [vmem:[#allocation4 + $0x1a8] sm:$0xff]  ;;  %v6661_v18 = vpack.c.bf16 %v822_v15, %v821_v14  ;;  %v823_v20 = vld [vmem:[#allocation4 + $0x2b0] sm:$0xff]  ;;  %p7396_p7 = scmp.ne.s32.totalorder %s10835_s9, %s7395_s17  ;;  %s7486_s18 = smov [#allocation15]  }
  0xbe   : > { %6656 = vmatpush3.bf16.msra.mxu1 %v6653_v9  ;;  %v6612_v19 = vpack.c.bf16 %v790_v17, %v789_v16  ;;  %v824_v21 = vld [vmem:[#allocation4 + $0x2b8] sm:$0xff]  ;;  %v791_v22 = vld [vmem:[#allocation4 + $0x1b0] sm:$0xff]  ;;  %v825_v27 = vld [vmem:[#allocation4 + $0x2c0] sm:$0xff]  ;;  %s7399_s25 = sshll.u32 %s7486_s18, 4  ;;  %s7400_s25 = int_to_ptr.vmem [resolvable:$false] %s7399_s25 }
  0xbf   : > { %6658 = vmatprep.subr.bf16.mxu1 %v6657_v13  ;;  %v792_v23 = vld [vmem:[#allocation4 + $0x1b8] sm:$0xff]  ;;  %v6665_v24 = vpack.c.bf16 %v824_v21, %v823_v20  ;;  %v826_v28 = vld [vmem:[#allocation4 + $0x2c8] sm:$0xff]  ;;  %v793_v30 = vld [vmem:[#allocation4 + $0x1c0] sm:$0xff]  ;;  %p7397_p4 = pnand %p7396_p7, %p11228_p10  ;;  %s7401_s29 = scalar_lea.vmem %s7400_s25, 8192 }
  0xc0   : > { %6610 = vmatpush1.bf16.msra.mxu0 %v6609_v12  ;;  %v417_v25 = vld [vmem:[%s7787_s11 + $0x10] sm:$0xff]  ;;  %v6615_v26 = vpack.c.bf16 %v792_v23, %v791_v22  ;;  %v7798_v29 = vld [vmem:[%s7787_s11 + $0x18] sm:$0xff]  ;;  %v794_v31 = vld [vmem:[#allocation4 + $0x1c8] sm:$0xff]  ;;  %v6669_v34 = vpack.c.bf16 %v826_v28, %v825_v27  ;;  %p7402_p13 = scmp.lt.s32.totalorder %s10835_s9, %s7400_s25  ;;  %p7403_p0 = scmp.lt.s32.totalorder %s7401_s29, %s7395_s17 }
  0xc1   : > { %6611 = vmatprep.subr.bf16.mxu0 %v10894_v0  ;;  %419 = vst [vmem:[#allocation2 + $0x25] sm:$0xff] %v417_v25  ;;  %421 = vst [vmem:[#allocation2 + $0x23] sm:$0x2] %v417_v25  ;;  %6121 = vmatprep.mubr.f32.mxu1 %v417_v25  ;;  %v423_v32 = vld [vmem:[%s7787_s11 + $0x20] sm:$0xff]  ;;  %v424_v33 = vld [vmem:[%s7787_s11 + $0x28] sm:$0xff]  ;;  %v6618_v36 = vpack.c.bf16 %v794_v31, %v793_v30  ;;  %p7398_p1 = pneg %p7397_p4 }
  0xc2   : > { %6660 = vmatpush3.bf16.msra.mxu1 %v6657_v13  ;;  %420 = vst [vmem:[#allocation2 + $0x2d] sm:$0xff] %v7798_v29  ;;  %422 = vst [vmem:[#allocation2 + $0x2f] sm:$0x40] %v7798_v29  ;;  %v7806_v35 = vld [vmem:[%s7787_s11 + $0x30] sm:$0xff]  ;;  %v7811_v39 = vld [vmem:[%s7787_s11 + $0x38] sm:$0xff]  ;;  %p7404_p2 = por %p7403_p0, %p7402_p13 }
  0xc3   : > { %6662 = vmatprep.subr.bf16.mxu1 %v6661_v18  ;;  %425 = vst [vmem:[#allocation2 + $0x37] sm:$0xff] %v423_v32  ;;  %427 = vst [vmem:[#allocation2 + $0x35] sm:$0x2] %v423_v32  ;;  %v827_v37 = vld [vmem:[#allocation4 + $0x2d0] sm:$0xff]  ;;  %v828_v38 = vld [vmem:[#allocation4 + $0x2d8] sm:$0xff] }
  0xc4   : > { %6613 = vmatpush1.bf16.msra.mxu0 %v6612_v19  ;;  %426 = vst [vmem:[#allocation2 + $0x3f] sm:$0xff] %v424_v33  ;;  %428 = vst [vmem:[#allocation2 + $0x41] sm:$0x40] %v424_v33  ;;  %v795_v40 = vld [vmem:[#allocation4 + $0x1d0] sm:$0xff]  ;;  %v796_v41 = vld [vmem:[#allocation4 + $0x1d8] sm:$0xff]  ;;  %v6673_v44 = vpack.c.bf16 %v828_v38, %v827_v37  ;;  %p7405_p8 = pnand %p7404_p2, %p7398_p1 }
  0xc5   : > { %6614 = vmatprep.subr.bf16.mxu0 %v10894_v0  ;;  %431 = vst [vmem:[#allocation2 + $0x49] sm:$0xff] %v7806_v35  ;;  %433 = vst [vmem:[#allocation2 + $0x47] sm:$0x2] %v7806_v35  ;;  %v7817_v42 = vld [vmem:[%s7787_s11 + $0x40] sm:$0xff]  ;;  %v7822_v43 = vld [vmem:[%s7787_s11 + $0x48] sm:$0xff]  ;;  %v6621_v46 = vpack.c.bf16 %v796_v41, %v795_v40 }
  0xc6   : > { %6664 = vmatpush3.bf16.msra.mxu1 %v6661_v18  ;;  %432 = vst [vmem:[#allocation2 + $0x51] sm:$0xff] %v7811_v39  ;;  %434 = vst [vmem:[#allocation2 + $0x53] sm:$0x40] %v7811_v39  ;;  %v7827_v45 = vld [vmem:[%s7787_s11 + $0x50] sm:$0xff]  ;;  %v829_v47 = vld [vmem:[#allocation4 + $0x2e0] sm:$0xff] }
  0xc7   : > { %6666 = vmatprep.subr.bf16.mxu1 %v6665_v24  ;;  %437 = vst [vmem:[#allocation2 + $0x5b] sm:$0xff] %v7817_v42  ;;  %439 = vst [vmem:[#allocation2 + $0x59] sm:$0x2] %v7817_v42  ;;  %v830_v48 = vld [vmem:[#allocation4 + $0x2e8] sm:$0xff]  ;;  %v7832_v49 = vld [vmem:[%s7787_s11 + $0x58] sm:$0xff] }
  0xc8   : > { %6616 = vmatpush1.bf16.msra.mxu0 %v6615_v26  ;;  %438 = vst [vmem:[#allocation2 + $0x63] sm:$0xff] %v7822_v43  ;;  %440 = vst [vmem:[#allocation2 + $0x65] sm:$0x40] %v7822_v43  ;;  %v797_v50 = vld [vmem:[#allocation4 + $0x1e0] sm:$0xff]  ;;  %v798_v51 = vld [vmem:[#allocation4 + $0x1e8] sm:$0xff]  ;;  %v6677_v52 = vpack.c.bf16 %v830_v48, %v829_v47 }
  0xc9   : > { %6617 = vmatprep.subr.bf16.mxu0 %v10894_v0  ;;  %445 = vst [vmem:[#allocation2 + $0x6b] sm:$0x2] %v7827_v45  ;;  %443 = vst [vmem:[#allocation2 + $0x6d] sm:$0xff] %v7827_v45  ;;  %v447_v53 = vld [vmem:[%s7787_s11 + $0x60] sm:$0xff]  ;;  %v448_v54 = vld [vmem:[%s7787_s11 + $0x68] sm:$0xff]  ;;  %v6624_v55 = vpack.c.bf16 %v798_v51, %v797_v50 }
  0xca   : > { %6668 = vmatpush3.bf16.msra.mxu1 %v6665_v24  ;;  %444 = vst [vmem:[#allocation2 + $0x75] sm:$0xff] %v7832_v49  ;;  %446 = vst [vmem:[#allocation2 + $0x77] sm:$0x40] %v7832_v49  ;;  %v831_v56 = vld [vmem:[#allocation4 + $0x2f0] sm:$0xff]  ;;  %v832_v57 = vld [vmem:[#allocation4 + $0x2f8] sm:$0xff] }
  0xcb   : > { %6670 = vmatprep.subr.bf16.mxu1 %v6669_v34  ;;  %449 = vst [vmem:[#allocation2 + $0x7f] sm:$0xff] %v447_v53  ;;  %451 = vst [vmem:[#allocation2 + $0x7d] sm:$0x2] %v447_v53  ;;  %v799_v58 = vld [vmem:[#allocation4 + $0x1f0] sm:$0xff]  ;;  %v800_v59 = vld [vmem:[#allocation4 + $0x1f8] sm:$0xff]  ;;  %v6681_v62 = vpack.c.bf16 %v832_v57, %v831_v56 }
  0xcc   : > { %6619 = vmatpush1.bf16.msra.mxu0 %v6618_v36  ;;  %450 = vst [vmem:[#allocation2 + $0x87] sm:$0xff] %v448_v54  ;;  %452 = vst [vmem:[#allocation2 + $0x89] sm:$0x40] %v448_v54  ;;  %v7841_v60 = vld [vmem:[%s7787_s11 + $0x70] sm:$0xff]  ;;  %v7846_v61 = vld [vmem:[%s7787_s11 + $0x78] sm:$0xff]  ;;  %v6627_v63 = vpack.c.bf16 %v800_v59, %v799_v58 }
  0xcd   : > { %6620 = vmatprep.subr.bf16.mxu0 %v10894_v0  ;;  %455 = vst [vmem:[#allocation2 + $0x91] sm:$0xff] %v7841_v60  ;;  %457 = vst [vmem:[#allocation2 + $0x8f] sm:$0x2] %v7841_v60  ;;  %v801_v1 = vld [vmem:[#allocation4 + $0x200] sm:$0xff]  ;;  %v802_v2 = vld [vmem:[#allocation4 + $0x208] sm:$0xff] }
  0xce   : > { %6672 = vmatpush3.bf16.msra.mxu1 %v6669_v34  ;;  %456 = vst [vmem:[#allocation2 + $0x99] sm:$0xff] %v7846_v61  ;;  %458 = vst [vmem:[#allocation2 + $0x9b] sm:$0x40] %v7846_v61  ;;  %v7851_v3 = vld [vmem:[%s7787_s11 + $0x80] sm:$0xff]  ;;  %v7859_v6 = vld [vmem:[#allocation2 + $0x2c] sm:$0xff]  ;;  %v6630_v11 = vpack.c.bf16 %v802_v2, %v801_v1 }
  0xcf   : > { %6674 = vmatprep.subr.bf16.mxu1 %v6673_v44  ;;  %461 = vst [vmem:[#allocation2 + $0xa3] sm:$0xff] %v7851_v3  ;;  %463 = vst [vmem:[#allocation2 + $0xa1] sm:$0x2] %v7851_v3  ;;  %v411_v4 = vld [vmem:[%s7787_s11] sm:$0xff]  ;;  %v7864_v7 = vld [vmem:[%s7787_s11 + $0x88] sm:$0xff] }
  0xd0   : > { %6622 = vmatpush1.bf16.msra.mxu0 %v6621_v46  ;;  %v7857_v5 = vld [vmem:[#allocation2 + $0x24] sm:$0xff]  ;;  %413 = vst [vmem:[#allocation2 + $0x13] sm:$0xff] %v411_v4  ;;  %897 = vmatprep.mubr.f32.mxu0 %v411_v4  ;;  %415 = vst [vmem:[#allocation2 + $0x11] sm:$0x2] %v411_v4  ;;  %v7867_v8 = vld [vmem:[%s7787_s11 + $0x90] sm:$0xff] }
  0xd1   : > { %6623 = vmatprep.subr.bf16.mxu0 %v10894_v0  ;;  %510 = vst [vmem:[#allocation2] sm:$0xff] %v7857_v5  ;;  %511 = vst [vmem:[#allocation2 + $0x8] sm:$0xff] %v7859_v6  ;;  %v628_v9 = vld [vmem:[#allocation4] sm:$0xff]  ;;  %v629_v10 = vld [vmem:[#allocation4 + $0x8] sm:$0xff] }
  0xd2   : > { %6676 = vmatpush3.bf16.msra.mxu1 %v6673_v44  ;;  %462 = vst [vmem:[#allocation2 + $0xab] sm:$0xff] %v7864_v7  ;;  %464 = vst [vmem:[#allocation2 + $0xad] sm:$0x40] %v7864_v7  ;;  %v7874_v12 = vld [vmem:[%s7787_s11 + $0x8] sm:$0xff]  ;;  %v509_v13 = vld [vmem:[#allocation2 + $0x34] sm:$0x3]  ;;  %v6686_v17 = vpack.c.bf16 %v629_v10, %v628_v9 }
  0xd3   : > { %6678 = vmatprep.subr.bf16.mxu1 %v6677_v52  ;;  %469 = vst [vmem:[#allocation2 + $0xb3] sm:$0x2] %v7867_v8  ;;  %467 = vst [vmem:[#allocation2 + $0xb5] sm:$0xff] %v7867_v8  ;;  %v7877_v14 = vld [vmem:[%s7787_s11 + $0x98] sm:$0xff]  ;;  %v803_v15 = vld [vmem:[#allocation4 + $0x210] sm:$0xff] }
  0xd4   : > { %6625 = vmatpush1.bf16.msra.mxu0 %v6624_v55  ;;  %v804_v16 = vld [vmem:[#allocation4 + $0x218] sm:$0xff]  ;;  %414 = vst [vmem:[#allocation2 + $0x1b] sm:$0xff] %v7874_v12  ;;  %416 = vst [vmem:[#allocation2 + $0x1d] sm:$0x40] %v7874_v12  ;;  %v471_v18 = vld [vmem:[%s7787_s11 + $0xa0] sm:$0xff] }
  0xd5   : > { %6626 = vmatprep.subr.bf16.mxu0 %v10894_v0  ;;  %512 = vst [vmem:[#allocation2 + $0x10] sm:$0x3] %v509_v13  ;;  %468 = vst [vmem:[#allocation2 + $0xbd] sm:$0xff] %v7877_v14  ;;  %v472_v19 = vld [vmem:[%s7787_s11 + $0xa8] sm:$0xff]  ;;  %v750_v20 = vld [vmem:[#allocation2 + $0x35] sm:$0xff]  ;;  %v6633_v23 = vpack.c.bf16 %v804_v16, %v803_v15 }
  0xd6   : > { %6680 = vmatpush3.bf16.msra.mxu1 %v6677_v52  ;;  %470 = vst [vmem:[#allocation2 + $0xbf] sm:$0x40] %v7877_v14  ;;  %v630_v21 = vld [vmem:[#allocation4 + $0x10] sm:$0xff]  ;;  %v631_v22 = vld [vmem:[#allocation4 + $0x18] sm:$0xff]  ;;  %473 = vst [vmem:[#allocation2 + $0xc7] sm:$0xff] %v471_v18 }
  0xd7   : > { %6682 = vmatprep.subr.bf16.mxu1 %v6681_v62  ;;  %475 = vst [vmem:[#allocation2 + $0xc5] sm:$0x2] %v471_v18  ;;  %474 = vst [vmem:[#allocation2 + $0xcf] sm:$0xff] %v472_v19  ;;  %v7888_v24 = vld [vmem:[%s7787_s11 + $0xb0] sm:$0xff]  ;;  %v7891_v25 = vld [vmem:[%s7787_s11 + $0xb8] sm:$0xff]  ;;  %v6689_v30 = vpack.c.bf16 %v631_v22, %v630_v21 }
  0xd8   : > { %6628 = vmatpush1.bf16.msra.mxu0 %v6627_v63  ;;  %476 = vst [vmem:[#allocation2 + $0xd1] sm:$0x40] %v472_v19  ;;  %v805_v26 = vld [vmem:[#allocation4 + $0x220] sm:$0xff]  ;;  %v806_v27 = vld [vmem:[#allocation4 + $0x228] sm:$0xff]  ;;  %479 = vst [vmem:[#allocation2 + $0xd9] sm:$0xff] %v7888_v24 }
  0xd9   : > { %6629 = vmatprep.subr.bf16.mxu0 %v10894_v0  ;;  %481 = vst [vmem:[#allocation2 + $0xd7] sm:$0x2] %v7888_v24  ;;  %480 = vst [vmem:[#allocation2 + $0xe1] sm:$0xff] %v7891_v25  ;;  %v751_v28 = vld [vmem:[#allocation2 + $0x3d] sm:$0xff]  ;;  %v752_v32 = vld [vmem:[#allocation2 + $0x45] sm:$0xff]  ;;  %v6636_v36 = vpack.c.bf16 %v806_v27, %v805_v26 }
  0xda   : > { %6684 = vmatpush3.bf16.msra.mxu1 %v6681_v62  ;;  %482 = vst [vmem:[#allocation2 + $0xe3] sm:$0x40] %v7891_v25  ;;  %v632_v31 = vld [vmem:[#allocation4 + $0x20] sm:$0xff]  ;;  %v7904_v34 = vld [vmem:[%s7787_s11 + $0xc8] sm:$0xff]  ;;  %v808_v38 = vld [vmem:[#allocation4 + $0x238] sm:$0xff] }
  0xdb   : > { %6685 = vmatprep.subr.bf16.mxu1 %v10894_v0  ;;  %v7901_v33 = vld [vmem:[%s7787_s11 + $0xc0] sm:$0xff]  ;;  %486 = vst [vmem:[#allocation2 + $0xf3] sm:$0xff] %v7904_v34  ;;  %488 = vst [vmem:[#allocation2 + $0xf5] sm:$0x40] %v7904_v34  ;;  %v807_v37 = vld [vmem:[#allocation4 + $0x230] sm:$0xff] }
  0xdc   : > { %6631 = vmatpush1.bf16.msra.mxu0 %v6630_v11  ;;  %485 = vst [vmem:[#allocation2 + $0xeb] sm:$0xff] %v7901_v33  ;;  %487 = vst [vmem:[#allocation2 + $0xe9] sm:$0x2] %v7901_v33  ;;  %v753_v40 = vld [vmem:[#allocation2 + $0x4d] sm:$0xff]  ;;  %v754_v46 = vld [vmem:[#allocation2 + $0x55] sm:$0xff]  ;;  %v6639_v50 = vpack.c.bf16 %v808_v38, %v807_v37 }
  0xdd   : > { %6122 = vmatmul.mubr.f32.vlgmr.msra.gmra.mrb[0].mxu1 %v7798_v29  ;;  %6632 = vmatprep.subr.bf16.mxu0 %v10894_v0  ;;  %v633_v29 = vld [vmem:[#allocation4 + $0x28] sm:$0xff]  ;;  %v7912_v44 = vld [vmem:[%s7787_s11 + $0xd0] sm:$0xff]  ;;  %v809_v51 = vld [vmem:[#allocation4 + $0x240] sm:$0xff] }
  0xde   : > { %6687 = vmatpush1.bf16.msra.mxu1 %v6686_v17  ;;  %6124 = vmatprep.mubr.f32.mxu1 %v750_v20  ;;  %v6692_v41 = vpack.c.bf16 %v633_v29, %v632_v31  ;;  %v634_v47 = vld [vmem:[#allocation4 + $0x30] sm:$0xff]  ;;  %v635_v48 = vld [vmem:[#allocation4 + $0x38] sm:$0xff]  ;;  %493 = vst [vmem:[#allocation2 + $0xfb] sm:$0x2] %v7912_v44  ;;  %491 = vst [vmem:[#allocation2 + $0xfd] sm:$0xff] %v7912_v44 }
  0xdf   : > { %6688 = vmatprep.subr.bf16.mxu1 %v10894_v0  ;;  %v810_v52 = vld [vmem:[#allocation4 + $0x248] sm:$0xff]  ;;  %v7919_v53 = vld [vmem:[%s7787_s11 + $0xd8] sm:$0xff]  ;;  %v6695_v55 = vpack.c.bf16 %v635_v48, %v634_v47  ;;  %v501_v1 = vld [vmem:[%s7787_s11 + $0xf0] sm:$0xff] }
  0xe0   : > { %6634 = vmatpush1.bf16.msra.mxu0 %v6633_v23  ;;  %v755_v54 = vld [vmem:[#allocation2 + $0x5d] sm:$0xff]  ;;  %492 = vst [vmem:[#allocation2 + $0x105] sm:$0xff] %v7919_v53  ;;  %494 = vst [vmem:[#allocation2 + $0x107] sm:$0x40] %v7919_v53  ;;  %v756_v58 = vld [vmem:[#allocation2 + $0x65] sm:$0xff]  ;;  %v6642_v63 = vpack.c.bf16 %v810_v52, %v809_v51 }
  0xe1   : > { %6125 = vmatmul.mubr.f32.gmra.mrb[2].mxu1 %v751_v28  ;;  %6635 = vmatprep.subr.bf16.mxu0 %v10894_v0  ;;  %v636_v56 = vld [vmem:[#allocation4 + $0x40] sm:$0xff]  ;;  %v637_v59 = vld [vmem:[#allocation4 + $0x48] sm:$0xff]  ;;  %v811_v2 = vld [vmem:[#allocation4 + $0x250] sm:$0xff]  ;;  %503 = vst [vmem:[#allocation2 + $0x121] sm:$0xff] %v501_v1 }
  0xe2   : > { %6690 = vmatpush1.bf16.msra.mxu1 %v6689_v30  ;;  %6127 = vmatprep.mubr.f32.mxu1 %v752_v32  ;;  %v495_v57 = vld [vmem:[%s7787_s11 + $0xe0] sm:$0xff]  ;;  %v496_v62 = vld [vmem:[%s7787_s11 + $0xe8] sm:$0xff]  ;;  %v812_v4 = vld [vmem:[#allocation4 + $0x258] sm:$0xff]  ;;  %505 = vst [vmem:[#allocation2 + $0x11f] sm:$0x2] %v501_v1  ;;  %v6698_v10 = vpack.c.bf16 %v637_v59, %v636_v56 }
  0xe3   : > { %6691 = vmatprep.subr.bf16.mxu1 %v10894_v0  ;;  %497 = vst [vmem:[#allocation2 + $0x10f] sm:$0xff] %v495_v57  ;;  %499 = vst [vmem:[#allocation2 + $0x10d] sm:$0x2] %v495_v57  ;;  %v502_v9 = vld [vmem:[%s7787_s11 + $0xf8] sm:$0xff]  ;;  %v638_v11 = vld [vmem:[#allocation4 + $0x50] sm:$0xff]  ;;  %v6645_v15 = vpack.c.bf16 %v812_v4, %v811_v2 }
  0xe4   : > { %6637 = vmatpush1.bf16.msra.mxu0 %v6636_v36  ;;  %498 = vst [vmem:[#allocation2 + $0x117] sm:$0xff] %v496_v62  ;;  %500 = vst [vmem:[#allocation2 + $0x119] sm:$0x40] %v496_v62  ;;  %v639_v13 = vld [vmem:[#allocation4 + $0x58] sm:$0xff]  ;;  %v813_v16 = vld [vmem:[#allocation4 + $0x260] sm:$0xff] }
  0xe5   : > { %6128 = vmatmul.mubr.f32.gmra.mrb[4].mxu1 %v753_v40  ;;  %6638 = vmatprep.subr.bf16.mxu0 %v10894_v0  ;;  %504 = vst [vmem:[#allocation2 + $0x129] sm:$0xff] %v502_v9  ;;  %506 = vst [vmem:[#allocation2 + $0x12b] sm:$0x40] %v502_v9  ;;  %v814_v17 = vld [vmem:[#allocation4 + $0x268] sm:$0xff]  ;;  %v640_v18 = vld [vmem:[#allocation4 + $0x60] sm:$0xff]  ;;  %v6701_v20 = vpack.c.bf16 %v639_v13, %v638_v11 }
  0xe6   : > { %6693 = vmatpush1.bf16.msra.mxu1 %v6692_v41  ;;  %6130 = vmatprep.mubr.f32.mxu1 %v754_v46  ;;  %v759_v19 = vld [vmem:[#allocation2 + $0x7d] sm:$0xff]  ;;  %v641_v21 = vld [vmem:[#allocation4 + $0x68] sm:$0xff]  ;;  %v815_v28 = vld [vmem:[#allocation4 + $0x270] sm:$0xff] }
  0xe7   : > { %6694 = vmatprep.subr.bf16.mxu1 %v10894_v0  ;;  %v760_v23 = vld [vmem:[#allocation2 + $0x85] sm:$0xff]  ;;  %v761_v30 = vld [vmem:[#allocation2 + $0x8d] sm:$0xff]  ;;  %v6704_v31 = vpack.c.bf16 %v641_v21, %v640_v18  ;;  %v762_v36 = vld [vmem:[#allocation2 + $0x95] sm:$0xff] }
  0xe8   : > { %6640 = vmatpush1.bf16.msra.mxu0 %v6639_v50  ;;  %v660_v29 = vld [vmem:[#allocation4 + $0x100] sm:$0xff]  ;;  %v661_v32 = vld [vmem:[#allocation4 + $0x108] sm:$0xff]  ;;  %v642_v37 = vld [vmem:[#allocation4 + $0x70] sm:$0xff] }
  0xe9   : > { %6131 = vmatmul.mubr.f32.gmra.mrb[6].mxu1 %v755_v54  ;;  %6641 = vmatprep.subr.bf16.mxu0 %v10894_v0  ;;  %v643_v38 = vld [vmem:[#allocation4 + $0x78] sm:$0xff]  ;;  %v6733_v41 = vpack.c.bf16 %v661_v32, %v660_v29  ;;  %v662_v48 = vld [vmem:[#allocation4 + $0x110] sm:$0xff]  ;;  %v764_v51 = vld [vmem:[#allocation2 + $0xa5] sm:$0xff] }
  0xea   : > { %6133 = vmatprep.mubr.f32.mxu1 %v756_v58  ;;  %6696 = vmatpush1.bf16.msra.mxu1 %v6695_v55  ;;  %v513_v22 = vld [vmem:[#allocation2 + $0x10e] sm:$0xff]  ;;  %v763_v46 = vld [vmem:[#allocation2 + $0x9d] sm:$0xff]  ;;  %v6707_v47 = vpack.c.bf16 %v643_v38, %v642_v37  ;;  %v768_v11 = vld [vmem:[#allocation2 + $0xc5] sm:$0xff] }
  0xeb   : > { %6697 = vmatprep.subr.bf16.mxu1 %v10894_v0  ;;  %516 = vst [vmem:[#allocation2 + $0x132] sm:$0xff] %v513_v22  ;;  %v514_v26 = vld [vmem:[#allocation2 + $0x116] sm:$0xff]  ;;  %v515_v27 = vld [vmem:[#allocation2 + $0x11e] sm:$0x3]  ;;  %v644_v52 = vld [vmem:[#allocation4 + $0x80] sm:$0xff] }
  0xec   : > { %6643 = vmatpush1.bf16.msra.mxu0 %v6642_v63  ;;  %517 = vst [vmem:[#allocation2 + $0x13a] sm:$0xff] %v514_v26  ;;  %518 = vst [vmem:[#allocation2 + $0x142] sm:$0x3] %v515_v27  ;;  %v663_v50 = vld [vmem:[#allocation4 + $0x118] sm:$0xff]  ;;  %v645_v54 = vld [vmem:[#allocation4 + $0x88] sm:$0xff] }
  0xed   : > { %6134 = vmatmul.mubr.f32.gmra.mrb[8].mxu1 %v7827_v45  ;;  %6644 = vmatprep.subr.bf16.mxu0 %v10894_v0  ;;  %v6648_v45 = vpack.c.bf16 %v814_v17, %v813_v16  ;;  %v676_v55 = vld [vmem:[#allocation2 + $0x1] sm:$0xff]  ;;  %v6737_v56 = vpack.c.bf16 %v663_v50, %v662_v48  ;;  %v765_v57 = vld [vmem:[#allocation2 + $0xad] sm:$0xff]  ;;  %v6710_v58 = vpack.c.bf16 %v645_v54, %v644_v52  ;;  %v647_v62 = vld [vmem:[#allocation4 + $0x98] sm:$0xff] }
  0xee   : > { %6136 = vmatprep.mubr.f32.mxu1 %v7832_v49  ;;  %6699 = vmatpush1.bf16.msra.mxu1 %v6698_v10  ;;  %v816_v49 = vld [vmem:[#allocation4 + $0x278] sm:$0xff]  ;;  %v646_v59 = vld [vmem:[#allocation4 + $0x90] sm:$0xff]  ;;  %v714_v1 = vld [vmem:[#allocation2 + $0x23] sm:$0xff] }
  0xef   : > { %6700 = vmatprep.subr.bf16.mxu1 %v10894_v0  ;;  %v6651_v40 = vpack.c.bf16 %v816_v49, %v815_v28  ;;  %v677_v63 = vld [vmem:[#allocation2 + $0x9] sm:$0xff]  ;;  %v664_v2 = vld [vmem:[#allocation4 + $0x120] sm:$0xff]  ;;  %v6713_v9 = vpack.c.bf16 %v647_v62, %v646_v59  ;;  %v770_v18 = vld [vmem:[#allocation2 + $0xd5] sm:$0xff] }
  0xf0   : > { %6646 = vmatpush1.bf16.msra.mxu0 %v6645_v15  ;;  %v665_v4 = vld [vmem:[#allocation4 + $0x128] sm:$0xff]  ;;  %v648_v13 = vld [vmem:[#allocation4 + $0xa0] sm:$0xff]  ;;  %v666_v22 = vld [vmem:[#allocation4 + $0x130] sm:$0xff] }
  0xf1   : > { %6137 = vmatmul.mubr.f32.gmra.mrb[10].mxu1 %v759_v19  ;;  %6647 = vmatprep.subr.bf16.mxu0 %v10894_v0  ;;  %v6741_v10 = vpack.c.bf16 %v665_v4, %v664_v2  ;;  %v649_v15 = vld [vmem:[#allocation4 + $0xa8] sm:$0xff]  ;;  %v650_v19 = vld [vmem:[#allocation4 + $0xb0] sm:$0xff]  ;;  %v679_v21 = vld [vmem:[#allocation2 + $0x19] sm:$0xff] }
  0xf2   : > { %6139 = vmatprep.mubr.f32.mxu1 %v760_v23  ;;  %6702 = vmatpush1.bf16.msra.mxu1 %v6701_v20  ;;  %v715_v16 = vld [vmem:[#allocation2 + $0x2b] sm:$0xff]  ;;  %v651_v20 = vld [vmem:[#allocation4 + $0xb8] sm:$0xff]  ;;  %v652_v49 = vld [vmem:[#allocation4 + $0xc0] sm:$0xff] }
  0xf3   : > { %6703 = vmatprep.subr.bf16.mxu1 %v10894_v0  ;;  %v769_v17 = vld [vmem:[#allocation2 + $0xcd] sm:$0xff]  ;;  %v667_v26 = vld [vmem:[#allocation4 + $0x138] sm:$0xff]  ;;  %v6719_v27 = vpack.c.bf16 %v651_v20, %v650_v19  ;;  %v772_v28 = vld [vmem:[#allocation2 + $0xe5] sm:$0xff] }
  0xf4   : > { %6649 = vmatpush1.bf16.msra.mxu0 %v6648_v45  ;;  %v716_v23 = vld [vmem:[#allocation2 + $0x33] sm:$0xff]  ;;  %v6745_v45 = vpack.c.bf16 %v667_v26, %v666_v22  ;;  %v717_v29 = vld [vmem:[#allocation2 + $0x3b] sm:$0xff]  ;;  %v718_v48 = vld [vmem:[#allocation2 + $0x43] sm:$0xff] }
  0xf5   : > { %6140 = vmatmul.mubr.f32.gmra.mrb[12].mxu1 %v761_v30  ;;  %6650 = vmatprep.subr.bf16.mxu0 %v10894_v0  ;;  %v653_v30 = vld [vmem:[#allocation4 + $0xc8] sm:$0xff]  ;;  %v654_v37 = vld [vmem:[#allocation4 + $0xd0] sm:$0xff]  ;;  %v656_v52 = vld [vmem:[#allocation4 + $0xe0] sm:$0xff] }
  0xf6   : > { %6142 = vmatprep.mubr.f32.mxu1 %v762_v36  ;;  %6705 = vmatpush1.bf16.msra.mxu1 %v6704_v31  ;;  %v680_v31 = vld [vmem:[#allocation2 + $0x21] sm:$0xff]  ;;  %v773_v32 = vld [vmem:[#allocation2 + $0xed] sm:$0xff]  ;;  %v6722_v36 = vpack.c.bf16 %v653_v30, %v652_v49  ;;  %v774_v38 = vld [vmem:[#allocation2 + $0xf5] sm:$0xff] }
  0xf7   : > { %6706 = vmatprep.subr.bf16.mxu1 %v10894_v0  ;;  %v657_v54 = vld [vmem:[#allocation4 + $0xe8] sm:$0xff]  ;;  %v658_v59 = vld [vmem:[#allocation4 + $0xf0] sm:$0xff]  ;;  %v659_v62 = vld [vmem:[#allocation4 + $0xf8] sm:$0xff] }
  0xf8   : > { %6652 = vmatpush1.bf16.msra.mxu0 %v6651_v40  ;;  %v655_v40 = vld [vmem:[#allocation4 + $0xd8] sm:$0xff]  ;;  %v1923_v26 = vld [vmem:[#allocation4 + $0x308] sm:$0xff] }
  0xf9   : > { %6143 = vmatmul.mubr.f32.gmra.mrb[14].mxu1 %v763_v46  ;;  %6734 = vmatprep.subr.bf16.mxu0 %v6733_v41  ;;  %v681_v46 = vld [vmem:[#allocation2 + $0x29] sm:$0xff]  ;;  %v671_v2 = vld [vmem:[#allocation4 + $0x158] sm:$0xff] }
  0xfa   : > { %6145 = vmatprep.mubr.f32.mxu1 %v764_v51  ;;  %6708 = vmatpush1.bf16.msra.mxu1 %v6707_v47  ;;  %v669_v47 = vld [vmem:[#allocation4 + $0x148] sm:$0xff]  ;;  %v6725_v51 = vpack.c.bf16 %v655_v40, %v654_v37  ;;  %v683_v4 = vld [vmem:[#allocation2 + $0x39] sm:$0xff] }
  0xfb   : > { %898 = vmatmul.mubr.f32.vlgmr.msra.gmra.mrb[0].mxu0 %v676_v55  ;;  %6709 = vmatprep.subr.bf16.mxu1 %v10894_v0  ;;  %v682_v55 = vld [vmem:[#allocation2 + $0x31] sm:$0xff]  ;;  %v687_v49 = vld [vmem:[#allocation2 + $0x59] sm:$0xff] }
  0xfc   : > { %902 = vmatprep.mubr.f32.mxu0 %v7874_v12  ;;  %6736 = vmatpush3.bf16.msra.mxu0 %v6733_v41  ;;  %v678_v12 = vld [vmem:[#allocation2 + $0x11] sm:$0xff]  ;;  %v668_v41 = vld [vmem:[#allocation4 + $0x140] sm:$0xff] }
  0xfd   : > { %6146 = vmatmul.mubr.f32.gmra.mrb[16].mxu1 %v765_v57  ;;  %6738 = vmatprep.subr.bf16.mxu0 %v6737_v56  ;;  %v6749_v50 = vpack.c.bf16 %v669_v47, %v668_v41  ;;  %v777_v57 = vld [vmem:[#allocation2 + $0x10d] sm:$0xff]  ;;  %v782_v20 = vld [vmem:[#allocation2 + $0x135] sm:$0xff] }
  0xfe   : > { %6148 = vmatprep.mubr.f32.mxu1 %v7867_v8  ;;  %6711 = vmatpush1.bf16.msra.mxu1 %v6710_v58  ;;  %v6716_v8 = vpack.c.bf16 %v649_v15, %v648_v13  ;;  %v6728_v58 = vpack.c.bf16 %v657_v54, %v656_v52  ;;  %v672_v13 = vld [vmem:[#allocation4 + $0x160] sm:$0xff]  ;;  %v673_v15 = vld [vmem:[#allocation4 + $0x168] sm:$0xff]  ;;  %v556_v22 = vld [vmem:[#allocation2 + $0x12] sm:$0xff] }
  0xff   : > { %903 = vmatmul.mubr.f32.gmra.mrb[2].mxu0 %v677_v63  ;;  %6712 = vmatprep.subr.bf16.mxu1 %v10894_v0  ;;  %v778_v63 = vld [vmem:[#allocation2 + $0x115] sm:$0xff]  ;;  %v689_v41 = vld [vmem:[#allocation2 + $0x69] sm:$0xff] }
 0x100   : > { %907 = vmatprep.mubr.f32.mxu0 %v714_v1  ;;  %6740 = vmatpush3.bf16.msra.mxu0 %v6737_v56  ;;  %v719_v56 = vld [vmem:[#allocation2 + $0x4b] sm:$0xff]  ;;  %v1929_v40 = vld [vmem:[#allocation4 + $0x338] sm:$0xff] }
 0x101   : > { %6149 = vmatmul.mubr.f32.gmra.mrb[18].mxu1 %v7877_v14  ;;  %6742 = vmatprep.subr.bf16.mxu0 %v6741_v10  ;;  %v771_v14 = vld [vmem:[#allocation2 + $0xdd] sm:$0xff]  ;;  %v670_v1 = vld [vmem:[#allocation4 + $0x150] sm:$0xff] }
 0x102   : > { %6151 = vmatprep.mubr.f32.mxu1 %v768_v11  ;;  %6714 = vmatpush1.bf16.msra.mxu1 %v6713_v9  ;;  %v6753_v9 = vpack.c.bf16 %v671_v2, %v670_v1  ;;  %v780_v11 = vld [vmem:[#allocation2 + $0x125] sm:$0xff]  ;;  %v523_v47 = vld [vmem:[#allocation2 + $0x18] sm:$0xff] }
 0x103   : > { %908 = vmatmul.mubr.f32.gmra.mrb[4].mxu0 %v678_v12  ;;  %6715 = vmatprep.subr.bf16.mxu1 %v10894_v0  ;;  %v684_v12 = vld [vmem:[#allocation2 + $0x41] sm:$0xff]  ;;  %v690_v52 = vld [vmem:[#allocation2 + $0x71] sm:$0xff]  ;;  %v691_v2 = vld [vmem:[#allocation2 + $0x79] sm:$0xff] }
 0x104   : > { %912 = vmatprep.mubr.f32.mxu0 %v715_v16  ;;  %6744 = vmatpush3.bf16.msra.mxu0 %v6741_v10  ;;  %v779_v10 = vld [vmem:[#allocation2 + $0x11d] sm:$0xff]  ;;  %v6757_v16 = vpack.c.bf16 %v673_v15, %v672_v13  ;;  %v727_v54 = vld [vmem:[#allocation2 + $0x8b] sm:$0xff] }
 0x105   : > { %6152 = vmatmul.mubr.f32.gmra.mrb[20].mxu1 %v769_v17  ;;  %6746 = vmatprep.subr.bf16.mxu0 %v6745_v45  ;;  %v674_v17 = vld [vmem:[#allocation4 + $0x170] sm:$0xff]  ;;  %v1933_v1 = vld [vmem:[#allocation4 + $0x358] sm:$0xff]  ;;  %v692_v13 = vld [vmem:[#allocation2 + $0x81] sm:$0xff] }
 0x106   : > { %6154 = vmatprep.mubr.f32.mxu1 %v770_v18  ;;  %6717 = vmatpush1.bf16.msra.mxu1 %v6716_v8  ;;  %v675_v8 = vld [vmem:[#allocation4 + $0x178] sm:$0xff]  ;;  %v781_v18 = vld [vmem:[#allocation2 + $0x12d] sm:$0xff] }
 0x107   : > { %913 = vmatmul.mubr.f32.gmra.mrb[6].mxu0 %v679_v21  ;;  %6718 = vmatprep.subr.bf16.mxu1 %v10894_v0  ;;  %v6761_v19 = vpack.c.bf16 %v675_v8, %v674_v17  ;;  %v783_v21 = vld [vmem:[#allocation2 + $0x13d] sm:$0xff]  ;;  %v563_v17 = vld [vmem:[#allocation2 + $0x4a] sm:$0xff] }
 0x108   : > { %917 = vmatprep.mubr.f32.mxu0 %v716_v23  ;;  %6748 = vmatpush3.bf16.msra.mxu0 %v6745_v45  ;;  %v1922_v23 = vld [vmem:[#allocation4 + $0x300] sm:$0xff]  ;;  %v1924_v45 = vld [vmem:[#allocation4 + $0x310] sm:$0xff] }
 0x109   : > { %6155 = vmatmul.mubr.f32.gmra.mrb[22].mxu1 %v771_v14  ;;  %6750 = vmatprep.subr.bf16.mxu0 %v6749_v50  ;;  %v723_v14 = vld [vmem:[#allocation2 + $0x6b] sm:$0xff]  ;;  %v729_v15 = vld [vmem:[#allocation2 + $0x9b] sm:$0xff] }
 0x10a   : > { %6157 = vmatprep.mubr.f32.mxu1 %v772_v28  ;;  %6720 = vmatpush1.bf16.msra.mxu1 %v6719_v27  ;;  %v6766_v27 = vpack.c.bf16 %v1923_v26, %v1922_v23  ;;  %v1925_v28 = vld [vmem:[#allocation4 + $0x318] sm:$0xff]  ;;  %v1936_v8 = vld [vmem:[#allocation4 + $0x370] sm:$0xff]  ;;  %v1938_v23 = vld [vmem:[#allocation4 + $0x380] sm:$0xff] }
 0x10b   : > { %918 = vmatmul.mubr.f32.gmra.mrb[8].mxu0 %v680_v31  ;;  %6721 = vmatprep.subr.bf16.mxu1 %v10894_v0  ;;  %v6769_v30 = vpack.c.bf16 %v1925_v28, %v1924_v45  ;;  %v1926_v31 = vld [vmem:[#allocation4 + $0x320] sm:$0xff]  ;;  %v1939_v26 = vld [vmem:[#allocation4 + $0x388] sm:$0xff]  ;;  %v1940_v45 = vld [vmem:[#allocation4 + $0x390] sm:$0xff] }
 0x10c   : > { %922 = vmatprep.mubr.f32.mxu0 %v717_v29  ;;  %6752 = vmatpush3.bf16.msra.mxu0 %v6749_v50  ;;  %v1927_v29 = vld [vmem:[#allocation4 + $0x328] sm:$0xff]  ;;  %v1930_v50 = vld [vmem:[#allocation4 + $0x340] sm:$0xff]  ;;  %v1941_v28 = vld [vmem:[#allocation4 + $0x398] sm:$0xff] }
 0x10d   : > { %6158 = vmatmul.mubr.f32.gmra.mrb[24].mxu1 %v773_v32  ;;  %6754 = vmatprep.subr.bf16.mxu0 %v6753_v9  ;;  %v688_v32 = vld [vmem:[#allocation2 + $0x61] sm:$0xff]  ;;  %v6772_v37 = vpack.c.bf16 %v1927_v29, %v1926_v31 }
 0x10e   : > { %6160 = vmatprep.mubr.f32.mxu1 %v774_v38  ;;  %6723 = vmatpush1.bf16.msra.mxu1 %v6722_v36  ;;  %v522_v36 = vld [vmem:[#allocation2 + $0x10] sm:$0xff]  ;;  %v696_v31 = vld [vmem:[#allocation2 + $0xa1] sm:$0xff] }
 0x10f   : > { %923 = vmatmul.mubr.f32.gmra.mrb[10].mxu0 %v681_v46  ;;  %6724 = vmatprep.subr.bf16.mxu1 %v10894_v0  ;;  %v1928_v38 = vld [vmem:[#allocation4 + $0x330] sm:$0xff]  ;;  %v726_v46 = vld [vmem:[#allocation2 + $0x83] sm:$0xff]  ;;  %v733_v29 = vld [vmem:[#allocation2 + $0xbb] sm:$0xff] }
 0x110   : > { %927 = vmatprep.mubr.f32.mxu0 %v718_v48  ;;  %6756 = vmatpush3.bf16.msra.mxu0 %v6753_v9  ;;  %v6775_v48 = vpack.c.bf16 %v1929_v40, %v1928_v38  ;;  %v525_v9 = vld [vmem:[#allocation2 + $0x28] sm:$0xff]  ;;  %v531_v38 = vld [vmem:[#allocation2 + $0x58] sm:$0xff] }
 0x111   : > { %6161 = vmatmul.mubr.f32.gmra.mrb[26].mxu1 %v7912_v44  ;;  %v720_v44 = vld [vmem:[#allocation2 + $0x53] sm:$0xff]  ;;  %6758 = vmatprep.subr.bf16.mxu0 %v6757_v16 }
 0x112   : > { %6163 = vmatprep.mubr.f32.mxu1 %v7919_v53  ;;  %6726 = vmatpush1.bf16.msra.mxu1 %v6725_v51  ;;  %v6731_v53 = vpack.c.bf16 %v659_v62, %v658_v59  ;;  %v1931_v51 = vld [vmem:[#allocation4 + $0x348] sm:$0xff]  ;;  %v561_v62 = vld [vmem:[#allocation2 + $0x3a] sm:$0xff] }
 0x113   : > { %928 = vmatmul.mubr.f32.gmra.mrb[12].mxu0 %v682_v55  ;;  %6727 = vmatprep.subr.bf16.mxu1 %v10894_v0  ;;  %v1954_v55 = vld [vmem:[#allocation4 + $0x400] sm:$0xff] }
 0x114   : > { %932 = vmatprep.mubr.f32.mxu0 %v719_v56  ;;  %6760 = vmatpush3.bf16.msra.mxu0 %v6757_v16  ;;  %v1955_v56 = vld [vmem:[#allocation4 + $0x408] sm:$0xff] }
 0x115   : > { %6164 = vmatmul.mubr.f32.gmra.mrb[28].mxu1 %v777_v57  ;;  %6762 = vmatprep.subr.bf16.mxu0 %v6761_v19  ;;  %v524_v57 = vld [vmem:[#allocation2 + $0x20] sm:$0xff]  ;;  %v7961_v59 = vpack.c.bf16 %v1955_v56, %v1954_v55  ;;  %v1949_v55 = vld [vmem:[#allocation4 + $0x3d8] sm:$0xff] }
 0x116   : > { %6166 = vmatprep.mubr.f32.mxu1 %v778_v63  ;;  %6729 = vmatpush1.bf16.msra.mxu1 %v6728_v58  ;;  %v6778_v58 = vpack.c.bf16 %v1931_v51, %v1930_v50  ;;  %v1932_v63 = vld [vmem:[#allocation4 + $0x350] sm:$0xff]  ;;  %v532_v50 = vld [vmem:[#allocation2 + $0x60] sm:$0xff] }
 0x117   : > { %933 = vmatmul.mubr.f32.gmra.mrb[14].mxu0 %v683_v4  ;;  %6730 = vmatprep.subr.bf16.mxu1 %v10894_v0  ;;  %v728_v4 = vld [vmem:[#allocation2 + $0x93] sm:$0xff] }
 0x118   : > { %937 = vmatprep.mubr.f32.mxu0 %v720_v44  ;;  %6764 = vmatpush3.bf16.msra.mxu0 %v6761_v19  ;;  %v6781_v44 = vpack.c.bf16 %v1933_v1, %v1932_v63  ;;  %v693_v19 = vld [vmem:[#allocation2 + $0x89] sm:$0xff]  ;;  %v699_v56 = vld [vmem:[#allocation2 + $0xb9] sm:$0xff] }
 0x119   : > { %6167 = vmatmul.mubr.f32.gmra.mrb[30].mxu1 %v779_v10  ;;  %6814 = vmatprep.subr.bf16.mxu0 %v7961_v59  ;;  %v562_v10 = vld [vmem:[#allocation2 + $0x42] sm:$0xff] }
 0x11a   : > { %6169 = vmatprep.mubr.f32.mxu1 %v780_v11  ;;  %6732 = vmatpush1.bf16.msra.mxu1 %v6731_v53  ;;  %v1934_v53 = vld [vmem:[#allocation4 + $0x360] sm:$0xff]  ;;  %v1935_v11 = vld [vmem:[#allocation4 + $0x368] sm:$0xff] }
 0x11b   : > { %938 = vmatmul.mubr.f32.gmra.mrb[16].mxu0 %v684_v12  ;;  %6765 = vmatprep.subr.bf16.mxu1 %v10894_v0  ;;  %v526_v12 = vld [vmem:[#allocation2 + $0x30] sm:$0xff]  ;;  %v6784_v16 = vpack.c.bf16 %v1935_v11, %v1934_v53  ;;  %v570_v63 = vld [vmem:[#allocation2 + $0x82] sm:$0xff] }
 0x11c   : > { %942 = vmatprep.mubr.f32.mxu0 %v7817_v42  ;;  %v557_v42 = vld [vmem:[#allocation2 + $0x1a] sm:$0xff]  ;;  %v571_v53 = vld [vmem:[#allocation2 + $0x8a] sm:$0xff] }
 0x11d   : > { %6170 = vmatmul.mubr.f32.gmra.mrb[32].mxu1 %v781_v18  ;;  %v1937_v18 = vld [vmem:[#allocation4 + $0x378] sm:$0xff]  ;;  %v1950_v1 = vld [vmem:[#allocation4 + $0x3e0] sm:$0xff]  ;;  %v1952_v11 = vld [vmem:[#allocation4 + $0x3f0] sm:$0xff] }
 0x11e   : > { %6172 = vmatprep.mubr.f32.mxu1 %v782_v20  ;;  %v527_v20 = vld [vmem:[#allocation2 + $0x38] sm:$0xff] }
 0x11f   : > { %943 = vmatmul.mubr.f32.gmra.mrb[18].mxu0 %v7806_v35  ;;  %v724_v35 = vld [vmem:[#allocation2 + $0x73] sm:$0xff] }
 0x120   : > { %947 = vmatprep.mubr.f32.mxu0 %v7822_v43  ;;  %v558_v43 = vld [vmem:[#allocation2 + $0x22] sm:$0xff] }
 0x121   : > { %6173 = vmatmul.mubr.f32.gmra.mrb[34].mxu1 %v783_v21  ;;  %v6787_v21 = vpack.c.bf16 %v1937_v18, %v1936_v8  ;;  %v572_v8 = vld [vmem:[#allocation2 + $0x92] sm:$0xff] }
 0x122   : > { %1387 = vmatprep.mubr.f32.mxu1 %v556_v22  ;;  %v564_v22 = vld [vmem:[#allocation2 + $0x52] sm:$0xff] }
 0x123   : > { %948 = vmatmul.mubr.f32.gmra.mrb[20].mxu0 %v7811_v39  ;;  %v725_v39 = vld [vmem:[#allocation2 + $0x7b] sm:$0xff]  ;;  %v702_v18 = vld [vmem:[#allocation2 + $0xd1] sm:$0xff] }
 0x124   : > { %952 = vmatprep.mubr.f32.mxu0 %v723_v14  ;;  %v528_v14 = vld [vmem:[#allocation2 + $0x40] sm:$0xff] }
 0x125   : > { %1388 = vmatmul.mubr.f32.vlgmr.msra.gmra.mrb[36].mxu1 %v7857_v5  ;;  %v559_v5 = vld [vmem:[#allocation2 + $0x2a] sm:$0xff] }
 0x126   : > { %6767 = vmatpush1.bf16.msra.mxu1 %v6766_v27  ;;  %1392 = vmatprep.mubr.f32.mxu1 %v557_v42  ;;  %v6790_v27 = vpack.c.bf16 %v1939_v26, %v1938_v23  ;;  %v565_v42 = vld [vmem:[#allocation2 + $0x5a] sm:$0xff]  ;;  %v538_v26 = vld [vmem:[#allocation2 + $0x90] sm:$0xff] }
 0x127   : > { %953 = vmatmul.mubr.f32.gmra.mrb[22].mxu0 %v687_v49  ;;  %6768 = vmatprep.subr.bf16.mxu1 %v10894_v0  ;;  %v732_v49 = vld [vmem:[#allocation2 + $0xb3] sm:$0xff]  ;;  %v741_v23 = vld [vmem:[#allocation2 + $0xfb] sm:$0xff] }
 0x128   : > { %957 = vmatprep.mubr.f32.mxu0 %v724_v35  ;;  %v529_v35 = vld [vmem:[#allocation2 + $0x48] sm:$0xff] }
 0x129   : > { %1393 = vmatmul.mubr.f32.gmra.mrb[38].mxu1 %v7859_v6  ;;  %v560_v6 = vld [vmem:[#allocation2 + $0x32] sm:$0xff] }
 0x12a   : > { %1397 = vmatprep.mubr.f32.mxu1 %v558_v43  ;;  %6770 = vmatpush1.bf16.msra.mxu1 %v6769_v30  ;;  %v566_v30 = vld [vmem:[#allocation2 + $0x62] sm:$0xff] }
 0x12b   : > { %958 = vmatmul.mubr.f32.gmra.mrb[24].mxu0 %v688_v32  ;;  %6771 = vmatprep.subr.bf16.mxu1 %v10894_v0  ;;  %v1942_v43 = vld [vmem:[#allocation4 + $0x3a0] sm:$0xff]  ;;  %v530_v32 = vld [vmem:[#allocation2 + $0x50] sm:$0xff] }
 0x12c   : > { %962 = vmatprep.mubr.f32.mxu0 %v725_v39  ;;  %v567_v39 = vld [vmem:[#allocation2 + $0x6a] sm:$0xff] }
 0x12d   : > { %1398 = vmatmul.mubr.f32.gmra.mrb[40].mxu1 %v522_v36  ;;  %v1944_v36 = vld [vmem:[#allocation4 + $0x3b0] sm:$0xff] }
 0x12e   : > { %1402 = vmatprep.mubr.f32.mxu1 %v559_v5  ;;  %6773 = vmatpush1.bf16.msra.mxu1 %v6772_v37  ;;  %v1945_v37 = vld [vmem:[#allocation4 + $0x3b8] sm:$0xff]  ;;  %v734_v5 = vld [vmem:[#allocation2 + $0xc3] sm:$0xff] }
 0x12f   : > { %963 = vmatmul.mubr.f32.gmra.mrb[26].mxu0 %v689_v41  ;;  %6774 = vmatprep.subr.bf16.mxu1 %v10894_v0  ;;  %v6799_v40 = vpack.c.bf16 %v1945_v37, %v1944_v36  ;;  %v568_v41 = vld [vmem:[#allocation2 + $0x72] sm:$0xff] }
 0x130   : > { %967 = vmatprep.mubr.f32.mxu0 %v726_v46  ;;  %v1946_v46 = vld [vmem:[#allocation4 + $0x3c0] sm:$0xff]  ;;  %v580_v36 = vld [vmem:[#allocation2 + $0xd2] sm:$0xff] }
 0x131   : > { %1403 = vmatmul.mubr.f32.gmra.mrb[42].mxu1 %v523_v47  ;;  %v1947_v47 = vld [vmem:[#allocation4 + $0x3c8] sm:$0xff]  ;;  %v710_v37 = vld [vmem:[#allocation2 + $0x111] sm:$0xff] }
 0x132   : > { %1407 = vmatprep.mubr.f32.mxu1 %v560_v6  ;;  %6776 = vmatpush1.bf16.msra.mxu1 %v6775_v48  ;;  %v698_v48 = vld [vmem:[#allocation2 + $0xb1] sm:$0xff]  ;;  %v6802_v51 = vpack.c.bf16 %v1947_v47, %v1946_v46 }
 0x133   : > { %968 = vmatmul.mubr.f32.gmra.mrb[28].mxu0 %v690_v52  ;;  %6777 = vmatprep.subr.bf16.mxu1 %v10894_v0  ;;  %v735_v6 = vld [vmem:[#allocation2 + $0xcb] sm:$0xff]  ;;  %v569_v52 = vld [vmem:[#allocation2 + $0x7a] sm:$0xff] }
 0x134   : > { %972 = vmatprep.mubr.f32.mxu0 %v727_v54  ;;  %v1948_v54 = vld [vmem:[#allocation4 + $0x3d0] sm:$0xff]  ;;  %v1957_v47 = vld [vmem:[#allocation4 + $0x418] sm:$0xff] }
 0x135   : > { %1408 = vmatmul.mubr.f32.gmra.mrb[44].mxu1 %v524_v57  ;;  %v736_v57 = vld [vmem:[#allocation2 + $0xd3] sm:$0xff] }
 0x136   : > { %1412 = vmatprep.mubr.f32.mxu1 %v561_v62  ;;  %6779 = vmatpush1.bf16.msra.mxu1 %v6778_v58  ;;  %v533_v58 = vld [vmem:[#allocation2 + $0x68] sm:$0xff]  ;;  %v6805_v62 = vpack.c.bf16 %v1949_v55, %v1948_v54  ;;  %v1956_v46 = vld [vmem:[#allocation4 + $0x410] sm:$0xff]  ;;  %v1958_v54 = vld [vmem:[#allocation4 + $0x420] sm:$0xff] }
 0x137   : > { %973 = vmatmul.mubr.f32.gmra.mrb[30].mxu0 %v691_v2  ;;  %6780 = vmatprep.subr.bf16.mxu1 %v10894_v0  ;;  %v1951_v2 = vld [vmem:[#allocation4 + $0x3e8] sm:$0xff] }
 0x138   : > { %977 = vmatprep.mubr.f32.mxu0 %v728_v4  ;;  %v700_v4 = vld [vmem:[#allocation2 + $0xc1] sm:$0xff] }
 0x139   : > { %1413 = vmatmul.mubr.f32.gmra.mrb[46].mxu1 %v525_v9  ;;  %v737_v9 = vld [vmem:[#allocation2 + $0xdb] sm:$0xff]  ;;  %v1959_v55 = vld [vmem:[#allocation4 + $0x428] sm:$0xff] }
 0x13a   : > { %1417 = vmatprep.mubr.f32.mxu1 %v562_v10  ;;  %6782 = vmatpush1.bf16.msra.mxu1 %v6781_v44  ;;  %v534_v44 = vld [vmem:[#allocation2 + $0x70] sm:$0xff]  ;;  %v6808_v10 = vpack.c.bf16 %v1951_v2, %v1950_v1  ;;  %v6821_v1 = vpack.c.bf16 %v1959_v55, %v1958_v54  ;;  %v7485_v2 = vmov 0  }
 0x13b   : > { %978 = vmatmul.mubr.f32.gmra.mrb[32].mxu0 %v692_v13  ;;  %6783 = vmatprep.subr.bf16.mxu1 %v10894_v0  ;;  %v1953_v13 = vld [vmem:[#allocation4 + $0x3f8] sm:$0xff] }
 0x13c   : > { %982 = vmatprep.mubr.f32.mxu0 %v729_v15  ;;  %v701_v15 = vld [vmem:[#allocation2 + $0xc9] sm:$0xff]  ;;  %7189 = vset.pattern.permute.xlu0 %v7485_v2 }
 0x13d   : > { %1418 = vmatmul.mubr.f32.gmra.mrb[48].mxu1 %v526_v12  ;;  %v738_v12 = vld [vmem:[#allocation2 + $0xe3] sm:$0xff]  ;;  %7190 = vset.pattern.permute.xlu1 %v7485_v2 }
 0x13e   : > { %1422 = vmatprep.mubr.f32.mxu1 %v563_v17  ;;  %6785 = vmatpush1.bf16.msra.mxu1 %v6784_v16  ;;  %v535_v16 = vld [vmem:[#allocation2 + $0x78] sm:$0xff]  ;;  %v6811_v17 = vpack.c.bf16 %v1953_v13, %v1952_v11  ;;  %v340_v11 = vld [vmem:[#allocation12 + $0x8] sm:$0xff] }
 0x13f   : > { %983 = vmatmul.mubr.f32.gmra.mrb[34].mxu0 %v693_v19  ;;  %6786 = vmatprep.subr.bf16.mxu1 %v10894_v0  ;;  %v536_v19 = vld [vmem:[#allocation2 + $0x80] sm:$0xff]  ;;  %v7996_v13 = vld [vmem:[#allocation2 + $0x4c] sm:$0xff]  ;;  %vm376_vm2 = vcmp.gt.f32.partialorder %v340_v11, 0.0 }
 0x140   : > { %987 = vmatprep.mubr.f32.mxu0 %v7851_v3  ;;  %v6793_v3 = vpack.c.bf16 %v1941_v28, %v1940_v45  ;;  %v576_v45 = vld [vmem:[#allocation2 + $0xb2] sm:$0xff] }
 0x141   : > { %1423 = vmatmul.mubr.f32.gmra.mrb[50].mxu1 %v527_v20  ;;  %v573_v20 = vld [vmem:[#allocation2 + $0x9a] sm:$0xff]  ;;  %v743_v28 = vld [vmem:[#allocation2 + $0x10b] sm:$0xff] }
 0x142   : > { %1427 = vmatprep.mubr.f32.mxu1 %v564_v22  ;;  %6788 = vmatpush1.bf16.msra.mxu1 %v6787_v21  ;;  %v537_v21 = vld [vmem:[#allocation2 + $0x88] sm:$0xff] }
 0x143   : > { %988 = vmatmul.mubr.f32.gmra.mrb[36].mxu0 %v7841_v60  ;;  %6789 = vmatprep.subr.bf16.mxu1 %v10894_v0  ;;  %v1943_v60 = vld [vmem:[#allocation4 + $0x3a8] sm:$0xff] }
 0x144   : > { %992 = vmatprep.mubr.f32.mxu0 %v7864_v7  ;;  %v6796_v7 = vpack.c.bf16 %v1943_v60, %v1942_v43  ;;  %v574_v22 = vld [vmem:[#allocation2 + $0xa2] sm:$0xff] }
 0x145   : > { %1428 = vmatmul.mubr.f32.gmra.mrb[52].mxu1 %v528_v14  ;;  %v575_v14 = vld [vmem:[#allocation2 + $0xaa] sm:$0xff]  ;;  %v708_v43 = vld [vmem:[#allocation2 + $0x101] sm:$0xff] }
 0x146   : > { %1432 = vmatprep.mubr.f32.mxu1 %v565_v42  ;;  %6791 = vmatpush1.bf16.msra.mxu1 %v6790_v27  ;;  %v705_v27 = vld [vmem:[#allocation2 + $0xe9] sm:$0xff]  ;;  %v745_v60 = vld [vmem:[#allocation2 + $0x11b] sm:$0xff] }
 0x147   : > { %993 = vmatmul.mubr.f32.gmra.mrb[38].mxu0 %v7846_v61  ;;  %6792 = vmatprep.subr.bf16.mxu1 %v10894_v0  ;;  %v697_v61 = vld [vmem:[#allocation2 + $0xa9] sm:$0xff] }
 0x148   : > { %997 = vmatprep.mubr.f32.mxu0 %v732_v49  ;;  %v742_v42 = vld [vmem:[#allocation2 + $0x103] sm:$0xff]  ;;  %v577_v49 = vld [vmem:[#allocation2 + $0xba] sm:$0xff] }
 0x149   : > { %1433 = vmatmul.mubr.f32.gmra.mrb[54].mxu1 %v529_v35  ;;  %v707_v35 = vld [vmem:[#allocation2 + $0xf9] sm:$0xff] }
 0x14a   : > { %1437 = vmatprep.mubr.f32.mxu1 %v566_v30  ;;  %6794 = vmatpush1.bf16.msra.mxu1 %v6793_v3  ;;  %v541_v3 = vld [vmem:[#allocation2 + $0xa8] sm:$0xff] }
 0x14b   : > { %998 = vmatmul.mubr.f32.gmra.mrb[40].mxu0 %v696_v31  ;;  %6795 = vmatprep.subr.bf16.mxu1 %v10894_v0  ;;  %v578_v30 = vld [vmem:[#allocation2 + $0xc2] sm:$0xff]  ;;  %v542_v31 = vld [vmem:[#allocation2 + $0xb0] sm:$0xff] }
 0x14c   : > { %1002 = vmatprep.mubr.f32.mxu0 %v733_v29  ;;  %v579_v29 = vld [vmem:[#allocation2 + $0xca] sm:$0xff] }
 0x14d   : > { %1438 = vmatmul.mubr.f32.gmra.mrb[56].mxu1 %v530_v32  ;;  %v709_v32 = vld [vmem:[#allocation2 + $0x109] sm:$0xff] }
 0x14e   : > { %1442 = vmatprep.mubr.f32.mxu1 %v567_v39  ;;  %6797 = vmatpush1.bf16.msra.mxu1 %v6796_v7  ;;  %v746_v7 = vld [vmem:[#allocation2 + $0x123] sm:$0xff]  ;;  %v543_v39 = vld [vmem:[#allocation2 + $0xb8] sm:$0xff] }
 0x14f   : > { %1003 = vmatmul.mubr.f32.gmra.mrb[42].mxu0 %v697_v61  ;;  %6798 = vmatprep.subr.bf16.mxu1 %v10894_v0  ;;  %v747_v61 = vld [vmem:[#allocation2 + $0x12b] sm:$0xff] }
 0x150   : > { %1007 = vmatprep.mubr.f32.mxu0 %v734_v5  ;;  %v544_v5 = vld [vmem:[#allocation2 + $0xc0] sm:$0xff] }
 0x151   : > { %1443 = vmatmul.mubr.f32.gmra.mrb[58].mxu1 %v531_v38  ;;  %v581_v38 = vld [vmem:[#allocation2 + $0xda] sm:$0xff] }
 0x152   : > { %1447 = vmatprep.mubr.f32.mxu1 %v568_v41  ;;  %6800 = vmatpush1.bf16.msra.mxu1 %v6799_v40  ;;  %v711_v40 = vld [vmem:[#allocation2 + $0x119] sm:$0xff]  ;;  %v545_v41 = vld [vmem:[#allocation2 + $0xc8] sm:$0xff] }
 0x153   : > { %1008 = vmatmul.mubr.f32.gmra.mrb[44].mxu0 %v698_v48  ;;  %6801 = vmatprep.subr.bf16.mxu1 %v10894_v0  ;;  %v582_v48 = vld [vmem:[#allocation2 + $0xe2] sm:$0xff] }
 0x154   : > { %1012 = vmatprep.mubr.f32.mxu0 %v735_v6  ;;  %v7195_v6 = vld [vmem:[#allocation2] sm:$0xff] }
 0x155   : > { %1448 = vmatmul.mubr.f32.gmra.mrb[60].mxu1 %v532_v50  ;;  %v7984_v50 = vld [vmem:[#allocation2 + $0x34] sm:$0xff] }
 0x156   : > { %1452 = vmatprep.mubr.f32.mxu1 %v569_v52  ;;  %6803 = vmatpush1.bf16.msra.mxu1 %v6802_v51  ;;  %v6817_v51 = vpack.c.bf16 %v1957_v47, %v1956_v46  ;;  %v546_v52 = vld [vmem:[#allocation2 + $0xd0] sm:$0xff] }
 0x157   : > { %1013 = vmatmul.mubr.f32.gmra.mrb[46].mxu0 %v699_v56  ;;  %6804 = vmatprep.subr.bf16.mxu1 %v10894_v0  ;;  %v7196_v56 = vld [vmem:[#allocation2 + $0x8] sm:$0xff]  ;;  %v588_v46 = vld [vmem:[#allocation2 + $0x112] sm:$0xff] }
 0x158   : > { %1017 = vmatprep.mubr.f32.mxu0 %v736_v57  ;;  %v583_v57 = vld [vmem:[#allocation2 + $0xea] sm:$0xff] }
 0x159   : > { %1453 = vmatmul.mubr.f32.gmra.mrb[62].mxu1 %v533_v58  ;;  %v339_v58 = vld [vmem:[#allocation12] sm:$0xff] }
 0x15a   : > { %1457 = vmatprep.mubr.f32.mxu1 %v570_v63  ;;  %6806 = vmatpush1.bf16.msra.mxu1 %v6805_v62  ;;  %v7987_v62 = vld [vmem:[#allocation2 + $0x3c] sm:$0xff]  ;;  %vm375_vm0 = vcmp.gt.f32.partialorder %v339_v58, 0.0  ;;  %v7990_v63 = vld [vmem:[#allocation2 + $0x44] sm:$0xff] }
 0x15b   : > { %1018 = vmatmul.mubr.f32.gmra.mrb[48].mxu0 %v700_v4  ;;  %6807 = vmatprep.subr.bf16.mxu1 %v10894_v0  ;;  %v2539_v4 = vsel %vm375_vm0, 1, %v7485_v2 }
 0x15c   : > { %1022 = vmatprep.mubr.f32.mxu0 %v737_v9  ;;  %v547_v9 = vld [vmem:[#allocation2 + $0xd8] sm:$0xff]  ;;  %2576 = vperm.xlu0 %7189, %v2539_v4   ;;  %v351_v4 = vld [vmem:[#allocation12 + $0x60] sm:$0xff] }
 0x15d   : > { %1458 = vmatmul.mubr.f32.gmra.mrb[64].mxu1 %v534_v44  ;;  %v1960_v44 = vld [vmem:[#allocation4 + $0x430] sm:$0xff]  ;;  %vm387_vm12 = vcmp.gt.f32.partialorder %v351_v4, 0.0 }
 0x15e   : > { %1462 = vmatprep.mubr.f32.mxu1 %v571_v53  ;;  %6809 = vmatpush1.bf16.msra.mxu1 %v6808_v10  ;;  %v1961_v10 = vld [vmem:[#allocation4 + $0x438] sm:$0xff]  ;;  %v2551_v11 = vsel %vm387_vm12, 1, %v7485_v2 }
 0x15f   : > { %1023 = vmatmul.mubr.f32.gmra.mrb[50].mxu0 %v701_v15  ;;  %6810 = vmatprep.subr.bf16.mxu1 %v10894_v0  ;;  %v584_v53 = vld [vmem:[#allocation2 + $0xf2] sm:$0xff] }
 0x160   : > { %1027 = vmatprep.mubr.f32.mxu0 %v738_v12  ;;  %v7998_v15 = vld [vmem:[#allocation2 + $0x54] sm:$0xff]  ;;  %v6825_v12 = vpack.c.bf16 %v1961_v10, %v1960_v44  ;;  %v8039_v44 = vld [vmem:[#allocation2 + $0xa4] sm:$0xff] }
 0x161   : > { %1463 = vmatmul.mubr.f32.gmra.mrb[66].mxu1 %v535_v16 }
 0x162   : > { %1467 = vmatprep.mubr.f32.mxu1 %v572_v8  ;;  %6812 = vmatpush1.bf16.msra.mxu1 %v6811_v17  ;;  %v548_v17 = vld [vmem:[#allocation2 + $0xe0] sm:$0xff] }
 0x163   : > { %1028 = vmatmul.mubr.f32.gmra.mrb[52].mxu0 %v702_v18  ;;  %v1962_v8 = vld [vmem:[#allocation4 + $0x440] sm:$0xff]  ;;  %v1963_v18 = vld [vmem:[#allocation4 + $0x448] sm:$0xff] }
 0x164   : > { %1032 = vmatprep.mubr.f32.mxu0 %v7901_v33  ;;  %v539_v33 = vld [vmem:[#allocation2 + $0x98] sm:$0xff] }
 0x165   : > { %1468 = vmatmul.mubr.f32.gmra.mrb[68].mxu1 %v536_v19  ;;  %v585_v19 = vld [vmem:[#allocation2 + $0xfa] sm:$0xff] }
 0x166   : > { %1472 = vmatprep.mubr.f32.mxu1 %v573_v20  ;;  %v2540_v20 = vsel %vm376_vm2, 1, %v7485_v2 }
 0x167   : > { %1033 = vmatmul.mubr.f32.gmra.mrb[54].mxu0 %v7888_v24  ;;  %v706_v24 = vld [vmem:[#allocation2 + $0xf1] sm:$0xff]  ;;  %2579 = vperm.xlu0 %7189, %v2540_v20  }
 0x168   : > { %1037 = vmatprep.mubr.f32.mxu0 %v7904_v34  ;;  %v540_v34 = vld [vmem:[#allocation2 + $0xa0] sm:$0xff]  ;;  %v591_v20 = vld [vmem:[#allocation2 + $0x12a] sm:$0xff] }
 0x169   : > { %1473 = vmatmul.mubr.f32.gmra.mrb[70].mxu1 %v537_v21  ;;  %v342_v21 = vld [vmem:[#allocation12 + $0x18] sm:$0xff] }
 0x16a   : > { %1477 = vmatprep.mubr.f32.mxu1 %v574_v22  ;;  %v343_v22 = vld [vmem:[#allocation12 + $0x20] sm:$0xff]  ;;  %vm378_vm3 = vcmp.gt.f32.partialorder %v342_v21, 0.0 }
 0x16b   : > { %1038 = vmatmul.mubr.f32.gmra.mrb[56].mxu0 %v7891_v25  ;;  %v744_v25 = vld [vmem:[#allocation2 + $0x113] sm:$0xff]  ;;  %vm379_vm4 = vcmp.gt.f32.partialorder %v343_v22, 0.0  ;;  %v354_v22 = vld [vmem:[#allocation12 + $0x78] sm:$0xff] }
 0x16c   : > { %1042 = vmatprep.mubr.f32.mxu0 %v741_v23  ;;  %v8005_v23 = vld [vmem:[#allocation2 + $0x5c] sm:$0xff]  ;;  %vm390_vm15 = vcmp.gt.f32.partialorder %v354_v22, 0.0 }
 0x16d   : > { %1478 = vmatmul.mubr.f32.gmra.mrb[72].mxu1 %v538_v26  ;;  %v8007_v26 = vld [vmem:[#allocation2 + $0x64] sm:$0xff] }
 0x16e   : > { %1482 = vmatprep.mubr.f32.mxu1 %v575_v14  ;;  %v6829_v14 = vpack.c.bf16 %v1963_v18, %v1962_v8  ;;  %v8047_v8 = vld [vmem:[#allocation2 + $0xb4] sm:$0xff] }
 0x16f   : > { %1043 = vmatmul.mubr.f32.gmra.mrb[58].mxu0 %v705_v27  ;;  %v2542_v27 = vsel %vm378_vm3, 1, %v7485_v2 }
 0x170   : > { %1047 = vmatprep.mubr.f32.mxu0 %v742_v42  ;;  %v549_v42 = vld [vmem:[#allocation2 + $0xe8] sm:$0xff] }
 0x171   : > { %1483 = vmatmul.mubr.f32.gmra.mrb[74].mxu1 %v539_v33  ;;  %v1964_v33 = vld [vmem:[#allocation4 + $0x450] sm:$0xff] }
 0x172   : > { %1487 = vmatprep.mubr.f32.mxu1 %v576_v45  ;;  %v1965_v45 = vld [vmem:[#allocation4 + $0x458] sm:$0xff] }
 0x173   : > { %1048 = vmatmul.mubr.f32.gmra.mrb[60].mxu0 %v706_v24  ;;  %v586_v24 = vld [vmem:[#allocation2 + $0x102] sm:$0xff] }
 0x174   : > { %1052 = vmatprep.mubr.f32.mxu0 %v743_v28  ;;  %v2543_v28 = vsel %vm379_vm4, 1, %v7485_v2 }
 0x175   : > { %1488 = vmatmul.mubr.f32.gmra.mrb[76].mxu1 %v540_v34  ;;  %v344_v34 = vld [vmem:[#allocation12 + $0x28] sm:$0xff]  ;;  %2588 = vperm.xlu0 %7189, %v2543_v28  }
 0x176   : > { %1492 = vmatprep.mubr.f32.mxu1 %v577_v49  ;;  %v345_v49 = vld [vmem:[#allocation12 + $0x30] sm:$0xff]  ;;  %vm380_vm5 = vcmp.gt.f32.partialorder %v344_v34, 0.0  ;;  %v356_v34 = vld [vmem:[#allocation12 + $0x88] sm:$0xff] }
 0x177   : > { %1053 = vmatmul.mubr.f32.gmra.mrb[62].mxu0 %v707_v35  ;;  %v8013_v35 = vld [vmem:[#allocation2 + $0x6c] sm:$0xff]  ;;  %vm381_vm6 = vcmp.gt.f32.partialorder %v345_v49, 0.0  ;;  %v357_v49 = vld [vmem:[#allocation12 + $0x90] sm:$0xff] }
 0x178   : > { %1057 = vmatprep.mubr.f32.mxu0 %v744_v25  ;;  %v8015_v25 = vld [vmem:[#allocation2 + $0x74] sm:$0xff]  ;;  %vm393_vm2 = vcmp.gt.f32.partialorder %v357_v49, 0.0 }
 0x179   : > { %1493 = vmatmul.mubr.f32.gmra.mrb[78].mxu1 %v541_v3  ;;  %v6833_v3 = vpack.c.bf16 %v1965_v45, %v1964_v33  ;;  %v2554_v33 = vsel %vm390_vm15, 1, %v7485_v2  ;;  %v555_v45 = vld [vmem:[#allocation2 + $0x118] sm:$0xff] }
 0x17a   : > { %1497 = vmatprep.mubr.f32.mxu1 %v578_v30  ;;  %v2544_v30 = vsel %vm380_vm5, 1, %v7485_v2  ;;  %v8116_v49 = vld [vmem:[#allocation2 + $0x114] sm:$0xff] }
 0x17b   : > { %1058 = vmatmul.mubr.f32.gmra.mrb[64].mxu0 %v708_v43  ;;  %v550_v43 = vld [vmem:[#allocation2 + $0xf0] sm:$0xff] }
 0x17c   : > { %1062 = vmatprep.mubr.f32.mxu0 %v745_v60  ;;  %v1966_v60 = vld [vmem:[#allocation4 + $0x460] sm:$0xff] }
 0x17d   : > { %1498 = vmatmul.mubr.f32.gmra.mrb[80].mxu1 %v542_v31  ;;  %v1967_v31 = vld [vmem:[#allocation4 + $0x468] sm:$0xff] }
 0x17e   : > { %1502 = vmatprep.mubr.f32.mxu1 %v579_v29  ;;  %v587_v29 = vld [vmem:[#allocation2 + $0x10a] sm:$0xff] }
 0x17f   : > { %1063 = vmatmul.mubr.f32.gmra.mrb[66].mxu0 %v709_v32  ;;  %v2545_v32 = vsel %vm381_vm6, 1, %v7485_v2 }
 0x180   : > { %1067 = vmatprep.mubr.f32.mxu0 %v746_v7  ;;  %v346_v7 = vld [vmem:[#allocation12 + $0x38] sm:$0xff]  ;;  %2594 = vperm.xlu0 %7189, %v2545_v32  }
 0x181   : > { %1503 = vmatmul.mubr.f32.gmra.mrb[82].mxu1 %v543_v39  ;;  %v347_v39 = vld [vmem:[#allocation12 + $0x40] sm:$0xff]  ;;  %vm382_vm7 = vcmp.gt.f32.partialorder %v346_v7, 0.0  ;;  %v1850_v32 = vld [vmem:[#allocation2 + $0x1c] sm:$0xff]  ;;  %v2557_v7 = vsel %vm393_vm2, 1, %v7485_v2 }
 0x182   : > { %1507 = vmatprep.mubr.f32.mxu1 %v580_v36  ;;  %v8021_v36 = vld [vmem:[#allocation2 + $0x7c] sm:$0xff]  ;;  %vm383_vm8 = vcmp.gt.f32.partialorder %v347_v39, 0.0 }
 0x183   : > { %1068 = vmatmul.mubr.f32.gmra.mrb[68].mxu0 %v710_v37  ;;  %v8023_v37 = vld [vmem:[#allocation2 + $0x84] sm:$0xff]  ;;  %v2547_v47 = vsel %vm383_vm8, 1, %v7485_v2  ;;  %v358_v39 = vld [vmem:[#allocation12 + $0x98] sm:$0xff] }
 0x184   : > { %1072 = vmatprep.mubr.f32.mxu0 %v747_v61  ;;  %v6837_v61 = vpack.c.bf16 %v1967_v31, %v1966_v60  ;;  %2600 = vperm.xlu0 %7189, %v2547_v47   ;;  %v8068_v60 = vld [vmem:[#allocation2 + $0xd4] sm:$0xff]  ;;  %vm394_vm3 = vcmp.gt.f32.partialorder %v358_v39, 0.0  ;;  %v1814_v47 = vld [vmem:[#allocation2 + $0xa] sm:$0xff] }
 0x185   : > { %1508 = vmatmul.mubr.f32.gmra.mrb[84].mxu1 %v544_v5  ;;  %v2546_v5 = vsel %vm382_vm7, 1, %v7485_v2 }
 0x186   : > { %1512 = vmatprep.mubr.f32.mxu1 %v581_v38  ;;  %v551_v38 = vld [vmem:[#allocation2 + $0xf8] sm:$0xff] }
 0x187   : > { %1073 = vmatmul.mubr.f32.gmra.mrb[70].mxu0 %v711_v40  ;;  %v1968_v40 = vld [vmem:[#allocation4 + $0x470] sm:$0xff] }
 0x188   : > { %6207 = vmatprep.mubr.f32.mxu0 %v7195_v6  ;;  %v349_v6 = vld [vmem:[#allocation12 + $0x50] sm:$0xff] }
 0x189   : > { %1513 = vmatmul.mubr.f32.gmra.mrb[86].mxu1 %v545_v41  ;;  %v1969_v41 = vld [vmem:[#allocation4 + $0x478] sm:$0xff]  ;;  %vm385_vm10 = vcmp.gt.f32.partialorder %v349_v6, 0.0 }
 0x18a   : > { %1517 = vmatprep.mubr.f32.mxu1 %v582_v48  ;;  %v348_v48 = vld [vmem:[#allocation12 + $0x48] sm:$0xff]  ;;  %v6841_v54 = vpack.c.bf16 %v1969_v41, %v1968_v40  ;;  %v2549_v58 = vsel %vm385_vm10, 1, %v7485_v2  ;;  %v8080_v41 = vld [vmem:[#allocation2 + $0xe4] sm:$0xff] }
 0x18b   : > { %6208 = vmatmul.mubr.f32.vlgmr.msra.gmra.mrb[72].mxu0 %v7196_v56  ;;  %vm384_vm9 = vcmp.gt.f32.partialorder %v348_v48, 0.0  ;;  %v552_v56 = vld [vmem:[#allocation2 + $0x100] sm:$0xff]  ;;  %2606 = vperm.xlu0 %7189, %v2549_v58  }
 0x18c   : > { %6210 = vmatprep.mubr.f32.mxu0 %v7984_v50  ;;  %6816 = vmatpush3.bf16.msra.mxu0 %v7961_v59  ;;  %v341_v59 = vld [vmem:[#allocation12 + $0x10] sm:$0xff]  ;;  %v2548_v55 = vsel %vm384_vm9, 1, %v7485_v2  ;;  %v1851_v48 = vld [vmem:[#allocation2 + $0x24] sm:$0xff] }
 0x18d   : > { %1518 = vmatmul.mubr.f32.gmra.mrb[88].mxu1 %v546_v52  ;;  %6818 = vmatprep.subr.bf16.mxu0 %v6817_v51  ;;  %vm377_vm1 = vcmp.gt.f32.partialorder %v341_v59, 0.0  ;;  %v8031_v52 = vld [vmem:[#allocation2 + $0x94] sm:$0xff]  ;;  %v590_v59 = vld [vmem:[#allocation2 + $0x122] sm:$0xff] }
 0x18e   : > { %1522 = vmatprep.mubr.f32.mxu1 %v583_v57  ;;  %v2541_v16 = vsel %vm377_vm1, 1, %v7485_v2  ;;  %v589_v57 = vld [vmem:[#allocation2 + $0x11a] sm:$0xff]  ;;  %vm392_vm1 = vcmp.gt.f32.partialorder %v356_v34, 0.0 }
 0x18f   : > { %6211 = vmatmul.mubr.f32.gmra.mrb[74].mxu0 %v7987_v62  ;;  %2582 = vperm.xlu1 %7190, %v2541_v16   ;;  %v353_v16 = vld [vmem:[#allocation12 + $0x70] sm:$0xff]  ;;  %v2556_v31 = vsel %vm392_vm1, 1, %v7485_v2 }
 0x190   : > { %6213 = vmatprep.mubr.f32.mxu0 %v7990_v63  ;;  %6820 = vmatpush3.bf16.msra.mxu0 %v6817_v51  ;;  %v8029_v51 = vld [vmem:[#allocation2 + $0x8c] sm:$0xff]  ;;  %vm389_vm14 = vcmp.gt.f32.partialorder %v353_v16, 0.0  ;;  %v8100_v16 = vld [vmem:[#allocation2 + $0xfc] sm:$0xff] }
 0x191   : > { %1523 = vmatmul.mubr.f32.gmra.mrb[90].mxu1 %v547_v9  ;;  %6822 = vmatprep.subr.bf16.mxu0 %v6821_v1  ;;  %v8037_v9 = vld [vmem:[#allocation2 + $0x9c] sm:$0xff]  ;;  %v2553_v21 = vsel %vm389_vm14, 1, %v7485_v2 }
 0x192   : > { %1527 = vmatprep.mubr.f32.mxu1 %v584_v53  ;;  %v553_v53 = vld [vmem:[#allocation2 + $0x108] sm:$0xff]  ;;  %2612 = vperm.xlu0 %7189, %v2551_v11   ;;  %v7198_v34 = vld [vmem:[#allocation2 + $0x1a] sm:$0xff] }
 0x193   : > { %6214 = vmatmul.mubr.f32.gmra.mrb[76].mxu0 %v7996_v13  ;;  %2585 = vperm.xlu1 %7190, %v2542_v27   ;;  %v8054_v27 = vld [vmem:[#allocation2 + $0xbc] sm:$0xff]  ;;  %v363_v11 = vld [vmem:[#allocation12 + $0xc0] sm:$0xff] }
 0x194   : > { %6216 = vmatprep.mubr.f32.mxu0 %v7998_v15  ;;  %6824 = vmatpush3.bf16.msra.mxu0 %v6821_v1  ;;  %v350_v1 = vld [vmem:[#allocation12 + $0x58] sm:$0xff]  ;;  %vm399_vm8 = vcmp.gt.f32.partialorder %v363_v11, 0.0 }
 0x195   : > { %1528 = vmatmul.mubr.f32.gmra.mrb[92].mxu1 %v548_v17  ;;  %6826 = vmatprep.subr.bf16.mxu0 %v6825_v12  ;;  %vm386_vm11 = vcmp.gt.f32.partialorder %v350_v1, 0.0  ;;  %v8045_v17 = vld [vmem:[#allocation2 + $0xac] sm:$0xff]  ;;  %v8092_v1 = vld [vmem:[#allocation2 + $0xf4] sm:$0xff]  ;;  %v2563_v22 = vsel %vm399_vm8, 1, %v7485_v2 }
 0x196   : > { %1532 = vmatprep.mubr.f32.mxu1 %v585_v19  ;;  %v2550_v10 = vsel %vm386_vm11, 1, %v7485_v2  ;;  %v554_v19 = vld [vmem:[#allocation2 + $0x110] sm:$0xff]  ;;  %2618 = vperm.xlu0 %7189, %v2553_v21  }
 0x197   : > { %6217 = vmatmul.mubr.f32.gmra.mrb[78].mxu0 %v8005_v23  ;;  %2591 = vperm.xlu1 %7190, %v2544_v30   ;;  %v8064_v30 = vld [vmem:[#allocation2 + $0xcc] sm:$0xff] }
 0x198   : > { %6219 = vmatprep.mubr.f32.mxu0 %v8007_v26  ;;  %6828 = vmatpush3.bf16.msra.mxu0 %v6825_v12  ;;  %v352_v12 = vld [vmem:[#allocation12 + $0x68] sm:$0xff] }
 0x199   : > { %1533 = vmatmul.mubr.f32.gmra.mrb[94].mxu1 %v549_v42  ;;  %6830 = vmatprep.subr.bf16.mxu0 %v6829_v14  ;;  %vm388_vm13 = vcmp.gt.f32.partialorder %v352_v12, 0.0  ;;  %v8056_v42 = vld [vmem:[#allocation2 + $0xc4] sm:$0xff] }
 0x19a   : > { %1537 = vmatprep.mubr.f32.mxu1 %v586_v24  ;;  %v2552_v18 = vsel %vm388_vm13, 1, %v7485_v2  ;;  %v1849_v24 = vld [vmem:[#allocation2 + $0x14] sm:$0xff] }
 0x19b   : > { %6220 = vmatmul.mubr.f32.gmra.mrb[80].mxu0 %v8013_v35  ;;  %2597 = vperm.xlu1 %7190, %v2546_v5  }
 0x19c   : > { %6222 = vmatprep.mubr.f32.mxu0 %v8015_v25  ;;  %6832 = vmatpush3.bf16.msra.mxu0 %v6829_v14  ;;  %v355_v14 = vld [vmem:[#allocation12 + $0x80] sm:$0xff] }
 0x19d   : > { %1538 = vmatmul.mubr.f32.gmra.mrb[96].mxu1 %v550_v43  ;;  %6834 = vmatprep.subr.bf16.mxu0 %v6833_v3  ;;  %vm391_vm0 = vcmp.gt.f32.partialorder %v355_v14, 0.0  ;;  %v364_v14 = vld [vmem:[#allocation12 + $0xc8] sm:$0xff] }
 0x19e   : > { %1542 = vmatprep.mubr.f32.mxu1 %v587_v29  ;;  %v2555_v28 = vsel %vm391_vm0, 1, %v7485_v2  ;;  %v1813_v29 = vld [vmem:[#allocation2 + $0x2] sm:$0xff]  ;;  %vm400_vm9 = vcmp.gt.f32.partialorder %v364_v14, 0.0 }
 0x19f   : > { %6223 = vmatmul.mubr.f32.gmra.mrb[82].mxu0 %v8021_v36  ;;  %2603 = vperm.xlu1 %7190, %v2548_v55   ;;  %v361_v55 = vld [vmem:[#allocation12 + $0xb0] sm:$0xff] }
 0x1a0   : > { %6225 = vmatprep.mubr.f32.mxu0 %v8023_v37  ;;  %6836 = vmatpush3.bf16.msra.mxu0 %v6833_v3  ;;  %vm397_vm6 = vcmp.gt.f32.partialorder %v361_v55, 0.0  ;;  %v369_v55 = vld [vmem:[#allocation12 + $0xf0] sm:$0xff] }
 0x1a1   : > { %1543 = vmatmul.mubr.f32.gmra.mrb[98].mxu1 %v551_v38  ;;  %6838 = vmatprep.subr.bf16.mxu0 %v6837_v61  ;;  %v8076_v38 = vld [vmem:[#allocation2 + $0xdc] sm:$0xff]  ;;  %vm405_vm14 = vcmp.gt.f32.partialorder %v369_v55, 0.0 }
 0x1a2   : > { %1547 = vmatprep.mubr.f32.mxu1 %v588_v46  ;;  %2624 = vperm.xlu0 %7189, %v2555_v28   ;;  %v2558_v46 = vsel %vm394_vm3, 1, %v7485_v2 }
 0x1a3   : > { %6226 = vmatmul.mubr.f32.gmra.mrb[84].mxu0 %v8029_v51  ;;  %2609 = vperm.xlu1 %7190, %v2550_v10   ;;  %v1852_v10 = vld [vmem:[#allocation2 + $0x2c] sm:$0xff] }
 0x1a4   : > { %6228 = vmatprep.mubr.f32.mxu0 %v8031_v52  ;;  %6840 = vmatpush3.bf16.msra.mxu0 %v6837_v61  ;;  %v359_v61 = vld [vmem:[#allocation12 + $0xa0] sm:$0xff] }
 0x1a5   : > { %1548 = vmatmul.mubr.f32.gmra.mrb[100].mxu1 %v552_v56  ;;  %6842 = vmatprep.subr.bf16.mxu0 %v6841_v54  ;;  %vm395_vm4 = vcmp.gt.f32.partialorder %v359_v61, 0.0  ;;  %v8125_v61 = vld [vmem:[#allocation2 + $0x11c] sm:$0xff] }
 0x1a6   : > { %1552 = vmatprep.mubr.f32.mxu1 %v589_v57  ;;  %2630 = vperm.xlu0 %7189, %v2557_v7   ;;  %v2559_v6 = vsel %vm395_vm4, 1, %v7485_v2  ;;  %v8088_v57 = vld [vmem:[#allocation2 + $0xec] sm:$0xff]  ;;  %v367_v7 = vld [vmem:[#allocation12 + $0xe0] sm:$0xff] }
 0x1a7   : > { %6229 = vmatmul.mubr.f32.gmra.mrb[86].mxu0 %v8037_v9  ;;  %2615 = vperm.xlu1 %7190, %v2552_v18   ;;  %vm403_vm12 = vcmp.gt.f32.partialorder %v367_v7, 0.0 }
 0x1a8   : > { %6231 = vmatprep.mubr.f32.mxu0 %v8039_v44  ;;  %6844 = vmatpush3.bf16.msra.mxu0 %v6841_v54  ;;  %v360_v54 = vld [vmem:[#allocation12 + $0xa8] sm:$0xff] }
 0x1a9   : > { %1553 = vmatmul.mubr.f32.gmra.mrb[102].mxu1 %v553_v53  ;;  %6845 = vmatprep.subr.bf16.mxu0 %v10894_v0  ;;  %vm396_vm5 = vcmp.gt.f32.partialorder %v360_v54, 0.0  ;;  %v2561_v53 = vsel %vm397_vm6, 1, %v7485_v2  ;;  %v368_v54 = vld [vmem:[#allocation12 + $0xe8] sm:$0xff] }
 0x1aa   : > { %1557 = vmatprep.mubr.f32.mxu1 %v590_v59  ;;  %v2560_v4 = vsel %vm396_vm5, 1, %v7485_v2  ;;  %2636 = vperm.xlu0 %7189, %v2559_v6   ;;  %v362_v59 = vld [vmem:[#allocation12 + $0xb8] sm:$0xff]  ;;  %v2567_v6 = vsel %vm403_vm12, 1, %v7485_v2  ;;  %vm404_vm13 = vcmp.gt.f32.partialorder %v368_v54, 0.0  ;;  %v373_v54 = vld [vmem:[#allocation12 + $0x110] sm:$0xff] }
 0x1ab   : > { %6232 = vmatmul.mubr.f32.gmra.mrb[88].mxu0 %v8045_v17  ;;  %2621 = vperm.xlu1 %7190, %v2554_v33   ;;  %vm398_vm7 = vcmp.gt.f32.partialorder %v362_v59, 0.0  ;;  %v365_v33 = vld [vmem:[#allocation12 + $0xd0] sm:$0xff]  ;;  %v7200_v59 = vld [vmem:[#allocation2 + $0x2a] sm:$0xff]  ;;  %v2568_v11 = vsel %vm404_vm13, 1, %v7485_v2  ;;  %vm409_vm2 = vcmp.gt.f32.partialorder %v373_v54, 0.0 }
 0x1ac   : > { %6234 = vmatprep.mubr.f32.mxu0 %v8047_v8  ;;  %v2562_v21 = vsel %vm398_vm7, 1, %v7485_v2  ;;  %vm401_vm10 = vcmp.gt.f32.partialorder %v365_v33, 0.0  ;;  %v627_v33 = vld [vmem:[#allocation2 + $0x13c] sm:$0xff] }
 0x1ad   : > { %1558 = vmatmul.mubr.f32.gmra.mrb[104].mxu1 %v554_v19  ;;  %v7197_v19 = vld [vmem:[#allocation2 + $0x12] sm:$0xff] }
 0x1ae   : > { %1562 = vmatprep.mubr.f32.mxu1 %v591_v20  ;;  %v8104_v20 = vld [vmem:[#allocation2 + $0x104] sm:$0xff]  ;;  %2642 = vperm.xlu0 %7189, %v2561_v53  }
 0x1af   : > { %6235 = vmatmul.mubr.f32.gmra.mrb[90].mxu0 %v8054_v27  ;;  %2627 = vperm.xlu1 %7190, %v2556_v31   ;;  %v2564_v31 = vsel %vm400_vm9, 1, %v7485_v2 }
 0x1b0   : > { %v8061_v3 = vpop.f32.mrb[0].mxu1  ;;  %6237 = vmatprep.mubr.f32.mxu0 %v8056_v42 }
 0x1b1   : > { %v8066_v43 = vpop.f32.mrb[1].mxu1  ;;  %1563 = vmatmul.mubr.f32.gmra.mrb[106].mxu1 %v555_v45 }
 0x1b2   : > { %2034 = vmatprep.mubr.f32.mxu1 %v1849_v24  ;;  %v8112_v24 = vld [vmem:[#allocation2 + $0x10c] sm:$0xff]  ;;  %2648 = vperm.xlu0 %7189, %v2563_v22   ;;  %v371_v22 = vld [vmem:[#allocation12 + $0x100] sm:$0xff] }
 0x1b3   : > { %6238 = vmatmul.mubr.f32.gmra.mrb[92].mxu0 %v8064_v30  ;;  %2633 = vperm.xlu1 %7190, %v2558_v46   ;;  %vm407_vm0 = vcmp.gt.f32.partialorder %v371_v22, 0.0 }
 0x1b4   : > { %v8073_v5 = vpop.f32.mrb[2].mxu1  ;;  %6240 = vmatprep.mubr.f32.mxu0 %v8068_v60 }
 0x1b5   : > { %v8078_v40 = vpop.f32.mrb[3].mxu1  ;;  %2035 = vmatmul.mubr.f32.vlgmr.msra.gmra.mrb[108].mxu1 %v1813_v29  ;;  %v2565_v29 = vsel %vm401_vm10, 1, %v7485_v2 }
 0x1b6   : > { %2039 = vmatprep.mubr.f32.mxu1 %v1850_v32  ;;  %v366_v32 = vld [vmem:[#allocation12 + $0xd8] sm:$0xff]  ;;  %2654 = vperm.xlu0 %7189, %v2565_v29   ;;  %v1885_v29 = vld [vmem:[#allocation2 + $0x26] sm:$0xff] }
 0x1b7   : > { %6241 = vmatmul.mubr.f32.gmra.mrb[94].mxu0 %v8076_v38  ;;  %2639 = vperm.xlu1 %7190, %v2560_v4   ;;  %vm402_vm11 = vcmp.gt.f32.partialorder %v366_v32, 0.0 }
 0x1b8   : > { %v8085_v56 = vpop.f32.mrb[4].mxu1  ;;  %6243 = vmatprep.mubr.f32.mxu0 %v8080_v41 }
 0x1b9   : > { %v8090_v58 = vpop.f32.mrb[5].mxu1  ;;  %2040 = vmatmul.mubr.f32.gmra.mrb[110].mxu1 %v1814_v47  ;;  %v7199_v47 = vld [vmem:[#allocation2 + $0x22] sm:$0xff] }
 0x1ba   : > { %2044 = vmatprep.mubr.f32.mxu1 %v1851_v48  ;;  %v2566_v48 = vsel %vm402_vm11, 1, %v7485_v2  ;;  %2660 = vperm.xlu0 %7189, %v2567_v6   ;;  %v372_v6 = vld [vmem:[#allocation12 + $0x108] sm:$0xff] }
 0x1bb   : > { %6244 = vmatmul.mubr.f32.gmra.mrb[96].mxu0 %v8088_v57  ;;  %2645 = vperm.xlu1 %7190, %v2562_v21   ;;  %v370_v21 = vld [vmem:[#allocation12 + $0xf8] sm:$0xff]  ;;  %vm408_vm1 = vcmp.gt.f32.partialorder %v372_v6, 0.0 }
 0x1bc   : > { %v8097_v12 = vpop.f32.mrb[6].mxu1  ;;  %6246 = vmatprep.mubr.f32.mxu0 %v8092_v1  ;;  %vm406_vm15 = vcmp.gt.f32.partialorder %v370_v21, 0.0 }
 0x1bd   : > { %v8102_v18 = vpop.f32.mrb[7].mxu1  ;;  %2045 = vmatmul.mubr.f32.gmra.mrb[112].mxu1 %v7197_v19  ;;  %v2569_v19 = vsel %vm405_vm14, 1, %v7485_v2 }
 0x1be   : > { %2049 = vmatprep.mubr.f32.mxu1 %v1852_v10  ;;  %v8138_v10 = vld [vmem:[#allocation2 + $0x12c] sm:$0xff]  ;;  %2666 = vperm.xlu0 %7189, %v2569_v19  }
 0x1bf   : > { %6247 = vmatmul.mubr.f32.gmra.mrb[98].mxu0 %v8100_v16  ;;  %2651 = vperm.xlu1 %7190, %v2564_v31   ;;  %v7201_v31 = vld [vmem:[#allocation2 + $0x32] sm:$0xff] }
 0x1c0   : > { %v8109_v45 = vpop.f32.mrb[8].mxu1  ;;  %6249 = vmatprep.mubr.f32.mxu0 %v8104_v20 }
 0x1c1   : > { %v8114_v28 = vpop.f32.mrb[9].mxu1  ;;  %2050 = vmatmul.mubr.f32.gmra.mrb[114].mxu1 %v7198_v34 }
 0x1c2   : > { %2054 = vmatprep.mubr.f32.mxu1 %v7984_v50  ;;  %v8129_v50 = vld [vmem:[#allocation2 + $0x124] sm:$0xff] }
 0x1c3   : > { %6250 = vmatmul.mubr.f32.gmra.mrb[100].mxu0 %v8112_v24  ;;  %2657 = vperm.xlu1 %7190, %v2566_v48   ;;  %v2571_v48 = vsel %vm407_vm0, 1, %v7485_v2 }
 0x1c4   : > { %v8122_v39 = vpop.f32.mrb[10].mxu1  ;;  %6252 = vmatprep.mubr.f32.mxu0 %v8116_v49  ;;  %2672 = vperm.xlu0 %7189, %v2571_v48  }
 0x1c5   : > { %v8127_v46 = vpop.f32.mrb[11].mxu1  ;;  %2055 = vmatmul.mubr.f32.gmra.mrb[116].mxu1 %v7199_v47 }
 0x1c6   : > { %2059 = vmatprep.mubr.f32.mxu1 %v7987_v62  ;;  %v626_v62 = vld [vmem:[#allocation2 + $0x134] sm:$0xff] }
 0x1c7   : > { %6253 = vmatmul.mubr.f32.gmra.mrb[102].mxu0 %v8125_v61  ;;  %2663 = vperm.xlu1 %7190, %v2568_v11   ;;  %v1887_v11 = vld [vmem:[#allocation2 + $0x36] sm:$0xff] }
 0x1c8   : > { %v8135_v4 = vpop.f32.mrb[12].mxu1  ;;  %6255 = vmatprep.mubr.f32.mxu0 %v8129_v50 }
 0x1c9   : > { %v8140_v53 = vpop.f32.mrb[13].mxu1  ;;  %2060 = vmatmul.mubr.f32.gmra.mrb[118].mxu1 %v7200_v59  ;;  %v1886_v59 = vld [vmem:[#allocation2 + $0x2e] sm:$0xff] }
 0x1ca   : > { %2064 = vmatprep.mubr.f32.mxu1 %v7990_v63  ;;  %v2570_v63 = vsel %vm406_vm15, 1, %v7485_v2 }
 0x1cb   : > { %6256 = vmatmul.mubr.f32.gmra.mrb[104].mxu0 %v8138_v10  ;;  %2669 = vperm.xlu1 %7190, %v2570_v63   ;;  %v1888_v63 = vld [vmem:[#allocation2 + $0x3e] sm:$0xff] }
 0x1cc   : > { %v8146_v14 = vpop.f32.mrb[14].mxu1  ;;  %6258 = vmatprep.mubr.f32.mxu0 %v626_v62 }
 0x1cd   : > { %v8148_v34 = vpop.f32.mrb[15].mxu1  ;;  %2065 = vmatmul.mubr.f32.gmra.mrb[120].mxu1 %v7201_v31  ;;  %v374_v31 = vld [vmem:[#allocation12 + $0x118] sm:$0xff] }
 0x1ce   : > { %v899_v32 = vpop.f32.mrb[0].mxu0  ;;  %2069 = vmatprep.mubr.f32.mxu1 %v7996_v13  ;;  %v7202_v13 = vld [vmem:[#allocation2 + $0x3a] sm:$0xff]  ;;  %vm410_vm3 = vcmp.gt.f32.partialorder %v374_v31, 0.0 }
 0x1cf   : > { %v8153_v7 = vadd.f32 %v8066_v43, %v899_v32  ;;  %6259 = vmatmul.mubr.f32.gmra.mrb[106].mxu0 %v627_v33  ;;  %v901_v47 = vpop.f32.mrb[1].mxu0  ;;  %v2572_v43 = vsel %vm408_vm1, 1, %v7485_v2  ;;  %v2573_v33 = vsel %vm409_vm2, 1, %v7485_v2  ;;  %v2574_v48 = vsel %vm410_vm3, 1, %v7485_v2 }
 0x1d0   : > { %v8156_v55 = vpop.f32.mrb[16].mxu1  ;;  %6293 = vmatprep.mubr.f32.mxu0 %v1885_v29  ;;  %2675 = vperm.xlu1 %7190, %v2572_v43   ;;  %v7203_v47 = vld [vmem:[#allocation2 + $0x42] sm:$0xff]  ;;  %v7204_v43 = vld [vmem:[#allocation2 + $0x4a] sm:$0xff] }
 0x1d1   : > { %v8158_v62 = vpop.f32.mrb[17].mxu1  ;;  %2070 = vmatmul.mubr.f32.gmra.mrb[122].mxu1 %v7202_v13  ;;  %2678 = vperm.xlu0 %7189, %v2573_v33   ;;  %v1890_v13 = vld [vmem:[#allocation2 + $0x4e] sm:$0xff]  ;;  %v1892_v33 = vld [vmem:[#allocation2 + $0x5e] sm:$0xff] }
 0x1d2   : > { %v904_v19 = vpop.f32.mrb[2].mxu0  ;;  %2074 = vmatprep.mubr.f32.mxu1 %v7998_v15  ;;  %v1889_v15 = vld [vmem:[#allocation2 + $0x46] sm:$0xff] }
 0x1d3   : > { %v8163_v21 = vadd.f32 %v8061_v3, %v904_v19  ;;  %6294 = vmatmul.mubr.f32.vlgmr.msra.gmra.mrb[108].mxu0 %v1886_v59  ;;  %v906_v22 = vpop.f32.mrb[3].mxu0  ;;  %v1891_v19 = vld [vmem:[#allocation2 + $0x56] sm:$0xff] }
 0x1d4   : > { %v8166_v29 = vpop.f32.mrb[18].mxu1  ;;  %6296 = vmatprep.mubr.f32.mxu0 %v1887_v11  ;;  %2681 = vperm.xlu1 %7190, %v2574_v48  }
 0x1d5   : > { %v8168_v32 = vpop.f32.mrb[19].mxu1  ;;  %2075 = vmatmul.mubr.f32.gmra.mrb[124].mxu1 %v7203_v47  ;;  %v1893_v47 = vld [vmem:[#allocation2 + $0x66] sm:$0xff] }
 0x1d6   : > { %v909_v3 = vpop.f32.mrb[4].mxu0  ;;  %2079 = vmatprep.mubr.f32.mxu1 %v8005_v23 }
 0x1d7   : > { %v8173_v6 = vadd.f32 %v8078_v40, %v909_v3  ;;  %6297 = vmatmul.mubr.f32.gmra.mrb[110].mxu0 %v1888_v63  ;;  %v911_v54 = vpop.f32.mrb[5].mxu0  ;;  %v7205_v63 = vld [vmem:[#allocation2 + $0x52] sm:$0xff] }
 0x1d8   : > { %v8175_v59 = vpop.f32.mrb[20].mxu1  ;;  %6299 = vmatprep.mubr.f32.mxu0 %v1889_v15  ;;  %v1894_v3 = vld [vmem:[#allocation2 + $0x6e] sm:$0xff] }
 0x1d9   : > { %v8177_v11 = vpop.f32.mrb[21].mxu1  ;;  %2080 = vmatmul.mubr.f32.gmra.mrb[126].mxu1 %v7204_v43  ;;  %v1895_v43 = vld [vmem:[#allocation2 + $0x76] sm:$0xff] }
 0x1da   : > { %v914_v2 = vpop.f32.mrb[6].mxu0  ;;  %2084 = vmatprep.mubr.f32.mxu1 %v8007_v26 }
 0x1db   : > { %v8181_v23 = vadd.f32 %v8073_v5, %v914_v2  ;;  %6300 = vmatmul.mubr.f32.gmra.mrb[112].mxu0 %v1890_v13  ;;  %v916_v40 = vpop.f32.mrb[7].mxu0  ;;  %v7206_v13 = vld [vmem:[#allocation2 + $0x5a] sm:$0xff] }
 0x1dc   : > { %v8183_v22 = vpop.f32.mrb[22].mxu1  ;;  %6302 = vmatprep.mubr.f32.mxu0 %v1891_v19  ;;  %v1896_v40 = vld [vmem:[#allocation2 + $0x7e] sm:$0xff] }
 0x1dd   : > { %v8185_v31 = vpop.f32.mrb[23].mxu1  ;;  %2085 = vmatmul.mubr.f32.gmra.mrb[128].mxu1 %v7205_v63  ;;  %v7207_v63 = vld [vmem:[#allocation2 + $0x62] sm:$0xff] }
 0x1de   : > { %v919_v15 = vpop.f32.mrb[8].mxu0  ;;  %2089 = vmatprep.mubr.f32.mxu1 %v8013_v35 }
 0x1df   : > { %v8189_v48 = vadd.f32 %v8090_v58, %v919_v15  ;;  %6303 = vmatmul.mubr.f32.gmra.mrb[114].mxu0 %v1892_v33  ;;  %v921_v26 = vpop.f32.mrb[9].mxu0 }
 0x1e0   : > { %v8191_v5 = vpop.f32.mrb[24].mxu1  ;;  %6305 = vmatprep.mubr.f32.mxu0 %v1893_v47  ;;  %v1897_v47 = vld [vmem:[#allocation2 + $0x86] sm:$0xff] }
 0x1e1   : > { %v8193_v54 = vpop.f32.mrb[25].mxu1  ;;  %2090 = vmatmul.mubr.f32.gmra.mrb[130].mxu1 %v7206_v13 }
 0x1e2   : > { %v924_v19 = vpop.f32.mrb[10].mxu0  ;;  %2094 = vmatprep.mubr.f32.mxu1 %v8015_v25 }
 0x1e3   : > { %v8197_v2 = vadd.f32 %v8085_v56, %v924_v19  ;;  %6306 = vmatmul.mubr.f32.gmra.mrb[116].mxu0 %v1894_v3  ;;  %v926_v35 = vpop.f32.mrb[11].mxu0  ;;  %v1898_v3 = vld [vmem:[#allocation2 + $0x8e] sm:$0xff]  ;;  %v1899_v19 = vld [vmem:[#allocation2 + $0x96] sm:$0xff] }
 0x1e4   : > { %v8199_v58 = vpop.f32.mrb[26].mxu1  ;;  %6308 = vmatprep.mubr.f32.mxu0 %v1895_v43  ;;  %v7208_v43 = vld [vmem:[#allocation2 + $0x6a] sm:$0xff] }
 0x1e5   : > { %v8201_v33 = vpop.f32.mrb[27].mxu1  ;;  %2095 = vmatmul.mubr.f32.gmra.mrb[132].mxu1 %v7207_v63 }
 0x1e6   : > { %v929_v15 = vpop.f32.mrb[12].mxu0  ;;  %2099 = vmatprep.mubr.f32.mxu1 %v8021_v36 }
 0x1e7   : > { %v8205_v26 = vadd.f32 %v8102_v18, %v929_v15  ;;  %6309 = vmatmul.mubr.f32.gmra.mrb[118].mxu0 %v1896_v40  ;;  %v931_v25 = vpop.f32.mrb[13].mxu0  ;;  %v1900_v40 = vld [vmem:[#allocation2 + $0x9e] sm:$0xff] }
 0x1e8   : > { %v8207_v56 = vpop.f32.mrb[28].mxu1  ;;  %6311 = vmatprep.mubr.f32.mxu0 %v1897_v47  ;;  %v7209_v47 = vld [vmem:[#allocation2 + $0x72] sm:$0xff]  ;;  %v1901_v25 = vld [vmem:[#allocation2 + $0xa6] sm:$0xff] }
 0x1e9   : > { %v8209_v13 = vpop.f32.mrb[29].mxu1  ;;  %2100 = vmatmul.mubr.f32.gmra.mrb[134].mxu1 %v7208_v43 }
 0x1ea   : > { %v934_v35 = vpop.f32.mrb[14].mxu0  ;;  %2104 = vmatprep.mubr.f32.mxu1 %v8023_v37 }
 0x1eb   : > { %v8213_v63 = vadd.f32 %v8097_v12, %v934_v35  ;;  %6312 = vmatmul.mubr.f32.gmra.mrb[120].mxu0 %v1898_v3  ;;  %v936_v36 = vpop.f32.mrb[15].mxu0  ;;  %v1902_v3 = vld [vmem:[#allocation2 + $0xae] sm:$0xff] }
 0x1ec   : > { %v8215_v18 = vpop.f32.mrb[30].mxu1  ;;  %6314 = vmatprep.mubr.f32.mxu0 %v1899_v19  ;;  %v7210_v19 = vld [vmem:[#allocation2 + $0x7a] sm:$0xff] }
 0x1ed   : > { %11024 = vst [vmem:[#allocation21_spill] sm:$0xff] %v8215_v18  ;;  %v8217_v15 = vpop.f32.mrb[31].mxu1  ;;  %2105 = vmatmul.mubr.f32.gmra.mrb[136].mxu1 %v7209_v47  ;;  %v1903_v36 = vld [vmem:[#allocation2 + $0xb6] sm:$0xff] }
 0x1ee   : > { %v939_v0 = vpop.f32.mrb[16].mxu0  ;;  %2109 = vmatprep.mubr.f32.mxu1 %v8029_v51 }
 0x1ef   : > { %v8221_v43 = vadd.f32 %v8114_v28, %v939_v0  ;;  %6315 = vmatmul.mubr.f32.gmra.mrb[122].mxu0 %v1900_v40  ;;  %v941_v37 = vpop.f32.mrb[17].mxu0  ;;  %v1904_v28 = vld [vmem:[#allocation2 + $0xbe] sm:$0xff] }
 0x1f0   : > { %v8223_v12 = vpop.f32.mrb[32].mxu1  ;;  %6317 = vmatprep.mubr.f32.mxu0 %v1901_v25  ;;  %v7211_v25 = vld [vmem:[#allocation2 + $0x82] sm:$0xff] }
 0x1f1   : > { %11025 = vst [vmem:[#allocation22_spill] sm:$0xff] %v8223_v12  ;;  %v8225_v35 = vpop.f32.mrb[33].mxu1  ;;  %2110 = vmatmul.mubr.f32.gmra.mrb[138].mxu1 %v7210_v19  ;;  %v1905_v37 = vld [vmem:[#allocation2 + $0xc6] sm:$0xff] }
 0x1f2   : > { %v944_v18 = vpop.f32.mrb[18].mxu0  ;;  %2114 = vmatprep.mubr.f32.mxu1 %v8031_v52 }
 0x1f3   : > { %v8229_v47 = vadd.f32 %v8109_v45, %v944_v18  ;;  %6318 = vmatmul.mubr.f32.gmra.mrb[124].mxu0 %v1902_v3  ;;  %v946_v0 = vpop.f32.mrb[19].mxu0  ;;  %v1906_v18 = vld [vmem:[#allocation2 + $0xce] sm:$0xff] }
 0x1f4   : > { %v8231_v51 = vpop.f32.mrb[34].mxu1  ;;  %6320 = vmatprep.mubr.f32.mxu0 %v1903_v36  ;;  %v7212_v0 = vld [vmem:[#allocation2 + $0x8a] sm:$0xff]  ;;  %v1907_v36 = vld [vmem:[#allocation2 + $0xd6] sm:$0xff] }
 0x1f5   : > { %11026 = vst [vmem:[#allocation23_spill] sm:$0xff] %v8231_v51  ;;  %v8233_v40 = vpop.f32.mrb[35].mxu1  ;;  %2115 = vmatmul.mubr.f32.gmra.mrb[140].mxu1 %v7211_v25 }
 0x1f6   : > { %v949_v12 = vpop.f32.mrb[20].mxu0  ;;  %2119 = vmatprep.mubr.f32.mxu1 %v8037_v9 }
 0x1f7   : > { %v8237_v19 = vadd.f32 %v8127_v46, %v949_v12  ;;  %v951_v52 = vpop.f32.mrb[21].mxu0  ;;  %6321 = vmatmul.mubr.f32.gmra.mrb[126].mxu0 %v1904_v28  ;;  %v1908_v28 = vld [vmem:[#allocation2 + $0xde] sm:$0xff] }
 0x1f8   : > { %v1389_v45 = vpop.f32.mrb[36].mxu1  ;;  %6323 = vmatprep.mubr.f32.mxu0 %v1905_v37  ;;  %v7213_v52 = vld [vmem:[#allocation2 + $0x92] sm:$0xff] }
 0x1f9   : > { %v1391_v3 = vpop.f32.mrb[37].mxu1  ;;  %2120 = vmatmul.mubr.f32.gmra.mrb[142].mxu1 %v7212_v0  ;;  %v8240_v51 = vadd.f32 %v1389_v45, %v8153_v7 }
 0x1fa   : > { %v954_v25 = vpop.f32.mrb[22].mxu0  ;;  %2124 = vmatprep.mubr.f32.mxu1 %v8039_v44  ;;  %v1909_v3 = vld [vmem:[#allocation2 + $0xe6] sm:$0xff] }
 0x1fb   : > { %v8244_v9 = vadd.f32 %v8122_v39, %v954_v25  ;;  %v956_v46 = vpop.f32.mrb[23].mxu0  ;;  %6324 = vmatmul.mubr.f32.gmra.mrb[128].mxu0 %v1906_v18  ;;  %v1910_v18 = vld [vmem:[#allocation2 + $0xee] sm:$0xff]  ;;  %v7214_v25 = vld [vmem:[#allocation2 + $0x9a] sm:$0xff] }
 0x1fc   : > { %v1394_v12 = vpop.f32.mrb[38].mxu1  ;;  %6326 = vmatprep.mubr.f32.mxu0 %v1907_v36  ;;  %v1911_v46 = vld [vmem:[#allocation2 + $0xf6] sm:$0xff] }
 0x1fd   : > { %v1396_v37 = vpop.f32.mrb[39].mxu1  ;;  %2125 = vmatmul.mubr.f32.gmra.mrb[144].mxu1 %v7213_v52  ;;  %v8247_v0 = vadd.f32 %v1394_v12, %v8163_v21 }
 0x1fe   : > { %v959_v7 = vpop.f32.mrb[24].mxu0  ;;  %2129 = vmatprep.mubr.f32.mxu1 %v8045_v17 }
 0x1ff   : > { %v8251_v44 = vadd.f32 %v8140_v53, %v959_v7  ;;  %v961_v39 = vpop.f32.mrb[25].mxu0  ;;  %6327 = vmatmul.mubr.f32.gmra.mrb[130].mxu0 %v1908_v28  ;;  %v1912_v28 = vld [vmem:[#allocation2 + $0xfe] sm:$0xff]  ;;  %v1913_v7 = vld [vmem:[#allocation2 + $0x106] sm:$0xff] }
 0x200   : > { %v1399_v45 = vpop.f32.mrb[40].mxu1  ;;  %6329 = vmatprep.mubr.f32.mxu0 %v1909_v3  ;;  %v7215_v3 = vld [vmem:[#allocation2 + $0xa2] sm:$0xff] }
 0x201   : > { %v1401_v36 = vpop.f32.mrb[41].mxu1  ;;  %2130 = vmatmul.mubr.f32.gmra.mrb[146].mxu1 %v7214_v25  ;;  %v8254_v37 = vadd.f32 %v1399_v45, %v8173_v6  ;;  %v7216_v25 = vld [vmem:[#allocation2 + $0xaa] sm:$0xff] }
 0x202   : > { %v964_v21 = vpop.f32.mrb[26].mxu0  ;;  %2134 = vmatprep.mubr.f32.mxu1 %v8047_v8 }
 0x203   : > { %v8258_v17 = vadd.f32 %v8135_v4, %v964_v21  ;;  %v966_v53 = vpop.f32.mrb[27].mxu0  ;;  %6330 = vmatmul.mubr.f32.gmra.mrb[132].mxu0 %v1910_v18  ;;  %v1914_v18 = vld [vmem:[#allocation2 + $0x10e] sm:$0xff] }
 0x204   : > { %v1404_v12 = vpop.f32.mrb[42].mxu1  ;;  %6332 = vmatprep.mubr.f32.mxu0 %v1911_v46  ;;  %v1915_v46 = vld [vmem:[#allocation2 + $0x116] sm:$0xff] }
 0x205   : > { %v1406_v52 = vpop.f32.mrb[43].mxu1  ;;  %2135 = vmatmul.mubr.f32.gmra.mrb[148].mxu1 %v7215_v3  ;;  %v8261_v39 = vadd.f32 %v1404_v12, %v8181_v23  ;;  %v1916_v12 = vld [vmem:[#allocation2 + $0x11e] sm:$0xff]  ;;  %v1917_v3 = vld [vmem:[#allocation2 + $0x126] sm:$0xff] }
 0x206   : > { %v969_v6 = vpop.f32.mrb[28].mxu0  ;;  %2139 = vmatprep.mubr.f32.mxu1 %v8054_v27  ;;  %v7217_v52 = vld [vmem:[#allocation2 + $0xb2] sm:$0xff] }
 0x207   : > { %v8265_v8 = vadd.f32 %v8148_v34, %v969_v6  ;;  %v971_v4 = vpop.f32.mrb[29].mxu0  ;;  %6333 = vmatmul.mubr.f32.gmra.mrb[134].mxu0 %v1912_v28 }
 0x208   : > { %v1409_v45 = vpop.f32.mrb[44].mxu1  ;;  %6335 = vmatprep.mubr.f32.mxu0 %v1913_v7  ;;  %v1918_v4 = vld [vmem:[#allocation2 + $0x12e] sm:$0xff] }
 0x209   : > { %v1411_v36 = vpop.f32.mrb[45].mxu1  ;;  %2140 = vmatmul.mubr.f32.gmra.mrb[150].mxu1 %v7216_v25  ;;  %v8268_v21 = vadd.f32 %v1409_v45, %v8189_v48 }
 0x20a   : > { %v974_v23 = vpop.f32.mrb[30].mxu0  ;;  %2144 = vmatprep.mubr.f32.mxu1 %v8056_v42  ;;  %v1919_v36 = vld [vmem:[#allocation2 + $0x136] sm:$0xff] }
 0x20b   : > { %v8272_v27 = vadd.f32 %v8146_v14, %v974_v23  ;;  %v976_v34 = vpop.f32.mrb[31].mxu0  ;;  %6336 = vmatmul.mubr.f32.gmra.mrb[136].mxu0 %v1914_v18  ;;  %v7218_v18 = vld [vmem:[#allocation2 + $0xba] sm:$0xff] }
 0x20c   : > { %v1414_v53 = vpop.f32.mrb[46].mxu1  ;;  %6338 = vmatprep.mubr.f32.mxu0 %v1915_v46  ;;  %v1920_v23 = vld [vmem:[#allocation2 + $0x13e] sm:$0xff] }
 0x20d   : > { %v1416_v28 = vpop.f32.mrb[47].mxu1  ;;  %2145 = vmatmul.mubr.f32.gmra.mrb[152].mxu1 %v7217_v52  ;;  %v8275_v7 = vadd.f32 %v1414_v53, %v8197_v2  ;;  %v7219_v53 = vld [vmem:[#allocation2 + $0xc2] sm:$0xff] }
 0x20e   : > { %v979_v48 = vpop.f32.mrb[32].mxu0  ;;  %2149 = vmatprep.mubr.f32.mxu1 %v8064_v30 }
 0x20f   : > { %v981_v6 = vpop.f32.mrb[33].mxu0  ;;  %6339 = vmatmul.mubr.f32.gmra.mrb[138].mxu0 %v1916_v12  ;;  %v8279_v42 = vadd.f32 %v8158_v62, %v979_v48 }
 0x210   : > { %v1419_v14 = vpop.f32.mrb[48].mxu1  ;;  %6341 = vmatprep.mubr.f32.mxu0 %v1917_v3  ;;  %v7220_v3 = vld [vmem:[#allocation2 + $0xca] sm:$0xff] }
 0x211   : > { %v1421_v45 = vpop.f32.mrb[49].mxu1  ;;  %2150 = vmatmul.mubr.f32.gmra.mrb[154].mxu1 %v7218_v18  ;;  %v8282_v25 = vadd.f32 %v1419_v14, %v8205_v26 }
 0x212   : > { %v984_v2 = vpop.f32.mrb[34].mxu0  ;;  %2154 = vmatprep.mubr.f32.mxu1 %v8068_v60  ;;  %v7221_v45 = vld [vmem:[#allocation2 + $0xd2] sm:$0xff] }
 0x213   : > { %v986_v46 = vpop.f32.mrb[35].mxu0  ;;  %6342 = vmatmul.mubr.f32.gmra.mrb[140].mxu0 %v1918_v4  ;;  %v8286_v30 = vadd.f32 %v8156_v55, %v984_v2 }
 0x214   : > { %v1424_v62 = vpop.f32.mrb[50].mxu1  ;;  %6344 = vmatprep.mubr.f32.mxu0 %v1919_v36  ;;  %v7222_v46 = vld [vmem:[#allocation2 + $0xda] sm:$0xff] }
 0x215   : > { %v1426_v34 = vpop.f32.mrb[51].mxu1  ;;  %2155 = vmatmul.mubr.f32.gmra.mrb[156].mxu1 %v7219_v53  ;;  %v8289_v12 = vadd.f32 %v1424_v62, %v8213_v63  ;;  %v7223_v53 = vld [vmem:[#allocation2 + $0xe2] sm:$0xff] }
 0x216   : > { %v989_v28 = vpop.f32.mrb[36].mxu0  ;;  %2159 = vmatprep.mubr.f32.mxu1 %v8076_v38 }
 0x217   : > { %v991_v26 = vpop.f32.mrb[37].mxu0  ;;  %6345 = vmatmul.mubr.f32.gmra.mrb[142].mxu0 %v1920_v23  ;;  %v8293_v60 = vadd.f32 %v8168_v32, %v989_v28 }
 0x218   : > { %v1429_v52 = vpop.f32.mrb[52].mxu1  ;;  %v1842_v26 = vld [vmem:[#allocation2 + $0xea] sm:$0xff] }
 0x219   : > { %v1431_v55 = vpop.f32.mrb[53].mxu1  ;;  %2160 = vmatmul.mubr.f32.gmra.mrb[158].mxu1 %v7220_v3  ;;  %v8296_v48 = vadd.f32 %v1429_v52, %v8221_v43 }
 0x21a   : > { %v994_v6 = vpop.f32.mrb[38].mxu0  ;;  %2164 = vmatprep.mubr.f32.mxu1 %v8080_v41 }
 0x21b   : > { %v996_v63 = vpop.f32.mrb[39].mxu0  ;;  %v8300_v14 = vadd.f32 %v8166_v29, %v994_v6  ;;  %v1843_v6 = vld [vmem:[#allocation2 + $0xf2] sm:$0xff] }
 0x21c   : > { %v1434_v38 = vpop.f32.mrb[54].mxu1 }
 0x21d   : > { %v1436_v4 = vpop.f32.mrb[55].mxu1  ;;  %2165 = vmatmul.mubr.f32.gmra.mrb[160].mxu1 %v7221_v45  ;;  %v8303_v32 = vadd.f32 %v1434_v38, %v8229_v47  ;;  %v1844_v45 = vld [vmem:[#allocation2 + $0xfa] sm:$0xff] }
 0x21e   : > { %v999_v18 = vpop.f32.mrb[40].mxu0  ;;  %2169 = vmatprep.mubr.f32.mxu1 %v8088_v57 }
 0x21f   : > { %v1001_v36 = vpop.f32.mrb[41].mxu0  ;;  %v8307_v43 = vadd.f32 %v8177_v11, %v999_v18 }
 0x220   : > { %v1439_v2 = vpop.f32.mrb[56].mxu1 }
 0x221   : > { %v1441_v41 = vpop.f32.mrb[57].mxu1  ;;  %2170 = vmatmul.mubr.f32.gmra.mrb[162].mxu1 %v7222_v46  ;;  %v8310_v29 = vadd.f32 %v1439_v2, %v8237_v19 }
 0x222   : > { %v1004_v62 = vpop.f32.mrb[42].mxu0  ;;  %2174 = vmatprep.mubr.f32.mxu1 %v8092_v1  ;;  %v1845_v41 = vld [vmem:[#allocation2 + $0x102] sm:$0xff] }
 0x223   : > { %v1006_v23 = vpop.f32.mrb[43].mxu0  ;;  %v8314_v47 = vadd.f32 %v8175_v59, %v1004_v62 }
 0x224   : > { %v1444_v34 = vpop.f32.mrb[58].mxu1 }
 0x225   : > { %v1446_v57 = vpop.f32.mrb[59].mxu1  ;;  %2175 = vmatmul.mubr.f32.gmra.mrb[164].mxu1 %v7223_v53  ;;  %v8317_v11 = vadd.f32 %v1444_v34, %v8244_v9  ;;  %v1846_v34 = vld [vmem:[#allocation2 + $0x10a] sm:$0xff] }
 0x226   : > { %v1009_v28 = vpop.f32.mrb[44].mxu0  ;;  %2179 = vmatprep.mubr.f32.mxu1 %v8100_v16 }
 0x227   : > { %v1011_v19 = vpop.f32.mrb[45].mxu0  ;;  %v8321_v52 = vadd.f32 %v8185_v31, %v1009_v28 }
 0x228   : > { %v1449_v1 = vpop.f32.mrb[60].mxu1 }
 0x229   : > { %v1451_v55 = vpop.f32.mrb[61].mxu1  ;;  %2180 = vmatmul.mubr.f32.gmra.mrb[166].mxu1 %v1842_v26  ;;  %v8324_v59 = vadd.f32 %v1449_v1, %v8251_v44  ;;  %v1847_v26 = vld [vmem:[#allocation2 + $0x112] sm:$0xff] }
 0x22a   : > { %v1014_v3 = vpop.f32.mrb[46].mxu0  ;;  %2184 = vmatprep.mubr.f32.mxu1 %v8104_v20 }
 0x22b   : > { %v1016_v9 = vpop.f32.mrb[47].mxu0  ;;  %v8328_v63 = vadd.f32 %v8183_v22, %v1014_v3 }
 0x22c   : > { %v1454_v16 = vpop.f32.mrb[62].mxu1 }
 0x22d   : > { %v1456_v38 = vpop.f32.mrb[63].mxu1  ;;  %2185 = vmatmul.mubr.f32.gmra.mrb[168].mxu1 %v1843_v6  ;;  %v8331_v31 = vadd.f32 %v1454_v16, %v8258_v17 }
 0x22e   : > { %v1019_v4 = vpop.f32.mrb[48].mxu0  ;;  %2189 = vmatprep.mubr.f32.mxu1 %v8112_v24 }
 0x22f   : > { %v1021_v44 = vpop.f32.mrb[49].mxu0  ;;  %v8335_v18 = vadd.f32 %v8193_v54, %v1019_v4 }
 0x230   : > { %v1459_v20 = vpop.f32.mrb[64].mxu1 }
 0x231   : > { %v1461_v36 = vpop.f32.mrb[65].mxu1  ;;  %2190 = vmatmul.mubr.f32.gmra.mrb[170].mxu1 %v1844_v45  ;;  %v8338_v22 = vadd.f32 %v1459_v20, %v8265_v8 }
 0x232   : > { %v1024_v2 = vpop.f32.mrb[50].mxu0  ;;  %2194 = vmatprep.mubr.f32.mxu1 %v8116_v49 }
 0x233   : > { %v1026_v17 = vpop.f32.mrb[51].mxu0  ;;  %v8342_v46 = vadd.f32 %v8191_v5, %v1024_v2 }
 0x234   : > { %v1464_v24 = vpop.f32.mrb[66].mxu1 }
 0x235   : > { %v1466_v62 = vpop.f32.mrb[67].mxu1  ;;  %2195 = vmatmul.mubr.f32.gmra.mrb[172].mxu1 %v1845_v41  ;;  %v8345_v54 = vadd.f32 %v1464_v24, %v8272_v27  ;;  %v11027_v24 = vld [vmem:[#allocation21_spill] sm:$0xff] }
 0x236   : > { %v1029_v23 = vpop.f32.mrb[52].mxu0  ;;  %2199 = vmatprep.mubr.f32.mxu1 %v8125_v61 }
 0x237   : > { %v1031_v8 = vpop.f32.mrb[53].mxu0  ;;  %v8349_v57 = vadd.f32 %v8201_v33, %v1029_v23 }
 0x238   : > { %v1469_v49 = vpop.f32.mrb[68].mxu1 }
 0x239   : > { %v8352_v53 = vadd.f32 %v1469_v49, %v8279_v42  ;;  %v1471_v5 = vpop.f32.mrb[69].mxu1  ;;  %2200 = vmatmul.mubr.f32.gmra.mrb[174].mxu1 %v1846_v34  ;;  %v1848_v42 = vld [vmem:[#allocation2 + $0x11a] sm:$0xff] }
 0x23a   : > { %v1034_v28 = vpop.f32.mrb[54].mxu0  ;;  %2204 = vmatprep.mubr.f32.mxu1 %v8129_v50 }
 0x23b   : > { %v1036_v27 = vpop.f32.mrb[55].mxu0  ;;  %v8356_v19 = vadd.f32 %v8199_v58, %v1034_v28 }
 0x23c   : > { %v1474_v61 = vpop.f32.mrb[70].mxu1  ;;  %v11028_v27 = vld [vmem:[#allocation22_spill] sm:$0xff] }
 0x23d   : > { %v8359_v1 = vadd.f32 %v1474_v61, %v8286_v30  ;;  %v1476_v33 = vpop.f32.mrb[71].mxu1  ;;  %2205 = vmatmul.mubr.f32.gmra.mrb[176].mxu1 %v1847_v26 }
 0x23e   : > { %v1039_v55 = vpop.f32.mrb[56].mxu0  ;;  %2209 = vmatprep.mubr.f32.mxu1 %v8138_v10 }
 0x23f   : > { %v1041_v3 = vpop.f32.mrb[57].mxu0  ;;  %v8363_v6 = vadd.f32 %v8209_v13, %v1039_v55 }
 0x240   : > { %v1479_v50 = vpop.f32.mrb[72].mxu1 }
 0x241   : > { %v8366_v9 = vadd.f32 %v1479_v50, %v8293_v60  ;;  %v1481_v58 = vpop.f32.mrb[73].mxu1  ;;  %2210 = vmatmul.mubr.f32.gmra.mrb[178].mxu1 %v1848_v42 }
 0x242   : > { %v1044_v16 = vpop.f32.mrb[58].mxu0 }
 0x243   : > { %v1046_v38 = vpop.f32.mrb[59].mxu0  ;;  %v8369_v30 = vadd.f32 %v8207_v56, %v1044_v16 }
 0x244   : > { %v1484_v4 = vpop.f32.mrb[74].mxu1  ;;  %v11029_v38 = vld [vmem:[#allocation23_spill] sm:$0xff] }
 0x245   : > { %v8372_v45 = vadd.f32 %v1484_v4, %v8300_v14  ;;  %v1486_v10 = vpop.f32.mrb[75].mxu1 }
 0x246   : > { %v1049_v44 = vpop.f32.mrb[60].mxu0 }
 0x247   : > { %v1051_v20 = vpop.f32.mrb[61].mxu0  ;;  %v8375_v13 = vadd.f32 %v8217_v15, %v1049_v44 }
 0x248   : > { %v1489_v36 = vpop.f32.mrb[76].mxu1 }
 0x249   : > { %v8378_v60 = vadd.f32 %v1489_v36, %v8307_v43  ;;  %v1491_v2 = vpop.f32.mrb[77].mxu1 }
 0x24a   : > { %v1054_v41 = vpop.f32.mrb[62].mxu0 }
 0x24b   : > { %v1056_v17 = vpop.f32.mrb[63].mxu0  ;;  %v8381_v56 = vadd.f32 %v11027_v24, %v1054_v41 }
 0x24c   : > { %v1494_v62 = vpop.f32.mrb[78].mxu1 }
 0x24d   : > { %v8384_v14 = vadd.f32 %v1494_v62, %v8314_v47  ;;  %v1496_v23 = vpop.f32.mrb[79].mxu1 }
 0x24e   : > { %v1059_v34 = vpop.f32.mrb[64].mxu0 }
 0x24f   : > { %v1061_v8 = vpop.f32.mrb[65].mxu0  ;;  %v8387_v15 = vadd.f32 %v8225_v35, %v1059_v34 }
 0x250   : > { %v1499_v49 = vpop.f32.mrb[80].mxu1 }
 0x251   : > { %v8390_v43 = vadd.f32 %v1499_v49, %v8321_v52  ;;  %v1501_v5 = vpop.f32.mrb[81].mxu1 }
 0x252   : > { %v1064_v28 = vpop.f32.mrb[66].mxu0 }
 0x253   : > { %v1066_v26 = vpop.f32.mrb[67].mxu0  ;;  %v8393_v61 = vadd.f32 %v11028_v27, %v1064_v28 }
 0x254   : > { %v1504_v33 = vpop.f32.mrb[82].mxu1 }
 0x255   : > { %v8396_v47 = vadd.f32 %v1504_v33, %v8328_v63  ;;  %v1506_v55 = vpop.f32.mrb[83].mxu1 }
 0x256   : > { %v1069_v42 = vpop.f32.mrb[68].mxu0 }
 0x257   : > { %v8399_v3 = vadd.f32 %v8233_v40, %v1069_v42  ;;  %v1071_v35 = vpop.f32.mrb[69].mxu0 }
 0x258   : > { %v1509_v50 = vpop.f32.mrb[84].mxu1 }
 0x259   : > { %v8402_v52 = vadd.f32 %v1509_v50, %v8335_v18  ;;  %v1511_v58 = vpop.f32.mrb[85].mxu1 }
 0x25a   : > { %v1074_v16 = vpop.f32.mrb[70].mxu0 }
 0x25b   : > { %v8405_v4 = vadd.f32 %v11029_v38, %v1074_v16  ;;  %v1076_v10 = vpop.f32.mrb[71].mxu0 }
 0x25c   : > { %v1514_v44 = vpop.f32.mrb[86].mxu1 }
 0x25d   : > { %v8408_v63 = vadd.f32 %v1514_v44, %v8342_v46  ;;  %v1516_v20 = vpop.f32.mrb[87].mxu1 }
 0x25e   : > { %v6209_v36 = vpop.f32.mrb[72].mxu0 }
 0x25f   : > { %v8411_v40 = vadd.f32 %v6209_v36, %v8247_v0  ;;  %v1634_v2 = vpop.f32.mrb[73].mxu0 }
 0x260   : > { %v1519_v41 = vpop.f32.mrb[88].mxu1  ;;  %v8414_v18 = vadd.f32 %v1634_v2, %v8240_v51 }
 0x261   : > { %v8417_v17 = vadd.f32 %v1519_v41, %v8349_v57  ;;  %v1521_v24 = vpop.f32.mrb[89].mxu1 }
 0x262   : > { %v6212_v62 = vpop.f32.mrb[74].mxu0 }
 0x263   : > { %v8420_v23 = vadd.f32 %v6212_v62, %v8261_v39  ;;  %v1644_v46 = vpop.f32.mrb[75].mxu0 }
 0x264   : > { %v1524_v34 = vpop.f32.mrb[90].mxu1  ;;  %v8423_v8 = vadd.f32 %v1644_v46, %v8254_v37 }
 0x265   : > { %v8426_v0 = vadd.f32 %v1524_v34, %v8356_v19  ;;  %v1526_v49 = vpop.f32.mrb[91].mxu1 }
 0x266   : > { %v6215_v5 = vpop.f32.mrb[76].mxu0 }
 0x267   : > { %v8429_v51 = vadd.f32 %v6215_v5, %v8275_v7  ;;  %v1654_v57 = vpop.f32.mrb[77].mxu0 }
 0x268   : > { %v1529_v28 = vpop.f32.mrb[92].mxu1  ;;  %v8432_v26 = vadd.f32 %v1654_v57, %v8268_v21 }
 0x269   : > { %v8435_v39 = vadd.f32 %v1529_v28, %v8363_v6  ;;  %v1531_v27 = vpop.f32.mrb[93].mxu1 }
 0x26a   : > { %v6218_v33 = vpop.f32.mrb[78].mxu0 }
 0x26b   : > { %v8438_v37 = vadd.f32 %v6218_v33, %v8289_v12  ;;  %v1664_v19 = vpop.f32.mrb[79].mxu0 }
 0x26c   : > { %v1534_v55 = vpop.f32.mrb[94].mxu1  ;;  %v8441_v42 = vadd.f32 %v1664_v19, %v8282_v25 }
 0x26d   : > { %v8444_v7 = vadd.f32 %v1534_v55, %v8369_v30  ;;  %v1536_v35 = vpop.f32.mrb[95].mxu1 }
 0x26e   : > { %v6221_v50 = vpop.f32.mrb[80].mxu0 }
 0x26f   : > { %v8447_v21 = vadd.f32 %v6221_v50, %v8303_v32  ;;  %v1674_v6 = vpop.f32.mrb[81].mxu0 }
 0x270   : > { %v1539_v58 = vpop.f32.mrb[96].mxu1  ;;  %v8450_v16 = vadd.f32 %v1674_v6, %v8296_v48 }
 0x271   : > { %v8453_v12 = vadd.f32 %v1539_v58, %v8375_v13  ;;  %v1541_v38 = vpop.f32.mrb[97].mxu1 }
 0x272   : > { %v6224_v10 = vpop.f32.mrb[82].mxu0 }
 0x273   : > { %v8456_v25 = vadd.f32 %v6224_v10, %v8317_v11  ;;  %v1684_v30 = vpop.f32.mrb[83].mxu0 }
 0x274   : > { %v1544_v44 = vpop.f32.mrb[98].mxu1  ;;  %v8459_v20 = vadd.f32 %v1684_v30, %v8310_v29 }
 0x275   : > { %v8462_v32 = vadd.f32 %v1544_v44, %v8381_v56  ;;  %v1546_v36 = vpop.f32.mrb[99].mxu1 }
 0x276   : > { %v6227_v2 = vpop.f32.mrb[84].mxu0 }
 0x277   : > { %v8465_v48 = vadd.f32 %v6227_v2, %v8331_v31  ;;  %v1694_v13 = vpop.f32.mrb[85].mxu0 }
 0x278   : > { %v1549_v41 = vpop.f32.mrb[100].mxu1  ;;  %v8468_v24 = vadd.f32 %v1694_v13, %v8324_v59 }
 0x279   : > { %v8471_v11 = vadd.f32 %v1549_v41, %v8387_v15  ;;  %v1551_v62 = vpop.f32.mrb[101].mxu1 }
 0x27a   : > { %v6230_v46 = vpop.f32.mrb[86].mxu0 }
 0x27b   : > { %v8474_v29 = vadd.f32 %v6230_v46, %v8345_v54  ;;  %v1704_v56 = vpop.f32.mrb[87].mxu0 }
 0x27c   : > { %v1554_v34 = vpop.f32.mrb[102].mxu1  ;;  %v8477_v49 = vadd.f32 %v1704_v56, %v8338_v22  ;;  %v3411_v56 = vld [vmem:[#allocation9 + $0x288] sm:$0xff] }
 0x27d   : > { %v8480_v31 = vadd.f32 %v1554_v34, %v8393_v61  ;;  %v1556_v5 = vpop.f32.mrb[103].mxu1  ;;  %v3378_v34 = vld [vmem:[#allocation9 + $0x180] sm:$0xff] }
 0x27e   : > { %v6233_v57 = vpop.f32.mrb[88].mxu0 }
 0x27f   : > { %v8483_v59 = vadd.f32 %v6233_v57, %v8359_v1  ;;  %v1714_v15 = vpop.f32.mrb[89].mxu0 }
 0x280   : > { %v1559_v28 = vpop.f32.mrb[104].mxu1  ;;  %v8486_v27 = vadd.f32 %v1714_v15, %v8352_v53  ;;  %v3379_v15 = vld [vmem:[#allocation9 + $0x188] sm:$0xff] }
 0x281   : > { %v8489_v54 = vadd.f32 %v1559_v28, %v8399_v3  ;;  %v1561_v33 = vpop.f32.mrb[105].mxu1 }
 0x282   : > { %v6236_v19 = vpop.f32.mrb[90].mxu0  ;;  %v6846_v33 = vpack.c.bf16 %v3379_v15, %v3378_v34 }
 0x283   : > { %v8492_v22 = vadd.f32 %v6236_v19, %v8372_v45  ;;  %v1724_v61 = vpop.f32.mrb[91].mxu0 }
 0x284   : > { %v1564_v55 = vpop.f32.mrb[106].mxu1  ;;  %v8495_v35 = vadd.f32 %v1724_v61, %v8366_v9  ;;  %6847 = vmatpush1.bf16.msra.mxu0 %v6846_v33  ;;  %v3380_v61 = vld [vmem:[#allocation9 + $0x190] sm:$0xff] }
 0x285   : > { %v1565_v1 = vadd.f32 %v1564_v55, %v8405_v4  ;;  %v1566_v50 = vpop.f32.mrb[107].mxu1  ;;  %v3381_v55 = vld [vmem:[#allocation9 + $0x198] sm:$0xff] }
 0x286   : > { %v6239_v6 = vpop.f32.mrb[92].mxu0 }
 0x287   : > { %v8499_v53 = vadd.f32 %v6239_v6, %v8384_v14  ;;  %v1734_v58 = vpop.f32.mrb[93].mxu0  ;;  %v11030_v6 = vmov 0.0|0.0  }
 0x288   : > { %v8502_v3 = vadd.f32 %v1734_v58, %v8378_v60  ;;  %v8504_v38 = vpop.f32.mrb[108].mxu1  ;;  %6848 = vmatprep.subr.bf16.mxu0 %v11030_v6  ;;  %v6849_v58 = vpack.c.bf16 %v3381_v55, %v3380_v61 }
 0x289   : > { %v2038_v45 = vpop.f32.mrb[109].mxu1 }
 0x28a   : > { %v6242_v10 = vpop.f32.mrb[94].mxu0  ;;  %6850 = vmatpush1.bf16.msra.mxu0 %v6849_v58 }
 0x28b   : > { %v8507_v30 = vadd.f32 %v6242_v10, %v8396_v47  ;;  %v1744_v9 = vpop.f32.mrb[95].mxu0  ;;  %v3410_v47 = vld [vmem:[#allocation9 + $0x280] sm:$0xff]  ;;  %6851 = vmatprep.subr.bf16.mxu0 %v11030_v6 }
 0x28c   : > { %v8510_v44 = vadd.f32 %v1744_v9, %v8390_v43  ;;  %v2041_v4 = vpop.f32.mrb[110].mxu1  ;;  %v6893_v57 = vpack.c.bf16 %v3411_v56, %v3410_v47 }
 0x28d   : > { %v2043_v36 = vpop.f32.mrb[111].mxu1 }
 0x28e   : > { %v6245_v2 = vpop.f32.mrb[96].mxu0  ;;  %6894 = vmatprep.subr.bf16.mxu1 %v6893_v57 }
 0x28f   : > { %v8513_v14 = vadd.f32 %v6245_v2, %v8408_v63  ;;  %v1754_v13 = vpop.f32.mrb[97].mxu0  ;;  %6896 = vmatpush3.bf16.msra.mxu1 %v6893_v57  ;;  %v8552_v57 = vpop.permute.xlu1 %2582 }
 0x290   : > { %v8516_v60 = vadd.f32 %v1754_v13, %v8402_v52  ;;  %v8518_v41 = vpop.f32.mrb[112].mxu1  ;;  %11032 = vst [vmem:[#allocation22_spill] sm:$0xff] %v8552_v57  ;;  %vm2685_vm6 = vcmp.eq.s32.totalorder %v8552_v57, 1  ;;  %v3405_v57 = vld [vmem:[#allocation9 + $0x258] sm:$0xff] }
 0x291   : > { %v2048_v62 = vpop.f32.mrb[113].mxu1 }
 0x292   : > { %v6248_v46 = vpop.f32.mrb[98].mxu0 }
 0x293   : > { %v8521_v43 = vadd.f32 %v6248_v46, %v8426_v0  ;;  %v1764_v5 = vpop.f32.mrb[99].mxu0  ;;  %v8542_v46 = vpop.permute.xlu0 %2576 }
 0x294   : > { %v8524_v63 = vadd.f32 %v1764_v5, %v8417_v17  ;;  %v2051_v28 = vpop.f32.mrb[114].mxu1  ;;  %11031 = vst [vmem:[#allocation21_spill] sm:$0xff] %v8542_v46  ;;  %v8563_v58 = vpop.permute.xlu1 %2585  ;;  %vm2683_vm5 = vcmp.eq.s32.totalorder %v8542_v46, 1 }
 0x295   : > { %v2053_v52 = vpop.f32.mrb[115].mxu1  ;;  %11035 = vst [vmem:[#allocation25_spill] sm:$0xff] %v8563_v58  ;;  %vm2686_vm7 = vcmp.eq.s32.totalorder %v8563_v58, 1  ;;  %v3424_v58 = vld [vmem:[#allocation9 + $0x2f0] sm:$0xff] }
 0x296   : > { %v6251_v19 = vpop.f32.mrb[100].mxu0 }
 0x297   : > { %v8527_v50 = vadd.f32 %v6251_v19, %v8444_v7  ;;  %v1774_v0 = vpop.f32.mrb[101].mxu0  ;;  %v8556_v52 = vpop.permute.xlu0 %2579 }
 0x298   : > { %v8531_v45 = vadd.f32 %v1774_v0, %v8435_v39  ;;  %v8533_v17 = vpop.f32.mrb[116].mxu1  ;;  %11034 = vst [vmem:[#allocation24_spill] sm:$0xff] %v8556_v52  ;;  %vm2684_vm4 = vcmp.eq.s32.totalorder %v8556_v52, 1 }
 0x299   : > { %v2058_v10 = vpop.f32.mrb[117].mxu1 }
 0x29a   : > { %v6254_v9 = vpop.f32.mrb[102].mxu0  ;;  %v8565_v10 = vld [vmem:[#allocation7] ss:$0 sm:$0xff] }
 0x29b   : > { %v8536_v36 = vadd.f32 %v6254_v9, %v8462_v32  ;;  %v1784_v2 = vpop.f32.mrb[103].mxu0 }
 0x29c   : > { %v8540_v7 = vadd.f32 %v1784_v2, %v8453_v12  ;;  %v2061_v13 = vpop.f32.mrb[118].mxu1 }
 0x29d   : > { %v2063_v62 = vpop.f32.mrb[119].mxu1 }
 0x29e   : > { %v6257_v39 = vpop.f32.mrb[104].mxu0 }
 0x29f   : > { %v8545_v47 = vadd.f32 %v6257_v39, %v8480_v31  ;;  %v1794_v56 = vpop.f32.mrb[105].mxu0  ;;  %v3382_v39 = vld [vmem:[#allocation9 + $0x1a0] sm:$0xff] }
 0x2a0   : > { %v8548_v34 = vadd.f32 %v1794_v56, %v8471_v11  ;;  %v8550_v32 = vpop.f32.mrb[120].mxu1  ;;  %v8572_v56 = vpop.permute.xlu0 %2588 }
 0x2a1   : > { %v2068_v5 = vpop.f32.mrb[121].mxu1  ;;  %11036 = vst [vmem:[#allocation26_spill] sm:$0xff] %v8572_v56  ;;  %vm2687_vm8 = vcmp.eq.s32.totalorder %v8572_v56, 1 }
 0x2a2   : > { %v6260_v15 = vpop.f32.mrb[106].mxu0 }
 0x2a3   : > { %v8554_v12 = vadd.f32 %v6260_v15, %v1565_v1  ;;  %v1804_v33 = vpop.f32.mrb[107].mxu0 }
 0x2a4   : > { %v8559_v19 = vadd.f32 %v1804_v33, %v8489_v54  ;;  %v8561_v31 = vpop.f32.mrb[122].mxu1  ;;  %v3383_v54 = vld [vmem:[#allocation9 + $0x1a8] sm:$0xff] }
 0x2a5   : > { %11033 = vst [vmem:[#allocation23_spill] sm:$0xff] %v8554_v12  ;;  %v2073_v61 = vpop.f32.mrb[123].mxu1  ;;  %v6852_v15 = vpack.c.bf16 %v3383_v54, %v3382_v39  ;;  %v8594_v39 = vpop.permute.xlu1 %2591 }
 0x2a6   : > { %v6295_v55 = vpop.f32.mrb[108].mxu0  ;;  %11039 = vst [vmem:[#allocation29_spill] sm:$0xff] %v8594_v39  ;;  %vm2688_vm9 = vcmp.eq.s32.totalorder %v8594_v39, 1 }
 0x2a7   : > { %v2287_v11 = vadd.f32 %v6295_v55, %v2041_v4  ;;  %v2281_v0 = vpop.f32.mrb[109].mxu0  ;;  %6853 = vmatpush1.bf16.msra.mxu0 %v6852_v15 }
 0x2a8   : > { %v8567_v9 = vpop.f32.mrb[124].mxu1  ;;  %v2282_v1 = vadd.f32 %v2281_v0, %v8504_v38  ;;  %6854 = vmatprep.subr.bf16.mxu0 %v11030_v6 }
 0x2a9   : > { %v2461_v2 = vadd.f32 %v2287_v11, %v8411_v40  ;;  %v2078_v62 = vpop.f32.mrb[125].mxu1 }
 0x2aa   : > { %v2460_v4 = vadd.f32 %v2282_v1, %v8414_v18  ;;  %v6298_v5 = vpop.f32.mrb[110].mxu0  ;;  %v3385_v62 = vld [vmem:[#allocation9 + $0x1b8] sm:$0xff] }
 0x2ab   : > { %v8577_v33 = vadd.f32 %v8565_v10, %v2461_v2  ;;  %v2297_v61 = vadd.f32 %v6298_v5, %v2051_v28  ;;  %v2291_v38 = vpop.f32.mrb[111].mxu0  ;;  %v3384_v2 = vld [vmem:[#allocation9 + $0x1b0] sm:$0xff] }
 0x2ac   : > { %v8581_v40 = vadd.f32 %v8565_v10, %v2460_v4  ;;  %v8583_v55 = vpop.f32.mrb[126].mxu1  ;;  %v2292_v11 = vadd.f32 %v2291_v38, %v8518_v41  ;;  %v6855_v15 = vpack.c.bf16 %v3385_v62, %v3384_v2 }
 0x2ad   : > { %11037 = vst [vmem:[#allocation27_spill] sm:$0xff] %v8577_v33  ;;  %v2720_v18 = vsel %vm2684_vm4, %v8577_v33, 0.0  ;;  %v2797_v28 = vmul.f32 %v8577_v33, %v8577_v33  ;;  %v2463_v0 = vadd.f32 %v2297_v61, %v8420_v23  ;;  %v2083_v1 = vpop.f32.mrb[127].mxu1 }
 0x2ae   : > { %11038 = vst [vmem:[#allocation28_spill] sm:$0xff] %v8581_v40  ;;  %v2719_v41 = vsel %vm2683_vm5, %v8581_v40, 0.0  ;;  %v2796_v54 = vmul.f32 %v8581_v40, %v8581_v40  ;;  %v2462_v4 = vadd.f32 %v2292_v11, %v8423_v8  ;;  %v6301_v5 = vpop.f32.mrb[112].mxu0  ;;  %v8607_v1 = vpop.permute.xlu0 %2594  ;;  %6856 = vmatpush1.bf16.msra.mxu0 %v6855_v15 }
 0x2af   : > { %v8605_v23 = vadd.f32 %v8565_v10, %v2463_v0  ;;  %v2307_v61 = vadd.f32 %v6301_v5, %v2061_v13  ;;  %v2301_v38 = vpop.f32.mrb[113].mxu0  ;;  %11040 = vst [vmem:[#allocation30_spill] sm:$0xff] %v8607_v1  ;;  %v2833_v33 = vsel %vm2684_vm4, %v2797_v28, 0.0  ;;  %vm2689_vm10 = vcmp.eq.s32.totalorder %v8607_v1, 1  ;;  %6857 = vmatprep.subr.bf16.mxu0 %v11030_v6  ;;  %v3387_v5 = vld [vmem:[#allocation9 + $0x1c8] sm:$0xff]  ;;  %v3414_v1 = vld [vmem:[#allocation9 + $0x2a0] sm:$0xff] }
 0x2b0   : > { %v2832_v40 = vsel %vm2683_vm5, %v2796_v54, 0.0  ;;  %v8614_v8 = vadd.f32 %v8565_v10, %v2462_v4  ;;  %v8616_v11 = vpop.f32.mrb[128].mxu1  ;;  %v2302_v2 = vadd.f32 %v2301_v38, %v8533_v17  ;;  %v2755_v13 = vadd.f32 %v2720_v18, %v2719_v41  ;;  %v3386_v54 = vld [vmem:[#allocation9 + $0x1c0] sm:$0xff] }
 0x2b1   : > { %v2799_v0 = vmul.f32 %v8605_v23, %v8605_v23  ;;  %v2465_v62 = vadd.f32 %v2307_v61, %v8429_v51  ;;  %v2088_v28 = vpop.f32.mrb[129].mxu1  ;;  %v6858_v41 = vpack.c.bf16 %v3387_v5, %v3386_v54  ;;  %v2868_v38 = vadd.f32 %v2833_v33, %v2832_v40 }
 0x2b2   : > { %11041 = vst [vmem:[#allocation31_spill] sm:$0xff] %v8614_v8  ;;  %v2721_v4 = vsel %vm2685_vm6, %v8614_v8, 0.0  ;;  %v2798_v17 = vmul.f32 %v8614_v8, %v8614_v8  ;;  %v2464_v15 = vadd.f32 %v2302_v2, %v8432_v26  ;;  %v6304_v18 = vpop.f32.mrb[114].mxu0  ;;  %v2722_v52 = vsel %vm2686_vm7, %v8605_v23, 0.0 }
 0x2b3   : > { %v2756_v46 = vadd.f32 %v2755_v13, %v2721_v4  ;;  %v8631_v51 = vadd.f32 %v8565_v10, %v2465_v62  ;;  %v2317_v61 = vadd.f32 %v6304_v18, %v8561_v31  ;;  %v2311_v28 = vpop.f32.mrb[115].mxu0  ;;  %6859 = vmatpush1.bf16.msra.mxu0 %v6858_v41  ;;  %v2835_v40 = vsel %vm2686_vm7, %v2799_v0, 0.0 }
 0x2b4   : > { %v2834_v12 = vsel %vm2685_vm6, %v2798_v17, 0.0  ;;  %v8640_v8 = vadd.f32 %v8565_v10, %v2464_v15  ;;  %v2091_v26 = vpop.f32.mrb[130].mxu1  ;;  %v2312_v33 = vadd.f32 %v2311_v28, %v8550_v32  ;;  %6860 = vmatprep.subr.bf16.mxu0 %v11030_v6  ;;  %v3389_v17 = vld [vmem:[#allocation9 + $0x1d8] sm:$0xff] }
 0x2b5   : > { %v2869_v2 = vadd.f32 %v2868_v38, %v2834_v12  ;;  %v2801_v31 = vmul.f32 %v8631_v51, %v8631_v51  ;;  %v2757_v13 = vadd.f32 %v2756_v46, %v2722_v52  ;;  %v2093_v62 = vpop.f32.mrb[131].mxu1  ;;  %v2467_v32 = vadd.f32 %v2317_v61, %v8438_v37  ;;  %v3388_v12 = vld [vmem:[#allocation9 + $0x1d0] sm:$0xff] }
 0x2b6   : > { %v2723_v54 = vsel %vm2687_vm8, %v8640_v8, 0.0  ;;  %v2800_v5 = vmul.f32 %v8640_v8, %v8640_v8  ;;  %v2466_v4 = vadd.f32 %v2312_v33, %v8441_v42  ;;  %v6307_v0 = vpop.f32.mrb[116].mxu0  ;;  %v2724_v46 = vsel %vm2688_vm9, %v8631_v51, 0.0 }
 0x2b7   : > { %v2758_v52 = vadd.f32 %v2757_v13, %v2723_v54  ;;  %v2870_v15 = vadd.f32 %v2869_v2, %v2835_v40  ;;  %v2327_v18 = vadd.f32 %v6307_v0, %v8583_v55  ;;  %v2321_v41 = vpop.f32.mrb[117].mxu0  ;;  %v8662_v28 = vadd.f32 %v8565_v10, %v2467_v32  ;;  %v8669_v55 = vpop.permute.xlu1 %2597 }
 0x2b8   : > { %v2836_v38 = vsel %vm2687_vm8, %v2800_v5, 0.0  ;;  %v8665_v37 = vadd.f32 %v8565_v10, %v2466_v4  ;;  %v2096_v42 = vpop.f32.mrb[132].mxu1  ;;  %v2322_v61 = vadd.f32 %v2321_v41, %v8567_v9  ;;  %v6861_v2 = vpack.c.bf16 %v3389_v17, %v3388_v12  ;;  %11042 = vst [vmem:[#allocation32_spill] sm:$0xff] %v8669_v55  ;;  %v8680_v12 = vpop.permute.xlu0 %2600 }
 0x2b9   : > { %v2871_v33 = vadd.f32 %v2870_v15, %v2836_v38  ;;  %v2759_v62 = vadd.f32 %v2758_v52, %v2724_v46  ;;  %v2469_v13 = vadd.f32 %v2327_v18, %v8447_v21  ;;  %v2098_v40 = vpop.f32.mrb[133].mxu1  ;;  %v2837_v54 = vsel %vm2688_vm9, %v2801_v31, 0.0  ;;  %11043 = vst [vmem:[#allocation33_spill] sm:$0xff] %v8680_v12  ;;  %v3412_v38 = vld [vmem:[#allocation9 + $0x290] sm:$0xff] }
 0x2ba   : > { %v2725_v5 = vsel %vm2689_vm10, %v8665_v37, 0.0  ;;  %v2802_v32 = vmul.f32 %v8665_v37, %v8665_v37  ;;  %v6310_v4 = vpop.f32.mrb[118].mxu0  ;;  %vm2690_vm11 = vcmp.eq.s32.totalorder %v8669_v55, 1  ;;  %v2468_v21 = vadd.f32 %v2322_v61, %v8450_v16  ;;  %6862 = vmatpush1.bf16.msra.mxu0 %v6861_v2  ;;  %v3413_v61 = vld [vmem:[#allocation9 + $0x298] sm:$0xff]  ;;  %v3390_v2 = vld [vmem:[#allocation9 + $0x1e0] sm:$0xff] }
 0x2bb   : > { %v2872_v9 = vadd.f32 %v2871_v33, %v2837_v54  ;;  %v2331_v0 = vpop.f32.mrb[119].mxu0  ;;  %v2760_v17 = vadd.f32 %v2759_v62, %v2725_v5  ;;  %v2337_v46 = vadd.f32 %v6310_v4, %v2091_v26  ;;  %6863 = vmatprep.subr.bf16.mxu0 %v11030_v6  ;;  %vm2691_vm12 = vcmp.eq.s32.totalorder %v8680_v12, 1  ;;  %v3391_v54 = vld [vmem:[#allocation9 + $0x1e8] sm:$0xff] }
 0x2bc   : > { %v2838_v31 = vsel %vm2689_vm10, %v2802_v32, 0.0  ;;  %v2101_v52 = vpop.f32.mrb[134].mxu1  ;;  %v2332_v15 = vadd.f32 %v2331_v0, %v8616_v11  ;;  %v2803_v18 = vmul.f32 %v8662_v28, %v8662_v28  ;;  %v8690_v16 = vadd.f32 %v8565_v10, %v2468_v21 }
 0x2bd   : > { %v2103_v41 = vpop.f32.mrb[135].mxu1  ;;  %v2873_v33 = vadd.f32 %v2872_v9, %v2838_v31  ;;  %v8693_v62 = vadd.f32 %v2337_v46, %v8456_v25  ;;  %v6897_v40 = vpack.c.bf16 %v3413_v61, %v3412_v38  ;;  %v2726_v5 = vsel %vm2690_vm11, %v8662_v28, 0.0  ;;  %v3393_v31 = vld [vmem:[#allocation9 + $0x1f8] sm:$0xff]  ;;  %v8704_v46 = vpop.permute.xlu1 %2603 }
 0x2be   : > { %v2470_v26 = vadd.f32 %v2332_v15, %v8459_v20  ;;  %v6313_v11 = vpop.f32.mrb[120].mxu0  ;;  %v2804_v32 = vmul.f32 %v8690_v16, %v8690_v16  ;;  %v8702_v21 = vadd.f32 %v8565_v10, %v2469_v13  ;;  %v2761_v9 = vadd.f32 %v2760_v17, %v2726_v5  ;;  %v3392_v20 = vld [vmem:[#allocation9 + $0x1f0] sm:$0xff]  ;;  %11044 = vst [vmem:[#allocation34_spill] sm:$0xff] %v8704_v46  ;;  %v3415_v17 = vld [vmem:[#allocation9 + $0x2a8] sm:$0xff] }
 0x2bf   : > { %v2341_v4 = vpop.f32.mrb[121].mxu0  ;;  %v2347_v25 = vadd.f32 %v6313_v11, %v2101_v52  ;;  %6898 = vmatprep.subr.bf16.mxu1 %v6897_v40  ;;  %v2839_v15 = vsel %vm2690_vm11, %v2803_v18, 0.0  ;;  %v2727_v41 = vsel %vm2691_vm12, %v8690_v16, 0.0  ;;  %v6864_v13 = vpack.c.bf16 %v3391_v54, %v3390_v2 }
 0x2c0   : > { %v2106_v0 = vpop.f32.mrb[136].mxu1  ;;  %v2342_v38 = vadd.f32 %v2341_v4, %v2096_v42  ;;  %6900 = vmatpush3.bf16.msra.mxu1 %v6897_v40  ;;  %v2874_v52 = vadd.f32 %v2873_v33, %v2839_v15  ;;  %v8712_v11 = vadd.f32 %v8565_v10, %v2470_v26  ;;  %v2840_v39 = vsel %vm2691_vm12, %v2804_v32, 0.0  ;;  %v8721_v40 = vpop.permute.xlu0 %2606  ;;  %v3394_v4 = vld [vmem:[#allocation9 + $0x200] sm:$0xff]  ;;  %v3395_v32 = vld [vmem:[#allocation9 + $0x208] sm:$0xff] }
 0x2c1   : > { %v2108_v61 = vpop.f32.mrb[137].mxu1  ;;  %v8717_v18 = vadd.f32 %v2347_v25, %v8465_v48  ;;  %6865 = vmatpush1.bf16.msra.mxu0 %v6864_v13  ;;  %v6867_v42 = vpack.c.bf16 %v3393_v31, %v3392_v20  ;;  %vm2692_vm13 = vcmp.eq.s32.totalorder %v8704_v46, 1  ;;  %11045 = vst [vmem:[#allocation35_spill] sm:$0xff] %v8721_v40  ;;  %v2762_v33 = vadd.f32 %v2761_v9, %v2727_v41 }
 0x2c2   : > { %v6316_v5 = vpop.f32.mrb[122].mxu0  ;;  %v2472_v55 = vadd.f32 %v2342_v38, %v8468_v24  ;;  %6866 = vmatprep.subr.bf16.mxu0 %v11030_v6  ;;  %v6901_v54 = vpack.c.bf16 %v3415_v17, %v3414_v1  ;;  %vm2693_vm14 = vcmp.eq.s32.totalorder %v8721_v40, 1  ;;  %v2805_v48 = vmul.f32 %v8702_v21, %v8702_v21  ;;  %v3416_v17 = vld [vmem:[#allocation9 + $0x2b0] sm:$0xff] }
 0x2c3   : > { %v2351_v56 = vpop.f32.mrb[123].mxu0  ;;  %v2875_v25 = vadd.f32 %v2874_v52, %v2840_v39  ;;  %v2806_v20 = vmul.f32 %v8712_v11, %v8712_v11  ;;  %v2728_v1 = vsel %vm2692_vm13, %v8702_v21, 0.0  ;;  %v6870_v41 = vpack.c.bf16 %v3395_v32, %v3394_v4  ;;  %v3396_v39 = vld [vmem:[#allocation9 + $0x210] sm:$0xff]  ;;  %v3417_v52 = vld [vmem:[#allocation9 + $0x2b8] sm:$0xff] }
 0x2c4   : > { %v2111_v2 = vpop.f32.mrb[138].mxu1  ;;  %v2352_v26 = vadd.f32 %v2351_v56, %v2106_v0  ;;  %6902 = vmatprep.subr.bf16.mxu1 %v6901_v54  ;;  %v8732_v0 = vpop.permute.xlu1 %2609  ;;  %v2763_v38 = vadd.f32 %v2762_v33, %v2728_v1  ;;  %v6905_v1 = vpack.c.bf16 %v3417_v52, %v3416_v17  ;;  %v3421_v17 = vld [vmem:[#allocation9 + $0x2d8] sm:$0xff] }
 0x2c5   : > { %v2113_v24 = vpop.f32.mrb[139].mxu1  ;;  %v2357_v31 = vadd.f32 %v6316_v5, %v2111_v2  ;;  %11046 = vst [vmem:[#allocation36_spill] sm:$0xff] %v8732_v0  ;;  %6868 = vmatpush1.bf16.msra.mxu0 %v6867_v42  ;;  %6904 = vmatpush3.bf16.msra.mxu1 %v6901_v54  ;;  %v2841_v5 = vsel %vm2692_vm13, %v2805_v48, 0.0  ;;  %v8745_v2 = vadd.f32 %v8565_v10, %v8693_v62  ;;  %v2729_v42 = vsel %vm2693_vm14, %v8712_v11, 0.0  ;;  %v8754_v32 = vpop.permute.xlu0 %2612 }
 0x2c6   : > { %v8730_v9 = vadd.f32 %v2352_v26, %v8477_v49  ;;  %v6319_v56 = vpop.f32.mrb[124].mxu0  ;;  %6869 = vmatprep.subr.bf16.mxu0 %v11030_v6  ;;  %v3397_v49 = vld [vmem:[#allocation9 + $0x218] sm:$0xff]  ;;  %v2842_v26 = vsel %vm2693_vm14, %v2806_v20, 0.0  ;;  %v2876_v54 = vadd.f32 %v2875_v25, %v2841_v5  ;;  %11047 = vst [vmem:[#allocation37_spill] sm:$0xff] %v8754_v32  ;;  %v8757_v48 = vadd.f32 %v8565_v10, %v2472_v55  ;;  %v3398_v5 = vld [vmem:[#allocation9 + $0x220] sm:$0xff] }
 0x2c7   : > { %v2361_v15 = vpop.f32.mrb[125].mxu0  ;;  %v8738_v61 = vadd.f32 %v2357_v31, %v8474_v29  ;;  %v6873_v31 = vpack.c.bf16 %v3397_v49, %v3396_v39  ;;  %vm2694_vm15 = vcmp.eq.s32.totalorder %v8732_v0, 1  ;;  %v2764_v20 = vadd.f32 %v2763_v38, %v2729_v42  ;;  %6906 = vmatprep.subr.bf16.mxu1 %v6905_v1 }
 0x2c8   : > { %v2116_v13 = vpop.f32.mrb[140].mxu1  ;;  %11048 = vst [vmem:[#allocation38_spill] sm:$0xff] %v8757_v48  ;;  %v8764_v40 = vpop.permute.xlu1 %2615  ;;  %vm2695_vm0 = vcmp.eq.s32.totalorder %v8754_v32, 1  ;;  %v2877_v39 = vadd.f32 %v2876_v54, %v2842_v26  ;;  %v2730_v52 = vsel %vm2694_vm15, %v8745_v2, 0.0  ;;  %v2808_v42 = vmul.f32 %v8757_v48, %v8757_v48  ;;  %v3400_v54 = vld [vmem:[#allocation9 + $0x230] sm:$0xff]  ;;  %v3425_v32 = vld [vmem:[#allocation9 + $0x2f8] sm:$0xff] }
 0x2c9   : > { %v2362_v33 = vadd.f32 %v2361_v15, %v2116_v13  ;;  %v2118_v29 = vpop.f32.mrb[141].mxu1  ;;  %6871 = vmatpush1.bf16.msra.mxu0 %v6870_v41  ;;  %v3418_v15 = vld [vmem:[#allocation9 + $0x2c0] sm:$0xff]  ;;  %v3419_v13 = vld [vmem:[#allocation9 + $0x2c8] sm:$0xff]  ;;  %11049 = vst [vmem:[#allocation39_spill] sm:$0xff] %v8764_v40  ;;  %v3420_v41 = vld [vmem:[#allocation9 + $0x2d0] sm:$0xff]  ;;  %6908 = vmatpush3.bf16.msra.mxu1 %v6905_v1  ;;  %vm10927_vm1 = vcmp.eq.s32.totalorder %v8764_v40, 1 }
 0x2ca   : > { %v8752_v4 = vpop.f32.mrb[126].mxu0  ;;  %6872 = vmatprep.subr.bf16.mxu0 %v11030_v6  ;;  %v3399_v29 = vld [vmem:[#allocation9 + $0x228] sm:$0xff]  ;;  %v6909_v38 = vpack.c.bf16 %v3419_v13, %v3418_v15  ;;  %v3401_v1 = vld [vmem:[#allocation9 + $0x238] sm:$0xff]  ;;  %v6913_v15 = vpack.c.bf16 %v3421_v17, %v3420_v41  ;;  %v8782_v13 = vpop.permute.xlu0 %2618  ;;  %v8795_v41 = vadd.f32 %v8565_v10, %v8730_v9 }
 0x2cb   : > { %v8760_v62 = vadd.f32 %v2362_v33, %v8486_v27  ;;  %v2371_v24 = vpop.f32.mrb[127].mxu0  ;;  %v2807_v27 = vmul.f32 %v8745_v2, %v8745_v2  ;;  %11050 = vst [vmem:[#allocation40_spill] sm:$0xff] %v8782_v13  ;;  %vm10926_vm2 = vcmp.eq.s32.totalorder %v8782_v13, 1 }
 0x2cc   : > { %v2121_v25 = vpop.f32.mrb[142].mxu1  ;;  %6910 = vmatprep.subr.bf16.mxu1 %v6909_v38 }
 0x2cd   : > { %v2367_v55 = vadd.f32 %v6319_v56, %v2121_v25  ;;  %v2123_v33 = vpop.f32.mrb[143].mxu1  ;;  %6874 = vmatpush1.bf16.msra.mxu0 %v6873_v31  ;;  %v6876_v56 = vpack.c.bf16 %v3399_v29, %v3398_v5  ;;  %v2765_v25 = vadd.f32 %v2764_v20, %v2730_v52  ;;  %v2843_v12 = vsel %vm2694_vm15, %v2807_v27, 0.0  ;;  %v3422_v29 = vld [vmem:[#allocation9 + $0x2e0] sm:$0xff]  ;;  %6912 = vmatpush3.bf16.msra.mxu1 %v6909_v38  ;;  %v3423_v27 = vld [vmem:[#allocation9 + $0x2e8] sm:$0xff]  ;;  %v8799_v52 = vpop.permute.xlu1 %2621 }
 0x2ce   : > { %v8769_v49 = vpop.f32.mrb[128].mxu0  ;;  %6875 = vmatprep.subr.bf16.mxu0 %v11030_v6  ;;  %v8788_v31 = vadd.f32 %v8565_v10, %v8717_v18  ;;  %11051 = vst [vmem:[#allocation41_spill] sm:$0xff] %v8799_v52  ;;  %v2844_v18 = vsel %vm2695_vm0, %v2808_v42, 0.0  ;;  %6914 = vmatprep.subr.bf16.mxu1 %v6913_v15  ;;  %v6917_v9 = vpack.c.bf16 %v3423_v27, %v3422_v29  ;;  %vm10942_vm3 = vcmp.eq.s32.totalorder %v8799_v52, 1 }
 0x2cf   : > { %v8776_v46 = vpop.f32.mrb[129].mxu0  ;;  %v8779_v33 = vadd.f32 %v2367_v55, %v8483_v59  ;;  %v2731_v59 = vsel %vm2695_vm0, %v8757_v48, 0.0  ;;  %v2878_v55 = vadd.f32 %v2877_v39, %v2843_v12  ;;  %v6879_v12 = vpack.c.bf16 %v3401_v1, %v3400_v54  ;;  %v3402_v39 = vld [vmem:[#allocation9 + $0x240] sm:$0xff] }
 0x2d0   : > { %v2126_v26 = vpop.f32.mrb[144].mxu1  ;;  %v2810_v54 = vmul.f32 %v8795_v41, %v8795_v41 }
 0x2d1   : > { %v2372_v20 = vadd.f32 %v2371_v24, %v2126_v26  ;;  %v2128_v5 = vpop.f32.mrb[145].mxu1  ;;  %6877 = vmatpush1.bf16.msra.mxu0 %v6876_v56  ;;  %v2766_v26 = vadd.f32 %v2765_v25, %v2731_v59  ;;  %v2879_v56 = vadd.f32 %v2878_v55, %v2844_v18  ;;  %6916 = vmatpush3.bf16.msra.mxu1 %v6913_v15  ;;  %v8818_v25 = vpop.permute.xlu0 %2624  ;;  %v2732_v59 = vsel %vm10927_vm1, %v8788_v31, 0.0 }
 0x2d2   : > { %v8797_v17 = vpop.f32.mrb[130].mxu0  ;;  %6878 = vmatprep.subr.bf16.mxu0 %v11030_v6  ;;  %v3403_v5 = vld [vmem:[#allocation9 + $0x248] sm:$0xff]  ;;  %11052 = vst [vmem:[#allocation42_spill] sm:$0xff] %v8818_v25  ;;  %6918 = vmatprep.subr.bf16.mxu1 %v6917_v9  ;;  %v6921_v55 = vpack.c.bf16 %v3425_v32, %v3424_v58  ;;  %v8828_v18 = vadd.f32 %v8565_v10, %v8738_v61  ;;  %v8831_v48 = vpop.permute.xlu1 %2627 }
 0x2d3   : > { %v8804_v0 = vadd.f32 %v2372_v20, %v8495_v35  ;;  %v8806_v24 = vpop.f32.mrb[131].mxu0  ;;  %v2809_v35 = vmul.f32 %v8788_v31, %v8788_v31  ;;  %11054 = vst [vmem:[#allocation44_spill] sm:$0xff] %v8831_v48 }
 0x2d4   : > { %v2131_v38 = vpop.f32.mrb[146].mxu1  ;;  %11053 = vst [vmem:[#allocation43_spill] sm:$0xff] %v8828_v18 }
 0x2d5   : > { %v2377_v42 = vadd.f32 %v8752_v4, %v2131_v38  ;;  %v2133_v20 = vpop.f32.mrb[147].mxu1  ;;  %6880 = vmatpush1.bf16.msra.mxu0 %v6879_v12  ;;  %v6882_v4 = vpack.c.bf16 %v3403_v5, %v3402_v39  ;;  %v2767_v38 = vadd.f32 %v2766_v26, %v2732_v59  ;;  %v2733_v12 = vsel %vm10926_vm2, %v8795_v41, 0.0  ;;  %6920 = vmatpush3.bf16.msra.mxu1 %v6917_v9  ;;  %v3406_v9 = vld [vmem:[#allocation9 + $0x260] sm:$0xff] }
 0x2d6   : > { %v8816_v1 = vpop.f32.mrb[132].mxu0  ;;  %6881 = vmatprep.subr.bf16.mxu0 %v11030_v6  ;;  %v3404_v20 = vld [vmem:[#allocation9 + $0x250] sm:$0xff]  ;;  %v8841_v39 = vadd.f32 %v8565_v10, %v8760_v62  ;;  %v2846_v5 = vsel %vm10926_vm2, %v2810_v54, 0.0  ;;  %6922 = vmatprep.subr.bf16.mxu1 %v6921_v55  ;;  %vm10936_vm2 = vcmp.eq.s32.totalorder %v8818_v25, 1 }
 0x2d7   : > { %v2479_v29 = vadd.f32 %v2377_v42, %v8492_v22  ;;  %v8824_v27 = vpop.f32.mrb[133].mxu0  ;;  %v2845_v22 = vsel %vm10927_vm1, %v2809_v35, 0.0  ;;  %v6885_v59 = vpack.c.bf16 %v3405_v57, %v3404_v20  ;;  %v2768_v62 = vadd.f32 %v2767_v38, %v2733_v12 }
 0x2d8   : > { %v2136_v15 = vpop.f32.mrb[148].mxu1  ;;  %v2880_v61 = vadd.f32 %v2879_v56, %v2845_v22  ;;  %11055 = vst [vmem:[#allocation45_spill] sm:$0xff] %v8841_v39  ;;  %v8854_v22 = vpop.permute.xlu0 %2630  ;;  %v2812_v38 = vmul.f32 %v8841_v39, %v8841_v39  ;;  %v8866_v20 = vadd.f32 %v8565_v10, %v8804_v0  ;;  %vm10943_vm1 = vcmp.eq.s32.totalorder %v8831_v48, 1 }
 0x2d9   : > { %v2382_v58 = vadd.f32 %v8776_v46, %v2136_v15  ;;  %v2138_v32 = vpop.f32.mrb[149].mxu1  ;;  %6883 = vmatpush1.bf16.msra.mxu0 %v6882_v4  ;;  %v2811_v46 = vmul.f32 %v8828_v18, %v8828_v18  ;;  %v3407_v15 = vld [vmem:[#allocation9 + $0x268] sm:$0xff]  ;;  %11056 = vst [vmem:[#allocation46_spill] sm:$0xff] %v8854_v22  ;;  %6924 = vmatpush3.bf16.msra.mxu1 %v6921_v55 }
 0x2da   : > { %v8843_v26 = vpop.f32.mrb[134].mxu0  ;;  %6884 = vmatprep.subr.bf16.mxu0 %v11030_v6  ;;  %v2881_v4 = vadd.f32 %v2880_v61, %v2846_v5  ;;  %v6888_v61 = vpack.c.bf16 %v3407_v15, %v3406_v9  ;;  %6925 = vmatprep.subr.bf16.mxu1 %v11030_v6  ;;  %v8889_v9 = vadd.f32 %v8565_v10, %v2479_v29 }
 0x2db   : > { %v2480_v35 = vadd.f32 %v2382_v58, %v8502_v3  ;;  %v8848_v42 = vpop.f32.mrb[135].mxu0  ;;  %v8858_v3 = vadd.f32 %v8565_v10, %v8779_v33  ;;  %v8870_v58 = vpop.permute.xlu1 %2633  ;;  %v2847_v0 = vsel %vm10942_vm3, %v2811_v46, 0.0  ;;  %v3253_v46 = vld [vmem:[#allocation9 + $0x100] sm:$0xff]  ;;  %v2814_v13 = vmul.f32 %v8866_v20, %v8866_v20 }
 0x2dc   : > { %v2141_v56 = vpop.f32.mrb[150].mxu1  ;;  %11058 = vst [vmem:[#allocation48_spill] sm:$0xff] %v8870_v58  ;;  %v2882_v52 = vadd.f32 %v2881_v4, %v2847_v0 }
 0x2dd   : > { %11057 = vst [vmem:[#allocation47_spill] sm:$0xff] %v8858_v3  ;;  %v2387_v57 = vadd.f32 %v8769_v49, %v2141_v56  ;;  %v2143_v54 = vpop.f32.mrb[151].mxu1  ;;  %v2734_v49 = vsel %vm10942_vm3, %v8828_v18, 0.0  ;;  %6886 = vmatpush1.bf16.msra.mxu0 %v6885_v59  ;;  %v3408_v56 = vld [vmem:[#allocation9 + $0x270] sm:$0xff]  ;;  %v2813_v59 = vmul.f32 %v8858_v3, %v8858_v3  ;;  %v2736_v29 = vsel %vm10943_vm1, %v8858_v3, 0.0 }
 0x2de   : > { %v8868_v12 = vpop.f32.mrb[136].mxu0  ;;  %v2769_v55 = vadd.f32 %v2768_v62, %v2734_v49  ;;  %6887 = vmatprep.subr.bf16.mxu0 %v11030_v6  ;;  %v3409_v54 = vld [vmem:[#allocation9 + $0x278] sm:$0xff]  ;;  %v3254_v62 = vld [vmem:[#allocation9 + $0x108] sm:$0xff]  ;;  %v2848_v49 = vsel %vm10936_vm2, %v2812_v38, 0.0  ;;  %vm10947_vm3 = vcmp.eq.s32.totalorder %v8870_v58, 1 }
 0x2df   : > { %v2481_v33 = vadd.f32 %v2387_v57, %v8499_v53  ;;  %v8876_v32 = vpop.f32.mrb[137].mxu0  ;;  %v2735_v53 = vsel %vm10936_vm2, %v8841_v39, 0.0  ;;  %v8898_v39 = vpop.permute.xlu0 %2636  ;;  %v6891_v4 = vpack.c.bf16 %v3409_v54, %v3408_v56  ;;  %vm10944_vm2 = vcmp.eq.s32.totalorder %v8854_v22, 1 }
 0x2e0   : > { %v2146_v5 = vpop.f32.mrb[152].mxu1  ;;  %11059 = vst [vmem:[#allocation49_spill] sm:$0xff] %v8898_v39  ;;  %v2770_v38 = vadd.f32 %v2769_v55, %v2735_v53  ;;  %v8914_v18 = vpack.c.bf16 %v3254_v62, %v3253_v46  ;;  %v8916_v3 = vpop.permute.xlu1 %2639  ;;  %v2883_v56 = vadd.f32 %v2882_v52, %v2848_v49  ;;  %v2850_v53 = vsel %vm10944_vm2, %v2814_v13, 0.0 }
 0x2e1   : > { %v2392_v15 = vadd.f32 %v8806_v24, %v2146_v5  ;;  %v2148_v57 = vpop.f32.mrb[153].mxu1  ;;  %v8904_v24 = vadd.f32 %v8565_v10, %v2480_v35  ;;  %6889 = vmatpush1.bf16.msra.mxu0 %v6888_v61  ;;  %v8911_v0 = vadd.f32 %v8565_v10, %v2481_v33  ;;  %11060 = vst [vmem:[#allocation50_spill] sm:$0xff] %v8916_v3  ;;  %v2737_v35 = vsel %vm10944_vm2, %v8866_v20, 0.0 }
 0x2e2   : > { %v8896_v40 = vpop.f32.mrb[138].mxu0  ;;  %6890 = vmatprep.subr.bf16.mxu0 %v11030_v6  ;;  %v2815_v61 = vmul.f32 %v8889_v9, %v8889_v9  ;;  %v2771_v54 = vadd.f32 %v2770_v38, %v2736_v29  ;;  %vm10953_vm2 = vcmp.eq.s32.totalorder %v8916_v3, 1 }
 0x2e3   : > { %v2482_v5 = vadd.f32 %v2392_v15, %v8510_v44  ;;  %v8907_v57 = vpop.f32.mrb[139].mxu0  ;;  %v2849_v44 = vsel %vm10943_vm1, %v2813_v59, 0.0  ;;  %v2738_v59 = vsel %vm10947_vm3, %v8889_v9, 0.0  ;;  %v2816_v46 = vmul.f32 %v8904_v24, %v8904_v24  ;;  %v8946_v38 = vpop.permute.xlu0 %2642 }
 0x2e4   : > { %v2151_v25 = vpop.f32.mrb[154].mxu1  ;;  %vm10950_vm1 = vcmp.eq.s32.totalorder %v8898_v39, 1  ;;  %v2884_v13 = vadd.f32 %v2883_v56, %v2849_v44  ;;  %v2772_v52 = vadd.f32 %v2771_v54, %v2737_v35  ;;  %v2817_v49 = vmul.f32 %v8911_v0, %v8911_v0  ;;  %11061 = vst [vmem:[#allocation51_spill] sm:$0xff] %v8946_v38  ;;  %v8960_v54 = vpop.permute.xlu1 %2645 }
 0x2e5   : > { %v2397_v33 = vadd.f32 %v8797_v17, %v2151_v25  ;;  %v2153_v55 = vpop.f32.mrb[155].mxu1  ;;  %v8937_v62 = vadd.f32 %v8565_v10, %v2482_v5  ;;  %6892 = vmatpush1.bf16.msra.mxu0 %v6891_v4  ;;  %v2851_v5 = vsel %vm10947_vm3, %v2815_v61, 0.0  ;;  %11062 = vst [vmem:[#allocation52_spill] sm:$0xff] %v8960_v54  ;;  %v2852_v61 = vsel %vm10950_vm1, %v2816_v46, 0.0 }
 0x2e6   : > { %v8929_v15 = vpop.f32.mrb[140].mxu0  ;;  %6974 = vmatprep.subr.bf16.mxu0 %v8914_v18  ;;  %v2773_v55 = vadd.f32 %v2772_v52, %v2738_v59  ;;  %v2740_v58 = vsel %vm10953_vm2, %v8911_v0, 0.0  ;;  %vm10954_vm3 = vcmp.eq.s32.totalorder %v8946_v38, 1 }
 0x2e7   : > { %v2483_v17 = vadd.f32 %v2397_v33, %v8507_v30  ;;  %v8940_v25 = vpop.f32.mrb[141].mxu0  ;;  %v2739_v30 = vsel %vm10950_vm1, %v8904_v24, 0.0  ;;  %v2885_v33 = vadd.f32 %v2884_v13, %v2850_v53  ;;  %v2853_v13 = vsel %vm10953_vm2, %v2817_v49, 0.0 }
 0x2e8   : > { %v2156_v29 = vpop.f32.mrb[156].mxu1  ;;  %v2774_v59 = vadd.f32 %v2773_v55, %v2739_v30  ;;  %v2741_v46 = vsel %vm10954_vm3, %v8937_v62, 0.0  ;;  %vm2706_vm1 = vcmp.eq.s32.totalorder %v8960_v54, 1 }
 0x2e9   : > { %v8954_v4 = vadd.f32 %v8565_v10, %v2483_v17  ;;  %v2402_v44 = vadd.f32 %v8824_v27, %v2156_v29  ;;  %v2158_v35 = vpop.f32.mrb[157].mxu1  ;;  %v2818_v17 = vmul.f32 %v8937_v62, %v8937_v62  ;;  %v2886_v53 = vadd.f32 %v2885_v33, %v2851_v5  ;;  %v8985_v33 = vpop.permute.xlu0 %2648 }
 0x2ea   : > { %v8958_v56 = vpop.f32.mrb[142].mxu0  ;;  %v2775_v30 = vadd.f32 %v2774_v59, %v2740_v58  ;;  %11063 = vst [vmem:[#allocation53_spill] sm:$0xff] %v8985_v33  ;;  %vm10957_vm2 = vcmp.eq.s32.totalorder %v8985_v33, 1  ;;  %v8996_v58 = vpop.permute.xlu1 %2651 }
 0x2eb   : > { %v2484_v27 = vadd.f32 %v2402_v44, %v8516_v60  ;;  %v8970_v29 = vpop.f32.mrb[143].mxu0  ;;  %v2819_v35 = vmul.f32 %v8954_v4, %v8954_v4  ;;  %v2887_v5 = vadd.f32 %v2886_v53, %v2852_v61  ;;  %v2854_v49 = vsel %vm10954_vm3, %v2818_v17, 0.0  ;;  %11064 = vst [vmem:[#allocation54_spill] sm:$0xff] %v8996_v58 }
 0x2ec   : > { %v2161_v52 = vpop.f32.mrb[158].mxu1  ;;  %v2742_v55 = vsel %vm2706_vm1, %v8954_v4, 0.0  ;;  %vm10958_vm3 = vcmp.eq.s32.totalorder %v8996_v58, 1 }
 0x2ed   : > { %v8981_v39 = vadd.f32 %v8565_v10, %v2484_v27  ;;  %v2407_v60 = vadd.f32 %v8816_v1, %v2161_v52  ;;  %v2163_v44 = vpop.f32.mrb[159].mxu1  ;;  %v2888_v1 = vadd.f32 %v2887_v5, %v2853_v13  ;;  %v2776_v52 = vadd.f32 %v2775_v30, %v2741_v46 }
 0x2ee   : > { %v2855_v53 = vsel %vm2706_vm1, %v2819_v35, 0.0 }
 0x2ef   : > { %v2820_v27 = vmul.f32 %v8981_v39, %v8981_v39  ;;  %v2485_v3 = vadd.f32 %v2407_v60, %v8513_v14  ;;  %v2743_v17 = vsel %vm10957_vm2, %v8981_v39, 0.0  ;;  %v2889_v13 = vadd.f32 %v2888_v1, %v2854_v49 }
 0x2f0   : > { %v2166_v61 = vpop.f32.mrb[160].mxu1  ;;  %v2777_v46 = vadd.f32 %v2776_v52, %v2742_v55 }
 0x2f1   : > { %v9004_v59 = vadd.f32 %v8565_v10, %v2485_v3  ;;  %v2412_v44 = vadd.f32 %v8848_v42, %v2166_v61  ;;  %v2168_v14 = vpop.f32.mrb[161].mxu1  ;;  %v2856_v60 = vsel %vm10957_vm2, %v2820_v27, 0.0  ;;  %v2890_v30 = vadd.f32 %v2889_v13, %v2855_v53  ;;  %v9016_v61 = vpop.permute.xlu0 %2654 }
 0x2f2   : > { %v2778_v54 = vadd.f32 %v2777_v46, %v2743_v17  ;;  %11065 = vst [vmem:[#allocation55_spill] sm:$0xff] %v9016_v61  ;;  %vm10959_vm2 = vcmp.eq.s32.totalorder %v9016_v61, 1 }
 0x2f3   : > { %v2744_v35 = vsel %vm10958_vm3, %v9004_v59, 0.0  ;;  %v2821_v5 = vmul.f32 %v9004_v59, %v9004_v59  ;;  %v2486_v3 = vadd.f32 %v2412_v44, %v8524_v63  ;;  %v2891_v52 = vadd.f32 %v2890_v30, %v2856_v60 }
 0x2f4   : > { %v2171_v42 = vpop.f32.mrb[162].mxu1  ;;  %v2779_v14 = vadd.f32 %v2778_v54, %v2744_v35 }
 0x2f5   : > { %v2857_v49 = vsel %vm10958_vm3, %v2821_v5, 0.0  ;;  %v9021_v55 = vadd.f32 %v8565_v10, %v2486_v3  ;;  %v2417_v27 = vadd.f32 %v8843_v26, %v2171_v42  ;;  %v2173_v1 = vpop.f32.mrb[163].mxu1  ;;  %v9031_v5 = vpop.permute.xlu1 %2657 }
 0x2f6   : > { %v2892_v44 = vadd.f32 %v2891_v52, %v2857_v49  ;;  %11066 = vst [vmem:[#allocation56_spill] sm:$0xff] %v9031_v5  ;;  %vm10960_vm3 = vcmp.eq.s32.totalorder %v9031_v5, 1  ;;  %v9046_v1 = vpop.permute.xlu0 %2660 }
 0x2f7   : > { %v2745_v63 = vsel %vm10959_vm2, %v9021_v55, 0.0  ;;  %v2822_v53 = vmul.f32 %v9021_v55, %v9021_v55  ;;  %v2487_v17 = vadd.f32 %v2417_v27, %v8521_v43  ;;  %11067 = vst [vmem:[#allocation57_spill] sm:$0xff] %v9046_v1 }
 0x2f8   : > { %v2780_v13 = vadd.f32 %v2779_v14, %v2745_v63  ;;  %v2176_v46 = vpop.f32.mrb[164].mxu1 }
 0x2f9   : > { %v2858_v26 = vsel %vm10959_vm2, %v2822_v53, 0.0  ;;  %v9036_v60 = vadd.f32 %v8565_v10, %v2487_v17  ;;  %v2422_v54 = vadd.f32 %v8876_v32, %v2176_v46  ;;  %v2178_v35 = vpop.f32.mrb[165].mxu1  ;;  %vm10961_vm2 = vcmp.eq.s32.totalorder %v9046_v1, 1 }
 0x2fa   : > { %v2893_v3 = vadd.f32 %v2892_v44, %v2858_v26  ;;  %v9061_v26 = vpop.permute.xlu1 %2663 }
 0x2fb   : > { %v2746_v43 = vsel %vm10960_vm3, %v9036_v60, 0.0  ;;  %v2823_v30 = vmul.f32 %v9036_v60, %v9036_v60  ;;  %v2488_v42 = vadd.f32 %v2422_v54, %v8531_v45  ;;  %11068 = vst [vmem:[#allocation58_spill] sm:$0xff] %v9061_v26 }
 0x2fc   : > { %v2781_v49 = vadd.f32 %v2780_v13, %v2746_v43  ;;  %v2181_v27 = vpop.f32.mrb[166].mxu1 }
 0x2fd   : > { %v2859_v32 = vsel %vm10960_vm3, %v2823_v30, 0.0  ;;  %v9051_v52 = vadd.f32 %v8565_v10, %v2488_v42  ;;  %v2427_v14 = vadd.f32 %v8868_v12, %v2181_v27  ;;  %v2183_v63 = vpop.f32.mrb[167].mxu1  ;;  %vm10962_vm3 = vcmp.eq.s32.totalorder %v9061_v26, 1 }
 0x2fe   : > { %v2894_v53 = vadd.f32 %v2893_v3, %v2859_v32  ;;  %v9076_v32 = vpop.permute.xlu0 %2666 }
 0x2ff   : > { %v2747_v45 = vsel %vm10961_vm2, %v9051_v52, 0.0  ;;  %v2824_v17 = vmul.f32 %v9051_v52, %v9051_v52  ;;  %v2489_v44 = vadd.f32 %v2427_v14, %v8527_v50  ;;  %11069 = vst [vmem:[#allocation59_spill] sm:$0xff] %v9076_v32 }
 0x300   : > { %v2782_v13 = vadd.f32 %v2781_v49, %v2747_v45  ;;  %v2186_v46 = vpop.f32.mrb[168].mxu1 }
 0x301   : > { %v2860_v12 = vsel %vm10961_vm2, %v2824_v17, 0.0  ;;  %v9066_v54 = vadd.f32 %v8565_v10, %v2489_v44  ;;  %v2432_v35 = vadd.f32 %v8907_v57, %v2186_v46  ;;  %v2188_v3 = vpop.f32.mrb[169].mxu1  ;;  %vm10963_vm2 = vcmp.eq.s32.totalorder %v9076_v32, 1 }
 0x302   : > { %v2895_v43 = vadd.f32 %v2894_v53, %v2860_v12  ;;  %v9091_v12 = vpop.permute.xlu1 %2669 }
 0x303   : > { %v2748_v50 = vsel %vm10962_vm3, %v9066_v54, 0.0  ;;  %v2825_v30 = vmul.f32 %v9066_v54, %v9066_v54  ;;  %v2490_v42 = vadd.f32 %v2432_v35, %v8540_v7  ;;  %11070 = vst [vmem:[#allocation60_spill] sm:$0xff] %v9091_v12 }
 0x304   : > { %v2783_v49 = vadd.f32 %v2782_v13, %v2748_v50  ;;  %v2191_v27 = vpop.f32.mrb[170].mxu1 }
 0x305   : > { %v2861_v57 = vsel %vm10962_vm3, %v2825_v30, 0.0  ;;  %v9081_v14 = vadd.f32 %v8565_v10, %v2490_v42  ;;  %v2437_v63 = vadd.f32 %v8896_v40, %v2191_v27  ;;  %v2193_v53 = vpop.f32.mrb[171].mxu1  ;;  %vm10964_vm3 = vcmp.eq.s32.totalorder %v9091_v12, 1 }
 0x306   : > { %v2896_v45 = vadd.f32 %v2895_v43, %v2861_v57  ;;  %v9106_v57 = vpop.permute.xlu0 %2672 }
 0x307   : > { %v2749_v7 = vsel %vm10963_vm2, %v9081_v14, 0.0  ;;  %v2826_v17 = vmul.f32 %v9081_v14, %v9081_v14  ;;  %v2491_v44 = vadd.f32 %v2437_v63, %v8536_v36  ;;  %11071 = vst [vmem:[#allocation61_spill] sm:$0xff] %v9106_v57 }
 0x308   : > { %v2784_v13 = vadd.f32 %v2783_v49, %v2749_v7  ;;  %v2196_v46 = vpop.f32.mrb[172].mxu1 }
 0x309   : > { %v2862_v40 = vsel %vm10963_vm2, %v2826_v17, 0.0  ;;  %v9096_v35 = vadd.f32 %v8565_v10, %v2491_v44  ;;  %v2442_v3 = vadd.f32 %v8940_v25, %v2196_v46  ;;  %v2198_v43 = vpop.f32.mrb[173].mxu1  ;;  %vm10965_vm2 = vcmp.eq.s32.totalorder %v9106_v57, 1 }
 0x30a   : > { %v2897_v50 = vadd.f32 %v2896_v45, %v2862_v40  ;;  %v9121_v40 = vpop.permute.xlu1 %2675 }
 0x30b   : > { %v2750_v36 = vsel %vm10964_vm3, %v9096_v35, 0.0  ;;  %v2827_v30 = vmul.f32 %v9096_v35, %v9096_v35  ;;  %v2492_v42 = vadd.f32 %v2442_v3, %v8548_v34  ;;  %11072 = vst [vmem:[#allocation62_spill] sm:$0xff] %v9121_v40 }
 0x30c   : > { %v2785_v49 = vadd.f32 %v2784_v13, %v2750_v36  ;;  %v2201_v27 = vpop.f32.mrb[174].mxu1 }
 0x30d   : > { %v2863_v25 = vsel %vm10964_vm3, %v2827_v30, 0.0  ;;  %v9111_v63 = vadd.f32 %v8565_v10, %v2492_v42  ;;  %v2447_v53 = vadd.f32 %v8929_v15, %v2201_v27  ;;  %v2203_v45 = vpop.f32.mrb[175].mxu1  ;;  %v7224_v15 = vld [vmem:[#allocation7] ss:$0 sm:$0xff]  ;;  %vm10966_vm3 = vcmp.eq.s32.totalorder %v9121_v40, 1  ;;  %v9129_v30 = vpop.permute.xlu0 %2678 }
 0x30e   : > { %v2898_v7 = vadd.f32 %v2897_v50, %v2863_v25  ;;  %11073 = vst [vmem:[#allocation63_spill] sm:$0xff] %v9129_v30 }
 0x30f   : > { %v2751_v34 = vsel %vm10965_vm2, %v9111_v63, 0.0  ;;  %v2828_v17 = vmul.f32 %v9111_v63, %v9111_v63  ;;  %v2493_v44 = vadd.f32 %v2447_v53, %v8545_v47 }
 0x310   : > { %v2786_v13 = vadd.f32 %v2785_v49, %v2751_v34  ;;  %v2206_v46 = vpop.f32.mrb[176].mxu1 }
 0x311   : > { %v2864_v10 = vsel %vm10965_vm2, %v2828_v17, 0.0  ;;  %v9125_v3 = vadd.f32 %v7224_v15, %v2493_v44  ;;  %v2452_v43 = vadd.f32 %v8970_v29, %v2206_v46  ;;  %v2208_v50 = vpop.f32.mrb[177].mxu1  ;;  %vm2717_vm2 = vcmp.eq.s32.totalorder %v9129_v30, 1  ;;  %v9143_v17 = vpop.permute.xlu1 %2681 }
 0x312   : > { %v2899_v36 = vadd.f32 %v2898_v7, %v2864_v10  ;;  %11074 = vst [vmem:[#allocation64_spill] sm:$0xff] %v9143_v17 }
 0x313   : > { %v2752_v47 = vsel %vm10966_vm3, %v9125_v3, 0.0  ;;  %v2829_v42 = vmul.f32 %v9125_v3, %v9125_v3  ;;  %v2494_v49 = vadd.f32 %v2452_v43, %v8559_v19 }
 0x314   : > { %v2787_v27 = vadd.f32 %v2786_v13, %v2752_v47  ;;  %v2211_v25 = vpop.f32.mrb[178].mxu1  ;;  %v11075_v13 = vld [vmem:[#allocation23_spill] sm:$0xff] }
 0x315   : > { %v2865_v29 = vsel %vm10966_vm3, %v2829_v42, 0.0  ;;  %v9139_v53 = vadd.f32 %v7224_v15, %v2494_v49  ;;  %v2457_v45 = vadd.f32 %v8958_v56, %v2211_v25  ;;  %v2213_v7 = vpop.f32.mrb[179].mxu1  ;;  %vm2718_vm3 = vcmp.eq.s32.totalorder %v9143_v17, 1 }
 0x316   : > { %v2900_v34 = vadd.f32 %v2899_v36, %v2865_v29 }
 0x317   : > { %v2753_v44 = vsel %vm2717_vm2, %v9139_v53, 0.0  ;;  %v2830_v19 = vmul.f32 %v9139_v53, %v9139_v53  ;;  %v2495_v46 = vadd.f32 %v2457_v45, %v11075_v13 }
 0x318   : > { %v2788_v10 = vadd.f32 %v2787_v27, %v2753_v44 }
 0x319   : > { %v2866_v43 = vsel %vm2717_vm2, %v2830_v19, 0.0  ;;  %v9153_v56 = vadd.f32 %v7224_v15, %v2495_v46 }
 0x31a   : > { %v2901_v50 = vadd.f32 %v2900_v34, %v2866_v43 }
 0x31b   : > { %v2754_v36 = vsel %vm2718_vm3, %v9153_v56, 0.0  ;;  %v2831_v47 = vmul.f32 %v9153_v56, %v9153_v56 }
 0x31c   : > { %v2789_v42 = vadd.f32 %v2788_v10, %v2754_v36 }
 0x31d   : > { %v2867_v49 = vsel %vm2718_vm3, %v2831_v47, 0.0 }
 0x31e   : > { %v2790_v27 = vrot.slane %v2789_v42, 4  ;;  %v2902_v25 = vadd.f32 %v2901_v50, %v2867_v49 }
 0x320   : > { %v2791_v29 = vadd.f32 %v2790_v27, %v2789_v42  ;;  %v2903_v45 = vrot.slane %v2902_v25, 4 }
 0x322   : > { %v2792_v15 = vrot.slane %v2791_v29, 2  ;;  %v2904_v7 = vadd.f32 %v2903_v45, %v2902_v25 }
 0x324   : > { %v2793_v44 = vadd.f32 %v2792_v15, %v2791_v29  ;;  %v2905_v19 = vrot.slane %v2904_v7, 2  ;;  %v9177_v29 = vld [vmem:[#allocation9] sm:$0xff]  ;;  %v11078_v15 = vld [vmem:[#allocation31_spill] sm:$0xff] }
 0x326   : > { %v2794_v34 = vrot.slane %v2793_v44, 1  ;;  %v2906_v13 = vadd.f32 %v2905_v19, %v2904_v7  ;;  %v9187_v7 = vld [vmem:[#allocation9 + $0x8] sm:$0xff]  ;;  %v9191_v19 = vld [vmem:[#allocation9 + $0x18] sm:$0xff] }
 0x328   : > { %v2795_v46 = vadd.f32 %v2794_v34, %v2793_v44  ;;  %v2907_v43 = vrot.slane %v2906_v13, 1  ;;  %v9189_v44 = vld [vmem:[#allocation9 + $0x10] sm:$0xff] }
 0x32a   : > { %v2908_v30 = vadd.f32 %v2907_v43, %v2906_v13  ;;  %v9163_v40 = vmul.f32 0.00390625, %v2795_v46  ;;  %v11076_v46 = vld [vmem:[#allocation28_spill] sm:$0xff] }
 0x32c   : > { %v2910_v57 = vmul.f32 0.00390625, %v2908_v30  ;;  %v2911_v10 = vmul.f32 %v9163_v40, %v9163_v40  ;;  %v3090_v50 = vsub.f32 %v9153_v56, %v9163_v40  ;;  %v2916_v43 = vsub.f32 %v11076_v46, %v9163_v40 }
 0x32d   : > { %v2926_v45 = vsub.f32 %v11078_v15, %v9163_v40  ;;  %v2927_v34 = vsub.f32 %v8605_v23, %v9163_v40  ;;  %v2928_v13 = vsub.f32 %v8640_v8, %v9163_v40  ;;  %v2940_v46 = vsub.f32 %v8631_v51, %v9163_v40  ;;  %v11079_v51 = vld [vmem:[#allocation38_spill] sm:$0xff] }
 0x32e   : > { %v2912_v36 = vsub.f32 %v2910_v57, %v2911_v10  ;;  %v2941_v10 = vsub.f32 %v8665_v37, %v9163_v40  ;;  %v2962_v15 = vsub.f32 %v8702_v21, %v9163_v40  ;;  %v2963_v23 = vsub.f32 %v8712_v11, %v9163_v40  ;;  %v11081_v21 = vld [vmem:[#allocation45_spill] sm:$0xff]  ;;  %v11082_v11 = vld [vmem:[#allocation47_spill] sm:$0xff] }
 0x32f   : > { %v2972_v8 = vsub.f32 %v8745_v2, %v9163_v40  ;;  %v2973_v56 = vsub.f32 %v11079_v51, %v9163_v40  ;;  %v2974_v37 = vsub.f32 %v8788_v31, %v9163_v40 }
 0x330   : > { %v2913_v47 = vmax.f32 %v2912_v36, 0.0  ;;  %v2951_v36 = vsub.f32 %v8662_v28, %v9163_v40  ;;  %v2986_v28 = vsub.f32 %v8795_v41, %v9163_v40 }
 0x332   : > { %v2914_v42 = vadd.f32 1e-05, %v2913_v47  ;;  %v11077_v47 = vld [vmem:[#allocation27_spill] sm:$0xff] }
 0x334   : > { %7191 = vrsqrt.f32 %v2914_v42  ;;  %v2917_v42 = vsub.f32 %v11077_v47, %v9163_v40  ;;  %v2952_v47 = vsub.f32 %v8690_v16, %v9163_v40  ;;  %v11080_v16 = vld [vmem:[#allocation43_spill] sm:$0xff] }
 0x335   : > { %v2987_v57 = vsub.f32 %v11080_v16, %v9163_v40 }
 0x33e   : > { %v9243_v27 = vpop.eup %7191 }
 0x33f   : > { %v3092_v25 = vmul.f32 %v9243_v27, %v3090_v50  ;;  %v2918_v51 = vmul.f32 %v9243_v27, %v2916_v43  ;;  %v2919_v31 = vmul.f32 %v9243_v27, %v2917_v42  ;;  %v2929_v30 = vmul.f32 %v9243_v27, %v2926_v45 }
 0x340   : > { %v9258_v17 = vmul.f32 %v9243_v27, %v2927_v34  ;;  %v2931_v41 = vmul.f32 %v9243_v27, %v2928_v13  ;;  %v9262_v16 = vmul.f32 %v9243_v27, %v2940_v46  ;;  %v2943_v49 = vmul.f32 %v9243_v27, %v2941_v10 }
 0x341   : > { %v3094_v12 = vmax.f32 %v3092_v25, 0.0  ;;  %v2920_v2 = vmax.f32 %v2918_v51, 0.0  ;;  %v9265_v32 = vmax.f32 %v2919_v31, 0.0  ;;  %v2932_v50 = vmax.f32 %v2929_v30, 0.0 }
 0x342   : > { %v2933_v43 = vmax.f32 %v9258_v17, 0.0  ;;  %v2934_v42 = vmax.f32 %v2931_v41, 0.0  ;;  %v2944_v45 = vmax.f32 %v9262_v16, 0.0  ;;  %v2945_v26 = vmax.f32 %v2943_v49, 0.0 }
 0x343   : > { %3097 = vst [vmem:[#allocation3 + $0x12b] sm:$0x3f] %v3094_v12  ;;  %3099 = vst [vmem:[#allocation3 + $0x12d] sm:$0x10] %v3094_v12  ;;  %v9272_v25 = vmul.f32 %v9243_v27, %v2951_v36  ;;  %v2954_v30 = vmul.f32 %v9243_v27, %v2952_v47  ;;  %v2964_v34 = vmul.f32 %v9243_v27, %v2962_v15  ;;  %3490 = vmatprep.mubr.f32.mxu0 %v2920_v2 }
 0x344   : > { %2922 = vst [vmem:[#allocation3 + $0x13] sm:$0xff] %v2920_v2  ;;  %2923 = vst [vmem:[#allocation3 + $0x1b] sm:$0xff] %v9265_v32  ;;  %v2965_v13 = vmul.f32 %v9243_v27, %v2963_v23  ;;  %v2975_v12 = vmul.f32 %v9243_v27, %v2972_v8  ;;  %v9283_v49 = vmul.f32 %v9243_v27, %v2973_v56 }
 0x345   : > { %2924 = vst [vmem:[#allocation3 + $0x11] sm:$0x2] %v2920_v2  ;;  %2925 = vst [vmem:[#allocation3 + $0x1d] sm:$0x40] %v9265_v32  ;;  %v2977_v10 = vmul.f32 %v9243_v27, %v2974_v37  ;;  %v9287_v36 = vmul.f32 %v9243_v27, %v2986_v28  ;;  %v2955_v46 = vmax.f32 %v9272_v25, 0.0  ;;  %v2956_v47 = vmax.f32 %v2954_v30, 0.0 }
 0x346   : > { %2935 = vst [vmem:[#allocation3 + $0x23] sm:$0xfc] %v2932_v50  ;;  %2938 = vst [vmem:[#allocation3 + $0x21] sm:$0x8] %v2932_v50  ;;  %v9290_v15 = vmax.f32 %v2964_v34, 0.0  ;;  %v9292_v23 = vmax.f32 %v2965_v13, 0.0  ;;  %v2989_v8 = vmul.f32 %v9243_v27, %v2987_v57  ;;  %v11083_v37 = vsub.f32 %v11081_v21, %v9163_v40 }
 0x347   : > { %2936 = vst [vmem:[#allocation3 + $0x2b] sm:$0xff] %v2933_v43  ;;  %2937 = vst [vmem:[#allocation3 + $0x33] sm:$0xf3] %v2934_v42   ;;  %v2978_v2 = vmax.f32 %v2975_v12, 0.0  ;;  %v2980_v51 = vmax.f32 %v2977_v10, 0.0  ;;  %v2990_v56 = vmax.f32 %v9287_v36, 0.0  ;;  %v11084_v28 = vsub.f32 %v11082_v11, %v9163_v40 }
 0x348   : > { %2939 = vst [vmem:[#allocation3 + $0x35] sm:$0x1] %v2934_v42  ;;  %2947 = vst [vmem:[#allocation3 + $0x3b] sm:$0xff] %v2944_v45  ;;  %v9307_v57 = vmul.f32 %v9243_v27, %v11083_v37  ;;  %v11085_v41 = vsub.f32 %v8866_v20, %v9163_v40  ;;  %v2991_v21 = vmax.f32 %v2989_v8, 0.0  ;;  %v11087_v30 = vsub.f32 %v8904_v24, %v9163_v40  ;;  %v4550_v36 = vld [vmem:[#allocation9 + $0x418] sm:$0xff] }
 0x349   : > { %2948 = vst [vmem:[#allocation3 + $0x43] sm:$0xcf] %v2945_v26   ;;  %2949 = vst [vmem:[#allocation3 + $0x31] sm:$0x20] %v2934_v42  ;;  %v3000_v31 = vmul.f32 %v9243_v27, %v11084_v28  ;;  %v11086_v42 = vsub.f32 %v8889_v9, %v9163_v40  ;;  %v11088_v34 = vsub.f32 %v8911_v0, %v9163_v40 }
 0x34a   : > { %2950 = vst [vmem:[#allocation3 + $0x45] sm:$0x4] %v2945_v26  ;;  %2960 = vst [vmem:[#allocation3 + $0x41] sm:$0x80] %v2945_v26  ;;  %v2979_v26 = vmax.f32 %v9283_v49, 0.0  ;;  %v3010_v50 = vmul.f32 %v9243_v27, %v11085_v41  ;;  %v3021_v20 = vmul.f32 %v9243_v27, %v11087_v30  ;;  %v3001_v12 = vmax.f32 %v9307_v57, 0.0 }
 0x34b   : > { %2958 = vst [vmem:[#allocation3 + $0x4b] sm:$0xff] %v2955_v46  ;;  %2959 = vst [vmem:[#allocation3 + $0x53] sm:$0x3f] %v2956_v47  ;;  %v3011_v11 = vmul.f32 %v9243_v27, %v11086_v42  ;;  %v9331_v13 = vmul.f32 %v9243_v27, %v11088_v34  ;;  %v3002_v10 = vmax.f32 %v3000_v31, 0.0  ;;  %v11090_v8 = vsub.f32 %v8954_v4, %v9163_v40  ;;  %v4442_v61 = vld [vmem:[#allocation3 + $0x14] sm:$0xff] }
 0x34c   : > { %2961 = vst [vmem:[#allocation3 + $0x55] sm:$0x10] %v2956_v47  ;;  %2968 = vst [vmem:[#allocation3 + $0x5b] sm:$0xff] %v9290_v15  ;;  %v9336_v9 = vmax.f32 %v3010_v50, 0.0  ;;  %v11089_v47 = vsub.f32 %v8937_v62, %v9163_v40  ;;  %v11091_v28 = vsub.f32 %v8981_v39, %v9163_v40  ;;  %v11092_v4 = vsub.f32 %v9004_v59, %v9163_v40 }
 0x34d   : > { %2969 = vst [vmem:[#allocation3 + $0x63] sm:$0xff] %v9292_v23  ;;  %2970 = vst [vmem:[#allocation3 + $0x59] sm:$0x2] %v9290_v15  ;;  %v9342_v0 = vmax.f32 %v3011_v11, 0.0  ;;  %v9349_v37 = vmul.f32 %v9243_v27, %v11090_v8  ;;  %v11093_v50 = vsub.f32 %v9021_v55, %v9163_v40  ;;  %v11094_v59 = vsub.f32 %v9036_v60, %v9163_v40 }
 0x34e   : > { %2971 = vst [vmem:[#allocation3 + $0x65] sm:$0x40] %v9292_v23  ;;  %2981 = vst [vmem:[#allocation3 + $0x6b] sm:$0xfc] %v2978_v2  ;;  %v3023_v24 = vmul.f32 %v9243_v27, %v11089_v47  ;;  %v3035_v31 = vmul.f32 %v9243_v27, %v11091_v28  ;;  %v9363_v41 = vmul.f32 %v9243_v27, %v11092_v4  ;;  %v3341_v42 = vld [vmem:[#allocation3 + $0x25] sm:$0xff]  ;;  %v3342_v11 = vld [vmem:[#allocation3 + $0x2d] sm:$0xff] }
 0x34f   : > { %2982 = vst [vmem:[#allocation3 + $0x73] sm:$0xff] %v2979_v26  ;;  %2983 = vst [vmem:[#allocation3 + $0x7b] sm:$0xf3] %v2980_v51   ;;  %v3036_v39 = vmax.f32 %v9349_v37, 0.0  ;;  %v3056_v55 = vmul.f32 %v9243_v27, %v11094_v59  ;;  %v11095_v30 = vsub.f32 %v9051_v52, %v9163_v40  ;;  %v11096_v34 = vsub.f32 %v9066_v54, %v9163_v40  ;;  %v9386_v47 = vld [vmem:[#allocation3 + $0x24] sm:$0xff] }
 0x350   : > { %2984 = vst [vmem:[#allocation3 + $0x69] sm:$0x8] %v2978_v2  ;;  %2985 = vst [vmem:[#allocation3 + $0x7d] sm:$0x1] %v2980_v51  ;;  %v3024_v2 = vmax.f32 %v3021_v20, 0.0  ;;  %v3026_v62 = vmax.f32 %v3023_v24, 0.0  ;;  %6379 = vmatprep.mubr.f32.mxu1 %v3341_v42  ;;  %v11097_v52 = vsub.f32 %v9081_v14, %v9163_v40  ;;  %v11098_v14 = vsub.f32 %v9096_v35, %v9163_v40 }
 0x351   : > { %2995 = vst [vmem:[#allocation3 + $0x79] sm:$0x20] %v2980_v51  ;;  %2993 = vst [vmem:[#allocation3 + $0x83] sm:$0xff] %v2990_v56  ;;  %v3025_v51 = vmax.f32 %v9331_v13, 0.0  ;;  %v3057_v20 = vmul.f32 %v9243_v27, %v11095_v30  ;;  %v9388_v24 = vld [vmem:[#allocation3 + $0x2c] sm:$0xff]  ;;  %v3037_v60 = vmax.f32 %v3035_v31, 0.0  ;;  %6380 = vmatmul.mubr.f32.vlgmr.msra.gmra.mrb[180].mxu1 %v3342_v11  ;;  %v11099_v42 = vpack.c.bf16 %v9187_v7, %v9177_v29 }
 0x352   : > { %2994 = vst [vmem:[#allocation3 + $0x8b] sm:$0xcf] %v2991_v21   ;;  %2996 = vst [vmem:[#allocation3 + $0x8d] sm:$0x4] %v2991_v21  ;;  %v9395_v28 = vmul.f32 %v9243_v27, %v11097_v52  ;;  %v3343_v54 = vld [vmem:[#allocation3 + $0x35] sm:$0xff]  ;;  %v11100_v35 = vsub.f32 %v9111_v63, %v9163_v40  ;;  %v11101_v29 = vsub.f32 %v9125_v3, %v9163_v40  ;;  %v3344_v3 = vld [vmem:[#allocation3 + $0x3d] sm:$0xff] }
 0x353   : > { %3006 = vst [vmem:[#allocation3 + $0x89] sm:$0x80] %v2991_v21  ;;  %3004 = vst [vmem:[#allocation3 + $0x93] sm:$0xff] %v3001_v12  ;;  %v3046_v21 = vmul.f32 %v9243_v27, %v11093_v50  ;;  %v3102_v4 = vld [vmem:[#allocation3 + $0x34] sm:$0x3]  ;;  %v9403_v31 = vmax.f32 %v3057_v20, 0.0  ;;  %v3069_v50 = vmul.f32 %v9243_v27, %v11098_v14  ;;  %6382 = vmatprep.mubr.f32.mxu1 %v3343_v54  ;;  %6927 = vmatpush1.bf16.msra.mxu1 %v11099_v42 }
 0x354   : > { %3005 = vst [vmem:[#allocation3 + $0x9b] sm:$0x3f] %v3002_v10  ;;  %3007 = vst [vmem:[#allocation3 + $0x9d] sm:$0x10] %v3002_v10  ;;  %v3067_v10 = vmul.f32 %v9243_v27, %v11096_v34  ;;  %v3071_v11 = vmax.f32 %v9395_v28, 0.0  ;;  %v9419_v59 = vmul.f32 %v9243_v27, %v11100_v35  ;;  %v3081_v7 = vmul.f32 %v9243_v27, %v11101_v29  ;;  %v3225_v20 = vld [vmem:[#allocation9 + $0x20] sm:$0xff] }
 0x355   : > { %3014 = vst [vmem:[#allocation3 + $0xa3] sm:$0xff] %v9336_v9  ;;  %3016 = vst [vmem:[#allocation3 + $0xa1] sm:$0x2] %v9336_v9  ;;  %v3048_v8 = vmax.f32 %v3046_v21, 0.0  ;;  %6928 = vmatprep.subr.bf16.mxu1 %v11030_v6  ;;  %v3072_v63 = vmax.f32 %v3069_v50, 0.0  ;;  %v3226_v34 = vld [vmem:[#allocation9 + $0x28] sm:$0xff]  ;;  %6383 = vmatmul.mubr.f32.gmra.mrb[182].mxu1 %v3344_v3  ;;  %v11103_v52 = vpack.c.bf16 %v9191_v19, %v9189_v44 }
 0x356   : > { %3015 = vst [vmem:[#allocation3 + $0xab] sm:$0xff] %v9342_v0  ;;  %3017 = vst [vmem:[#allocation3 + $0xad] sm:$0x40] %v9342_v0  ;;  %v3070_v21 = vmax.f32 %v3067_v10, 0.0  ;;  %v3345_v10 = vld [vmem:[#allocation3 + $0x45] sm:$0xff]  ;;  %v6932_v54 = vpack.c.bf16 %v3226_v34, %v3225_v20  ;;  %v3346_v50 = vld [vmem:[#allocation3 + $0x4d] sm:$0xff] }
 0x357   : > { %3027 = vst [vmem:[#allocation3 + $0xb3] sm:$0xfc] %v3024_v2  ;;  %3028 = vst [vmem:[#allocation3 + $0xbb] sm:$0xff] %v3025_v51  ;;  %6385 = vmatprep.mubr.f32.mxu1 %v3345_v10  ;;  %6930 = vmatpush1.bf16.msra.mxu1 %v11103_v52  ;;  %v3257_v35 = vld [vmem:[#allocation9 + $0x120] sm:$0xff]  ;;  %v3258_v44 = vld [vmem:[#allocation9 + $0x128] sm:$0xff] }
 0x358   : > { %3030 = vst [vmem:[#allocation3 + $0xb1] sm:$0x8] %v3024_v2  ;;  %3029 = vst [vmem:[#allocation3 + $0xc3] sm:$0xf3] %v3026_v62   ;;  %v3047_v2 = vmax.f32 %v9363_v41, 0.0  ;;  %6931 = vmatprep.subr.bf16.mxu1 %v11030_v6  ;;  %v3347_v19 = vld [vmem:[#allocation3 + $0x55] sm:$0xff]  ;;  %v6981_v3 = vpack.c.bf16 %v3258_v44, %v3257_v35 }
 0x359   : > { %3031 = vst [vmem:[#allocation3 + $0xc5] sm:$0x1] %v3026_v62  ;;  %3041 = vst [vmem:[#allocation3 + $0xc1] sm:$0x20] %v3026_v62  ;;  %v9401_v62 = vmax.f32 %v3056_v55, 0.0  ;;  %v11102_v55 = vsub.f32 %v9139_v53, %v9163_v40  ;;  %v3082_v40 = vmax.f32 %v9419_v59, 0.0  ;;  %6386 = vmatmul.mubr.f32.gmra.mrb[184].mxu1 %v3346_v50 }
 0x35a   : > { %3103 = vst [vmem:[#allocation3] sm:$0xff] %v9386_v47  ;;  %3104 = vst [vmem:[#allocation3 + $0x8] sm:$0xff] %v9388_v24  ;;  %v3083_v53 = vmax.f32 %v3081_v7, 0.0  ;;  %6388 = vmatprep.mubr.f32.mxu1 %v3347_v19  ;;  %v3229_v7 = vld [vmem:[#allocation9 + $0x40] sm:$0xff]  ;;  %v3259_v20 = vld [vmem:[#allocation9 + $0x130] sm:$0xff] }
 0x35b   : > { %3039 = vst [vmem:[#allocation3 + $0xcb] sm:$0xff] %v3036_v39  ;;  %3105 = vst [vmem:[#allocation3 + $0x10] sm:$0x3] %v3102_v4  ;;  %v3091_v30 = vmul.f32 %v9243_v27, %v11102_v55  ;;  %v3227_v4 = vld [vmem:[#allocation9 + $0x30] sm:$0xff]  ;;  %6933 = vmatpush1.bf16.msra.mxu1 %v6932_v54  ;;  %v3230_v55 = vld [vmem:[#allocation9 + $0x48] sm:$0xff] }
 0x35c   : > { %3040 = vst [vmem:[#allocation3 + $0xd3] sm:$0xcf] %v3037_v60   ;;  %3042 = vst [vmem:[#allocation3 + $0xd5] sm:$0x4] %v3037_v60  ;;  %6934 = vmatprep.subr.bf16.mxu1 %v11030_v6  ;;  %v3307_v34 = vld [vmem:[#allocation3 + $0x23] sm:$0xff]  ;;  %v3261_v54 = vld [vmem:[#allocation9 + $0x140] sm:$0xff] }
 0x35d   : > { %3050 = vst [vmem:[#allocation3 + $0xdb] sm:$0xff] %v3047_v2  ;;  %3051 = vst [vmem:[#allocation3 + $0xe3] sm:$0x3f] %v3048_v8  ;;  %v3093_v27 = vmax.f32 %v3091_v30, 0.0  ;;  %v3232_v10 = vld [vmem:[#allocation9 + $0x58] sm:$0xff]  ;;  %v3262_v50 = vld [vmem:[#allocation9 + $0x148] sm:$0xff] }
 0x35e   : > { %3052 = vst [vmem:[#allocation3 + $0xd1] sm:$0x80] %v3037_v60  ;;  %3053 = vst [vmem:[#allocation3 + $0xe5] sm:$0x10] %v3048_v8  ;;  %v3255_v60 = vld [vmem:[#allocation9 + $0x110] sm:$0xff]  ;;  %v3256_v8 = vld [vmem:[#allocation9 + $0x118] sm:$0xff] }
 0x35f   : > { %3060 = vst [vmem:[#allocation3 + $0xeb] sm:$0xff] %v9401_v62  ;;  %3061 = vst [vmem:[#allocation3 + $0xf3] sm:$0xff] %v9403_v31  ;;  %v6977_v42 = vpack.c.bf16 %v3256_v8, %v3255_v60  ;;  %v3350_v8 = vld [vmem:[#allocation3 + $0x6d] sm:$0xff]  ;;  %v3234_v19 = vld [vmem:[#allocation9 + $0x68] sm:$0xff] }
 0x360   : > { %3062 = vst [vmem:[#allocation3 + $0xe9] sm:$0x2] %v9401_v62  ;;  %3063 = vst [vmem:[#allocation3 + $0xf5] sm:$0x40] %v9403_v31  ;;  %v3233_v44 = vld [vmem:[#allocation9 + $0x60] sm:$0xff]  ;;  %v4481_v1 = vld [vmem:[#allocation3 + $0x3e] sm:$0xff] }
 0x361   : > { %3073 = vst [vmem:[#allocation3 + $0xfb] sm:$0xfc] %v3070_v21  ;;  %3076 = vst [vmem:[#allocation3 + $0xf9] sm:$0x8] %v3070_v21  ;;  %v3269_v14 = vld [vmem:[#allocation3 + $0x1] sm:$0xff]  ;;  %v3228_v21 = vld [vmem:[#allocation9 + $0x38] sm:$0xff] }
 0x362   : > { %3074 = vst [vmem:[#allocation3 + $0x103] sm:$0xff] %v3071_v11  ;;  %3075 = vst [vmem:[#allocation3 + $0x10b] sm:$0xf3] %v3072_v63   ;;  %3491 = vmatmul.mubr.f32.vlgmr.msra.gmra.mrb[144].mxu0 %v3269_v14  ;;  %v6935_v29 = vpack.c.bf16 %v3228_v21, %v3227_v4  ;;  %v3270_v30 = vld [vmem:[#allocation3 + $0x9] sm:$0xff]  ;;  %v3271_v60 = vld [vmem:[#allocation3 + $0x11] sm:$0xff] }
 0x363   : > { %3077 = vst [vmem:[#allocation3 + $0x10d] sm:$0x1] %v3072_v63  ;;  %3087 = vst [vmem:[#allocation3 + $0x109] sm:$0x20] %v3072_v63  ;;  %3495 = vmatprep.mubr.f32.mxu0 %v9265_v32  ;;  %6976 = vmatpush3.bf16.msra.mxu0 %v8914_v18  ;;  %v3348_v63 = vld [vmem:[#allocation3 + $0x5d] sm:$0xff]  ;;  %v3260_v32 = vld [vmem:[#allocation9 + $0x138] sm:$0xff]  ;;  %v6938_v18 = vpack.c.bf16 %v3230_v55, %v3229_v7  ;;  %v6989_v55 = vpack.c.bf16 %v3262_v50, %v3261_v54 }
 0x364   : > { %3085 = vst [vmem:[#allocation3 + $0x113] sm:$0xff] %v3082_v40  ;;  %3086 = vst [vmem:[#allocation3 + $0x11b] sm:$0xcf] %v3083_v53   ;;  %6978 = vmatprep.subr.bf16.mxu0 %v6977_v42  ;;  %6389 = vmatmul.mubr.f32.gmra.mrb[186].mxu1 %v3348_v63  ;;  %v6985_v52 = vpack.c.bf16 %v3260_v32, %v3259_v20  ;;  %v3351_v4 = vld [vmem:[#allocation3 + $0x75] sm:$0xff]  ;;  %v3352_v7 = vld [vmem:[#allocation3 + $0x7d] sm:$0xff]  ;;  %v6944_v20 = vpack.c.bf16 %v3234_v19, %v3233_v44 }
 0x365   : > { %3088 = vst [vmem:[#allocation3 + $0x11d] sm:$0x4] %v3083_v53  ;;  %3096 = vst [vmem:[#allocation3 + $0x123] sm:$0xff] %v3093_v27  ;;  %6936 = vmatpush1.bf16.msra.mxu1 %v6935_v29  ;;  %v3231_v27 = vld [vmem:[#allocation9 + $0x50] sm:$0xff]  ;;  %v3272_v29 = vld [vmem:[#allocation3 + $0x19] sm:$0xff] }
 0x366   : > { %3098 = vst [vmem:[#allocation3 + $0x119] sm:$0x80] %v3083_v53  ;;  %3496 = vmatmul.mubr.f32.gmra.mrb[146].mxu0 %v3270_v30  ;;  %v3349_v53 = vld [vmem:[#allocation3 + $0x65] sm:$0xff]  ;;  %6937 = vmatprep.subr.bf16.mxu1 %v11030_v6  ;;  %v6941_v35 = vpack.c.bf16 %v3232_v10, %v3231_v27  ;;  %v3309_v17 = vld [vmem:[#allocation3 + $0x33] sm:$0xff] }
 0x367   : > { %3500 = vmatprep.mubr.f32.mxu0 %v3307_v34  ;;  %6391 = vmatprep.mubr.f32.mxu1 %v3349_v53  ;;  %v3263_v30 = vld [vmem:[#allocation9 + $0x150] sm:$0xff]  ;;  %v3264_v63 = vld [vmem:[#allocation9 + $0x158] sm:$0xff]  ;;  %v3355_v27 = vld [vmem:[#allocation3 + $0x95] sm:$0xff] }
 0x368   : > { %6980 = vmatpush3.bf16.msra.mxu0 %v6977_v42  ;;  %6392 = vmatmul.mubr.f32.gmra.mrb[188].mxu1 %v3350_v8  ;;  %v3235_v34 = vld [vmem:[#allocation9 + $0x70] sm:$0xff]  ;;  %v3354_v53 = vld [vmem:[#allocation3 + $0x8d] sm:$0xff]  ;;  %v3124_v41 = vld [vmem:[#allocation3 + $0x58] sm:$0xff] }
 0x369   : > { %6982 = vmatprep.subr.bf16.mxu0 %v6981_v3  ;;  %6394 = vmatprep.mubr.f32.mxu1 %v3351_v4  ;;  %v3236_v32 = vld [vmem:[#allocation9 + $0x78] sm:$0xff]  ;;  %v3265_v10 = vld [vmem:[#allocation9 + $0x160] sm:$0xff]  ;;  %v3356_v4 = vld [vmem:[#allocation3 + $0x9d] sm:$0xff] }
 0x36a   : > { %3501 = vmatmul.mubr.f32.gmra.mrb[148].mxu0 %v3271_v60  ;;  %6939 = vmatpush1.bf16.msra.mxu1 %v6938_v18  ;;  %v6993_v18 = vpack.c.bf16 %v3264_v63, %v3263_v30  ;;  %v3266_v60 = vld [vmem:[#allocation9 + $0x168] sm:$0xff]  ;;  %v6947_v8 = vpack.c.bf16 %v3236_v32, %v3235_v34  ;;  %v3237_v54 = vld [vmem:[#allocation9 + $0x80] sm:$0xff]  ;;  %v3240_v19 = vld [vmem:[#allocation9 + $0x98] sm:$0xff] }
 0x36b   : > { %v3106_v14 = vld [vmem:[#allocation3 + $0x10e] sm:$0xff]  ;;  %3505 = vmatprep.mubr.f32.mxu0 %v2933_v43  ;;  %v3107_v21 = vld [vmem:[#allocation3 + $0x116] sm:$0xff]  ;;  %6940 = vmatprep.subr.bf16.mxu1 %v11030_v6  ;;  %v3353_v43 = vld [vmem:[#allocation3 + $0x85] sm:$0xff]  ;;  %v6997_v50 = vpack.c.bf16 %v3266_v60, %v3265_v10 }
 0x36c   : > { %3109 = vst [vmem:[#allocation3 + $0x132] sm:$0xff] %v3106_v14  ;;  %v3108_v42 = vld [vmem:[#allocation3 + $0x11e] sm:$0x3]  ;;  %6984 = vmatpush3.bf16.msra.mxu0 %v6981_v3  ;;  %3110 = vst [vmem:[#allocation3 + $0x13a] sm:$0xff] %v3107_v21  ;;  %6395 = vmatmul.mubr.f32.gmra.mrb[190].mxu1 %v3352_v7  ;;  %v3273_v3 = vld [vmem:[#allocation3 + $0x21] sm:$0xff] }
 0x36d   : > { %3111 = vst [vmem:[#allocation3 + $0x142] sm:$0x3] %v3108_v42  ;;  %6986 = vmatprep.subr.bf16.mxu0 %v6985_v52  ;;  %6397 = vmatprep.mubr.f32.mxu1 %v3353_v43  ;;  %v3238_v14 = vld [vmem:[#allocation9 + $0x88] sm:$0xff]  ;;  %v3311_v21 = vld [vmem:[#allocation3 + $0x43] sm:$0xff]  ;;  %v3358_v44 = vld [vmem:[#allocation3 + $0xad] sm:$0xff] }
 0x36e   : > { %3506 = vmatmul.mubr.f32.gmra.mrb[150].mxu0 %v3272_v29  ;;  %6942 = vmatpush1.bf16.msra.mxu1 %v6941_v35  ;;  %v3357_v42 = vld [vmem:[#allocation3 + $0xa5] sm:$0xff]  ;;  %v6950_v16 = vpack.c.bf16 %v3238_v14, %v3237_v54  ;;  %v3275_v35 = vld [vmem:[#allocation3 + $0x31] sm:$0xff]  ;;  %v3276_v30 = vld [vmem:[#allocation3 + $0x39] sm:$0xff] }
 0x36f   : > { %3510 = vmatprep.mubr.f32.mxu0 %v3309_v17  ;;  %6943 = vmatprep.subr.bf16.mxu1 %v11030_v6  ;;  %v3359_v29 = vld [vmem:[#allocation3 + $0xb5] sm:$0xff]  ;;  %v3360_v17 = vld [vmem:[#allocation3 + $0xbd] sm:$0xff]  ;;  %v3278_v54 = vld [vmem:[#allocation3 + $0x49] sm:$0xff] }
 0x370   : > { %6988 = vmatpush3.bf16.msra.mxu0 %v6985_v52  ;;  %6398 = vmatmul.mubr.f32.gmra.mrb[192].mxu1 %v3354_v53  ;;  %v3274_v52 = vld [vmem:[#allocation3 + $0x29] sm:$0xff]  ;;  %v3242_v43 = vld [vmem:[#allocation9 + $0xa8] sm:$0xff]  ;;  %v3291_v13 = vld [vmem:[#allocation3 + $0xb1] sm:$0xff] }
 0x371   : > { %6990 = vmatprep.subr.bf16.mxu0 %v6989_v55  ;;  %6400 = vmatprep.mubr.f32.mxu1 %v3355_v27  ;;  %v3313_v63 = vld [vmem:[#allocation3 + $0x53] sm:$0xff]  ;;  %v3267_v34 = vld [vmem:[#allocation9 + $0x170] sm:$0xff]  ;;  %v3244_v27 = vld [vmem:[#allocation9 + $0xb8] sm:$0xff] }
 0x372   : > { %3511 = vmatmul.mubr.f32.gmra.mrb[152].mxu0 %v3273_v3  ;;  %6945 = vmatpush1.bf16.msra.mxu1 %v6944_v20  ;;  %v3361_v20 = vld [vmem:[#allocation3 + $0xc5] sm:$0xff]  ;;  %v3363_v10 = vld [vmem:[#allocation3 + $0xd5] sm:$0xff] }
 0x373   : > { %3515 = vmatprep.mubr.f32.mxu0 %v2944_v45  ;;  %6946 = vmatprep.subr.bf16.mxu1 %v11030_v6  ;;  %v3239_v45 = vld [vmem:[#allocation9 + $0x90] sm:$0xff]  ;;  %v3268_v3 = vld [vmem:[#allocation9 + $0x178] sm:$0xff] }
 0x374   : > { %6992 = vmatpush3.bf16.msra.mxu0 %v6989_v55  ;;  %6401 = vmatmul.mubr.f32.gmra.mrb[194].mxu1 %v3356_v4  ;;  %v6953_v7 = vpack.c.bf16 %v3240_v19, %v3239_v45  ;;  %v3241_v55 = vld [vmem:[#allocation9 + $0xa0] sm:$0xff]  ;;  %v7001_v53 = vpack.c.bf16 %v3268_v3, %v3267_v34  ;;  %v3277_v32 = vld [vmem:[#allocation3 + $0x41] sm:$0xff]  ;;  %v3294_v37 = vld [vmem:[#allocation3 + $0xc9] sm:$0xff] }
 0x375   : > { %6994 = vmatprep.subr.bf16.mxu0 %v6993_v18  ;;  %6403 = vmatprep.mubr.f32.mxu1 %v3357_v42  ;;  %v6956_v25 = vpack.c.bf16 %v3242_v43, %v3241_v55  ;;  %v3246_v4 = vld [vmem:[#allocation9 + $0xc8] sm:$0xff]  ;;  %v3365_v14 = vld [vmem:[#allocation3 + $0xe5] sm:$0xff]  ;;  %v3366_v42 = vld [vmem:[#allocation3 + $0xed] sm:$0xff] }
 0x376   : > { %3516 = vmatmul.mubr.f32.gmra.mrb[154].mxu0 %v3274_v52  ;;  %6948 = vmatpush1.bf16.msra.mxu1 %v6947_v8  ;;  %v3245_v8 = vld [vmem:[#allocation9 + $0xc0] sm:$0xff]  ;;  %v3364_v52 = vld [vmem:[#allocation3 + $0xdd] sm:$0xff]  ;;  %v3369_v55 = vld [vmem:[#allocation3 + $0x105] sm:$0xff] }
 0x377   : > { %3520 = vmatprep.mubr.f32.mxu0 %v3311_v21  ;;  %6949 = vmatprep.subr.bf16.mxu1 %v11030_v6  ;;  %v3279_v21 = vld [vmem:[#allocation3 + $0x51] sm:$0xff]  ;;  %v3280_v19 = vld [vmem:[#allocation3 + $0x59] sm:$0xff]  ;;  %v3301_v28 = vld [vmem:[#allocation3 + $0x101] sm:$0xff] }
 0x378   : > { %6996 = vmatpush3.bf16.msra.mxu0 %v6993_v18  ;;  %6404 = vmatmul.mubr.f32.gmra.mrb[196].mxu1 %v3358_v44  ;;  %v3362_v18 = vld [vmem:[#allocation3 + $0xcd] sm:$0xff]  ;;  %v3371_v3 = vld [vmem:[#allocation3 + $0x115] sm:$0xff] }
 0x379   : > { %6998 = vmatprep.subr.bf16.mxu0 %v6997_v50  ;;  %6406 = vmatprep.mubr.f32.mxu1 %v3359_v29  ;;  %v3316_v45 = vld [vmem:[#allocation3 + $0x6b] sm:$0xff]  ;;  %v3368_v29 = vld [vmem:[#allocation3 + $0xfd] sm:$0xff] }
 0x37a   : > { %3521 = vmatmul.mubr.f32.gmra.mrb[156].mxu0 %v3275_v35  ;;  %6951 = vmatpush1.bf16.msra.mxu1 %v6950_v16  ;;  %v3248_v16 = vld [vmem:[#allocation9 + $0xd8] sm:$0xff]  ;;  %v3367_v35 = vld [vmem:[#allocation3 + $0xf5] sm:$0xff] }
 0x37b   : > { %3525 = vmatprep.mubr.f32.mxu0 %v2955_v46  ;;  %6952 = vmatprep.subr.bf16.mxu1 %v11030_v6  ;;  %v3243_v46 = vld [vmem:[#allocation9 + $0xb0] sm:$0xff]  ;;  %v3252_v43 = vld [vmem:[#allocation9 + $0xf8] sm:$0xff] }
 0x37c   : > { %7000 = vmatpush3.bf16.msra.mxu0 %v6997_v50  ;;  %6407 = vmatmul.mubr.f32.gmra.mrb[198].mxu1 %v3360_v17  ;;  %v6959_v60 = vpack.c.bf16 %v3244_v27, %v3243_v46  ;;  %v6962_v50 = vpack.c.bf16 %v3246_v4, %v3245_v8  ;;  %v3251_v17 = vld [vmem:[#allocation9 + $0xf0] sm:$0xff]  ;;  %v3370_v34 = vld [vmem:[#allocation3 + $0x10d] sm:$0xff]  ;;  %v4548_v46 = vld [vmem:[#allocation9 + $0x408] sm:$0xff] }
 0x37d   : > { %6409 = vmatprep.mubr.f32.mxu1 %v3361_v20  ;;  %7002 = vmatprep.subr.bf16.mxu0 %v7001_v53  ;;  %v3318_v20 = vld [vmem:[#allocation3 + $0x7b] sm:$0xff]  ;;  %v6971_v49 = vpack.c.bf16 %v3252_v43, %v3251_v17  ;;  %v3283_v27 = vld [vmem:[#allocation3 + $0x71] sm:$0xff]  ;;  %v4482_v58 = vld [vmem:[#allocation3 + $0x46] sm:$0xff] }
 0x37e   : > { %3526 = vmatmul.mubr.f32.gmra.mrb[158].mxu0 %v3276_v30  ;;  %6954 = vmatpush1.bf16.msra.mxu1 %v6953_v7  ;;  %v3250_v7 = vld [vmem:[#allocation9 + $0xe8] sm:$0xff]  ;;  %v9471_v4 = vld [vmem:[#allocation3 + $0x12] sm:$0xff] }
 0x37f   : > { %3530 = vmatprep.mubr.f32.mxu0 %v3313_v63  ;;  %6955 = vmatprep.subr.bf16.mxu1 %v11030_v6  ;;  %v3281_v63 = vld [vmem:[#allocation3 + $0x61] sm:$0xff]  ;;  %v3375_v8 = vld [vmem:[#allocation3 + $0x135] sm:$0xff] }
 0x380   : > { %6410 = vmatmul.mubr.f32.gmra.mrb[200].mxu1 %v3362_v18  ;;  %7004 = vmatpush3.bf16.msra.mxu0 %v7001_v53  ;;  %v3372_v53 = vld [vmem:[#allocation3 + $0x11d] sm:$0xff]  ;;  %v3373_v18 = vld [vmem:[#allocation3 + $0x125] sm:$0xff]  ;;  %v3131_v59 = vld [vmem:[#allocation3 + $0x90] sm:$0xff] }
 0x381   : > { %6412 = vmatprep.mubr.f32.mxu1 %v3363_v10  ;;  %7005 = vmatprep.subr.bf16.mxu0 %v11030_v6  ;;  %v3374_v10 = vld [vmem:[#allocation3 + $0x12d] sm:$0xff]  ;;  %v3288_v17 = vld [vmem:[#allocation3 + $0x99] sm:$0xff] }
 0x382   : > { %3531 = vmatmul.mubr.f32.gmra.mrb[160].mxu0 %v3277_v32  ;;  %6957 = vmatpush1.bf16.msra.mxu1 %v6956_v25  ;;  %v4547_v25 = vld [vmem:[#allocation9 + $0x400] sm:$0xff] }
 0x383   : > { %3535 = vmatprep.mubr.f32.mxu0 %v9290_v15  ;;  %6958 = vmatprep.subr.bf16.mxu1 %v11030_v6  ;;  %v3247_v15 = vld [vmem:[#allocation9 + $0xd0] sm:$0xff]  ;;  %v7053_v32 = vpack.c.bf16 %v4548_v46, %v4547_v25  ;;  %v3116_v43 = vld [vmem:[#allocation3 + $0x18] sm:$0xff] }
 0x384   : > { %6413 = vmatmul.mubr.f32.gmra.mrb[202].mxu1 %v3364_v52  ;;  %v6965_v44 = vpack.c.bf16 %v3248_v16, %v3247_v15  ;;  %v3376_v52 = vld [vmem:[#allocation3 + $0x13d] sm:$0xff] }
 0x385   : > { %6415 = vmatprep.mubr.f32.mxu1 %v3365_v14  ;;  %v4549_v14 = vld [vmem:[#allocation9 + $0x410] sm:$0xff]  ;;  %v4552_v16 = vld [vmem:[#allocation9 + $0x428] sm:$0xff] }
 0x386   : > { %3536 = vmatmul.mubr.f32.gmra.mrb[162].mxu0 %v3278_v54  ;;  %6960 = vmatpush1.bf16.msra.mxu1 %v6959_v60  ;;  %v3320_v60 = vld [vmem:[#allocation3 + $0x8b] sm:$0xff]  ;;  %v3284_v54 = vld [vmem:[#allocation3 + $0x79] sm:$0xff]  ;;  %v7057_v15 = vpack.c.bf16 %v4550_v36, %v4549_v14  ;;  %v3289_v25 = vld [vmem:[#allocation3 + $0xa1] sm:$0xff] }
 0x387   : > { %3540 = vmatprep.mubr.f32.mxu0 %v9292_v23  ;;  %6961 = vmatprep.subr.bf16.mxu1 %v11030_v6  ;;  %v3249_v23 = vld [vmem:[#allocation9 + $0xe0] sm:$0xff]  ;;  %v3156_v14 = vld [vmem:[#allocation3 + $0x4a] sm:$0xff] }
 0x388   : > { %6416 = vmatmul.mubr.f32.gmra.mrb[204].mxu1 %v3366_v42  ;;  %v6968_v30 = vpack.c.bf16 %v3250_v7, %v3249_v23  ;;  %v4551_v42 = vld [vmem:[#allocation9 + $0x420] sm:$0xff]  ;;  %v9485_v7 = vld [vmem:[#allocation3 + $0x2a] sm:$0xff] }
 0x389   : > { %6418 = vmatprep.mubr.f32.mxu1 %v3367_v35  ;;  %v7061_v57 = vpack.c.bf16 %v4552_v16, %v4551_v42  ;;  %v4553_v35 = vld [vmem:[#allocation9 + $0x430] sm:$0xff]  ;;  %v3287_v23 = vld [vmem:[#allocation3 + $0x91] sm:$0xff]  ;;  %v3292_v36 = vld [vmem:[#allocation3 + $0xb9] sm:$0xff] }
 0x38a   : > { %3541 = vmatmul.mubr.f32.gmra.mrb[164].mxu0 %v3279_v21  ;;  %6963 = vmatpush1.bf16.msra.mxu1 %v6962_v50  ;;  %v3322_v50 = vld [vmem:[#allocation3 + $0x9b] sm:$0xff] }
 0x38b   : > { %3545 = vmatprep.mubr.f32.mxu0 %v3316_v45  ;;  %6964 = vmatprep.subr.bf16.mxu1 %v11030_v6  ;;  %v9477_v21 = vld [vmem:[#allocation3 + $0x1a] sm:$0xff]  ;;  %v3286_v45 = vld [vmem:[#allocation3 + $0x89] sm:$0xff] }
 0x38c   : > { %6419 = vmatmul.mubr.f32.gmra.mrb[206].mxu1 %v3368_v29  ;;  %v3293_v42 = vld [vmem:[#allocation3 + $0xc1] sm:$0xff] }
 0x38d   : > { %6421 = vmatprep.mubr.f32.mxu1 %v3369_v55  ;;  %v4555_v55 = vld [vmem:[#allocation9 + $0x440] sm:$0xff]  ;;  %v3121_v16 = vld [vmem:[#allocation3 + $0x40] sm:$0xff] }
 0x38e   : > { %3546 = vmatmul.mubr.f32.gmra.mrb[166].mxu0 %v3280_v19  ;;  %6966 = vmatpush1.bf16.msra.mxu1 %v6965_v44  ;;  %v4554_v44 = vld [vmem:[#allocation9 + $0x438] sm:$0xff] }
 0x38f   : > { %3550 = vmatprep.mubr.f32.mxu0 %v2979_v26  ;;  %6967 = vmatprep.subr.bf16.mxu1 %v11030_v6  ;;  %v3282_v26 = vld [vmem:[#allocation3 + $0x69] sm:$0xff]  ;;  %v7065_v29 = vpack.c.bf16 %v4554_v44, %v4553_v35  ;;  %v3295_v44 = vld [vmem:[#allocation3 + $0xd1] sm:$0xff] }
 0x390   : > { %6422 = vmatmul.mubr.f32.gmra.mrb[208].mxu1 %v3370_v34  ;;  %v3115_v19 = vld [vmem:[#allocation3 + $0x10] sm:$0xff]  ;;  %v4557_v34 = vld [vmem:[#allocation9 + $0x450] sm:$0xff] }
 0x391   : > { %6424 = vmatprep.mubr.f32.mxu1 %v3371_v3  ;;  %v4558_v3 = vld [vmem:[#allocation9 + $0x458] sm:$0xff]  ;;  %v3159_v35 = vld [vmem:[#allocation3 + $0x62] sm:$0xff] }
 0x392   : > { %3551 = vmatmul.mubr.f32.gmra.mrb[168].mxu0 %v3281_v63  ;;  %6969 = vmatpush1.bf16.msra.mxu1 %v6968_v30  ;;  %v4556_v30 = vld [vmem:[#allocation9 + $0x448] sm:$0xff]  ;;  %v7073_v46 = vpack.c.bf16 %v4558_v3, %v4557_v34  ;;  %v3299_v34 = vld [vmem:[#allocation3 + $0xf1] sm:$0xff] }
 0x393   : > { %3555 = vmatprep.mubr.f32.mxu0 %v3318_v20  ;;  %6970 = vmatprep.subr.bf16.mxu1 %v11030_v6  ;;  %v7069_v63 = vpack.c.bf16 %v4556_v30, %v4555_v55  ;;  %v9489_v20 = vld [vmem:[#allocation3 + $0x32] sm:$0xff]  ;;  %v3297_v55 = vld [vmem:[#allocation3 + $0xe1] sm:$0xff] }
 0x394   : > { %6425 = vmatmul.mubr.f32.gmra.mrb[210].mxu1 %v3372_v53  ;;  %v4560_v53 = vld [vmem:[#allocation9 + $0x468] sm:$0xff]  ;;  %v3336_v3 = vld [vmem:[#allocation3 + $0x10b] sm:$0xff] }
 0x395   : > { %6427 = vmatprep.mubr.f32.mxu1 %v3373_v18  ;;  %v3327_v18 = vld [vmem:[#allocation3 + $0xc3] sm:$0xff] }
 0x396   : > { %3556 = vmatmul.mubr.f32.gmra.mrb[170].mxu0 %v3282_v26  ;;  %6972 = vmatpush1.bf16.msra.mxu1 %v6971_v49  ;;  %v9492_v49 = vld [vmem:[#allocation3 + $0x3a] sm:$0xff]  ;;  %v4559_v26 = vld [vmem:[#allocation9 + $0x460] sm:$0xff] }
 0x397   : > { %3560 = vmatprep.mubr.f32.mxu0 %v2990_v56  ;;  %7054 = vmatprep.subr.bf16.mxu1 %v7053_v32  ;;  %v3285_v56 = vld [vmem:[#allocation3 + $0x81] sm:$0xff] }
 0x398   : > { %6428 = vmatmul.mubr.f32.gmra.mrb[212].mxu1 %v3374_v10  ;;  %v7077_v10 = vpack.c.bf16 %v4560_v53, %v4559_v26  ;;  %v3125_v30 = vld [vmem:[#allocation3 + $0x60] sm:$0xff]  ;;  %v3165_v26 = vld [vmem:[#allocation3 + $0x92] sm:$0xff] }
 0x399   : > { %6430 = vmatprep.mubr.f32.mxu1 %v3375_v8  ;;  %v4561_v8 = vld [vmem:[#allocation9 + $0x470] sm:$0xff] }
 0x39a   : > { %3561 = vmatmul.mubr.f32.gmra.mrb[172].mxu0 %v3283_v27  ;;  %v3118_v27 = vld [vmem:[#allocation3 + $0x28] sm:$0xff]  ;;  %v3338_v53 = vld [vmem:[#allocation3 + $0x11b] sm:$0xff] }
 0x39b   : > { %3565 = vmatprep.mubr.f32.mxu0 %v3320_v60  ;;  %v9497_v60 = vld [vmem:[#allocation3 + $0x42] sm:$0xff] }
 0x39c   : > { %6431 = vmatmul.mubr.f32.gmra.mrb[214].mxu1 %v3376_v52 }
 0x39d   : > { %3980 = vmatprep.mubr.f32.mxu1 %v9471_v4 }
 0x39e   : > { %3566 = vmatmul.mubr.f32.gmra.mrb[174].mxu0 %v3284_v54  ;;  %v4562_v54 = vld [vmem:[#allocation9 + $0x478] sm:$0xff] }
 0x39f   : > { %3570 = vmatprep.mubr.f32.mxu0 %v3001_v12  ;;  %v9481_v12 = vld [vmem:[#allocation3 + $0x22] sm:$0xff]  ;;  %v7081_v52 = vpack.c.bf16 %v4562_v54, %v4561_v8  ;;  %v3303_v54 = vld [vmem:[#allocation3 + $0x111] sm:$0xff] }
 0x3a0   : > { %3981 = vmatmul.mubr.f32.vlgmr.msra.gmra.mrb[216].mxu1 %v9386_v47  ;;  %v3167_v8 = vld [vmem:[#allocation3 + $0xa2] sm:$0xff] }
 0x3a1   : > { %3985 = vmatprep.mubr.f32.mxu1 %v9477_v21  ;;  %7056 = vmatpush3.bf16.msra.mxu1 %v7053_v32  ;;  %v3290_v32 = vld [vmem:[#allocation3 + $0xa9] sm:$0xff] }
 0x3a2   : > { %3571 = vmatmul.mubr.f32.gmra.mrb[176].mxu0 %v3285_v56  ;;  %7058 = vmatprep.subr.bf16.mxu1 %v7057_v15  ;;  %v3120_v56 = vld [vmem:[#allocation3 + $0x38] sm:$0xff] }
 0x3a3   : > { %3575 = vmatprep.mubr.f32.mxu0 %v3322_v50  ;;  %v3329_v50 = vld [vmem:[#allocation3 + $0xd3] sm:$0xff] }
 0x3a4   : > { %3986 = vmatmul.mubr.f32.gmra.mrb[218].mxu1 %v9388_v24 }
 0x3a5   : > { %3990 = vmatprep.mubr.f32.mxu1 %v9481_v12  ;;  %7060 = vmatpush3.bf16.msra.mxu1 %v7057_v15  ;;  %v3157_v15 = vld [vmem:[#allocation3 + $0x52] sm:$0xff] }
 0x3a6   : > { %3576 = vmatmul.mubr.f32.gmra.mrb[178].mxu0 %v3286_v45  ;;  %7062 = vmatprep.subr.bf16.mxu1 %v7061_v57  ;;  %v3158_v45 = vld [vmem:[#allocation3 + $0x5a] sm:$0xff] }
 0x3a7   : > { %3580 = vmatprep.mubr.f32.mxu0 %v9336_v9  ;;  %v3325_v9 = vld [vmem:[#allocation3 + $0xb3] sm:$0xff] }
 0x3a8   : > { %3991 = vmatmul.mubr.f32.gmra.mrb[220].mxu1 %v3115_v19  ;;  %v3160_v19 = vld [vmem:[#allocation3 + $0x6a] sm:$0xff] }
 0x3a9   : > { %3995 = vmatprep.mubr.f32.mxu1 %v9485_v7  ;;  %7064 = vmatpush3.bf16.msra.mxu1 %v7061_v57  ;;  %v3331_v57 = vld [vmem:[#allocation3 + $0xe3] sm:$0xff] }
 0x3aa   : > { %3581 = vmatmul.mubr.f32.gmra.mrb[180].mxu0 %v3287_v23  ;;  %7066 = vmatprep.subr.bf16.mxu1 %v7065_v29  ;;  %v3123_v23 = vld [vmem:[#allocation3 + $0x50] sm:$0xff] }
 0x3ab   : > { %3585 = vmatprep.mubr.f32.mxu0 %v9342_v0  ;;  %v3117_v0 = vld [vmem:[#allocation3 + $0x20] sm:$0xff] }
 0x3ac   : > { %3996 = vmatmul.mubr.f32.gmra.mrb[222].mxu1 %v3116_v43  ;;  %v3298_v43 = vld [vmem:[#allocation3 + $0xe9] sm:$0xff] }
 0x3ad   : > { %4000 = vmatprep.mubr.f32.mxu1 %v9489_v20  ;;  %7068 = vmatpush3.bf16.msra.mxu1 %v7065_v29  ;;  %v3296_v29 = vld [vmem:[#allocation3 + $0xd9] sm:$0xff] }
 0x3ae   : > { %3586 = vmatmul.mubr.f32.gmra.mrb[182].mxu0 %v3288_v17  ;;  %7070 = vmatprep.subr.bf16.mxu1 %v7069_v63  ;;  %v3334_v17 = vld [vmem:[#allocation3 + $0xfb] sm:$0xff] }
 0x3af   : > { %3590 = vmatprep.mubr.f32.mxu0 %v3325_v9  ;;  %v3162_v9 = vld [vmem:[#allocation3 + $0x7a] sm:$0xff] }
 0x3b0   : > { %4001 = vmatmul.mubr.f32.gmra.mrb[224].mxu1 %v3117_v0  ;;  %v3300_v0 = vld [vmem:[#allocation3 + $0xf9] sm:$0xff] }
 0x3b1   : > { %4005 = vmatprep.mubr.f32.mxu1 %v9492_v49  ;;  %7072 = vmatpush3.bf16.msra.mxu1 %v7069_v63  ;;  %v3126_v63 = vld [vmem:[#allocation3 + $0x68] sm:$0xff] }
 0x3b2   : > { %3591 = vmatmul.mubr.f32.gmra.mrb[184].mxu0 %v3289_v25  ;;  %7074 = vmatprep.subr.bf16.mxu1 %v7073_v46  ;;  %v3164_v25 = vld [vmem:[#allocation3 + $0x8a] sm:$0xff] }
 0x3b3   : > { %3595 = vmatprep.mubr.f32.mxu0 %v3025_v51  ;;  %v3119_v51 = vld [vmem:[#allocation3 + $0x30] sm:$0xff] }
 0x3b4   : > { %4006 = vmatmul.mubr.f32.gmra.mrb[226].mxu1 %v3118_v27  ;;  %v3130_v27 = vld [vmem:[#allocation3 + $0x88] sm:$0xff] }
 0x3b5   : > { %4010 = vmatprep.mubr.f32.mxu1 %v9497_v60  ;;  %7076 = vmatpush3.bf16.msra.mxu1 %v7073_v46  ;;  %v3128_v46 = vld [vmem:[#allocation3 + $0x78] sm:$0xff] }
 0x3b6   : > { %3596 = vmatmul.mubr.f32.gmra.mrb[186].mxu0 %v3290_v32  ;;  %7078 = vmatprep.subr.bf16.mxu1 %v7077_v10  ;;  %v3166_v32 = vld [vmem:[#allocation3 + $0x9a] sm:$0xff] }
 0x3b7   : > { %3600 = vmatprep.mubr.f32.mxu0 %v3327_v18  ;;  %v3302_v18 = vld [vmem:[#allocation3 + $0x109] sm:$0xff] }
 0x3b8   : > { %4011 = vmatmul.mubr.f32.gmra.mrb[228].mxu1 %v3119_v51  ;;  %v4515_v51 = vld [vmem:[#allocation9 + $0x300] sm:$0xff] }
 0x3b9   : > { %4015 = vmatprep.mubr.f32.mxu1 %v3156_v14  ;;  %7080 = vmatpush3.bf16.msra.mxu1 %v7077_v10  ;;  %v3339_v10 = vld [vmem:[#allocation3 + $0x123] sm:$0xff]  ;;  %v3304_v14 = vld [vmem:[#allocation3 + $0x119] sm:$0xff] }
 0x3ba   : > { %3601 = vmatmul.mubr.f32.gmra.mrb[188].mxu0 %v3291_v13  ;;  %7082 = vmatprep.subr.bf16.mxu1 %v7081_v52  ;;  %v3168_v13 = vld [vmem:[#allocation3 + $0xaa] sm:$0xff] }
 0x3bb   : > { %3605 = vmatprep.mubr.f32.mxu0 %v3036_v39  ;;  %v3122_v39 = vld [vmem:[#allocation3 + $0x48] sm:$0xff] }
 0x3bc   : > { %4016 = vmatmul.mubr.f32.gmra.mrb[230].mxu1 %v3120_v56  ;;  %v3169_v56 = vld [vmem:[#allocation3 + $0xb2] sm:$0xff] }
 0x3bd   : > { %4020 = vmatprep.mubr.f32.mxu1 %v3157_v15  ;;  %7084 = vmatpush3.bf16.msra.mxu1 %v7081_v52  ;;  %v4516_v52 = vld [vmem:[#allocation9 + $0x308] sm:$0xff] }
 0x3be   : > { %3606 = vmatmul.mubr.f32.gmra.mrb[190].mxu0 %v3292_v36  ;;  %v3132_v36 = vld [vmem:[#allocation3 + $0x98] sm:$0xff]  ;;  %v3133_v15 = vld [vmem:[#allocation3 + $0xa0] sm:$0xff] }
 0x3bf   : > { %3610 = vmatprep.mubr.f32.mxu0 %v3329_v50  ;;  %v7006_v50 = vpack.c.bf16 %v4516_v52, %v4515_v51  ;;  %v3139_v51 = vld [vmem:[#allocation3 + $0xd0] sm:$0xff]  ;;  %v4529_v52 = vld [vmem:[#allocation9 + $0x370] sm:$0xff] }
 0x3c0   : > { %4021 = vmatmul.mubr.f32.gmra.mrb[232].mxu1 %v3121_v16  ;;  %v4518_v16 = vld [vmem:[#allocation9 + $0x318] sm:$0xff] }
 0x3c1   : > { %4025 = vmatprep.mubr.f32.mxu1 %v3158_v45  ;;  %v9512_v45 = vld [vmem:[#allocation3 + $0x34] sm:$0xff] }
 0x3c2   : > { %3611 = vmatmul.mubr.f32.gmra.mrb[192].mxu0 %v3293_v42  ;;  %v4517_v42 = vld [vmem:[#allocation9 + $0x310] sm:$0xff] }
 0x3c3   : > { %3615 = vmatprep.mubr.f32.mxu0 %v3047_v2  ;;  %v3161_v2 = vld [vmem:[#allocation3 + $0x72] sm:$0xff] }
 0x3c4   : > { %4026 = vmatmul.mubr.f32.gmra.mrb[234].mxu1 %v3122_v39  ;;  %v9515_v39 = vld [vmem:[#allocation3 + $0x3c] sm:$0xff] }
 0x3c5   : > { %4030 = vmatprep.mubr.f32.mxu1 %v3159_v35  ;;  %v4519_v35 = vld [vmem:[#allocation9 + $0x320] sm:$0xff] }
 0x3c6   : > { %3616 = vmatmul.mubr.f32.gmra.mrb[194].mxu0 %v3294_v37  ;;  %v3170_v37 = vld [vmem:[#allocation3 + $0xba] sm:$0xff] }
 0x3c7   : > { %3620 = vmatprep.mubr.f32.mxu0 %v3331_v57  ;;  %v3134_v57 = vld [vmem:[#allocation3 + $0xa8] sm:$0xff] }
 0x3c8   : > { %4031 = vmatmul.mubr.f32.gmra.mrb[236].mxu1 %v3123_v23  ;;  %v3171_v23 = vld [vmem:[#allocation3 + $0xc2] sm:$0xff] }
 0x3c9   : > { %4035 = vmatprep.mubr.f32.mxu1 %v3160_v19  ;;  %v9522_v19 = vld [vmem:[#allocation3 + $0x4c] sm:$0xff] }
 0x3ca   : > { %3621 = vmatmul.mubr.f32.gmra.mrb[196].mxu0 %v3295_v44  ;;  %v4520_v44 = vld [vmem:[#allocation9 + $0x328] sm:$0xff] }
 0x3cb   : > { %3625 = vmatprep.mubr.f32.mxu0 %v9401_v62  ;;  %v3163_v62 = vld [vmem:[#allocation3 + $0x82] sm:$0xff] }
 0x3cc   : > { %4036 = vmatmul.mubr.f32.gmra.mrb[238].mxu1 %v3124_v41  ;;  %v3135_v41 = vld [vmem:[#allocation3 + $0xb0] sm:$0xff] }
 0x3cd   : > { %4040 = vmatprep.mubr.f32.mxu1 %v3161_v2  ;;  %v4521_v2 = vld [vmem:[#allocation9 + $0x330] sm:$0xff] }
 0x3ce   : > { %3626 = vmatmul.mubr.f32.gmra.mrb[198].mxu0 %v3296_v29  ;;  %v7012_v29 = vpack.c.bf16 %v4520_v44, %v4519_v35  ;;  %v9564_v35 = vld [vmem:[#allocation3 + $0xac] sm:$0xff] }
 0x3cf   : > { %3630 = vmatprep.mubr.f32.mxu0 %v9403_v31  ;;  %v3127_v31 = vld [vmem:[#allocation3 + $0x70] sm:$0xff] }
 0x3d0   : > { %4041 = vmatmul.mubr.f32.gmra.mrb[240].mxu1 %v3125_v30  ;;  %v9526_v30 = vld [vmem:[#allocation3 + $0x54] sm:$0xff] }
 0x3d1   : > { %4045 = vmatprep.mubr.f32.mxu1 %v3162_v9  ;;  %v9529_v9 = vld [vmem:[#allocation3 + $0x5c] sm:$0xff] }
 0x3d2   : > { %3631 = vmatmul.mubr.f32.gmra.mrb[200].mxu0 %v3297_v55  ;;  %v4522_v55 = vld [vmem:[#allocation9 + $0x338] sm:$0xff] }
 0x3d3   : > { %3635 = vmatprep.mubr.f32.mxu0 %v3334_v17  ;;  %v3172_v17 = vld [vmem:[#allocation3 + $0xca] sm:$0xff] }
 0x3d4   : > { %4046 = vmatmul.mubr.f32.gmra.mrb[242].mxu1 %v3126_v63  ;;  %v3136_v63 = vld [vmem:[#allocation3 + $0xb8] sm:$0xff] }
 0x3d5   : > { %4050 = vmatprep.mubr.f32.mxu1 %v3163_v62  ;;  %v4523_v62 = vld [vmem:[#allocation9 + $0x340] sm:$0xff] }
 0x3d6   : > { %3636 = vmatmul.mubr.f32.gmra.mrb[202].mxu0 %v3298_v43  ;;  %v7015_v43 = vpack.c.bf16 %v4522_v55, %v4521_v2  ;;  %v9568_v2 = vld [vmem:[#allocation3 + $0xb4] sm:$0xff] }
 0x3d7   : > { %3640 = vmatprep.mubr.f32.mxu0 %v3071_v11  ;;  %v3129_v11 = vld [vmem:[#allocation3 + $0x80] sm:$0xff] }
 0x3d8   : > { %4051 = vmatmul.mubr.f32.gmra.mrb[244].mxu1 %v3127_v31  ;;  %v9533_v31 = vld [vmem:[#allocation3 + $0x64] sm:$0xff]  ;;  %v9570_v55 = vld [vmem:[#allocation3 + $0xfa] sm:$0xff] }
 0x3d9   : > { %4055 = vmatprep.mubr.f32.mxu1 %v3164_v25  ;;  %v9536_v25 = vld [vmem:[#allocation3 + $0x6c] sm:$0xff] }
 0x3da   : > { %3641 = vmatmul.mubr.f32.gmra.mrb[204].mxu0 %v3299_v34  ;;  %v4524_v34 = vld [vmem:[#allocation9 + $0x348] sm:$0xff] }
 0x3db   : > { %3645 = vmatprep.mubr.f32.mxu0 %v3336_v3  ;;  %v3173_v3 = vld [vmem:[#allocation3 + $0xd2] sm:$0xff] }
 0x3dc   : > { %4056 = vmatmul.mubr.f32.gmra.mrb[246].mxu1 %v3128_v46  ;;  %v3137_v46 = vld [vmem:[#allocation3 + $0xc0] sm:$0xff] }
 0x3dd   : > { %4060 = vmatprep.mubr.f32.mxu1 %v3165_v26  ;;  %v4525_v26 = vld [vmem:[#allocation9 + $0x350] sm:$0xff] }
 0x3de   : > { %3646 = vmatmul.mubr.f32.gmra.mrb[206].mxu0 %v3300_v0  ;;  %v7018_v0 = vpack.c.bf16 %v4524_v34, %v4523_v62  ;;  %v4535_v62 = vld [vmem:[#allocation9 + $0x3a0] sm:$0xff]  ;;  %v4536_v34 = vld [vmem:[#allocation9 + $0x3a8] sm:$0xff] }
 0x3df   : > { %3650 = vmatprep.mubr.f32.mxu0 %v3082_v40  ;;  %v3340_v40 = vld [vmem:[#allocation3 + $0x12b] sm:$0xff] }
 0x3e0   : > { %4061 = vmatmul.mubr.f32.gmra.mrb[248].mxu1 %v3129_v11  ;;  %v9540_v11 = vld [vmem:[#allocation3 + $0x74] sm:$0xff] }
 0x3e1   : > { %4065 = vmatprep.mubr.f32.mxu1 %v3166_v32  ;;  %v9543_v32 = vld [vmem:[#allocation3 + $0x7c] sm:$0xff] }
 0x3e2   : > { %3651 = vmatmul.mubr.f32.gmra.mrb[208].mxu0 %v3301_v28  ;;  %v4526_v28 = vld [vmem:[#allocation9 + $0x358] sm:$0xff] }
 0x3e3   : > { %3655 = vmatprep.mubr.f32.mxu0 %v3338_v53  ;;  %v3174_v53 = vld [vmem:[#allocation3 + $0xda] sm:$0xff] }
 0x3e4   : > { %4066 = vmatmul.mubr.f32.gmra.mrb[250].mxu1 %v3130_v27  ;;  %v3138_v27 = vld [vmem:[#allocation3 + $0xc8] sm:$0xff] }
 0x3e5   : > { %4070 = vmatprep.mubr.f32.mxu1 %v3167_v8  ;;  %v4528_v8 = vld [vmem:[#allocation9 + $0x368] sm:$0xff] }
 0x3e6   : > { %3656 = vmatmul.mubr.f32.gmra.mrb[210].mxu0 %v3302_v18  ;;  %v7021_v18 = vpack.c.bf16 %v4526_v28, %v4525_v26  ;;  %v7036_v26 = vpack.c.bf16 %v4536_v34, %v4535_v62  ;;  %v3143_v28 = vld [vmem:[#allocation3 + $0xf0] sm:$0xff]  ;;  %v4544_v62 = vld [vmem:[#allocation9 + $0x3e8] sm:$0xff]  ;;  %v9618_v34 = vld [vmem:[#allocation3 + $0x104] sm:$0xff] }
 0x3e7   : > { %3660 = vmatprep.mubr.f32.mxu0 %v3339_v10  ;;  %v4527_v10 = vld [vmem:[#allocation9 + $0x360] sm:$0xff] }
 0x3e8   : > { %4071 = vmatmul.mubr.f32.gmra.mrb[252].mxu1 %v3131_v59  ;;  %v3175_v59 = vld [vmem:[#allocation3 + $0xe2] sm:$0xff] }
 0x3e9   : > { %4075 = vmatprep.mubr.f32.mxu1 %v3168_v13  ;;  %v7024_v13 = vpack.c.bf16 %v4528_v8, %v4527_v10  ;;  %v9590_v10 = vld [vmem:[#allocation3 + $0x10a] sm:$0xff]  ;;  %v9594_v8 = vld [vmem:[#allocation3 + $0xdc] sm:$0xff] }
 0x3ea   : > { %3661 = vmatmul.mubr.f32.gmra.mrb[212].mxu0 %v3303_v54  ;;  %v9547_v54 = vld [vmem:[#allocation3 + $0x84] sm:$0xff]  ;;  %11105 = vst [vmem:[#allocation28_spill] sm:$0xff] %v9590_v10 }
 0x3eb   : > { %3665 = vmatprep.mubr.f32.mxu0 %v3340_v40  ;;  %v9550_v40 = vld [vmem:[#allocation3 + $0x8c] sm:$0xff] }
 0x3ec   : > { %4076 = vmatmul.mubr.f32.gmra.mrb[254].mxu1 %v3132_v36  ;;  %v9554_v36 = vld [vmem:[#allocation3 + $0x94] sm:$0xff] }
 0x3ed   : > { %4080 = vmatprep.mubr.f32.mxu1 %v3169_v56  ;;  %v3176_v56 = vld [vmem:[#allocation3 + $0xea] sm:$0xff] }
 0x3ee   : > { %3666 = vmatmul.mubr.f32.gmra.mrb[214].mxu0 %v3304_v14  ;;  %v4530_v14 = vld [vmem:[#allocation9 + $0x378] sm:$0xff] }
 0x3ef   : > { %6465 = vmatprep.mubr.f32.mxu0 %v9386_v47  ;;  %v7009_v47 = vpack.c.bf16 %v4518_v16, %v4517_v42  ;;  %v3140_v42 = vld [vmem:[#allocation3 + $0xd8] sm:$0xff] }
 0x3f0   : > { %4081 = vmatmul.mubr.f32.gmra.mrb[0].mxu1 %v3133_v15  ;;  %v7027_v15 = vpack.c.bf16 %v4530_v14, %v4529_v52  ;;  %v4531_v16 = vld [vmem:[#allocation9 + $0x380] sm:$0xff]  ;;  %v4540_v52 = vld [vmem:[#allocation9 + $0x3c8] sm:$0xff]  ;;  %v9598_v14 = vld [vmem:[#allocation3 + $0xe4] sm:$0xff] }
 0x3f1   : > { %4085 = vmatprep.mubr.f32.mxu1 %v3170_v37  ;;  %v4532_v37 = vld [vmem:[#allocation9 + $0x388] sm:$0xff] }
 0x3f2   : > { %6466 = vmatmul.mubr.f32.vlgmr.msra.gmra.mrb[216].mxu0 %v9388_v24  ;;  %v9519_v24 = vld [vmem:[#allocation3 + $0x44] sm:$0xff]  ;;  %v7030_v44 = vpack.c.bf16 %v4532_v37, %v4531_v16 }
 0x3f3   : > { %6468 = vmatprep.mubr.f32.mxu0 %v9512_v45  ;;  %7007 = vmatpush1.bf16.msra.mxu0 %v7006_v50  ;;  %v9557_v50 = vld [vmem:[#allocation3 + $0x9c] sm:$0xff] }
 0x3f4   : > { %7008 = vmatprep.subr.bf16.mxu0 %v11030_v6  ;;  %4086 = vmatmul.mubr.f32.gmra.mrb[2].mxu1 %v3134_v57  ;;  %v3177_v57 = vld [vmem:[#allocation3 + $0xf2] sm:$0xff]  ;;  %v3145_v16 = vld [vmem:[#allocation3 + $0x100] sm:$0xff] }
 0x3f5   : > { %4090 = vmatprep.mubr.f32.mxu1 %v3171_v23  ;;  %v3141_v23 = vld [vmem:[#allocation3 + $0xe0] sm:$0xff] }
 0x3f6   : > { %6469 = vmatmul.mubr.f32.gmra.mrb[218].mxu0 %v9515_v39  ;;  %v4541_v37 = vld [vmem:[#allocation9 + $0x3d0] sm:$0xff] }
 0x3f7   : > { %6471 = vmatprep.mubr.f32.mxu0 %v9519_v24  ;;  %7010 = vmatpush1.bf16.msra.mxu0 %v7009_v47  ;;  %v9561_v47 = vld [vmem:[#allocation3 + $0xa4] sm:$0xff] }
 0x3f8   : > { %7011 = vmatprep.subr.bf16.mxu0 %v11030_v6  ;;  %4091 = vmatmul.mubr.f32.gmra.mrb[4].mxu1 %v3135_v41  ;;  %v4534_v41 = vld [vmem:[#allocation9 + $0x398] sm:$0xff] }
 0x3f9   : > { %4095 = vmatprep.mubr.f32.mxu1 %v3172_v17  ;;  %v9574_v17 = vld [vmem:[#allocation3 + $0xbc] sm:$0xff] }
 0x3fa   : > { %6472 = vmatmul.mubr.f32.gmra.mrb[220].mxu0 %v9522_v19 }
 0x3fb   : > { %6474 = vmatprep.mubr.f32.mxu0 %v9526_v30  ;;  %7013 = vmatpush1.bf16.msra.mxu0 %v7012_v29  ;;  %v4533_v29 = vld [vmem:[#allocation9 + $0x390] sm:$0xff] }
 0x3fc   : > { %7014 = vmatprep.subr.bf16.mxu0 %v11030_v6  ;;  %4096 = vmatmul.mubr.f32.gmra.mrb[6].mxu1 %v3136_v63  ;;  %v3142_v63 = vld [vmem:[#allocation3 + $0xe8] sm:$0xff] }
 0x3fd   : > { %4100 = vmatprep.mubr.f32.mxu1 %v3173_v3  ;;  %v9578_v3 = vld [vmem:[#allocation3 + $0xc4] sm:$0xff] }
 0x3fe   : > { %6475 = vmatmul.mubr.f32.gmra.mrb[222].mxu0 %v9529_v9 }
 0x3ff   : > { %6477 = vmatprep.mubr.f32.mxu0 %v9533_v31  ;;  %7016 = vmatpush1.bf16.msra.mxu0 %v7015_v43  ;;  %v7033_v43 = vpack.c.bf16 %v4534_v41, %v4533_v29  ;;  %v9614_v29 = vld [vmem:[#allocation3 + $0xfc] sm:$0xff] }
 0x400   : > { %7017 = vmatprep.subr.bf16.mxu0 %v11030_v6  ;;  %4101 = vmatmul.mubr.f32.gmra.mrb[8].mxu1 %v3137_v46  ;;  %v9584_v46 = vld [vmem:[#allocation3 + $0xcc] sm:$0xff] }
 0x401   : > { %4105 = vmatprep.mubr.f32.mxu1 %v3174_v53  ;;  %v4537_v53 = vld [vmem:[#allocation9 + $0x3b0] sm:$0xff] }
 0x402   : > { %6478 = vmatmul.mubr.f32.gmra.mrb[224].mxu0 %v9536_v25 }
 0x403   : > { %6480 = vmatprep.mubr.f32.mxu0 %v9540_v11  ;;  %7019 = vmatpush1.bf16.msra.mxu0 %v7018_v0  ;;  %v9580_v0 = vld [vmem:[#allocation3 + $0x102] sm:$0xff] }
 0x404   : > { %7020 = vmatprep.subr.bf16.mxu0 %v11030_v6  ;;  %4106 = vmatmul.mubr.f32.gmra.mrb[10].mxu1 %v3138_v27  ;;  %11104 = vst [vmem:[#allocation23_spill] sm:$0xff] %v9580_v0  ;;  %v9588_v27 = vld [vmem:[#allocation3 + $0xd4] sm:$0xff] }
 0x405   : > { %4110 = vmatprep.mubr.f32.mxu1 %v3175_v59 }
 0x406   : > { %6481 = vmatmul.mubr.f32.gmra.mrb[226].mxu0 %v9543_v32 }
 0x407   : > { %6483 = vmatprep.mubr.f32.mxu0 %v9547_v54  ;;  %7022 = vmatpush1.bf16.msra.mxu0 %v7021_v18  ;;  %v4538_v18 = vld [vmem:[#allocation9 + $0x3b8] sm:$0xff] }
 0x408   : > { %7023 = vmatprep.subr.bf16.mxu0 %v11030_v6  ;;  %4111 = vmatmul.mubr.f32.gmra.mrb[12].mxu1 %v3139_v51  ;;  %v7039_v59 = vpack.c.bf16 %v4538_v18, %v4537_v53  ;;  %v4539_v51 = vld [vmem:[#allocation9 + $0x3c0] sm:$0xff] }
 0x409   : > { %4115 = vmatprep.mubr.f32.mxu1 %v3176_v56  ;;  %v9600_v56 = vld [vmem:[#allocation3 + $0x112] sm:$0xff] }
 0x40a   : > { %6484 = vmatmul.mubr.f32.gmra.mrb[228].mxu0 %v9550_v40  ;;  %11106 = vst [vmem:[#allocation27_spill] sm:$0xff] %v9600_v56  ;;  %v3147_v18 = vld [vmem:[#allocation3 + $0x110] sm:$0xff] }
 0x40b   : > { %6486 = vmatprep.mubr.f32.mxu0 %v9554_v36  ;;  %7025 = vmatpush1.bf16.msra.mxu0 %v7024_v13  ;;  %v3144_v13 = vld [vmem:[#allocation3 + $0xf8] sm:$0xff] }
 0x40c   : > { %7026 = vmatprep.subr.bf16.mxu0 %v11030_v6  ;;  %4116 = vmatmul.mubr.f32.gmra.mrb[14].mxu1 %v3140_v42  ;;  %v7042_v42 = vpack.c.bf16 %v4540_v52, %v4539_v51  ;;  %v9625_v51 = vld [vmem:[#allocation3 + $0x114] sm:$0xff]  ;;  %v3184_v52 = vld [vmem:[#allocation3 + $0x12a] sm:$0xff] }
 0x40d   : > { %4120 = vmatprep.mubr.f32.mxu1 %v3177_v57  ;;  %v4542_v57 = vld [vmem:[#allocation9 + $0x3d8] sm:$0xff]  ;;  %11108 = vst [vmem:[#allocation38_spill] sm:$0xff] %v9625_v51 }
 0x40e   : > { %6487 = vmatmul.mubr.f32.gmra.mrb[230].mxu0 %v9557_v50  ;;  %v7045_v41 = vpack.c.bf16 %v4542_v57, %v4541_v37  ;;  %v9628_v37 = vld [vmem:[#allocation3 + $0x11c] sm:$0xff] }
 0x40f   : > { %6489 = vmatprep.mubr.f32.mxu0 %v9561_v47  ;;  %7028 = vmatpush1.bf16.msra.mxu0 %v7027_v15  ;;  %v9604_v15 = vld [vmem:[#allocation3 + $0xec] sm:$0xff]  ;;  %11109 = vst [vmem:[#allocation43_spill] sm:$0xff] %v9628_v37  ;;  %v3148_v57 = vld [vmem:[#allocation3 + $0x118] sm:$0xff] }
 0x410   : > { %7029 = vmatprep.subr.bf16.mxu0 %v11030_v6  ;;  %4121 = vmatmul.mubr.f32.gmra.mrb[16].mxu1 %v3141_v23  ;;  %v9610_v23 = vld [vmem:[#allocation3 + $0x11a] sm:$0xff] }
 0x411   : > { %4125 = vmatprep.mubr.f32.mxu1 %v9570_v55  ;;  %11107 = vst [vmem:[#allocation31_spill] sm:$0xff] %v9610_v23 }
 0x412   : > { %6490 = vmatmul.mubr.f32.gmra.mrb[232].mxu0 %v9564_v35 }
 0x413   : > { %6492 = vmatprep.mubr.f32.mxu0 %v9568_v2  ;;  %7031 = vmatpush1.bf16.msra.mxu0 %v7030_v44  ;;  %v9608_v44 = vld [vmem:[#allocation3 + $0xf4] sm:$0xff] }
 0x414   : > { %7032 = vmatprep.subr.bf16.mxu0 %v11030_v6  ;;  %4126 = vmatmul.mubr.f32.gmra.mrb[18].mxu1 %v3142_v63  ;;  %v4543_v63 = vld [vmem:[#allocation9 + $0x3e0] sm:$0xff] }
 0x415   : > { %4130 = vmatprep.mubr.f32.mxu1 %v9580_v0  ;;  %v7048_v53 = vpack.c.bf16 %v4544_v62, %v4543_v63  ;;  %v4478_v63 = vld [vmem:[#allocation3 + $0x26] sm:$0xff] }
 0x416   : > { %6493 = vmatmul.mubr.f32.gmra.mrb[234].mxu0 %v9574_v17 }
 0x417   : > { %6495 = vmatprep.mubr.f32.mxu0 %v9578_v3  ;;  %7034 = vmatpush1.bf16.msra.mxu0 %v7033_v43  ;;  %v3146_v43 = vld [vmem:[#allocation3 + $0x108] sm:$0xff] }
 0x418   : > { %7035 = vmatprep.subr.bf16.mxu0 %v11030_v6  ;;  %4131 = vmatmul.mubr.f32.gmra.mrb[20].mxu1 %v3143_v28  ;;  %v9621_v28 = vld [vmem:[#allocation3 + $0x10c] sm:$0xff] }
 0x419   : > { %4135 = vmatprep.mubr.f32.mxu1 %v9590_v10 }
 0x41a   : > { %6496 = vmatmul.mubr.f32.gmra.mrb[236].mxu0 %v9584_v46 }
 0x41b   : > { %6498 = vmatprep.mubr.f32.mxu0 %v9588_v27  ;;  %7037 = vmatpush1.bf16.msra.mxu0 %v7036_v26  ;;  %v3183_v26 = vld [vmem:[#allocation3 + $0x122] sm:$0xff] }
 0x41c   : > { %7038 = vmatprep.subr.bf16.mxu0 %v11030_v6  ;;  %4136 = vmatmul.mubr.f32.gmra.mrb[22].mxu1 %v3144_v13  ;;  %v4546_v13 = vld [vmem:[#allocation9 + $0x3f8] sm:$0xff] }
 0x41d   : > { %4140 = vmatprep.mubr.f32.mxu1 %v9600_v56 }
 0x41e   : > { %6499 = vmatmul.mubr.f32.gmra.mrb[238].mxu0 %v9594_v8 }
 0x41f   : > { %6501 = vmatprep.mubr.f32.mxu0 %v9598_v14  ;;  %7040 = vmatpush1.bf16.msra.mxu0 %v7039_v59  ;;  %v4545_v59 = vld [vmem:[#allocation9 + $0x3f0] sm:$0xff] }
 0x420   : > { %7041 = vmatprep.subr.bf16.mxu0 %v11030_v6  ;;  %4141 = vmatmul.mubr.f32.gmra.mrb[24].mxu1 %v3145_v16 }
 0x421   : > { %4145 = vmatprep.mubr.f32.mxu1 %v9610_v23 }
 0x422   : > { %6502 = vmatmul.mubr.f32.gmra.mrb[240].mxu0 %v9604_v15 }
 0x423   : > { %6504 = vmatprep.mubr.f32.mxu0 %v9608_v44  ;;  %7043 = vmatpush1.bf16.msra.mxu0 %v7042_v42  ;;  %v7051_v42 = vpack.c.bf16 %v4546_v13, %v4545_v59  ;;  %v3219_v59 = vld [vmem:[#allocation3 + $0x134] sm:$0xff] }
 0x424   : > { %7044 = vmatprep.subr.bf16.mxu0 %v11030_v6  ;;  %4146 = vmatmul.mubr.f32.gmra.mrb[26].mxu1 %v3146_v43  ;;  %v6381_v16 = vpop.f32.mrb[180].mxu1  ;;  %v9632_v43 = vld [vmem:[#allocation3 + $0x124] sm:$0xff] }
 0x425   : > { %4150 = vmatprep.mubr.f32.mxu1 %v3183_v26  ;;  %11110 = vst [vmem:[#allocation45_spill] sm:$0xff] %v9632_v43  ;;  %v9635_v26 = vld [vmem:[#allocation3 + $0x12c] sm:$0xff] }
 0x426   : > { %6505 = vmatmul.mubr.f32.gmra.mrb[242].mxu0 %v9614_v29  ;;  %11111 = vst [vmem:[#allocation47_spill] sm:$0xff] %v9635_v26 }
 0x427   : > { %6507 = vmatprep.mubr.f32.mxu0 %v9618_v34  ;;  %7046 = vmatpush1.bf16.msra.mxu0 %v7045_v41  ;;  %v3737_v41 = vpop.f32.mrb[181].mxu1 }
 0x428   : > { %7047 = vmatprep.subr.bf16.mxu0 %v11030_v6  ;;  %4151 = vmatmul.mubr.f32.gmra.mrb[28].mxu1 %v3147_v18  ;;  %v6384_v62 = vpop.f32.mrb[182].mxu1 }
 0x429   : > { %4155 = vmatprep.mubr.f32.mxu1 %v3184_v52  ;;  %v3747_v18 = vpop.f32.mrb[183].mxu1 }
 0x42a   : > { %6508 = vmatmul.mubr.f32.gmra.mrb[244].mxu0 %v9621_v28 }
 0x42b   : > { %6510 = vmatprep.mubr.f32.mxu0 %v9625_v51  ;;  %7049 = vmatpush1.bf16.msra.mxu0 %v7048_v53  ;;  %v4479_v53 = vld [vmem:[#allocation3 + $0x2e] sm:$0xff] }
 0x42c   : > { %7050 = vmatprep.subr.bf16.mxu0 %v11030_v6  ;;  %4156 = vmatmul.mubr.f32.gmra.mrb[30].mxu1 %v3148_v57  ;;  %v4480_v6 = vld [vmem:[#allocation3 + $0x36] sm:$0xff]  ;;  %v9638_v52 = vpop.f32.mrb[184].mxu1 }
 0x42d   : > { %6551 = vmatprep.mubr.f32.mxu1 %v4478_v63  ;;  %v3220_v57 = vld [vmem:[#allocation3 + $0x13c] sm:$0xff]  ;;  %v3757_v63 = vpop.f32.mrb[185].mxu1 }
 0x42e   : > { %6511 = vmatmul.mubr.f32.gmra.mrb[246].mxu0 %v9628_v37 }
 0x42f   : > { %6513 = vmatprep.mubr.f32.mxu0 %v9632_v43  ;;  %7052 = vmatpush1.bf16.msra.mxu0 %v7051_v42 }
 0x430   : > { %6552 = vmatmul.mubr.f32.vlgmr.msra.gmra.mrb[32].mxu1 %v4479_v53 }
 0x431   : > { %6554 = vmatprep.mubr.f32.mxu1 %v4480_v6  ;;  %v4483_v6 = vld [vmem:[#allocation3 + $0x4e] sm:$0xff] }
 0x432   : > { %6514 = vmatmul.mubr.f32.gmra.mrb[248].mxu0 %v9635_v26 }
 0x433   : > { %6516 = vmatprep.mubr.f32.mxu0 %v3219_v59  ;;  %v4406_v59 = vld [vmem:[#allocation3 + $0x2] sm:$0xff] }
 0x434   : > { %6555 = vmatmul.mubr.f32.gmra.mrb[34].mxu1 %v4481_v1 }
 0x435   : > { %v3492_v13 = vpop.f32.mrb[144].mxu0  ;;  %6557 = vmatprep.mubr.f32.mxu1 %v4482_v58  ;;  %v4485_v58 = vld [vmem:[#allocation3 + $0x5e] sm:$0xff] }
 0x436   : > { %v9640_v5 = vadd.f32 %v3737_v41, %v3492_v13  ;;  %v3494_v42 = vpop.f32.mrb[145].mxu0  ;;  %6517 = vmatmul.mubr.f32.gmra.mrb[250].mxu0 %v3220_v57  ;;  %v4443_v41 = vld [vmem:[#allocation3 + $0x1c] sm:$0xff] }
 0x437   : > { %4627 = vmatprep.mubr.f32.mxu0 %v4442_v61  ;;  %v9642_v53 = vpop.f32.mrb[186].mxu1  ;;  %v4484_v13 = vld [vmem:[#allocation3 + $0x56] sm:$0xff]  ;;  %v4407_v61 = vld [vmem:[#allocation3 + $0xa] sm:$0xff] }
 0x438   : > { %v3767_v48 = vpop.f32.mrb[187].mxu1  ;;  %6558 = vmatmul.mubr.f32.gmra.mrb[36].mxu1 %v4483_v6  ;;  %v4487_v6 = vld [vmem:[#allocation3 + $0x6e] sm:$0xff] }
 0x439   : > { %v3497_v33 = vpop.f32.mrb[146].mxu0  ;;  %6560 = vmatprep.mubr.f32.mxu1 %v4484_v13 }
 0x43a   : > { %v9644_v38 = vadd.f32 %v6381_v16, %v3497_v33  ;;  %v3499_v22 = vpop.f32.mrb[147].mxu0  ;;  %4628 = vmatmul.mubr.f32.vlgmr.msra.gmra.mrb[252].mxu0 %v4406_v59  ;;  %v4444_v33 = vld [vmem:[#allocation3 + $0x24] sm:$0xff] }
 0x43b   : > { %4632 = vmatprep.mubr.f32.mxu0 %v4443_v41  ;;  %v9646_v1 = vpop.f32.mrb[188].mxu1  ;;  %v4486_v22 = vld [vmem:[#allocation3 + $0x66] sm:$0xff] }
 0x43c   : > { %v9650_v26 = vpop.f32.mrb[189].mxu1  ;;  %6561 = vmatmul.mubr.f32.gmra.mrb[38].mxu1 %v4485_v58 }
 0x43d   : > { %v3502_v57 = vpop.f32.mrb[148].mxu0  ;;  %6563 = vmatprep.mubr.f32.mxu1 %v4486_v22 }
 0x43e   : > { %v9648_v42 = vadd.f32 %v3747_v18, %v3502_v57  ;;  %v3504_v23 = vpop.f32.mrb[149].mxu0  ;;  %4633 = vmatmul.mubr.f32.gmra.mrb[254].mxu0 %v4407_v61  ;;  %v4488_v57 = vld [vmem:[#allocation3 + $0x76] sm:$0xff] }
 0x43f   : > { %4637 = vmatprep.mubr.f32.mxu0 %v4444_v33  ;;  %v9652_v59 = vpop.f32.mrb[190].mxu1  ;;  %v4445_v23 = vld [vmem:[#allocation3 + $0x2c] sm:$0xff]  ;;  %v4489_v33 = vld [vmem:[#allocation3 + $0x7e] sm:$0xff] }
 0x440   : > { %v9657_v18 = vpop.f32.mrb[191].mxu1  ;;  %6564 = vmatmul.mubr.f32.gmra.mrb[40].mxu1 %v4487_v6 }
 0x441   : > { %v3507_v16 = vpop.f32.mrb[150].mxu0  ;;  %6566 = vmatprep.mubr.f32.mxu1 %v4488_v57 }
 0x442   : > { %v9654_v41 = vadd.f32 %v6384_v62, %v3507_v16  ;;  %v3509_v13 = vpop.f32.mrb[151].mxu0  ;;  %4638 = vmatmul.mubr.f32.gmra.mrb[0].mxu0 %v9471_v4  ;;  %v4490_v4 = vld [vmem:[#allocation3 + $0x86] sm:$0xff] }
 0x443   : > { %4642 = vmatprep.mubr.f32.mxu0 %v4445_v23  ;;  %v9659_v58 = vpop.f32.mrb[192].mxu1  ;;  %v4491_v13 = vld [vmem:[#allocation3 + $0x8e] sm:$0xff] }
 0x444   : > { %v9664_v62 = vpop.f32.mrb[193].mxu1  ;;  %6567 = vmatmul.mubr.f32.gmra.mrb[42].mxu1 %v4489_v33 }
 0x445   : > { %v3512_v61 = vpop.f32.mrb[152].mxu0  ;;  %6569 = vmatprep.mubr.f32.mxu1 %v4490_v4 }
 0x446   : > { %v9661_v22 = vadd.f32 %v3757_v63, %v3512_v61  ;;  %v3514_v56 = vpop.f32.mrb[153].mxu0  ;;  %4643 = vmatmul.mubr.f32.gmra.mrb[2].mxu0 %v9477_v21  ;;  %v4492_v21 = vld [vmem:[#allocation3 + $0x96] sm:$0xff]  ;;  %v4493_v61 = vld [vmem:[#allocation3 + $0x9e] sm:$0xff] }
 0x447   : > { %4647 = vmatprep.mubr.f32.mxu0 %v9512_v45  ;;  %v9667_v6 = vpop.f32.mrb[194].mxu1 }
 0x448   : > { %v9673_v56 = vpop.f32.mrb[195].mxu1  ;;  %6570 = vmatmul.mubr.f32.gmra.mrb[44].mxu1 %v4491_v13 }
 0x449   : > { %v3517_v16 = vpop.f32.mrb[154].mxu0  ;;  %6572 = vmatprep.mubr.f32.mxu1 %v4492_v21 }
 0x44a   : > { %v9670_v23 = vadd.f32 %v9638_v52, %v3517_v16  ;;  %v3519_v57 = vpop.f32.mrb[155].mxu0  ;;  %4648 = vmatmul.mubr.f32.gmra.mrb[4].mxu0 %v9481_v12  ;;  %v4494_v12 = vld [vmem:[#allocation3 + $0xa6] sm:$0xff] }
 0x44b   : > { %4652 = vmatprep.mubr.f32.mxu0 %v9515_v39  ;;  %v9676_v45 = vpop.f32.mrb[196].mxu1  ;;  %v4495_v39 = vld [vmem:[#allocation3 + $0xae] sm:$0xff] }
 0x44c   : > { %v9681_v52 = vpop.f32.mrb[197].mxu1  ;;  %6573 = vmatmul.mubr.f32.gmra.mrb[46].mxu1 %v4493_v61  ;;  %v4497_v61 = vld [vmem:[#allocation3 + $0xbe] sm:$0xff] }
 0x44d   : > { %v3522_v63 = vpop.f32.mrb[156].mxu0  ;;  %6575 = vmatprep.mubr.f32.mxu1 %v4494_v12 }
 0x44e   : > { %v9678_v33 = vadd.f32 %v3767_v48, %v3522_v63  ;;  %v3524_v4 = vpop.f32.mrb[157].mxu0  ;;  %4653 = vmatmul.mubr.f32.gmra.mrb[6].mxu0 %v9485_v7  ;;  %v4496_v7 = vld [vmem:[#allocation3 + $0xb6] sm:$0xff] }
 0x44f   : > { %4657 = vmatprep.mubr.f32.mxu0 %v9519_v24  ;;  %v9684_v13 = vpop.f32.mrb[198].mxu1 }
 0x450   : > { %v9690_v48 = vpop.f32.mrb[199].mxu1  ;;  %6576 = vmatmul.mubr.f32.gmra.mrb[48].mxu1 %v4495_v39  ;;  %v4499_v39 = vld [vmem:[#allocation3 + $0xce] sm:$0xff] }
 0x451   : > { %v3527_v16 = vpop.f32.mrb[158].mxu0  ;;  %6578 = vmatprep.mubr.f32.mxu1 %v4496_v7 }
 0x452   : > { %v9687_v57 = vadd.f32 %v9642_v53, %v3527_v16  ;;  %v3529_v21 = vpop.f32.mrb[159].mxu0  ;;  %4658 = vmatmul.mubr.f32.gmra.mrb[8].mxu0 %v9489_v20  ;;  %v4498_v20 = vld [vmem:[#allocation3 + $0xc6] sm:$0xff] }
 0x453   : > { %4662 = vmatprep.mubr.f32.mxu0 %v9522_v19  ;;  %v9693_v24 = vpop.f32.mrb[200].mxu1 }
 0x454   : > { %v9699_v53 = vpop.f32.mrb[201].mxu1  ;;  %6579 = vmatmul.mubr.f32.gmra.mrb[50].mxu1 %v4497_v61  ;;  %v4415_v61 = vld [vmem:[#allocation3 + $0x4a] sm:$0xff] }
 0x455   : > { %v3532_v63 = vpop.f32.mrb[160].mxu0  ;;  %6581 = vmatprep.mubr.f32.mxu1 %v4498_v20 }
 0x456   : > { %v9696_v4 = vadd.f32 %v9650_v26, %v3532_v63  ;;  %v3534_v12 = vpop.f32.mrb[161].mxu0  ;;  %4663 = vmatmul.mubr.f32.gmra.mrb[10].mxu0 %v9492_v49  ;;  %v4500_v49 = vld [vmem:[#allocation3 + $0xd6] sm:$0xff] }
 0x457   : > { %4667 = vmatprep.mubr.f32.mxu0 %v9526_v30  ;;  %v9702_v19 = vpop.f32.mrb[202].mxu1  ;;  %v4501_v12 = vld [vmem:[#allocation3 + $0xde] sm:$0xff] }
 0x458   : > { %v9708_v26 = vpop.f32.mrb[203].mxu1  ;;  %6582 = vmatmul.mubr.f32.gmra.mrb[52].mxu1 %v4499_v39 }
 0x459   : > { %v3537_v16 = vpop.f32.mrb[162].mxu0  ;;  %6584 = vmatprep.mubr.f32.mxu1 %v4500_v49  ;;  %v4503_v49 = vld [vmem:[#allocation3 + $0xee] sm:$0xff] }
 0x45a   : > { %v9705_v21 = vadd.f32 %v9646_v1, %v3537_v16  ;;  %v3539_v7 = vpop.f32.mrb[163].mxu0  ;;  %4668 = vmatmul.mubr.f32.gmra.mrb[12].mxu0 %v9497_v60  ;;  %v4502_v60 = vld [vmem:[#allocation3 + $0xe6] sm:$0xff] }
 0x45b   : > { %4672 = vmatprep.mubr.f32.mxu0 %v9529_v9  ;;  %v9711_v30 = vpop.f32.mrb[204].mxu1  ;;  %v4416_v7 = vld [vmem:[#allocation3 + $0x52] sm:$0xff] }
 0x45c   : > { %v9716_v16 = vpop.f32.mrb[205].mxu1  ;;  %6585 = vmatmul.mubr.f32.gmra.mrb[54].mxu1 %v4501_v12  ;;  %v4417_v12 = vld [vmem:[#allocation3 + $0x5a] sm:$0xff] }
 0x45d   : > { %v3542_v63 = vpop.f32.mrb[164].mxu0  ;;  %6587 = vmatprep.mubr.f32.mxu1 %v4502_v60 }
 0x45e   : > { %v9714_v20 = vadd.f32 %v9657_v18, %v3542_v63  ;;  %v3544_v1 = vpop.f32.mrb[165].mxu0  ;;  %4673 = vmatmul.mubr.f32.gmra.mrb[14].mxu0 %v4415_v61  ;;  %v4504_v63 = vld [vmem:[#allocation3 + $0xf6] sm:$0xff] }
 0x45f   : > { %4677 = vmatprep.mubr.f32.mxu0 %v9533_v31  ;;  %v9719_v9 = vpop.f32.mrb[206].mxu1  ;;  %v4505_v1 = vld [vmem:[#allocation3 + $0xfe] sm:$0xff] }
 0x460   : > { %v9724_v18 = vpop.f32.mrb[207].mxu1  ;;  %6588 = vmatmul.mubr.f32.gmra.mrb[56].mxu1 %v4503_v49  ;;  %v4507_v49 = vld [vmem:[#allocation3 + $0x10e] sm:$0xff] }
 0x461   : > { %v3547_v39 = vpop.f32.mrb[166].mxu0  ;;  %6590 = vmatprep.mubr.f32.mxu1 %v4504_v63 }
 0x462   : > { %v9722_v43 = vadd.f32 %v9652_v59, %v3547_v39  ;;  %v3549_v10 = vpop.f32.mrb[167].mxu0  ;;  %4678 = vmatmul.mubr.f32.gmra.mrb[16].mxu0 %v4416_v7  ;;  %v4418_v7 = vld [vmem:[#allocation3 + $0x62] sm:$0xff] }
 0x463   : > { %4682 = vmatprep.mubr.f32.mxu0 %v9536_v25  ;;  %v9727_v31 = vpop.f32.mrb[208].mxu1  ;;  %v4506_v10 = vld [vmem:[#allocation3 + $0x106] sm:$0xff] }
 0x464   : > { %v9732_v59 = vpop.f32.mrb[209].mxu1  ;;  %6591 = vmatmul.mubr.f32.gmra.mrb[58].mxu1 %v4505_v1  ;;  %v4509_v1 = vld [vmem:[#allocation3 + $0x11e] sm:$0xff] }
 0x465   : > { %v3552_v61 = vpop.f32.mrb[168].mxu0  ;;  %6593 = vmatprep.mubr.f32.mxu1 %v4506_v10 }
 0x466   : > { %v9730_v60 = vadd.f32 %v9664_v62, %v3552_v61  ;;  %v3554_v37 = vpop.f32.mrb[169].mxu0  ;;  %4683 = vmatmul.mubr.f32.gmra.mrb[18].mxu0 %v4417_v12  ;;  %v4419_v12 = vld [vmem:[#allocation3 + $0x6a] sm:$0xff] }
 0x467   : > { %4687 = vmatprep.mubr.f32.mxu0 %v9540_v11  ;;  %v9735_v25 = vpop.f32.mrb[210].mxu1  ;;  %v4508_v37 = vld [vmem:[#allocation3 + $0x116] sm:$0xff] }
 0x468   : > { %v9740_v62 = vpop.f32.mrb[211].mxu1  ;;  %6594 = vmatmul.mubr.f32.gmra.mrb[60].mxu1 %v4507_v49  ;;  %v4511_v49 = vld [vmem:[#allocation3 + $0x12e] sm:$0xff] }
 0x469   : > { %v3557_v39 = vpop.f32.mrb[170].mxu0  ;;  %6596 = vmatprep.mubr.f32.mxu1 %v4508_v37 }
 0x46a   : > { %v9738_v63 = vadd.f32 %v9659_v58, %v3557_v39  ;;  %v3559_v0 = vpop.f32.mrb[171].mxu0  ;;  %4688 = vmatmul.mubr.f32.gmra.mrb[20].mxu0 %v4418_v7  ;;  %v4420_v7 = vld [vmem:[#allocation3 + $0x72] sm:$0xff] }
 0x46b   : > { %4692 = vmatprep.mubr.f32.mxu0 %v9543_v32  ;;  %v9743_v11 = vpop.f32.mrb[212].mxu1  ;;  %v4510_v0 = vld [vmem:[#allocation3 + $0x126] sm:$0xff] }
 0x46c   : > { %11112 = vst [vmem:[#allocation65_spill] sm:$0xff] %v9743_v11  ;;  %v9748_v58 = vpop.f32.mrb[213].mxu1  ;;  %6597 = vmatmul.mubr.f32.gmra.mrb[62].mxu1 %v4509_v1  ;;  %v4513_v1 = vld [vmem:[#allocation3 + $0x13e] sm:$0xff] }
 0x46d   : > { %v3562_v61 = vpop.f32.mrb[172].mxu0  ;;  %6599 = vmatprep.mubr.f32.mxu1 %v4510_v0 }
 0x46e   : > { %v9746_v10 = vadd.f32 %v9673_v56, %v3562_v61  ;;  %v3564_v51 = vpop.f32.mrb[173].mxu0  ;;  %4693 = vmatmul.mubr.f32.gmra.mrb[22].mxu0 %v4419_v12  ;;  %v4421_v12 = vld [vmem:[#allocation3 + $0x7a] sm:$0xff] }
 0x46f   : > { %4697 = vmatprep.mubr.f32.mxu0 %v9547_v54  ;;  %v9751_v32 = vpop.f32.mrb[214].mxu1  ;;  %v4512_v51 = vld [vmem:[#allocation3 + $0x136] sm:$0xff] }
 0x470   : > { %11113 = vst [vmem:[#allocation66_spill] sm:$0xff] %v9751_v32  ;;  %v9756_v56 = vpop.f32.mrb[215].mxu1  ;;  %6600 = vmatmul.mubr.f32.gmra.mrb[64].mxu1 %v4511_v49 }
 0x471   : > { %v3567_v39 = vpop.f32.mrb[174].mxu0  ;;  %11114 = vst [vmem:[#allocation67_spill] sm:$0xff] %v9756_v56  ;;  %6602 = vmatprep.mubr.f32.mxu1 %v4512_v51 }
 0x472   : > { %v9754_v37 = vadd.f32 %v9667_v6, %v3567_v39  ;;  %v3569_v11 = vpop.f32.mrb[175].mxu0  ;;  %4698 = vmatmul.mubr.f32.gmra.mrb[24].mxu0 %v4420_v7 }
 0x473   : > { %4702 = vmatprep.mubr.f32.mxu0 %v9550_v40  ;;  %v3982_v54 = vpop.f32.mrb[216].mxu1  ;;  %v4422_v40 = vld [vmem:[#allocation3 + $0x82] sm:$0xff] }
 0x474   : > { %v9763_v6 = vadd.f32 %v3982_v54, %v9640_v5  ;;  %v3984_v11 = vpop.f32.mrb[217].mxu1  ;;  %6603 = vmatmul.mubr.f32.gmra.mrb[66].mxu1 %v4513_v1 }
 0x475   : > { %v3572_v61 = vpop.f32.mrb[176].mxu0  ;;  %v4424_v11 = vld [vmem:[#allocation3 + $0x92] sm:$0xff] }
 0x476   : > { %v9760_v0 = vadd.f32 %v9681_v52, %v3572_v61  ;;  %v3574_v32 = vpop.f32.mrb[177].mxu0  ;;  %4703 = vmatmul.mubr.f32.gmra.mrb[26].mxu0 %v4421_v12  ;;  %v4423_v61 = vld [vmem:[#allocation3 + $0x8a] sm:$0xff] }
 0x477   : > { %4707 = vmatprep.mubr.f32.mxu0 %v9554_v36  ;;  %v3987_v7 = vpop.f32.mrb[218].mxu1 }
 0x478   : > { %v9770_v56 = vadd.f32 %v3987_v7, %v9644_v38  ;;  %v3989_v52 = vpop.f32.mrb[219].mxu1 }
 0x479   : > { %v3577_v39 = vpop.f32.mrb[178].mxu0 }
 0x47a   : > { %v9767_v49 = vadd.f32 %v9676_v45, %v3577_v39  ;;  %v3579_v51 = vpop.f32.mrb[179].mxu0  ;;  %4708 = vmatmul.mubr.f32.gmra.mrb[28].mxu0 %v4422_v40 }
 0x47b   : > { %4712 = vmatprep.mubr.f32.mxu0 %v9557_v50  ;;  %v3992_v32 = vpop.f32.mrb[220].mxu1  ;;  %v4425_v51 = vld [vmem:[#allocation3 + $0x9a] sm:$0xff] }
 0x47c   : > { %v9777_v12 = vadd.f32 %v3992_v32, %v9648_v42  ;;  %v3994_v45 = vpop.f32.mrb[221].mxu1 }
 0x47d   : > { %v3582_v5 = vpop.f32.mrb[180].mxu0 }
 0x47e   : > { %v9774_v54 = vadd.f32 %v9690_v48, %v3582_v5  ;;  %v3584_v36 = vpop.f32.mrb[181].mxu0  ;;  %4713 = vmatmul.mubr.f32.gmra.mrb[30].mxu0 %v4423_v61  ;;  %v4426_v61 = vld [vmem:[#allocation3 + $0xa2] sm:$0xff] }
 0x47f   : > { %4717 = vmatprep.mubr.f32.mxu0 %v9561_v47  ;;  %v3997_v1 = vpop.f32.mrb[222].mxu1 }
 0x480   : > { %v9784_v7 = vadd.f32 %v3997_v1, %v9654_v41  ;;  %v3999_v48 = vpop.f32.mrb[223].mxu1  ;;  %v4427_v1 = vld [vmem:[#allocation3 + $0xaa] sm:$0xff] }
 0x481   : > { %v3587_v38 = vpop.f32.mrb[182].mxu0 }
 0x482   : > { %v9781_v39 = vadd.f32 %v9684_v13, %v3587_v38  ;;  %v3589_v50 = vpop.f32.mrb[183].mxu0  ;;  %4718 = vmatmul.mubr.f32.gmra.mrb[32].mxu0 %v4424_v11 }
 0x483   : > { %4722 = vmatprep.mubr.f32.mxu0 %v9564_v35  ;;  %v4002_v40 = vpop.f32.mrb[224].mxu1 }
 0x484   : > { %v9791_v5 = vadd.f32 %v4002_v40, %v9661_v22  ;;  %v4004_v13 = vpop.f32.mrb[225].mxu1 }
 0x485   : > { %v3592_v42 = vpop.f32.mrb[184].mxu0  ;;  %v4429_v13 = vld [vmem:[#allocation3 + $0xba] sm:$0xff] }
 0x486   : > { %v9788_v52 = vadd.f32 %v9699_v53, %v3592_v42  ;;  %v3594_v47 = vpop.f32.mrb[185].mxu0  ;;  %4723 = vmatmul.mubr.f32.gmra.mrb[34].mxu0 %v4425_v51  ;;  %v4428_v42 = vld [vmem:[#allocation3 + $0xb2] sm:$0xff] }
 0x487   : > { %4727 = vmatprep.mubr.f32.mxu0 %v9568_v2  ;;  %v4007_v32 = vpop.f32.mrb[226].mxu1 }
 0x488   : > { %v9798_v45 = vadd.f32 %v4007_v32, %v9670_v23  ;;  %v4009_v53 = vpop.f32.mrb[227].mxu1 }
 0x489   : > { %v3597_v41 = vpop.f32.mrb[186].mxu0 }
 0x48a   : > { %v9795_v36 = vadd.f32 %v9693_v24, %v3597_v41  ;;  %v3599_v35 = vpop.f32.mrb[187].mxu0  ;;  %4728 = vmatmul.mubr.f32.gmra.mrb[36].mxu0 %v4426_v61 }
 0x48b   : > { %4732 = vmatprep.mubr.f32.mxu0 %v9574_v17  ;;  %v4012_v38 = vpop.f32.mrb[228].mxu1  ;;  %v4430_v35 = vld [vmem:[#allocation3 + $0xc2] sm:$0xff] }
 0x48c   : > { %v9805_v50 = vadd.f32 %v4012_v38, %v9678_v33  ;;  %v4014_v24 = vpop.f32.mrb[229].mxu1 }
 0x48d   : > { %v3602_v22 = vpop.f32.mrb[188].mxu0 }
 0x48e   : > { %v9802_v11 = vadd.f32 %v9708_v26, %v3602_v22  ;;  %v3604_v2 = vpop.f32.mrb[189].mxu0  ;;  %4733 = vmatmul.mubr.f32.gmra.mrb[38].mxu0 %v4427_v1  ;;  %v4431_v1 = vld [vmem:[#allocation3 + $0xca] sm:$0xff] }
 0x48f   : > { %4737 = vmatprep.mubr.f32.mxu0 %v9578_v3  ;;  %v4017_v48 = vpop.f32.mrb[230].mxu1 }
 0x490   : > { %v9812_v51 = vadd.f32 %v4017_v48, %v9687_v57  ;;  %v4019_v26 = vpop.f32.mrb[231].mxu1  ;;  %v4432_v48 = vld [vmem:[#allocation3 + $0xd2] sm:$0xff] }
 0x491   : > { %v3607_v23 = vpop.f32.mrb[190].mxu0 }
 0x492   : > { %v9809_v40 = vadd.f32 %v9702_v19, %v3607_v23  ;;  %v3609_v17 = vpop.f32.mrb[191].mxu0  ;;  %4738 = vmatmul.mubr.f32.gmra.mrb[40].mxu0 %v4428_v42 }
 0x493   : > { %4742 = vmatprep.mubr.f32.mxu0 %v9584_v46  ;;  %v4022_v47 = vpop.f32.mrb[232].mxu1 }
 0x494   : > { %v9819_v32 = vadd.f32 %v4022_v47, %v9696_v4  ;;  %v4024_v19 = vpop.f32.mrb[233].mxu1 }
 0x495   : > { %v3612_v33 = vpop.f32.mrb[192].mxu0  ;;  %v4434_v19 = vld [vmem:[#allocation3 + $0xe2] sm:$0xff] }
 0x496   : > { %v9816_v41 = vadd.f32 %v9716_v16, %v3612_v33  ;;  %v3614_v3 = vpop.f32.mrb[193].mxu0  ;;  %4743 = vmatmul.mubr.f32.gmra.mrb[42].mxu0 %v4429_v13  ;;  %v4433_v33 = vld [vmem:[#allocation3 + $0xda] sm:$0xff] }
 0x497   : > { %4747 = vmatprep.mubr.f32.mxu0 %v9588_v27  ;;  %v4027_v61 = vpop.f32.mrb[234].mxu1 }
 0x498   : > { %v9826_v22 = vadd.f32 %v4027_v61, %v9705_v21  ;;  %v4029_v16 = vpop.f32.mrb[235].mxu1 }
 0x499   : > { %v3617_v57 = vpop.f32.mrb[194].mxu0 }
 0x49a   : > { %v9823_v53 = vadd.f32 %v9711_v30, %v3617_v57  ;;  %v3619_v46 = vpop.f32.mrb[195].mxu0  ;;  %4748 = vmatmul.mubr.f32.gmra.mrb[44].mxu0 %v4430_v35 }
 0x49b   : > { %4752 = vmatprep.mubr.f32.mxu0 %v9594_v8  ;;  %v4032_v38 = vpop.f32.mrb[236].mxu1  ;;  %v4435_v46 = vld [vmem:[#allocation3 + $0xea] sm:$0xff] }
 0x49c   : > { %v9833_v24 = vadd.f32 %v4032_v38, %v9714_v20  ;;  %v4034_v30 = vpop.f32.mrb[237].mxu1 }
 0x49d   : > { %v3622_v4 = vpop.f32.mrb[196].mxu0 }
 0x49e   : > { %v9830_v2 = vadd.f32 %v9724_v18, %v3622_v4  ;;  %v3624_v27 = vpop.f32.mrb[197].mxu0  ;;  %4753 = vmatmul.mubr.f32.gmra.mrb[46].mxu0 %v4431_v1  ;;  %v4436_v1 = vld [vmem:[#allocation3 + $0xf2] sm:$0xff] }
 0x49f   : > { %4757 = vmatprep.mubr.f32.mxu0 %v9598_v14  ;;  %v4037_v23 = vpop.f32.mrb[238].mxu1 }
 0x4a0   : > { %v9840_v17 = vadd.f32 %v4037_v23, %v9722_v43  ;;  %v4039_v18 = vpop.f32.mrb[239].mxu1 }
 0x4a1   : > { %v3627_v21 = vpop.f32.mrb[198].mxu0 }
 0x4a2   : > { %v9837_v42 = vadd.f32 %v9719_v9, %v3627_v21  ;;  %v3629_v8 = vpop.f32.mrb[199].mxu0  ;;  %4758 = vmatmul.mubr.f32.gmra.mrb[48].mxu0 %v4432_v48 }
 0x4a3   : > { %4762 = vmatprep.mubr.f32.mxu0 %v9604_v15  ;;  %v4042_v26 = vpop.f32.mrb[240].mxu1  ;;  %v11115_v8 = vld [vmem:[#allocation38_spill] sm:$0xff] }
 0x4a4   : > { %v9847_v13 = vadd.f32 %v4042_v26, %v9730_v60  ;;  %v4044_v9 = vpop.f32.mrb[241].mxu1 }
 0x4a5   : > { %v3632_v20 = vpop.f32.mrb[200].mxu0  ;;  %v11118_v9 = vld [vmem:[#allocation43_spill] sm:$0xff] }
 0x4a6   : > { %v9844_v47 = vadd.f32 %v9732_v59, %v3632_v20  ;;  %v3634_v14 = vpop.f32.mrb[201].mxu0  ;;  %4763 = vmatmul.mubr.f32.gmra.mrb[50].mxu0 %v4433_v33  ;;  %v11116_v20 = vld [vmem:[#allocation65_spill] sm:$0xff] }
 0x4a7   : > { %4767 = vmatprep.mubr.f32.mxu0 %v9608_v44  ;;  %v4047_v3 = vpop.f32.mrb[242].mxu1 }
 0x4a8   : > { %v9854_v61 = vadd.f32 %v4047_v3, %v9738_v63  ;;  %v4049_v59 = vpop.f32.mrb[243].mxu1 }
 0x4a9   : > { %v3637_v43 = vpop.f32.mrb[202].mxu0  ;;  %v11120_v59 = vld [vmem:[#allocation28_spill] sm:$0xff] }
 0x4aa   : > { %v9851_v57 = vadd.f32 %v9727_v31, %v3637_v43  ;;  %v3639_v15 = vpop.f32.mrb[203].mxu0  ;;  %4768 = vmatmul.mubr.f32.gmra.mrb[52].mxu0 %v4434_v19 }
 0x4ab   : > { %4772 = vmatprep.mubr.f32.mxu0 %v9614_v29  ;;  %v4052_v35 = vpop.f32.mrb[244].mxu1 }
 0x4ac   : > { %v9861_v4 = vadd.f32 %v4052_v35, %v9746_v10  ;;  %v4054_v31 = vpop.f32.mrb[245].mxu1  ;;  %v11121_v35 = vld [vmem:[#allocation45_spill] sm:$0xff] }
 0x4ad   : > { %v3642_v60 = vpop.f32.mrb[204].mxu0 }
 0x4ae   : > { %v9858_v16 = vadd.f32 %v9740_v62, %v3642_v60  ;;  %v3644_v44 = vpop.f32.mrb[205].mxu0  ;;  %4773 = vmatmul.mubr.f32.gmra.mrb[54].mxu0 %v4435_v46 }
 0x4af   : > { %4777 = vmatprep.mubr.f32.mxu0 %v9618_v34  ;;  %v4057_v38 = vpop.f32.mrb[246].mxu1  ;;  %v11122_v44 = vld [vmem:[#allocation66_spill] sm:$0xff] }
 0x4b0   : > { %v9868_v30 = vadd.f32 %v4057_v38, %v9754_v37  ;;  %v4059_v62 = vpop.f32.mrb[247].mxu1 }
 0x4b1   : > { %v3647_v63 = vpop.f32.mrb[206].mxu0  ;;  %v11124_v62 = vld [vmem:[#allocation47_spill] sm:$0xff] }
 0x4b2   : > { %v9865_v27 = vadd.f32 %v9735_v25, %v3647_v63  ;;  %v3649_v29 = vpop.f32.mrb[207].mxu0  ;;  %4778 = vmatmul.mubr.f32.gmra.mrb[56].mxu0 %v4436_v1  ;;  %v11123_v1 = vld [vmem:[#allocation27_spill] sm:$0xff] }
 0x4b3   : > { %4782 = vmatprep.mubr.f32.mxu0 %v9621_v28  ;;  %v4062_v21 = vpop.f32.mrb[248].mxu1 }
 0x4b4   : > { %v9875_v48 = vadd.f32 %v4062_v21, %v9760_v0  ;;  %v4064_v25 = vpop.f32.mrb[249].mxu1 }
 0x4b5   : > { %v3652_v10 = vpop.f32.mrb[208].mxu0 }
 0x4b6   : > { %v9872_v23 = vadd.f32 %v9748_v58, %v3652_v10  ;;  %v3654_v34 = vpop.f32.mrb[209].mxu0  ;;  %4783 = vmatmul.mubr.f32.gmra.mrb[58].mxu0 %v9570_v55  ;;  %v11117_v58 = vld [vmem:[#allocation23_spill] sm:$0xff] }
 0x4b7   : > { %4787 = vmatprep.mubr.f32.mxu0 %v11115_v8  ;;  %v4067_v18 = vpop.f32.mrb[250].mxu1  ;;  %v11119_v55 = vld [vmem:[#allocation67_spill] sm:$0xff] }
 0x4b8   : > { %v9883_v33 = vadd.f32 %v4067_v18, %v9767_v49  ;;  %v4069_v14 = vpop.f32.mrb[251].mxu1  ;;  %v11125_v8 = vld [vmem:[#allocation31_spill] sm:$0xff] }
 0x4b9   : > { %v3657_v37 = vpop.f32.mrb[210].mxu0 }
 0x4ba   : > { %v9880_v26 = vadd.f32 %v11116_v20, %v3657_v37  ;;  %v3659_v28 = vpop.f32.mrb[211].mxu0  ;;  %4788 = vmatmul.mubr.f32.gmra.mrb[60].mxu0 %v11117_v58 }
 0x4bb   : > { %4792 = vmatprep.mubr.f32.mxu0 %v11118_v9  ;;  %v4072_v43 = vpop.f32.mrb[252].mxu1 }
 0x4bc   : > { %v9891_v15 = vadd.f32 %v4072_v43, %v9774_v54  ;;  %v4074_v60 = vpop.f32.mrb[253].mxu1 }
 0x4bd   : > { %v3662_v0 = vpop.f32.mrb[212].mxu0 }
 0x4be   : > { %v9888_v3 = vadd.f32 %v11119_v55, %v3662_v0  ;;  %v3664_v19 = vpop.f32.mrb[213].mxu0  ;;  %4793 = vmatmul.mubr.f32.gmra.mrb[62].mxu0 %v11120_v59 }
 0x4bf   : > { %4797 = vmatprep.mubr.f32.mxu0 %v11121_v35  ;;  %v4077_v46 = vpop.f32.mrb[254].mxu1 }
 0x4c0   : > { %v9899_v38 = vadd.f32 %v4077_v46, %v9781_v39  ;;  %v4079_v29 = vpop.f32.mrb[255].mxu1 }
 0x4c1   : > { %v3667_v49 = vpop.f32.mrb[214].mxu0 }
 0x4c2   : > { %v9896_v31 = vadd.f32 %v11122_v44, %v3667_v49  ;;  %v3669_v63 = vpop.f32.mrb[215].mxu0  ;;  %4798 = vmatmul.mubr.f32.gmra.mrb[64].mxu0 %v11123_v1 }
 0x4c3   : > { %4802 = vmatprep.mubr.f32.mxu0 %v11124_v62  ;;  %v4082_v10 = vpop.f32.mrb[0].mxu1 }
 0x4c4   : > { %v9907_v34 = vadd.f32 %v4082_v10, %v9788_v52  ;;  %v4084_v37 = vpop.f32.mrb[1].mxu1 }
 0x4c5   : > { %v6467_v54 = vpop.f32.mrb[216].mxu0 }
 0x4c6   : > { %v9904_v21 = vadd.f32 %v6467_v54, %v9770_v56  ;;  %v4227_v25 = vpop.f32.mrb[217].mxu0  ;;  %4803 = vmatmul.mubr.f32.gmra.mrb[66].mxu0 %v11125_v8 }
 0x4c7   : > { %v9911_v39 = vadd.f32 %v4227_v25, %v9763_v6  ;;  %v4087_v20 = vpop.f32.mrb[2].mxu1 }
 0x4c8   : > { %v4088_v58 = vadd.f32 %v4087_v20, %v9795_v36  ;;  %v4089_v56 = vpop.f32.mrb[3].mxu1 }
 0x4c9   : > { %v6470_v18 = vpop.f32.mrb[218].mxu0 }
 0x4ca   : > { %v9914_v28 = vadd.f32 %v6470_v18, %v9784_v7  ;;  %v4237_v14 = vpop.f32.mrb[219].mxu0 }
 0x4cb   : > { %v9918_v9 = vadd.f32 %v4237_v14, %v9777_v12  ;;  %v4092_v0 = vpop.f32.mrb[4].mxu1 }
 0x4cc   : > { %v9924_v6 = vadd.f32 %v4092_v0, %v9802_v11  ;;  %v4094_v19 = vpop.f32.mrb[5].mxu1 }
 0x4cd   : > { %v6473_v52 = vpop.f32.mrb[220].mxu0 }
 0x4ce   : > { %v9921_v43 = vadd.f32 %v6473_v52, %v9798_v45  ;;  %v4247_v55 = vpop.f32.mrb[221].mxu0 }
 0x4cf   : > { %v9927_v7 = vadd.f32 %v4247_v55, %v9791_v5  ;;  %v4097_v36 = vpop.f32.mrb[6].mxu1 }
 0x4d0   : > { %v4098_v12 = vadd.f32 %v4097_v36, %v9809_v40  ;;  %v4099_v49 = vpop.f32.mrb[7].mxu1 }
 0x4d1   : > { %v6476_v59 = vpop.f32.mrb[222].mxu0 }
 0x4d2   : > { %v9930_v60 = vadd.f32 %v6476_v59, %v9812_v51  ;;  %v4257_v35 = vpop.f32.mrb[223].mxu0 }
 0x4d3   : > { %v9934_v45 = vadd.f32 %v4257_v35, %v9805_v50  ;;  %v4102_v11 = vpop.f32.mrb[8].mxu1 }
 0x4d4   : > { %v4103_v5 = vadd.f32 %v4102_v11, %v9816_v41  ;;  %v4104_v1 = vpop.f32.mrb[9].mxu1 }
 0x4d5   : > { %v6479_v46 = vpop.f32.mrb[224].mxu0 }
 0x4d6   : > { %v9937_v44 = vadd.f32 %v6479_v46, %v9826_v22  ;;  %v4267_v63 = vpop.f32.mrb[225].mxu0 }
 0x4d7   : > { %v9941_v29 = vadd.f32 %v4267_v63, %v9819_v32  ;;  %v4107_v62 = vpop.f32.mrb[10].mxu1 }
 0x4d8   : > { %v4108_v50 = vadd.f32 %v4107_v62, %v9823_v53  ;;  %v4109_v10 = vpop.f32.mrb[11].mxu1 }
 0x4d9   : > { %v6482_v51 = vpop.f32.mrb[226].mxu0 }
 0x4da   : > { %v9944_v40 = vadd.f32 %v6482_v51, %v9840_v17  ;;  %v4277_v54 = vpop.f32.mrb[227].mxu0 }
 0x4db   : > { %v9948_v25 = vadd.f32 %v4277_v54, %v9833_v24  ;;  %v4112_v8 = vpop.f32.mrb[12].mxu1 }
 0x4dc   : > { %v4113_v32 = vadd.f32 %v4112_v8, %v9830_v2  ;;  %v4114_v18 = vpop.f32.mrb[13].mxu1 }
 0x4dd   : > { %v6485_v22 = vpop.f32.mrb[228].mxu0 }
 0x4de   : > { %v9951_v41 = vadd.f32 %v6485_v22, %v9854_v61  ;;  %v4287_v37 = vpop.f32.mrb[229].mxu0 }
 0x4df   : > { %v9955_v20 = vadd.f32 %v4287_v37, %v9847_v13  ;;  %v4117_v14 = vpop.f32.mrb[14].mxu1 }
 0x4e0   : > { %v4118_v24 = vadd.f32 %v4117_v14, %v9837_v42  ;;  %v4119_v52 = vpop.f32.mrb[15].mxu1 }
 0x4e1   : > { %v6488_v17 = vpop.f32.mrb[230].mxu0 }
 0x4e2   : > { %v9958_v53 = vadd.f32 %v6488_v17, %v9868_v30  ;;  %v4297_v56 = vpop.f32.mrb[231].mxu0 }
 0x4e3   : > { %v9962_v0 = vadd.f32 %v4297_v56, %v9861_v4  ;;  %v4122_v55 = vpop.f32.mrb[16].mxu1 }
 0x4e4   : > { %v4123_v13 = vadd.f32 %v4122_v55, %v9844_v47  ;;  %v4124_v59 = vpop.f32.mrb[17].mxu1 }
 0x4e5   : > { %v6491_v61 = vpop.f32.mrb[232].mxu0 }
 0x4e6   : > { %v9965_v2 = vadd.f32 %v6491_v61, %v9883_v33  ;;  %v4307_v19 = vpop.f32.mrb[233].mxu0 }
 0x4e7   : > { %v9969_v36 = vadd.f32 %v4307_v19, %v9875_v48  ;;  %v4127_v35 = vpop.f32.mrb[18].mxu1 }
 0x4e8   : > { %v4128_v4 = vadd.f32 %v4127_v35, %v9851_v57  ;;  %v4129_v46 = vpop.f32.mrb[19].mxu1 }
 0x4e9   : > { %v6494_v30 = vpop.f32.mrb[234].mxu0 }
 0x4ea   : > { %v9972_v42 = vadd.f32 %v6494_v30, %v9899_v38  ;;  %v4317_v49 = vpop.f32.mrb[235].mxu0 }
 0x4eb   : > { %v9976_v11 = vadd.f32 %v4317_v49, %v9891_v15  ;;  %v4132_v63 = vpop.f32.mrb[20].mxu1 }
 0x4ec   : > { %v4133_v1 = vadd.f32 %v4132_v63, %v9858_v16  ;;  %v4134_v51 = vpop.f32.mrb[21].mxu1 }
 0x4ed   : > { %v6497_v33 = vpop.f32.mrb[236].mxu0 }
 0x4ee   : > { %v9978_v47 = vadd.f32 %v6497_v33, %v4088_v58  ;;  %v4327_v48 = vpop.f32.mrb[237].mxu0 }
 0x4ef   : > { %v9982_v62 = vadd.f32 %v4327_v48, %v9907_v34  ;;  %v4137_v54 = vpop.f32.mrb[22].mxu1 }
 0x4f0   : > { %v4138_v57 = vadd.f32 %v4137_v54, %v9865_v27  ;;  %v4139_v15 = vpop.f32.mrb[23].mxu1 }
 0x4f1   : > { %v6500_v38 = vpop.f32.mrb[238].mxu0 }
 0x4f2   : > { %v9984_v10 = vadd.f32 %v6500_v38, %v4098_v12  ;;  %v4337_v22 = vpop.f32.mrb[239].mxu0 }
 0x4f3   : > { %v9988_v8 = vadd.f32 %v4337_v22, %v9924_v6  ;;  %v4142_v37 = vpop.f32.mrb[24].mxu1 }
 0x4f4   : > { %v4143_v16 = vadd.f32 %v4142_v37, %v9872_v23  ;;  %v4144_v34 = vpop.f32.mrb[25].mxu1 }
 0x4f5   : > { %v6503_v58 = vpop.f32.mrb[240].mxu0 }
 0x4f6   : > { %v9990_v18 = vadd.f32 %v6503_v58, %v4108_v50  ;;  %v4347_v17 = vpop.f32.mrb[241].mxu0 }
 0x4f7   : > { %v9993_v14 = vadd.f32 %v4347_v17, %v4103_v5  ;;  %v4147_v12 = vpop.f32.mrb[26].mxu1 }
 0x4f8   : > { %v4148_v27 = vadd.f32 %v4147_v12, %v9880_v26  ;;  %v4149_v55 = vpop.f32.mrb[27].mxu1 }
 0x4f9   : > { %v6506_v56 = vpop.f32.mrb[242].mxu0 }
 0x4fa   : > { %v9995_v52 = vadd.f32 %v6506_v56, %v4118_v24  ;;  %v4357_v61 = vpop.f32.mrb[243].mxu0 }
 0x4fb   : > { %v9998_v6 = vadd.f32 %v4357_v61, %v4113_v32  ;;  %v4152_v59 = vpop.f32.mrb[28].mxu1 }
 0x4fc   : > { %v4153_v23 = vadd.f32 %v4152_v59, %v9888_v3  ;;  %v4154_v35 = vpop.f32.mrb[29].mxu1 }
 0x4fd   : > { %v6509_v19 = vpop.f32.mrb[244].mxu0 }
 0x4fe   : > { %v10000_v50 = vadd.f32 %v6509_v19, %v4128_v4  ;;  %v4367_v30 = vpop.f32.mrb[245].mxu0 }
 0x4ff   : > { %v10003_v5 = vadd.f32 %v4367_v30, %v4123_v13  ;;  %v4157_v46 = vpop.f32.mrb[30].mxu1 }
 0x500   : > { %v4158_v26 = vadd.f32 %v4157_v46, %v9896_v31  ;;  %v4159_v63 = vpop.f32.mrb[31].mxu1 }
 0x501   : > { %v6512_v49 = vpop.f32.mrb[246].mxu0 }
 0x502   : > { %v10005_v24 = vadd.f32 %v6512_v49, %v4138_v57  ;;  %v4377_v33 = vpop.f32.mrb[247].mxu0 }
 0x503   : > { %v10008_v32 = vadd.f32 %v4377_v33, %v4133_v1  ;;  %v6553_v51 = vpop.f32.mrb[32].mxu1 }
 0x504   : > { %11126 = vst [vmem:[#allocation38_spill] sm:$0xff] %v10005_v24  ;;  %v4874_v3 = vpop.f32.mrb[33].mxu1 }
 0x505   : > { %v6515_v48 = vpop.f32.mrb[248].mxu0 }
 0x506   : > { %v10010_v4 = vadd.f32 %v6515_v48, %v4148_v27  ;;  %v4387_v38 = vpop.f32.mrb[249].mxu0 }
 0x507   : > { %v10012_v54 = vadd.f32 %v4387_v38, %v4143_v16  ;;  %v6556_v22 = vpop.f32.mrb[34].mxu1 }
 0x508   : > { %11127 = vst [vmem:[#allocation65_spill] sm:$0xff] %v10010_v4  ;;  %v4884_v58 = vpop.f32.mrb[35].mxu1 }
 0x509   : > { %11128 = vst [vmem:[#allocation23_spill] sm:$0xff] %v10012_v54  ;;  %v6518_v13 = vpop.f32.mrb[250].mxu0 }
 0x50a   : > { %v10014_v15 = vadd.f32 %v6518_v13, %v4158_v26  ;;  %v4397_v57 = vpop.f32.mrb[251].mxu0 }
 0x50b   : > { %v10016_v37 = vadd.f32 %v4397_v57, %v4153_v23  ;;  %v6559_v17 = vpop.f32.mrb[36].mxu1 }
 0x50c   : > { %11129 = vst [vmem:[#allocation43_spill] sm:$0xff] %v10014_v15  ;;  %v4894_v56 = vpop.f32.mrb[37].mxu1 }
 0x50d   : > { %11130 = vst [vmem:[#allocation67_spill] sm:$0xff] %v10016_v37  ;;  %v4629_v31 = vpop.f32.mrb[252].mxu0 }
 0x50e   : > { %v4875_v1 = vadd.f32 %v4874_v3, %v4629_v31  ;;  %v4631_v34 = vpop.f32.mrb[253].mxu0 }
 0x50f   : > { %v6562_v61 = vpop.f32.mrb[38].mxu1 }
 0x510   : > { %v10019_v12 = vadd.f32 %v4875_v1, %v9911_v39  ;;  %v4904_v19 = vpop.f32.mrb[39].mxu1 }
 0x511   : > { %v4634_v27 = vpop.f32.mrb[254].mxu0 }
 0x512   : > { %v4880_v16 = vadd.f32 %v6553_v51, %v4634_v27  ;;  %v4636_v55 = vpop.f32.mrb[255].mxu0 }
 0x513   : > { %v6565_v35 = vpop.f32.mrb[40].mxu1 }
 0x514   : > { %v10022_v59 = vadd.f32 %v4880_v16, %v9904_v21  ;;  %v4914_v46 = vpop.f32.mrb[41].mxu1 }
 0x515   : > { %v4639_v30 = vpop.f32.mrb[0].mxu0 }
 0x516   : > { %v4885_v23 = vadd.f32 %v4884_v58, %v4639_v30  ;;  %v4641_v49 = vpop.f32.mrb[1].mxu0 }
 0x517   : > { %v6568_v63 = vpop.f32.mrb[42].mxu1 }
 0x518   : > { %v10025_v26 = vadd.f32 %v4885_v23, %v9918_v9  ;;  %v4924_v38 = vpop.f32.mrb[43].mxu1 }
 0x519   : > { %v4644_v33 = vpop.f32.mrb[2].mxu0 }
 0x51a   : > { %v4890_v39 = vadd.f32 %v6556_v22, %v4644_v33  ;;  %v4646_v48 = vpop.f32.mrb[3].mxu0 }
 0x51b   : > { %v6571_v13 = vpop.f32.mrb[44].mxu1 }
 0x51c   : > { %v10028_v51 = vadd.f32 %v4890_v39, %v9914_v28  ;;  %v4934_v31 = vpop.f32.mrb[45].mxu1 }
 0x51d   : > { %v4649_v3 = vpop.f32.mrb[4].mxu0 }
 0x51e   : > { %v4895_v21 = vadd.f32 %v4894_v56, %v4649_v3  ;;  %v4651_v57 = vpop.f32.mrb[5].mxu0 }
 0x51f   : > { %v10033_v34 = vpop.f32.mrb[46].mxu1 }
 0x520   : > { %v10031_v58 = vadd.f32 %v4895_v21, %v9927_v7  ;;  %v4944_v16 = vpop.f32.mrb[47].mxu1 }
 0x521   : > { %v4654_v1 = vpop.f32.mrb[6].mxu0 }
 0x522   : > { %v4900_v9 = vadd.f32 %v6559_v17, %v4654_v1  ;;  %v4656_v27 = vpop.f32.mrb[7].mxu0 }
 0x523   : > { %v10038_v28 = vpop.f32.mrb[48].mxu1 }
 0x524   : > { %v10036_v22 = vadd.f32 %v4900_v9, %v9921_v43  ;;  %v10040_v56 = vpop.f32.mrb[49].mxu1 }
 0x525   : > { %v4659_v55 = vpop.f32.mrb[8].mxu0 }
 0x526   : > { %v4905_v30 = vadd.f32 %v4904_v19, %v4659_v55  ;;  %v4661_v23 = vpop.f32.mrb[9].mxu0 }
 0x527   : > { %v10045_v33 = vpop.f32.mrb[50].mxu1 }
 0x528   : > { %v10043_v49 = vadd.f32 %v4905_v30, %v9934_v45  ;;  %v10047_v48 = vpop.f32.mrb[51].mxu1 }
 0x529   : > { %v4664_v7 = vpop.f32.mrb[10].mxu0 }
 0x52a   : > { %v4910_v39 = vadd.f32 %v6562_v61, %v4664_v7  ;;  %v4666_v17 = vpop.f32.mrb[11].mxu0 }
 0x52b   : > { %v10052_v21 = vpop.f32.mrb[52].mxu1 }
 0x52c   : > { %v10050_v43 = vadd.f32 %v4910_v39, %v9930_v60  ;;  %v10054_v1 = vpop.f32.mrb[53].mxu1 }
 0x52d   : > { %v4669_v3 = vpop.f32.mrb[12].mxu0 }
 0x52e   : > { %v4915_v19 = vadd.f32 %v4914_v46, %v4669_v3  ;;  %v4671_v57 = vpop.f32.mrb[13].mxu0 }
 0x52f   : > { %v10059_v27 = vpop.f32.mrb[54].mxu1 }
 0x530   : > { %v10057_v45 = vadd.f32 %v4915_v19, %v9941_v29  ;;  %v10061_v30 = vpop.f32.mrb[55].mxu1 }
 0x531   : > { %v4674_v9 = vpop.f32.mrb[14].mxu0 }
 0x532   : > { %v4920_v61 = vadd.f32 %v6565_v35, %v4674_v9  ;;  %v4676_v55 = vpop.f32.mrb[15].mxu0 }
 0x533   : > { %v10066_v7 = vpop.f32.mrb[56].mxu1 }
 0x534   : > { %v10064_v60 = vadd.f32 %v4920_v61, %v9937_v44  ;;  %v10068_v17 = vpop.f32.mrb[57].mxu1 }
 0x535   : > { %v4679_v23 = vpop.f32.mrb[16].mxu0 }
 0x536   : > { %v4925_v46 = vadd.f32 %v4924_v38, %v4679_v23  ;;  %v4681_v39 = vpop.f32.mrb[17].mxu0 }
 0x537   : > { %v10073_v19 = vpop.f32.mrb[58].mxu1 }
 0x538   : > { %v10071_v29 = vadd.f32 %v4925_v46, %v9948_v25  ;;  %v10075_v9 = vpop.f32.mrb[59].mxu1 }
 0x539   : > { %v4684_v3 = vpop.f32.mrb[18].mxu0 }
 0x53a   : > { %v4930_v35 = vadd.f32 %v6568_v63, %v4684_v3  ;;  %v4686_v57 = vpop.f32.mrb[19].mxu0  ;;  %v10089_v63 = vld [vmem:[#allocation10] ss:$0 sm:$0xff] }
 0x53b   : > { %v10080_v55 = vpop.f32.mrb[60].mxu1 }
 0x53c   : > { %v10078_v44 = vadd.f32 %v4930_v35, %v9944_v40  ;;  %v10082_v39 = vpop.f32.mrb[61].mxu1  ;;  %v10095_v40 = vadd.f32 %v10089_v63, %v10022_v59 }
 0x53d   : > { %v4689_v61 = vpop.f32.mrb[20].mxu0 }
 0x53e   : > { %v4935_v38 = vadd.f32 %v4934_v31, %v4689_v61  ;;  %v4691_v23 = vpop.f32.mrb[21].mxu0  ;;  %11131 = vst [vmem:[#allocation28_spill] sm:$0xff] %v10095_v40  ;;  %v5210_v59 = vmul.f32 %v10095_v40, %v10095_v40 }
 0x53f   : > { %v10087_v15 = vpop.f32.mrb[62].mxu1 }
 0x540   : > { %v10085_v25 = vadd.f32 %v4935_v38, %v9955_v20  ;;  %v10091_v37 = vpop.f32.mrb[63].mxu1  ;;  %v10102_v20 = vadd.f32 %v10089_v63, %v10019_v12  ;;  %v5246_v54 = vsel %vm2684_vm4, %v5210_v59, 0.0 }
 0x541   : > { %v4694_v46 = vpop.f32.mrb[22].mxu0 }
 0x542   : > { %v4940_v3 = vadd.f32 %v6571_v13, %v4694_v46  ;;  %v4696_v57 = vpop.f32.mrb[23].mxu0  ;;  %11132 = vst [vmem:[#allocation45_spill] sm:$0xff] %v10102_v20  ;;  %v10108_v13 = vadd.f32 %v10089_v63, %v10025_v26  ;;  %v10125_v26 = vadd.f32 %v10089_v63, %v10031_v58  ;;  %v5132_v58 = vsel %vm2683_vm5, %v10102_v20, 0.0 }
 0x543   : > { %v10104_v61 = vpop.f32.mrb[64].mxu1 }
 0x544   : > { %v10098_v31 = vadd.f32 %v4940_v3, %v9951_v41  ;;  %11133 = vst [vmem:[#allocation66_spill] sm:$0xff] %v10104_v61  ;;  %11134 = vst [vmem:[#allocation27_spill] sm:$0xff] %v10108_v13  ;;  %v10110_v46 = vpop.f32.mrb[65].mxu1  ;;  %v10116_v41 = vadd.f32 %v10089_v63, %v10028_v51  ;;  %v5209_v3 = vmul.f32 %v10102_v20, %v10102_v20 }
 0x545   : > { %v4699_v35 = vpop.f32.mrb[24].mxu0  ;;  %11135 = vst [vmem:[#allocation47_spill] sm:$0xff] %v10110_v46  ;;  %v5211_v51 = vmul.f32 %v10108_v13, %v10108_v13  ;;  %v5134_v46 = vsel %vm2685_vm6, %v10108_v13, 0.0  ;;  %v5213_v59 = vmul.f32 %v10125_v26, %v10125_v26 }
 0x546   : > { %v4945_v38 = vadd.f32 %v4944_v16, %v4699_v35  ;;  %v4701_v23 = vpop.f32.mrb[25].mxu0  ;;  %11136 = vst [vmem:[#allocation31_spill] sm:$0xff] %v10116_v41  ;;  %v5135_v24 = vsel %vm2686_vm7, %v10116_v41, 0.0 }
 0x547   : > { %v10127_v57 = vpop.f32.mrb[66].mxu1  ;;  %v5133_v23 = vsel %vm2684_vm4, %v10095_v40, 0.0  ;;  %v5212_v40 = vmul.f32 %v10116_v41, %v10116_v41  ;;  %v5247_v13 = vsel %vm2685_vm6, %v5211_v51, 0.0  ;;  %v10210_v51 = vadd.f32 %v10089_v63, %v10071_v29 }
 0x548   : > { %v10119_v12 = vadd.f32 %v4945_v38, %v9962_v0  ;;  %11137 = vst [vmem:[#allocation68_spill] sm:$0xff] %v10127_v57  ;;  %v10135_v4 = vpop.f32.mrb[67].mxu1  ;;  %v5168_v20 = vadd.f32 %v5133_v23, %v5132_v58  ;;  %v5136_v58 = vsel %vm2687_vm8, %v10125_v26, 0.0 }
 0x549   : > { %v4704_v16 = vpop.f32.mrb[26].mxu0  ;;  %11139 = vst [vmem:[#allocation24_spill] sm:$0xff] %v10135_v4  ;;  %v5248_v57 = vsel %vm2686_vm7, %v5212_v40, 0.0 }
 0x54a   : > { %v4950_v0 = vadd.f32 %v10033_v34, %v4704_v16  ;;  %v4706_v38 = vpop.f32.mrb[27].mxu0  ;;  %v10149_v34 = vadd.f32 %v10089_v63, %v10036_v22  ;;  %v10165_v22 = vadd.f32 %v10089_v63, %v10043_v49  ;;  %v5169_v23 = vadd.f32 %v5168_v20, %v5134_v46 }
 0x54b   : > { %v5245_v38 = vsel %vm2683_vm5, %v5209_v3, 0.0  ;;  %v5249_v20 = vsel %vm2687_vm8, %v5213_v59, 0.0 }
 0x54c   : > { %v10152_v16 = vadd.f32 %v4950_v0, %v9958_v53  ;;  %v5281_v3 = vadd.f32 %v5246_v54, %v5245_v38  ;;  %v10170_v0 = vadd.f32 %v10089_v63, %v10050_v43  ;;  %v5214_v49 = vmul.f32 %v10149_v34, %v10149_v34 }
 0x54d   : > { %v4709_v35 = vpop.f32.mrb[28].mxu0  ;;  %v5170_v54 = vadd.f32 %v5169_v23, %v5135_v24  ;;  %v5137_v4 = vsel %vm2688_vm9, %v10149_v34, 0.0  ;;  %v5215_v40 = vmul.f32 %v10165_v22, %v10165_v22  ;;  %v10191_v38 = vadd.f32 %v10089_v63, %v10057_v45 }
 0x54e   : > { %v4955_v53 = vadd.f32 %v10040_v56, %v4709_v35  ;;  %v4711_v61 = vpop.f32.mrb[29].mxu0  ;;  %v5282_v56 = vadd.f32 %v5281_v3, %v5247_v13  ;;  %v5216_v59 = vmul.f32 %v10170_v0, %v10170_v0  ;;  %v5138_v3 = vsel %vm2689_vm10, %v10165_v22, 0.0 }
 0x54f   : > { %v5171_v24 = vadd.f32 %v5170_v54, %v5136_v58  ;;  %v10203_v23 = vadd.f32 %v10089_v63, %v10064_v60  ;;  %v5139_v54 = vsel %vm2690_vm11, %v10170_v0, 0.0  ;;  %v5217_v60 = vmul.f32 %v10191_v38, %v10191_v38 }
 0x550   : > { %v10180_v41 = vadd.f32 %v4955_v53, %v9969_v36  ;;  %v5283_v13 = vadd.f32 %v5282_v56, %v5248_v57  ;;  %v5250_v53 = vsel %vm2688_vm9, %v5214_v49, 0.0  ;;  %v5251_v49 = vsel %vm2689_vm10, %v5215_v40, 0.0 }
 0x551   : > { %v4714_v43 = vpop.f32.mrb[30].mxu0  ;;  %v5172_v57 = vadd.f32 %v5171_v24, %v5137_v4  ;;  %v5252_v29 = vsel %vm2690_vm11, %v5216_v59, 0.0  ;;  %v5218_v40 = vmul.f32 %v10203_v23, %v10203_v23  ;;  %v5253_v59 = vsel %vm2691_vm12, %v5217_v60, 0.0  ;;  %v11152_v60 = vld [vmem:[#allocation39_spill] sm:$0xff] }
 0x552   : > { %v4960_v36 = vadd.f32 %v10038_v28, %v4714_v43  ;;  %v4716_v35 = vpop.f32.mrb[31].mxu0  ;;  %v5284_v28 = vadd.f32 %v5283_v13, %v5249_v20  ;;  %v10246_v56 = vadd.f32 %v10089_v63, %v10098_v31  ;;  %vm11153_vm4 = vcmp.eq.s32.totalorder %v11152_v60, 1 }
 0x553   : > { %v5173_v46 = vadd.f32 %v5172_v57, %v5138_v3  ;;  %v10229_v35 = vadd.f32 %v10089_v63, %v10078_v44  ;;  %v10241_v57 = vadd.f32 %v10089_v63, %v10085_v25  ;;  %vm11154_vm5 = vmmov %vm11153_vm4 }
 0x554   : > { %v10206_v45 = vadd.f32 %v4960_v36, %v9965_v2  ;;  %v5285_v20 = vadd.f32 %v5284_v28, %v5250_v53  ;;  %v5140_v36 = vsel %vm2691_vm12, %v10191_v38, 0.0  ;;  %v5219_v53 = vmul.f32 %v10210_v51, %v10210_v51 }
 0x555   : > { %v4719_v58 = vpop.f32.mrb[32].mxu0  ;;  %v5174_v24 = vadd.f32 %v5173_v46, %v5139_v54  ;;  %v5141_v28 = vsel %vm2692_vm13, %v10203_v23, 0.0  ;;  %v5254_v54 = vsel %vm2692_vm13, %v5218_v40, 0.0  ;;  %v5220_v25 = vmul.f32 %v10229_v35, %v10229_v35 }
 0x556   : > { %v4965_v2 = vadd.f32 %v10047_v48, %v4719_v58  ;;  %v4721_v43 = vpop.f32.mrb[33].mxu0  ;;  %v5286_v48 = vadd.f32 %v5285_v20, %v5251_v49  ;;  %v5255_v46 = vsel %vm2693_vm14, %v5219_v53, 0.0  ;;  %v5143_v4 = vsel %vm2694_vm15, %v10229_v35, 0.0 }
 0x557   : > { %v5175_v49 = vadd.f32 %v5174_v24, %v5140_v36  ;;  %v5221_v36 = vmul.f32 %v10241_v57, %v10241_v57  ;;  %v10265_v40 = vadd.f32 %v10089_v63, %v10119_v12  ;;  %v5222_v53 = vmul.f32 %v10246_v56, %v10246_v56 }
 0x558   : > { %v5071_v13 = vadd.f32 %v4965_v2, %v9976_v11  ;;  %v5287_v58 = vadd.f32 %v5286_v48, %v5252_v29  ;;  %v5142_v2 = vsel %vm2693_vm14, %v10210_v51, 0.0 }
 0x559   : > { %v4724_v61 = vpop.f32.mrb[34].mxu0  ;;  %v5176_v20 = vadd.f32 %v5175_v49, %v5141_v28  ;;  %v5144_v28 = vsel %vm2695_vm0, %v10241_v57, 0.0 }
 0x55a   : > { %v4970_v44 = vadd.f32 %v10045_v33, %v4724_v61  ;;  %v4726_v11 = vpop.f32.mrb[35].mxu0  ;;  %v5288_v33 = vadd.f32 %v5287_v58, %v5253_v59  ;;  %v5256_v59 = vsel %vm2694_vm15, %v5220_v25, 0.0  ;;  %v10282_v58 = vadd.f32 %v10089_v63, %v10180_v41 }
 0x55b   : > { %v5177_v61 = vadd.f32 %v5176_v20, %v5142_v2  ;;  %v5145_v2 = vsel %vm11153_vm4, %v10246_v56, 0.0  ;;  %v5258_v41 = vsel %vm11154_vm5, %v5222_v53, 0.0  ;;  %v11158_v53 = vld [vmem:[#allocation41_spill] sm:$0xff]  ;;  %v10312_v3 = vadd.f32 %v10089_v63, %v5071_v13 }
 0x55c   : > { %v5072_v43 = vadd.f32 %v4970_v44, %v9972_v42  ;;  %v5289_v24 = vadd.f32 %v5288_v33, %v5254_v54  ;;  %v10277_v44 = vadd.f32 %v10089_v63, %v10152_v16  ;;  %v5257_v54 = vsel %vm2695_vm0, %v5221_v36, 0.0 }
 0x55d   : > { %v4729_v29 = vpop.f32.mrb[36].mxu0  ;;  %v5178_v11 = vadd.f32 %v5177_v61, %v5143_v4  ;;  %v5223_v16 = vmul.f32 %v10265_v40, %v10265_v40  ;;  %v10301_v4 = vadd.f32 %v10089_v63, %v10206_v45  ;;  %vm11159_vm8 = vcmp.eq.s32.totalorder %v11158_v53, 1 }
 0x55e   : > { %v4975_v48 = vadd.f32 %v10054_v1, %v4729_v29  ;;  %v4731_v42 = vpop.f32.mrb[37].mxu0  ;;  %v5290_v1 = vadd.f32 %v5289_v24, %v5255_v46  ;;  %v11155_v46 = vld [vmem:[#allocation40_spill] sm:$0xff]  ;;  %v5224_v31 = vmul.f32 %v10277_v44, %v10277_v44  ;;  %vm11160_vm9 = vmmov %vm11159_vm8 }
 0x55f   : > { %v5179_v20 = vadd.f32 %v5178_v11, %v5144_v28  ;;  %vm11156_vm6 = vcmp.eq.s32.totalorder %v11155_v46, 1  ;;  %v5225_v42 = vmul.f32 %v10282_v58, %v10282_v58  ;;  %v10316_v11 = vadd.f32 %v10089_v63, %v5072_v43  ;;  %v11164_v43 = vld [vmem:[#allocation44_spill] sm:$0xff] }
 0x560   : > { %v5073_v12 = vadd.f32 %v4975_v48, %v9982_v62  ;;  %v5291_v33 = vadd.f32 %v5290_v1, %v5256_v59  ;;  %v5146_v29 = vsel %vm11156_vm6, %v10265_v40, 0.0  ;;  %vm11157_vm7 = vmmov %vm11156_vm6  ;;  %v5147_v59 = vsel %vm11159_vm8, %v10277_v44, 0.0 }
 0x561   : > { %v4734_v49 = vpop.f32.mrb[38].mxu0  ;;  %v5180_v48 = vadd.f32 %v5179_v20, %v5145_v2  ;;  %v5259_v61 = vsel %vm11157_vm7, %v5223_v16, 0.0  ;;  %v5226_v2 = vmul.f32 %v10301_v4, %v10301_v4  ;;  %vm11165_vm12 = vcmp.eq.s32.totalorder %v11164_v43, 1 }
 0x562   : > { %v4980_v25 = vadd.f32 %v10052_v21, %v4734_v49  ;;  %v4736_v62 = vpop.f32.mrb[39].mxu0  ;;  %v5292_v21 = vadd.f32 %v5291_v33, %v5257_v54  ;;  %v5260_v49 = vsel %vm11160_vm9, %v5224_v31, 0.0  ;;  %v11161_v54 = vld [vmem:[#allocation42_spill] sm:$0xff]  ;;  %v5149_v33 = vsel %vm11165_vm12, %v10301_v4, 0.0  ;;  %vm11166_vm13 = vmmov %vm11165_vm12 }
 0x563   : > { %v5181_v1 = vadd.f32 %v5180_v48, %v5146_v29  ;;  %vm11162_vm10 = vcmp.eq.s32.totalorder %v11161_v54, 1  ;;  %v5227_v20 = vmul.f32 %v10312_v3, %v10312_v3  ;;  %v5262_v48 = vsel %vm11166_vm13, %v5226_v2, 0.0 }
 0x564   : > { %v5074_v36 = vadd.f32 %v4980_v25, %v9978_v47  ;;  %v5293_v47 = vadd.f32 %v5292_v21, %v5258_v41  ;;  %v5148_v60 = vsel %vm11162_vm10, %v10282_v58, 0.0  ;;  %vm11163_vm11 = vmmov %vm11162_vm10  ;;  %v10334_v41 = vadd.f32 %v10089_v63, %v5073_v12 }
 0x565   : > { %v4739_v24 = vpop.f32.mrb[40].mxu0  ;;  %v5261_v25 = vsel %vm11163_vm11, %v5225_v42, 0.0  ;;  %v5228_v21 = vmul.f32 %v10316_v11, %v10316_v11  ;;  %v11167_v42 = vld [vmem:[#allocation46_spill] sm:$0xff] }
 0x566   : > { %v4985_v45 = vadd.f32 %v10061_v30, %v4739_v24  ;;  %v4741_v28 = vpop.f32.mrb[41].mxu0  ;;  %v5294_v16 = vadd.f32 %v5293_v47, %v5259_v61  ;;  %v5182_v30 = vadd.f32 %v5181_v1, %v5147_v59  ;;  %vm11168_vm14 = vcmp.eq.s32.totalorder %v11167_v42, 1  ;;  %v11170_v47 = vld [vmem:[#allocation48_spill] sm:$0xff] }
 0x567   : > { %v5150_v24 = vsel %vm11168_vm14, %v10312_v3, 0.0  ;;  %v10345_v61 = vadd.f32 %v10089_v63, %v5074_v36  ;;  %vm11169_vm15 = vmmov %vm11168_vm14  ;;  %vm11171_vm0 = vcmp.eq.s32.totalorder %v11170_v47, 1 }
 0x568   : > { %v5075_v13 = vadd.f32 %v4985_v45, %v9988_v8  ;;  %v5295_v8 = vadd.f32 %v5294_v16, %v5260_v49  ;;  %v5183_v31 = vadd.f32 %v5182_v30, %v5148_v60  ;;  %v5263_v28 = vsel %vm11169_vm15, %v5227_v20, 0.0  ;;  %vm11172_vm4 = vmmov %vm11171_vm0 }
 0x569   : > { %v4744_v62 = vpop.f32.mrb[42].mxu0  ;;  %v5151_v1 = vsel %vm11171_vm0, %v10316_v11, 0.0  ;;  %v5229_v49 = vmul.f32 %v10334_v41, %v10334_v41  ;;  %v5264_v2 = vsel %vm11172_vm4, %v5228_v21, 0.0  ;;  %v5230_v30 = vmul.f32 %v10345_v61, %v10345_v61 }
 0x56a   : > { %v4990_v46 = vadd.f32 %v10059_v27, %v4744_v62  ;;  %v4746_v29 = vpop.f32.mrb[43].mxu0  ;;  %v5296_v53 = vadd.f32 %v5295_v8, %v5261_v25  ;;  %v5184_v27 = vadd.f32 %v5183_v31, %v5149_v33  ;;  %v10349_v59 = vadd.f32 %v10089_v63, %v5075_v13  ;;  %v11173_v13 = vld [vmem:[#allocation49_spill] sm:$0xff] }
 0x56b   : > { %vm11174_vm5 = vcmp.eq.s32.totalorder %v11173_v13, 1  ;;  %v11176_v29 = vld [vmem:[#allocation50_spill] sm:$0xff] }
 0x56c   : > { %v5076_v12 = vadd.f32 %v4990_v46, %v9984_v10  ;;  %v5297_v10 = vadd.f32 %v5296_v53, %v5262_v48  ;;  %v5185_v60 = vadd.f32 %v5184_v27, %v5150_v24  ;;  %v5152_v16 = vsel %vm11174_vm5, %v10334_v41, 0.0  ;;  %vm11175_vm6 = vmmov %vm11174_vm5 }
 0x56d   : > { %v4749_v45 = vpop.f32.mrb[44].mxu0  ;;  %v5231_v33 = vmul.f32 %v10349_v59, %v10349_v59  ;;  %v5265_v46 = vsel %vm11175_vm6, %v5229_v49, 0.0  ;;  %vm11177_vm7 = vcmp.eq.s32.totalorder %v11176_v29, 1  ;;  %v11186_v29 = vld [vmem:[#allocation54_spill] sm:$0xff] }
 0x56e   : > { %v4995_v36 = vadd.f32 %v10068_v17, %v4749_v45  ;;  %v4751_v54 = vpop.f32.mrb[45].mxu0  ;;  %v10367_v25 = vadd.f32 %v10089_v63, %v5076_v12  ;;  %v5298_v43 = vadd.f32 %v5297_v10, %v5263_v28  ;;  %v5186_v17 = vadd.f32 %v5185_v60, %v5151_v1  ;;  %vm11178_vm8 = vmmov %vm11177_vm7  ;;  %v11179_v12 = vld [vmem:[#allocation51_spill] sm:$0xff] }
 0x56f   : > { %v5153_v8 = vsel %vm11177_vm7, %v10345_v61, 0.0  ;;  %v5266_v24 = vsel %vm11178_vm8, %v5230_v30, 0.0  ;;  %vm11180_vm9 = vcmp.eq.s32.totalorder %v11179_v12, 1  ;;  %v11183_v30 = vld [vmem:[#allocation53_spill] sm:$0xff]  ;;  %vm11187_vm13 = vcmp.eq.s32.totalorder %v11186_v29, 1  ;;  %v11189_v12 = vld [vmem:[#allocation55_spill] sm:$0xff] }
 0x570   : > { %v5077_v62 = vadd.f32 %v4995_v36, %v9993_v14  ;;  %v5299_v14 = vadd.f32 %v5298_v43, %v5264_v2  ;;  %v5187_v42 = vadd.f32 %v5186_v17, %v5152_v16  ;;  %v5154_v53 = vsel %vm11180_vm9, %v10349_v59, 0.0  ;;  %vm11181_vm10 = vmmov %vm11180_vm9 }
 0x571   : > { %v4754_v20 = vpop.f32.mrb[46].mxu0  ;;  %v5232_v27 = vmul.f32 %v10367_v25, %v10367_v25  ;;  %v5155_v36 = vsel %vm2706_vm1, %v10367_v25, 0.0  ;;  %vm11184_vm11 = vcmp.eq.s32.totalorder %v11183_v30, 1  ;;  %vm11190_vm14 = vcmp.eq.s32.totalorder %v11189_v12, 1  ;;  %v11198_v12 = vld [vmem:[#allocation58_spill] sm:$0xff] }
 0x572   : > { %v10378_v31 = vadd.f32 %v10089_v63, %v5077_v62  ;;  %v5000_v21 = vadd.f32 %v10066_v7, %v4754_v20  ;;  %v4756_v48 = vpop.f32.mrb[47].mxu0  ;;  %v5300_v28 = vadd.f32 %v5299_v14, %v5265_v46  ;;  %v5188_v47 = vadd.f32 %v5187_v42, %v5153_v8  ;;  %vm11185_vm12 = vmmov %vm11184_vm11 }
 0x573   : > { %v5267_v7 = vsel %vm11181_vm10, %v5231_v33, 0.0  ;;  %v5268_v16 = vsel %vm2706_vm1, %v5232_v27, 0.0  ;;  %vm11188_vm1 = vmmov %vm11187_vm13  ;;  %vm11199_vm7 = vcmp.eq.s32.totalorder %v11198_v12, 1  ;;  %v11211_v12 = vld [vmem:[#allocation61_spill] sm:$0xff] }
 0x574   : > { %v5078_v45 = vadd.f32 %v5000_v21, %v9990_v18  ;;  %v5233_v54 = vmul.f32 %v10378_v31, %v10378_v31  ;;  %v5301_v18 = vadd.f32 %v5300_v28, %v5266_v24  ;;  %v5189_v13 = vadd.f32 %v5188_v47, %v5154_v53  ;;  %vm11191_vm15 = vmmov %vm11190_vm14 }
 0x575   : > { %v4759_v1 = vpop.f32.mrb[48].mxu0  ;;  %v5156_v62 = vsel %vm11184_vm11, %v10378_v31, 0.0  ;;  %vm11200_vm8 = vmmov %vm11199_vm7 }
 0x576   : > { %v10397_v10 = vadd.f32 %v10089_v63, %v5078_v45  ;;  %v5005_v60 = vadd.f32 %v10075_v9, %v4759_v1  ;;  %v4761_v2 = vpop.f32.mrb[49].mxu0  ;;  %v5302_v33 = vadd.f32 %v5301_v18, %v5267_v7  ;;  %v5190_v20 = vadd.f32 %v5189_v13, %v5155_v36 }
 0x577   : > { %v5269_v9 = vsel %vm11185_vm12, %v5233_v54, 0.0  ;;  %v11192_v2 = vld [vmem:[#allocation56_spill] sm:$0xff] }
 0x578   : > { %v5234_v43 = vmul.f32 %v10397_v10, %v10397_v10  ;;  %v5079_v17 = vadd.f32 %v5005_v60, %v9998_v6  ;;  %v5157_v8 = vsel %vm11187_vm13, %v10397_v10, 0.0  ;;  %v5303_v42 = vadd.f32 %v5302_v33, %v5268_v16 }
 0x579   : > { %v4764_v46 = vpop.f32.mrb[50].mxu0  ;;  %v5191_v24 = vadd.f32 %v5190_v20, %v5156_v62  ;;  %vm11193_vm0 = vcmp.eq.s32.totalorder %v11192_v2, 1  ;;  %vm11212_vm13 = vcmp.eq.s32.totalorder %v11211_v12, 1 }
 0x57a   : > { %v10414_v21 = vadd.f32 %v10089_v63, %v5079_v17  ;;  %v5010_v48 = vadd.f32 %v10073_v19, %v4764_v46  ;;  %v4766_v14 = vpop.f32.mrb[51].mxu0  ;;  %v5270_v6 = vsel %vm11188_vm1, %v5234_v43, 0.0  ;;  %v5304_v28 = vadd.f32 %v5303_v42, %v5269_v9  ;;  %vm11194_vm4 = vmmov %vm11193_vm0  ;;  %v11195_v46 = vld [vmem:[#allocation57_spill] sm:$0xff] }
 0x57b   : > { %v5192_v47 = vadd.f32 %v5191_v24, %v5157_v8  ;;  %vm11196_vm5 = vcmp.eq.s32.totalorder %v11195_v46, 1  ;;  %v11208_v46 = vld [vmem:[#allocation23_spill] sm:$0xff]  ;;  %vm11214_vm1 = vmmov %vm11212_vm13 }
 0x57c   : > { %v5158_v53 = vsel %vm11190_vm14, %v10414_v21, 0.0  ;;  %v5235_v27 = vmul.f32 %v10414_v21, %v10414_v21  ;;  %v5080_v45 = vadd.f32 %v5010_v48, %v9995_v52  ;;  %v5305_v54 = vadd.f32 %v5304_v28, %v5270_v6  ;;  %vm11197_vm6 = vmmov %vm11196_vm5 }
 0x57d   : > { %v4769_v7 = vpop.f32.mrb[52].mxu0  ;;  %v5193_v60 = vadd.f32 %v5192_v47, %v5158_v53 }
 0x57e   : > { %v5271_v19 = vsel %vm11191_vm15, %v5235_v27, 0.0  ;;  %v10428_v1 = vadd.f32 %v10089_v63, %v5080_v45  ;;  %v5015_v49 = vadd.f32 %v10082_v39, %v4769_v7  ;;  %v4771_v36 = vpop.f32.mrb[53].mxu0 }
 0x57f   : > { %v5306_v16 = vadd.f32 %v5305_v54, %v5271_v19  ;;  %v11201_v36 = vld [vmem:[#allocation59_spill] sm:$0xff] }
 0x580   : > { %v5159_v18 = vsel %vm11193_vm0, %v10428_v1, 0.0  ;;  %v5236_v52 = vmul.f32 %v10428_v1, %v10428_v1  ;;  %v5081_v13 = vadd.f32 %v5015_v49, %v10003_v5  ;;  %vm11202_vm9 = vcmp.eq.s32.totalorder %v11201_v36, 1 }
 0x581   : > { %v5194_v30 = vadd.f32 %v5193_v60, %v5159_v18  ;;  %v4774_v62 = vpop.f32.mrb[54].mxu0  ;;  %vm11204_vm10 = vmmov %vm11202_vm9  ;;  %vm5370_vm0 = vcmask 1043456  }
 0x582   : > { %v5272_v43 = vsel %vm11194_vm4, %v5236_v52, 0.0  ;;  %v10440_v39 = vadd.f32 %v10089_v63, %v5081_v13  ;;  %v5020_v17 = vadd.f32 %v10080_v55, %v4774_v62  ;;  %v4776_v33 = vpop.f32.mrb[55].mxu0 }
 0x583   : > { %v5307_v20 = vadd.f32 %v5306_v16, %v5272_v43 }
 0x584   : > { %v5160_v9 = vsel %vm11196_vm5, %v10440_v39, 0.0  ;;  %v5237_v5 = vmul.f32 %v10440_v39, %v10440_v39  ;;  %v5082_v29 = vadd.f32 %v5020_v17, %v10000_v50  ;;  %v11206_v17 = vld [vmem:[#allocation60_spill] sm:$0xff] }
 0x585   : > { %v5195_v8 = vadd.f32 %v5194_v30, %v5160_v9  ;;  %v4779_v48 = vpop.f32.mrb[56].mxu0  ;;  %vm11207_vm11 = vcmp.eq.s32.totalorder %v11206_v17, 1  ;;  %v11220_v17 = vld [vmem:[#allocation68_spill] sm:$0xff] }
 0x586   : > { %v5273_v14 = vsel %vm11197_vm6, %v5237_v5, 0.0  ;;  %v10452_v42 = vadd.f32 %v10089_v63, %v5082_v29  ;;  %v5025_v55 = vadd.f32 %v10091_v37, %v4779_v48  ;;  %v4781_v24 = vpop.f32.mrb[57].mxu0  ;;  %vm11209_vm12 = vmmov %vm11207_vm11 }
 0x587   : > { %v5308_v6 = vadd.f32 %v5307_v20, %v5273_v14  ;;  %v11210_v14 = vld [vmem:[#allocation66_spill] sm:$0xff] }
 0x588   : > { %v5161_v53 = vsel %vm11199_vm7, %v10452_v42, 0.0  ;;  %v5238_v27 = vmul.f32 %v10452_v42, %v10452_v42  ;;  %v5083_v50 = vadd.f32 %v5025_v55, %v10008_v32  ;;  %v11203_v32 = vld [vmem:[#allocation38_spill] sm:$0xff] }
 0x589   : > { %v5196_v45 = vadd.f32 %v5195_v8, %v5161_v53  ;;  %v4784_v28 = vpop.f32.mrb[58].mxu0 }
 0x58a   : > { %v5274_v47 = vsel %vm11200_vm8, %v5238_v27, 0.0  ;;  %v10464_v7 = vadd.f32 %v10089_v63, %v5083_v50  ;;  %v5030_v37 = vadd.f32 %v10087_v15, %v4784_v28  ;;  %v4786_v19 = vpop.f32.mrb[59].mxu0  ;;  %v11205_v15 = vld [vmem:[#allocation47_spill] sm:$0xff]  ;;  %v11213_v50 = vld [vmem:[#allocation65_spill] sm:$0xff] }
 0x58b   : > { %v5309_v49 = vadd.f32 %v5308_v6, %v5274_v47 }
 0x58c   : > { %v5162_v54 = vsel %vm11202_vm9, %v10464_v7, 0.0  ;;  %v5239_v60 = vmul.f32 %v10464_v7, %v10464_v7  ;;  %v5084_v2 = vadd.f32 %v5030_v37, %v11203_v32  ;;  %v11216_v32 = vld [vmem:[#allocation62_spill] sm:$0xff] }
 0x58d   : > { %v5197_v18 = vadd.f32 %v5196_v45, %v5162_v54  ;;  %v4789_v52 = vpop.f32.mrb[60].mxu0  ;;  %vm11217_vm14 = vcmp.eq.s32.totalorder %v11216_v32, 1 }
 0x58e   : > { %v5275_v13 = vsel %vm11204_vm10, %v5239_v60, 0.0  ;;  %v10476_v16 = vadd.f32 %v10089_v63, %v5084_v2  ;;  %v5035_v30 = vadd.f32 %v11205_v15, %v4789_v52  ;;  %v4791_v62 = vpop.f32.mrb[61].mxu0  ;;  %v11218_v52 = vld [vmem:[#allocation67_spill] sm:$0xff]  ;;  %vm11219_vm15 = vmmov %vm11217_vm14 }
 0x58f   : > { %v5310_v43 = vadd.f32 %v5309_v49, %v5275_v13  ;;  %v11215_v49 = vld [vmem:[#allocation24_spill] sm:$0xff] }
 0x590   : > { %v5163_v33 = vsel %vm11207_vm11, %v10476_v16, 0.0  ;;  %v5240_v20 = vmul.f32 %v10476_v16, %v10476_v16  ;;  %v5085_v9 = vadd.f32 %v5035_v30, %v11208_v46 }
 0x591   : > { %v5198_v5 = vadd.f32 %v5197_v18, %v5163_v33  ;;  %v4794_v29 = vpop.f32.mrb[62].mxu0 }
 0x592   : > { %v5276_v8 = vsel %vm11209_vm12, %v5240_v20, 0.0  ;;  %v10488_v48 = vadd.f32 %v10089_v63, %v5085_v9  ;;  %v5040_v55 = vadd.f32 %v11210_v14, %v4794_v29  ;;  %v4796_v24 = vpop.f32.mrb[63].mxu0 }
 0x593   : > { %v5311_v6 = vadd.f32 %v5310_v43, %v5276_v8  ;;  %v11222_v8 = vld [vmem:[#allocation43_spill] sm:$0xff] }
 0x594   : > { %v5164_v53 = vsel %vm11212_vm13, %v10488_v48, 0.0  ;;  %v5241_v27 = vmul.f32 %v10488_v48, %v10488_v48  ;;  %v5086_v45 = vadd.f32 %v5040_v55, %v11213_v50 }
 0x595   : > { %v5199_v28 = vadd.f32 %v5198_v5, %v5164_v53  ;;  %v4799_v47 = vpop.f32.mrb[64].mxu0  ;;  %v11224_v53 = vld [vmem:[#allocation45_spill] sm:$0xff] }
 0x596   : > { %v5277_v37 = vsel %vm11214_vm1, %v5241_v27, 0.0  ;;  %v10500_v19 = vadd.f32 %v10089_v63, %v5086_v45  ;;  %v5045_v36 = vadd.f32 %v11215_v49, %v4799_v47  ;;  %v4801_v54 = vpop.f32.mrb[65].mxu0 }
 0x597   : > { %v5312_v60 = vadd.f32 %v5311_v6, %v5277_v37 }
 0x598   : > { %v5165_v2 = vsel %vm11217_vm14, %v10500_v19, 0.0  ;;  %v5242_v18 = vmul.f32 %v10500_v19, %v10500_v19  ;;  %v5087_v13 = vadd.f32 %v5045_v36, %v11218_v52 }
 0x599   : > { %v5200_v15 = vadd.f32 %v5199_v28, %v5165_v2  ;;  %v4804_v30 = vpop.f32.mrb[66].mxu0 }
 0x59a   : > { %v5278_v62 = vsel %vm11219_vm15, %v5242_v18, 0.0  ;;  %v10512_v43 = vadd.f32 %v10089_v63, %v5087_v13  ;;  %v5050_v33 = vadd.f32 %v11220_v17, %v4804_v30  ;;  %v4806_v20 = vpop.f32.mrb[67].mxu0 }
 0x59b   : > { %v5313_v46 = vadd.f32 %v5312_v60, %v5278_v62 }
 0x59c   : > { %v5166_v5 = vsel %vm2717_vm2, %v10512_v43, 0.0  ;;  %v5243_v29 = vmul.f32 %v10512_v43, %v10512_v43  ;;  %v5088_v14 = vadd.f32 %v5050_v33, %v11222_v8 }
 0x59d   : > { %v5201_v55 = vadd.f32 %v5200_v15, %v5166_v5 }
 0x59e   : > { %v5279_v24 = vsel %vm2717_vm2, %v5243_v29, 0.0  ;;  %v10524_v6 = vadd.f32 %v10089_v63, %v5088_v14  ;;  %vm5390_vm2 = vcmask 1041408  }
 0x59f   : > { %v5314_v12 = vadd.f32 %v5313_v46, %v5279_v24 }
 0x5a0   : > { %v5167_v27 = vsel %vm2718_vm3, %v10524_v6, 0.0  ;;  %v5244_v50 = vmul.f32 %v10524_v6, %v10524_v6 }
 0x5a1   : > { %v5202_v45 = vadd.f32 %v5201_v55, %v5167_v27 }
 0x5a2   : > { %v5280_v28 = vsel %vm2718_vm3, %v5244_v50, 0.0  ;;  %v11225_v50 = vld [vmem:[#allocation28_spill] sm:$0xff]  ;;  %vm5350_vm3 = vcmask 1045504  }
 0x5a3   : > { %v5203_v47 = vrot.slane %v5202_v45, 4  ;;  %v5315_v37 = vadd.f32 %v5314_v12, %v5280_v28  ;;  %v11226_v28 = vld [vmem:[#allocation27_spill] sm:$0xff] }
 0x5a5   : > { %v5204_v49 = vadd.f32 %v5203_v47, %v5202_v45  ;;  %v5316_v36 = vrot.slane %v5315_v37, 4 }
 0x5a7   : > { %v5205_v54 = vrot.slane %v5204_v49, 2  ;;  %v5317_v60 = vadd.f32 %v5316_v36, %v5315_v37  ;;  %v11227_v37 = vld [vmem:[#allocation31_spill] sm:$0xff] }
 0x5a9   : > { %v5206_v63 = vadd.f32 %v5205_v54, %v5204_v49  ;;  %v5318_v32 = vrot.slane %v5317_v60, 2 }
 0x5ab   : > { %v5207_v2 = vrot.slane %v5206_v63, 1  ;;  %v5319_v18 = vadd.f32 %v5318_v32, %v5317_v60 }
 0x5ad   : > { %v5208_v52 = vadd.f32 %v5207_v2, %v5206_v63  ;;  %v5320_v13 = vrot.slane %v5319_v18, 1 }
 0x5af   : > { %v5321_v15 = vadd.f32 %v5320_v13, %v5319_v18  ;;  %v10533_v30 = vmul.f32 0.00390625, %v5208_v52 }
 0x5b1   : > { %v5323_v62 = vmul.f32 0.00390625, %v5321_v15  ;;  %v5324_v17 = vmul.f32 %v10533_v30, %v10533_v30  ;;  %v5593_v33 = vsub.f32 %v10512_v43, %v10533_v30  ;;  %v5594_v20 = vsub.f32 %v10524_v6, %v10533_v30 }
 0x5b2   : > { %v5524_v29 = vsub.f32 %v10414_v21, %v10533_v30  ;;  %v5542_v8 = vsub.f32 %v10428_v1, %v10533_v30  ;;  %v5543_v14 = vsub.f32 %v10440_v39, %v10533_v30  ;;  %v5552_v55 = vsub.f32 %v10452_v42, %v10533_v30 }
 0x5b3   : > { %v5325_v46 = vsub.f32 %v5323_v62, %v5324_v17  ;;  %v5553_v43 = vsub.f32 %v10464_v7, %v10533_v30  ;;  %v5554_v24 = vsub.f32 %v10476_v16, %v10533_v30  ;;  %v5574_v6 = vsub.f32 %v10488_v48, %v10533_v30  ;;  %v5345_v7 = vld [vmem:[%s7787_s11 + $0x10] sm:$0xff]  ;;  %v5366_v48 = vld [vmem:[%s7787_s11 + $0x20] sm:$0xff] }
 0x5b4   : > { %v5575_v12 = vsub.f32 %v10500_v19, %v10533_v30  ;;  %v5329_v27 = vsub.f32 %v11224_v53, %v10533_v30  ;;  %v5330_v45 = vsub.f32 %v11225_v50, %v10533_v30  ;;  %v5339_v47 = vsub.f32 %v11226_v28, %v10533_v30 }
 0x5b5   : > { %v5326_v9 = vmax.f32 %v5325_v46, 0.0  ;;  %v5340_v49 = vsub.f32 %v11227_v37, %v10533_v30  ;;  %v5341_v36 = vsub.f32 %v10125_v26, %v10533_v30  ;;  %v5362_v54 = vsub.f32 %v10149_v34, %v10533_v30 }
 0x5b6   : > { %v5363_v60 = vsub.f32 %v10165_v22, %v10533_v30  ;;  %v5382_v63 = vsub.f32 %v10170_v0, %v10533_v30  ;;  %v5383_v32 = vsub.f32 %v10191_v38, %v10533_v30  ;;  %v5402_v2 = vsub.f32 %v10203_v23, %v10533_v30 }
 0x5b7   : > { %v5327_v5 = vadd.f32 1e-05, %v5326_v9  ;;  %v5403_v18 = vsub.f32 %v10210_v51, %v10533_v30  ;;  %v5412_v26 = vsub.f32 %v10229_v35, %v10533_v30  ;;  %v5413_v34 = vsub.f32 %v10241_v57, %v10533_v30 }
 0x5b8   : > { %v5414_v22 = vsub.f32 %v10246_v56, %v10533_v30  ;;  %v5434_v0 = vsub.f32 %v10265_v40, %v10533_v30  ;;  %v5435_v38 = vsub.f32 %v10277_v44, %v10533_v30  ;;  %v5453_v23 = vsub.f32 %v10282_v58, %v10533_v30 }
 0x5b9   : > { %7193 = vrsqrt.f32 %v5327_v5  ;;  %v5454_v51 = vsub.f32 %v10301_v4, %v10533_v30  ;;  %v5472_v35 = vsub.f32 %v10312_v3, %v10533_v30  ;;  %v5473_v57 = vsub.f32 %v10316_v11, %v10533_v30 }
 0x5ba   : > { %v5482_v56 = vsub.f32 %v10334_v41, %v10533_v30  ;;  %v5483_v40 = vsub.f32 %v10345_v61, %v10533_v30  ;;  %v5484_v58 = vsub.f32 %v10349_v59, %v10533_v30  ;;  %v5504_v4 = vsub.f32 %v10367_v25, %v10533_v30  ;;  %v5598_v25 = vld [vmem:[%s7787_s11 + $0xf8] sm:$0xff] }
 0x5bb   : > { %v5505_v3 = vsub.f32 %v10378_v31, %v10533_v30  ;;  %v5523_v11 = vsub.f32 %v10397_v10, %v10533_v30 }
 0x5c3   : > { %v7194_v44 = vpop.eup %7193 }
 0x5c4   : > { %v10609_v52 = vmul.f32 %v7194_v44, %v5593_v33  ;;  %v5596_v41 = vmul.f32 %v7194_v44, %v5594_v20  ;;  %v5331_v13 = vmul.f32 %v7194_v44, %v5329_v27  ;;  %v5332_v15 = vmul.f32 %v7194_v44, %v5330_v45 }
 0x5c5   : > { %v5342_v61 = vmul.f32 %v7194_v44, %v5339_v47  ;;  %v10611_v62 = vmul.f32 %v7194_v44, %v5340_v49  ;;  %v10613_v17 = vmul.f32 %v7194_v44, %v5341_v36  ;;  %v10615_v59 = vmul.f32 %v7194_v44, %v5362_v54 }
 0x5c6   : > { %v5602_v31 = vrot.slane %v10609_v52, 6  ;;  %v5604_v46 = vrot.slane %v5596_v41, 6  ;;  %v10619_v9 = vmul.f32 %v7194_v44, %v5363_v60  ;;  %v10621_v10 = vmul.f32 %v7194_v44, %v5382_v63 }
 0x5c7   : > { %v10623_v33 = vmul.f32 %v7194_v44, %v5383_v32  ;;  %v10625_v20 = vmul.f32 %v7194_v44, %v5402_v2  ;;  %v10627_v5 = vmul.f32 %v7194_v44, %v5403_v18  ;;  %v10629_v53 = vmul.f32 %v7194_v44, %v5412_v26  ;;  %v5333_v2 = vld [vmem:[%s7787_s11] sm:$0xff]  ;;  %v5334_v18 = vld [vmem:[%s7787_s11 + $0x8] sm:$0xff] }
 0x5c8   : > { %v5605_v27 = vsel %vm5390_vm2, %v5602_v31, %v5604_v46  ;;  %v10634_v50 = vmul.f32 %v7194_v44, %v5413_v34  ;;  %v10636_v45 = vmul.f32 %v7194_v44, %v5414_v22  ;;  %v10638_v28 = vmul.f32 %v7194_v44, %v5434_v0 }
 0x5c9   : > { %v5609_v47 = vadd.f32 %v5605_v27, %v5598_v25  ;;  %v10640_v37 = vmul.f32 %v7194_v44, %v5435_v38  ;;  %v10642_v49 = vmul.f32 %v7194_v44, %v5453_v23  ;;  %v10644_v36 = vmul.f32 %v7194_v44, %v5454_v51  ;;  %v5419_v27 = vld [vmem:[%s7787_s11 + $0x58] sm:$0xff] }
 0x5ca   : > { %v10646_v54 = vmul.f32 %v7194_v44, %v5472_v35  ;;  %v10648_v60 = vmul.f32 %v7194_v44, %v5473_v57  ;;  %v10650_v63 = vmul.f32 %v7194_v44, %v5482_v56  ;;  %v10652_v32 = vmul.f32 %v7194_v44, %v5483_v40  ;;  %v5406_v57 = vld [vmem:[%s7787_s11 + $0x40] sm:$0xff]  ;;  %v5407_v56 = vld [vmem:[%s7787_s11 + $0x48] sm:$0xff] }
 0x5cb   : > { %5611 = vst [vmem:[%s10658_s16 + $0xf8] sm:$0xff] %v5609_v47  ;;  %v10661_v26 = vmul.f32 %v7194_v44, %v5484_v58  ;;  %v10663_v34 = vmul.f32 %v7194_v44, %v5504_v4  ;;  %v10665_v22 = vmul.f32 %v7194_v44, %v5505_v3  ;;  %v10667_v0 = vmul.f32 %v7194_v44, %v5523_v11  ;;  %v5387_v3 = vld [vmem:[%s7787_s11 + $0x38] sm:$0xff]  ;;  %v5438_v47 = vld [vmem:[%s7787_s11 + $0x60] sm:$0xff] }
 0x5cc   : > { %v10672_v38 = vmul.f32 %v7194_v44, %v5524_v29  ;;  %v10677_v23 = vmul.f32 %v7194_v44, %v5542_v8  ;;  %v10682_v51 = vmul.f32 %v7194_v44, %v5543_v14  ;;  %v10687_v35 = vmul.f32 %v7194_v44, %v5552_v55  ;;  %v5346_v29 = vld [vmem:[%s7787_s11 + $0x18] sm:$0xff] }
 0x5cd   : > { %v10692_v21 = vmul.f32 %v7194_v44, %v5553_v43  ;;  %v10697_v1 = vmul.f32 %v7194_v44, %v5554_v24  ;;  %v10702_v39 = vmul.f32 %v7194_v44, %v5574_v6  ;;  %v10707_v42 = vmul.f32 %v7194_v44, %v5575_v12  ;;  %v5367_v43 = vld [vmem:[%s7787_s11 + $0x28] sm:$0xff]  ;;  %v5386_v12 = vld [vmem:[%s7787_s11 + $0x30] sm:$0xff] }
 0x5ce   : > { %v5335_v16 = vadd.f32 %v5333_v2, %v5331_v13  ;;  %v5336_v8 = vadd.f32 %v5334_v18, %v5332_v15  ;;  %v5351_v14 = vrot.slane %v5342_v61, 2  ;;  %v5352_v55 = vrot.slane %v10611_v62, 2 }
 0x5cf   : > { %v5354_v24 = vrot.slane %v10613_v17, 2  ;;  %v5371_v6 = vrot.slane %v10613_v17, 4  ;;  %v5372_v19 = vrot.slane %v10615_v59, 4  ;;  %v5374_v30 = vrot.slane %v10619_v9, 4 }
 0x5d0   : > { %5337 = vst [vmem:[%s10658_s16] sm:$0xff] %v5335_v16  ;;  %5338 = vst [vmem:[%s10658_s16 + $0x8] sm:$0xff] %v5336_v8  ;;  %v5353_v40 = vsel %vm5350_vm3, %v5351_v14, %v5352_v55  ;;  %v5391_v44 = vrot.slane %v10619_v9, 6  ;;  %v5392_v58 = vrot.slane %v10621_v10, 6  ;;  %v5394_v4 = vrot.slane %v10623_v33, 6  ;;  %v5418_v33 = vld [vmem:[%s7787_s11 + $0x50] sm:$0xff] }
 0x5d1   : > { %v5355_v11 = vsel %vm5350_vm3, %v5352_v55, %v5354_v24  ;;  %v5358_v41 = vadd.f32 %v5353_v40, %v5345_v7  ;;  %v5373_v13 = vsel %vm5370_vm0, %v5371_v6, %v5372_v19  ;;  %v5375_v15 = vsel %vm5370_vm0, %v5372_v19, %v5374_v30  ;;  %v5457_v16 = vld [vmem:[%s7787_s11 + $0x70] sm:$0xff] }
 0x5d2   : > { %v5359_v61 = vadd.f32 %v5355_v11, %v5346_v29  ;;  %v5378_v62 = vadd.f32 %v5373_v13, %v5366_v48  ;;  %v5379_v17 = vadd.f32 %v5375_v15, %v5367_v43  ;;  %v5393_v59 = vsel %vm5390_vm2, %v5391_v44, %v5392_v58  ;;  %v5439_v29 = vld [vmem:[%s7787_s11 + $0x68] sm:$0xff]  ;;  %v5458_v48 = vld [vmem:[%s7787_s11 + $0x78] sm:$0xff] }
 0x5d3   : > { %5360 = vst [vmem:[%s10658_s16 + $0x10] sm:$0xff] %v5358_v41  ;;  %v5395_v25 = vsel %vm5390_vm2, %v5392_v58, %v5394_v4  ;;  %v5398_v46 = vadd.f32 %v5393_v59, %v5386_v12  ;;  %v5408_v9 = vadd.f32 %v5406_v57, %v10625_v20  ;;  %v5409_v10 = vadd.f32 %v5407_v56, %v10627_v5  ;;  %v5489_v11 = vld [vmem:[%s7787_s11 + $0x98] sm:$0xff] }
 0x5d4   : > { %5361 = vst [vmem:[%s10658_s16 + $0x18] sm:$0xff] %v5359_v61  ;;  %5380 = vst [vmem:[%s10658_s16 + $0x20] sm:$0xff] %v5378_v62  ;;  %v5399_v2 = vadd.f32 %v5395_v25, %v5387_v3  ;;  %v5423_v18 = vrot.slane %v10629_v53, 2  ;;  %v5424_v7 = vrot.slane %v10634_v50, 2  ;;  %v5426_v20 = vrot.slane %v10636_v45, 2  ;;  %v5476_v53 = vld [vmem:[%s7787_s11 + $0x80] sm:$0xff] }
 0x5d5   : > { %5381 = vst [vmem:[%s10658_s16 + $0x28] sm:$0xff] %v5379_v17  ;;  %5400 = vst [vmem:[%s10658_s16 + $0x30] sm:$0xff] %v5398_v46  ;;  %v5442_v5 = vrot.slane %v10636_v45, 4  ;;  %v5443_v8 = vrot.slane %v10638_v28, 4  ;;  %v5445_v14 = vrot.slane %v10640_v37, 4  ;;  %v5461_v55 = vrot.slane %v10640_v37, 6 }
 0x5d6   : > { %5410 = vst [vmem:[%s10658_s16 + $0x40] sm:$0xff] %v5408_v9  ;;  %5411 = vst [vmem:[%s10658_s16 + $0x48] sm:$0xff] %v5409_v10  ;;  %v5477_v50 = vld [vmem:[%s7787_s11 + $0x88] sm:$0xff]  ;;  %v5425_v43 = vsel %vm5350_vm3, %v5423_v18, %v5424_v7  ;;  %v5427_v24 = vsel %vm5350_vm3, %v5424_v7, %v5426_v20  ;;  %v5462_v6 = vrot.slane %v10642_v49, 6  ;;  %v5464_v45 = vrot.slane %v10644_v36, 6  ;;  %v5546_v49 = vld [vmem:[%s7787_s11 + $0xc0] sm:$0xff] }
 0x5d7   : > { %5401 = vst [vmem:[%s10658_s16 + $0x38] sm:$0xff] %v5399_v2  ;;  %v5430_v28 = vadd.f32 %v5425_v43, %v5418_v33  ;;  %v5431_v19 = vadd.f32 %v5427_v24, %v5419_v27  ;;  %v5444_v37 = vsel %vm5370_vm0, %v5442_v5, %v5443_v8  ;;  %v5446_v30 = vsel %vm5370_vm0, %v5443_v8, %v5445_v14  ;;  %v5488_v3 = vld [vmem:[%s7787_s11 + $0x90] sm:$0xff]  ;;  %v5508_v62 = vld [vmem:[%s7787_s11 + $0xa0] sm:$0xff]  ;;  %v5509_v17 = vld [vmem:[%s7787_s11 + $0xa8] sm:$0xff] }
 0x5d8   : > { %v5449_v12 = vadd.f32 %v5444_v37, %v5438_v47  ;;  %v5450_v57 = vadd.f32 %v5446_v30, %v5439_v29  ;;  %v5463_v56 = vsel %vm5390_vm2, %v5461_v55, %v5462_v6  ;;  %v5465_v40 = vsel %vm5390_vm2, %v5462_v6, %v5464_v45  ;;  %v5528_v25 = vld [vmem:[%s7787_s11 + $0xb8] sm:$0xff]  ;;  %v5578_v8 = vld [vmem:[%s7787_s11 + $0xe0] sm:$0xff] }
 0x5d9   : > { %5432 = vst [vmem:[%s10658_s16 + $0x50] sm:$0xff] %v5430_v28  ;;  %5433 = vst [vmem:[%s10658_s16 + $0x58] sm:$0xff] %v5431_v19  ;;  %v5468_v36 = vadd.f32 %v5463_v56, %v5457_v16  ;;  %v5469_v44 = vadd.f32 %v5465_v40, %v5458_v48  ;;  %v5478_v58 = vadd.f32 %v5476_v53, %v10646_v54  ;;  %v5493_v41 = vrot.slane %v10650_v63, 2  ;;  %v5559_v5 = vld [vmem:[%s7787_s11 + $0xd8] sm:$0xff] }
 0x5da   : > { %v5479_v4 = vadd.f32 %v5477_v50, %v10648_v60  ;;  %5451 = vst [vmem:[%s10658_s16 + $0x60] sm:$0xff] %v5449_v12  ;;  %5452 = vst [vmem:[%s10658_s16 + $0x68] sm:$0xff] %v5450_v57  ;;  %v5494_v13 = vrot.slane %v10652_v32, 2  ;;  %v5496_v15 = vrot.slane %v10661_v26, 2  ;;  %v5512_v61 = vrot.slane %v10661_v26, 4  ;;  %v5527_v32 = vld [vmem:[%s7787_s11 + $0xb0] sm:$0xff] }
 0x5db   : > { %5470 = vst [vmem:[%s10658_s16 + $0x70] sm:$0xff] %v5468_v36  ;;  %5471 = vst [vmem:[%s10658_s16 + $0x78] sm:$0xff] %v5469_v44  ;;  %v5513_v54 = vrot.slane %v10663_v34, 4  ;;  %v5515_v60 = vrot.slane %v10665_v22, 4  ;;  %v5531_v59 = vrot.slane %v10665_v22, 6  ;;  %v5532_v63 = vrot.slane %v10667_v0, 6 }
 0x5dc   : > { %5480 = vst [vmem:[%s10658_s16 + $0x80] sm:$0xff] %v5478_v58  ;;  %5481 = vst [vmem:[%s10658_s16 + $0x88] sm:$0xff] %v5479_v4  ;;  %v5547_v26 = vld [vmem:[%s7787_s11 + $0xc8] sm:$0xff]  ;;  %v5495_v46 = vsel %vm5350_vm3, %v5493_v41, %v5494_v13  ;;  %v5497_v9 = vsel %vm5350_vm3, %v5494_v13, %v5496_v15  ;;  %v5534_v10 = vrot.slane %v10672_v38, 6  ;;  %v5548_v34 = vadd.f32 %v5546_v49, %v10677_v23  ;;  %v5558_v38 = vld [vmem:[%s7787_s11 + $0xd0] sm:$0xff] }
 0x5dd   : > { %v5500_v33 = vadd.f32 %v5495_v46, %v5488_v3  ;;  %v5501_v22 = vadd.f32 %v5497_v9, %v5489_v11  ;;  %v5514_v0 = vsel %vm5370_vm0, %v5512_v61, %v5513_v54  ;;  %v5516_v27 = vsel %vm5370_vm0, %v5513_v54, %v5515_v60  ;;  %v5579_v50 = vld [vmem:[%s7787_s11 + $0xe8] sm:$0xff] }
 0x5de   : > { %v5519_v47 = vadd.f32 %v5514_v0, %v5508_v62  ;;  %v5520_v2 = vadd.f32 %v5516_v27, %v5509_v17  ;;  %v5533_v18 = vsel %vm5390_vm2, %v5531_v59, %v5532_v63  ;;  %v5535_v7 = vsel %vm5390_vm2, %v5532_v63, %v5534_v10  ;;  %5550 = vst [vmem:[%s10658_s16 + $0xc0] sm:$0xff] %v5548_v34 }
 0x5df   : > { %5502 = vst [vmem:[%s10658_s16 + $0x90] sm:$0xff] %v5500_v33  ;;  %5503 = vst [vmem:[%s10658_s16 + $0x98] sm:$0xff] %v5501_v22  ;;  %v5538_v23 = vadd.f32 %v5533_v18, %v5527_v32  ;;  %v5539_v20 = vadd.f32 %v5535_v7, %v5528_v25  ;;  %v5549_v29 = vadd.f32 %v5547_v26, %v10682_v51  ;;  %v5563_v16 = vrot.slane %v10687_v35, 2 }
 0x5e0   : > { %5521 = vst [vmem:[%s10658_s16 + $0xa0] sm:$0xff] %v5519_v47  ;;  %5522 = vst [vmem:[%s10658_s16 + $0xa8] sm:$0xff] %v5520_v2  ;;  %v5564_v14 = vrot.slane %v10692_v21, 2  ;;  %v5566_v55 = vrot.slane %v10697_v1, 2  ;;  %v5582_v48 = vrot.slane %v10697_v1, 4  ;;  %v5583_v53 = vrot.slane %v10702_v39, 4 }
 0x5e1   : > { %5540 = vst [vmem:[%s10658_s16 + $0xb0] sm:$0xff] %v5538_v23  ;;  %5541 = vst [vmem:[%s10658_s16 + $0xb8] sm:$0xff] %v5539_v20  ;;  %v5585_v51 = vrot.slane %v10707_v42, 4  ;;  %v5601_v35 = vrot.slane %v10707_v42, 6  ;;  %v5597_v21 = vld [vmem:[%s7787_s11 + $0xf0] sm:$0xff] }
 0x5e2   : > { %5551 = vst [vmem:[%s10658_s16 + $0xc8] sm:$0xff] %v5549_v29  ;;  %v5565_v43 = vsel %vm5350_vm3, %v5563_v16, %v5564_v14  ;;  %v5567_v1 = vsel %vm5350_vm3, %v5564_v14, %v5566_v55  ;;  %v5584_v39 = vsel %vm5370_vm0, %v5582_v48, %v5583_v53 }
 0x5e3   : > { %v5570_v24 = vadd.f32 %v5565_v43, %v5558_v38  ;;  %v5571_v6 = vadd.f32 %v5567_v1, %v5559_v5  ;;  %v5586_v45 = vsel %vm5370_vm0, %v5583_v53, %v5585_v51  ;;  %v5589_v42 = vadd.f32 %v5584_v39, %v5578_v8 }
 0x5e4   : > { %v5590_v28 = vadd.f32 %v5586_v45, %v5579_v50  ;;  %v5603_v19 = vsel %vm5390_vm2, %v5601_v35, %v5602_v31 }
 0x5e5   : > { %5572 = vst [vmem:[%s10658_s16 + $0xd0] sm:$0xff] %v5570_v24  ;;  %5573 = vst [vmem:[%s10658_s16 + $0xd8] sm:$0xff] %v5571_v6  ;;  %v5608_v37 = vadd.f32 %v5603_v19, %v5597_v21 }
 0x5e6   : > { %5591 = vst [vmem:[%s10658_s16 + $0xe0] sm:$0xff] %v5589_v42  ;;  %5592 = vst [vmem:[%s10658_s16 + $0xe8] sm:$0xff] %v5590_v28 }
 0x5e7   : > { %5610 = vst [vmem:[%s10658_s16 + $0xf0] sm:$0xff] %v5608_v37 }
 0x5e8   : > { %7408 = shalt.err (!%p7405_p8)
}
 0x5e9   : > { %s7409_s10 = scalar_lea.hbm %s10833_s14, 4096  ;;  %s7413_s11 = scalar_lea.hbm %s10890_s6, 8192 }
 0x5ea   : > { %p7410_p3 = scmp.ne.s32.totalorder %s10833_s14, %s7409_s10  ;;  %p7414_p11 = scmp.lt.u32.totalorder %s10833_s14, %s10890_s6 }
 0x5eb   : > { %p7415_p9 = scmp.lt.u32.totalorder %s7413_s11, %s7409_s10  ;;  %p7417_p7 = scmp.lt.u32.totalorder %s7409_s10, %s10833_s14 }
 0x5ec   : > { %p7411_p5 = pnand %p7410_p3, %p11228_p10 }
 0x5ed   : > { %p7416_p12 = por %p7415_p9, %p7414_p11 }
 0x5ee   : > { %p7412_p6 = pneg %p7411_p5 }
 0x5ef   : > { %p7418_p4 = por %p7417_p7, %p7416_p12 }
 0x5f1   : > { %p7419_p1 = pnand %p7418_p4, %p7412_p6 }
 0x5f3   : > { %7422 = shalt.err (!%p7419_p1)
}
 0x5f4   : > { %s7487_s27 = smov 128   ;;  %s7488_s8 = smov 8  }
 0x5f5   : > { %7107 = dma.vmem_to_hbm [thread:$0]  (%p11228_p10), %s10835_s9, 4096, %s10833_s14, %s5613_s7, %s7487_s27, %s7487_s27, %s7488_s8  }
 0x5f6 PF: > { %s5641_s17 = sand.u32 1, %s7461_s21   ;;  %p11229_p13 = scmp.ne.s32.totalorder %s11015_s20, 0 }
 0x5f7   : > { %p11230_p0 = scmp.ge.s32.totalorder %s7473_s24, 2  ;;  %s5642_s18 = scalar_lea.sflag [#allocation6], %s5641_s17 }
 0x5f9   : > { %p7130_p2 = pnand %p11230_p0, %p11229_p13 }
 0x5fb   : > { %7456 = dma.done.wait (!%p7130_p2), %s5642_s18, 4096  }
 0x5fc   : > { %7458 = vsyncadd (!%p7130_p2), %s5642_s18, 4294963200  ;;  %p22_p8 = scmp.ge.s32.totalorder %s7693_s15, 4   ;;  %s11231_s21 = smov %s7465_s22 }
 0x5fd   : > { %s11232_s22 = smov %s7469_s23  ;;  %s11233_s23 = smov %s7705_s26 }
 0x5fe   : > { %s11234_s24 = smov %s7693_s15  ;;  %24 = sbr.rel (!%p22_p8) target bundleno = 8 (0x8), region = 114 }
 0x605   :  { %5647 = vsyncpa [#allocation5], 1 }
 0x606   :  { %5649 = vsyncpa [#allocation5 + $0x1], 1 }
 0x607   :  { %5650 = vsyncpa [#allocation8], 1 }
 0x608   :  { %5651 = vsyncpa [#allocation11], 1 }
 0x609   :  { %5652 = vsyncpa [#allocation14], 1 }
 0x60a   :  { %5654 = vsyncpa [#allocation14 + $0x1], 1 }
 0x60b   :  { %5655 = vsyncpa [#allocation6], 1 }
 0x60c   :  { %5657 = vsyncpa [#allocation6 + $0x1], 1 }

</bundles_post_ra>
